<compile_context>
chip_gen: v7x
topology: tpu7x:2x2x1
jax: 0.10.0
libtpu: 0.0.40
codegen_flags: <defaults>
</compile_context>

<pallas_src>
import functools

import jax
import jax.numpy as jnp
from jax import lax
from jax.experimental import pallas as pl
from jax.experimental.pallas import tpu as pltpu


# --------------------------------------------------------------------------
# Bilinear interpolation weights (align_corners=False), matches F.interpolate
# --------------------------------------------------------------------------

def _interp_matrix(out_size, in_size):
    scale = in_size / out_size
    dst = jnp.arange(out_size, dtype=jnp.float32)
    src = jnp.maximum((dst + 0.5) * scale - 0.5, 0.0)
    i0 = jnp.minimum(jnp.floor(src).astype(jnp.int32), in_size - 1)
    i1 = jnp.minimum(i0 + 1, in_size - 1)
    w1 = src - i0.astype(jnp.float32)
    w0 = 1.0 - w1
    eye = jnp.eye(in_size, dtype=jnp.float32)
    return w0[:, None] * eye[i0] + w1[:, None] * eye[i1]   # (out_size, in_size)


# --------------------------------------------------------------------------
# Fused decoder kernel (one batch element per grid step)
# --------------------------------------------------------------------------

def _decoder_kernel(
    x32_ref, x16_ref, x8_ref, x4_ref,
    w32_ref, w16_ref, w8_ref, w4_ref,
    wh1_ref, ww1_ref, wh2_ref, ww2_ref, wh3_ref, ww3_ref,
    wc16_ref, wc8_ref,
    wdwa_ref, wdwb_ref, bdwa_ref, bdwb_ref,
    wpwa_ref, wpwb_ref, bpw_ref,
    wcls_ref, bcls_ref,
    o_ref,
    *, dims):
    (H32, W32), (H16, W16), (H8, W8), (H4, W4) = dims

    def conv1x1(x2, w_ref, relu):
        y = jnp.dot(x2, w_ref[...], preferred_element_type=jnp.float32)
        if relu:
            y = jnp.maximum(y, 0.0)
        return y

    def dw3x3(x, w, b, relu):
        # depthwise 3x3, stride 1, zero pad 1; padding built in VMEM (no HBM pad).
        H, W, C = x.shape
        zr = jnp.zeros((1, W, C), jnp.float32)
        xp = jnp.concatenate([zr, x, zr], axis=0)
        zc = jnp.zeros((H + 2, 1, C), jnp.float32)
        xp = jnp.concatenate([zc, xp, zc], axis=1)
        acc = None
        for di in range(3):
            for dj in range(3):
                t = xp[di:di + H, dj:dj + W, :] * w[di, dj].reshape(1, 1, C)
                acc = t if acc is None else acc + t
        if b is not None:
            acc = acc + b
        if relu:
            acc = jnp.maximum(acc, 0.0)
        return acc

    def upsample(x, wh_ref, ww_ref, Ho, Wo):
        # Separable bilinear resize (align_corners=False), x: (Hi, Wi, C).
        Hi, Wi, C = x.shape
        # ---- H axis ----
        if Ho == 2 * Hi:
            # exact 2x: 2-tap lerp on the VPU, interleave even/odd output rows
            xp_ = jnp.concatenate([x[:1], x[:-1]], axis=0)   # row h-1 (clamped)
            xn_ = jnp.concatenate([x[1:], x[-1:]], axis=0)   # row h+1 (clamped)
            even = 0.25 * xp_ + 0.75 * x
            odd = 0.75 * x + 0.25 * xn_
            y = jnp.concatenate([even[:, None], odd[:, None]], axis=1)
            y = y.reshape(Ho, Wi, C)
        else:
            # TODO(synk): general ratio path is an unrolled tap loop (fine for
            # small Hi); switch to a matmul form if Hi gets large.
            wh = wh_ref[...]                                  # (Ho, Hi)
            y = jnp.zeros((Ho, Wi, C), jnp.float32)
            for h in range(Hi):
                y = y + wh[:, h:h + 1][:, :, None] * x[h:h + 1]
        # ---- W axis: batched matmul over output rows (MXU) ----
        ww = ww_ref[...]                                      # (Wo, Wi)
        ww_b = jnp.broadcast_to(ww[None], (Ho, Wo, Wi))
        return lax.dot_general(
            ww_b, y, (((2,), (1,)), ((0,), (0,))),
            preferred_element_type=jnp.float32)               # (Ho, Wo, C)

    # ---- heads (1x1 conv, no bias, ReLU) ----
    h32 = conv1x1(x32_ref[0], w32_ref, True).reshape(H32, W32, 64)
    h16 = conv1x1(x16_ref[0], w16_ref, True).reshape(H16, W16, 64)
    h8 = conv1x1(x8_ref[0], w8_ref, True).reshape(H8, W8, 64)
    h4 = conv1x1(x4_ref[0], w4_ref, True).reshape(H4, W4, 8)

    # ---- up(x32) + x16 -> conv16 (depthwise 3x3, ReLU) ----
    y = upsample(h32, wh1_ref, ww1_ref, H16, W16) + h16
    y16 = dw3x3(y, wc16_ref[...], None, True)

    # ---- up(x16) + x8 -> conv8 ----
    y = upsample(y16, wh2_ref, ww2_ref, H8, W8) + h8
    y8 = dw3x3(y, wc8_ref[...], None, True)

    # ---- up(x8) to x4 size ----
    y4 = upsample(y8, wh3_ref, ww3_ref, H4, W4)

    # ---- conv4 = DWConvBnAct(72, 64): concat eliminated by channel split ----
    d1 = dw3x3(y4, wdwa_ref[...], bdwa_ref[...], False)       # (H4, W4, 64)
    d2 = dw3x3(h4, wdwb_ref[...], bdwb_ref[...], False)       # (H4, W4, 8)

    S4 = H4 * W4
    yp = (jnp.dot(d1.reshape(S4, 64), wpwa_ref[...],
                  preferred_element_type=jnp.float32)
          + jnp.dot(d2.reshape(S4, 8), wpwb_ref[...],
                    preferred_element_type=jnp.float32)
          + bpw_ref[...])                                     # 1x1 conv + folded BN
    yp = jnp.maximum(yp, 0.0)

    # ---- classifier (lane-dense, channels padded to 128) ----
    out = jnp.dot(yp, wcls_ref[...],
                  preferred_element_type=jnp.float32) + bcls_ref[...]
    o_ref[0] = out.astype(o_ref.dtype)


# --------------------------------------------------------------------------
# Wrapper: weight prep (BN fold, concat split, lane padding) + pallas_call
# --------------------------------------------------------------------------

def lightseg_decoder1(p, x4, x8, x16, x32):
    """Inputs NHWC fp32. Returns (N, H4, W4, num_classes) NHWC fp32."""
    N, H4, W4, C4 = x4.shape
    _, H8, W8, C8 = x8.shape
    _, H16, W16, C16 = x16.shape
    _, H32, W32, C32 = x32.shape
    num_classes = p['cls_w'].shape[1]

    # Fold BatchNorm (eval) of DWConvBnAct into the pointwise 1x1 conv.
    eps = 1e-5
    scale = p['conv4_bn_gamma'] / jnp.sqrt(p['conv4_bn_var'] + eps)
    pw_w = p['conv4_pw_w'] * scale[None, :]
    pw_b = (p['conv4_pw_b'] - p['conv4_bn_mean']) * scale + p['conv4_bn_beta']

    # Split the 72-channel depthwise / pointwise weights so torch.cat never
    # materializes (first 64 channels = upsampled x8, last 8 = head4 output).
    wdwa = p['conv4_dw_w'][:, :, :64]
    wdwb = p['conv4_dw_w'][:, :, 64:]
    bdwa = p['conv4_dw_b'][:64].reshape(1, 1, 64)
    bdwb = p['conv4_dw_b'][64:].reshape(1, 1, 8)
    wpwa = pw_w[:64]
    wpwb = pw_w[64:]
    bpw = pw_b.reshape(1, 64)

    # Lane-dense classifier output: pad Cout up to a multiple of 128.
    CP = max(128, ((num_classes + 127) // 128) * 128)
    wcls = jnp.zeros((64, CP), jnp.float32).at[:, :num_classes].set(p['cls_w'])
    bcls = jnp.zeros((1, CP), jnp.float32).at[0, :num_classes].set(p['cls_b'])

    # Separable interpolation weight matrices (tiny).
    wh1, ww1 = _interp_matrix(H16, H32), _interp_matrix(W16, W32)
    wh2, ww2 = _interp_matrix(H8, H16), _interp_matrix(W8, W16)
    wh3, ww3 = _interp_matrix(H4, H8), _interp_matrix(W4, W8)

    # Flatten spatial dims so the in-kernel 1x1 convs are plain 2D matmuls.
    x32r = x32.reshape(N, H32 * W32, C32)
    x16r = x16.reshape(N, H16 * W16, C16)
    x8r = x8.reshape(N, H8 * W8, C8)
    x4r = x4.reshape(N, H4 * W4, C4)

    def full(shape):
        nd = len(shape)
        return pl.BlockSpec(tuple(shape), lambda n: (0,) * nd)

    def batched(shape):
        nd = len(shape)
        return pl.BlockSpec(tuple(shape), lambda n: (n,) + (0,) * (nd - 1))

    in_specs = [
        batched((1, H32 * W32, C32)), batched((1, H16 * W16, C16)),
        batched((1, H8 * W8, C8)), batched((1, H4 * W4, C4)),
        full(p['head32_w'].shape), full(p['head16_w'].shape),
        full(p['head8_w'].shape), full(p['head4_w'].shape),
        full(wh1.shape), full(ww1.shape), full(wh2.shape), full(ww2.shape),
        full(wh3.shape), full(ww3.shape),
        full(p['conv16_w'].shape), full(p['conv8_w'].shape),
        full(wdwa.shape), full(wdwb.shape), full(bdwa.shape), full(bdwb.shape),
        full(wpwa.shape), full(wpwb.shape), full(bpw.shape),
        full(wcls.shape), full(bcls.shape),
    ]

    out = pl.pallas_call(
        functools.partial(
            _decoder_kernel,
            dims=((H32, W32), (H16, W16), (H8, W8), (H4, W4))),
        out_shape=jax.ShapeDtypeStruct((N, H4 * W4, CP), jnp.float32),
        grid=(N,),
        in_specs=in_specs,
        out_specs=pl.BlockSpec((1, H4 * W4, CP), lambda n: (n, 0, 0)),
        compiler_params=pltpu.CompilerParams(
            dimension_semantics=("parallel",)),
    )(x32r, x16r, x8r, x4r,
      p['head32_w'], p['head16_w'], p['head8_w'], p['head4_w'],
      wh1, ww1, wh2, ww2, wh3, ww3,
      p['conv16_w'], p['conv8_w'],
      wdwa, wdwb, bdwa, bdwb,
      wpwa, wpwb, bpw,
      wcls, bcls)

    return out[:, :, :num_classes].reshape(N, H4, W4, num_classes)


# --------------------------------------------------------------------------
# Parameters (deterministic synthetic init)
# --------------------------------------------------------------------------

def init_params(key, channels, num_classes):
    c4, c8, c16, c32 = channels['4'], channels['8'], channels['16'], channels['32']
    ks = jax.random.split(key, 16)

    def w(k, shape, fan_in):
        return jax.random.normal(k, shape, jnp.float32) / jnp.sqrt(float(fan_in))

    p = {}
    p['head32_w'] = w(ks[0], (c32, 64), c32)
    p['head16_w'] = w(ks[1], (c16, 64), c16)
    p['head8_w'] = w(ks[2], (c8, 64), c8)
    p['head4_w'] = w(ks[3], (c4, 8), c4)
    p['conv16_w'] = w(ks[4], (3, 3, 64), 9)
    p['conv8_w'] = w(ks[5], (3, 3, 64), 9)
    p['conv4_dw_w'] = w(ks[6], (3, 3, 72), 9)
    p['conv4_dw_b'] = 0.1 * jax.random.normal(ks[7], (72,), jnp.float32)
    p['conv4_pw_w'] = w(ks[8], (72, 64), 72)
    p['conv4_pw_b'] = 0.1 * jax.random.normal(ks[9], (64,), jnp.float32)
    p['conv4_bn_gamma'] = 1.0 + 0.1 * jax.random.normal(ks[10], (64,), jnp.float32)
    p['conv4_bn_beta'] = 0.1 * jax.random.normal(ks[11], (64,), jnp.float32)
    p['conv4_bn_mean'] = 0.1 * jax.random.normal(ks[12], (64,), jnp.float32)
    p['conv4_bn_var'] = jnp.abs(1.0 + 0.1 * jax.random.normal(ks[13], (64,), jnp.float32))
    p['cls_w'] = w(ks[14], (64, num_classes), 64)
    p['cls_b'] = 0.1 * jax.random.normal(ks[15], (num_classes,), jnp.float32)
    return p


# --------------------------------------------------------------------------
# Pure-JAX reference (same math, no Pallas) for validation
# --------------------------------------------------------------------------

def _ref_conv1x1(x, w, b=None, relu=False):
    y = jnp.einsum('nhwc,co->nhwo', x, w)
    if b is not None:
        y = y + b
    return jnp.maximum(y, 0.0) if relu else y


def _ref_dw3x3(x, w, b=None, relu=True):
    N, H, W, C = x.shape
    xp = jnp.pad(x, ((0, 0), (1, 1), (1, 1), (0, 0)))
    acc = jnp.zeros((N, H, W, C), jnp.float32)
    for di in range(3):
        for dj in range(3):
            acc = acc + xp[:, di:di + H, dj:dj + W, :] * w[di, dj]
    if b is not None:
        acc = acc + b
    return jnp.maximum(acc, 0.0) if relu else acc


def _ref_resize(x, out_hw, add=None):
    N, Hi, Wi, C = x.shape
    Ho, Wo = out_hw
    y = jnp.einsum('oh,pw,nhwc->nopc', _interp_matrix(Ho, Hi), _interp_matrix(Wo, Wi), x)
    return y + add if add is not None else y


def _ref_forward(p, x4, x8, x16, x32):
    h32 = _ref_conv1x1(x32, p['head32_w'], relu=True)
    h16 = _ref_conv1x1(x16, p['head16_w'], relu=True)
    h8 = _ref_conv1x1(x8, p['head8_w'], relu=True)
    h4 = _ref_conv1x1(x4, p['head4_w'], relu=True)
    y16 = _ref_dw3x3(_ref_resize(h32, h16.shape[1:3], add=h16), p['conv16_w'], relu=True)
    y8 = _ref_dw3x3(_ref_resize(y16, h8.shape[1:3], add=h8), p['conv8_w'], relu=True)
    y4 = _ref_resize(y8, h4.shape[1:3])
    ycat = jnp.concatenate([y4, h4], axis=-1)
    yd = _ref_dw3x3(ycat, p['conv4_dw_w'], p['conv4_dw_b'], relu=False)
    eps = 1e-5
    scale = p['conv4_bn_gamma'] / jnp.sqrt(p['conv4_bn_var'] + eps)
    yp = _ref_conv1x1(yd, p['conv4_pw_w'] * scale[None, :],
                      (p['conv4_pw_b'] - p['conv4_bn_mean']) * scale + p['conv4_bn_beta'],
                      relu=True)
    return _ref_conv1x1(yp, p['cls_w'], p['cls_b'], relu=False)


# --------------------------------------------------------------------------
# Demo
# --------------------------------------------------------------------------

if __name__ == "__main__":
    key = jax.random.PRNGKey(0)
    channels = {'4': 16, '8': 24, '16': 32, '32': 48}
    num_classes = 5
    N = 2
    H4 = W4 = 16
    H8 = W8 = 8
    H16 = W16 = 4
    H32 = W32 = 2

    k_in, k_p = jax.random.split(key)
    k4, k8, k16, k32 = jax.random.split(k_in, 4)
    # Inputs generated directly in NHWC (equivalent to PyTorch NCHW transposed).
    x4 = jax.random.normal(k4, (N, H4, W4, channels['4']), jnp.float32)
    x8 = jax.random.normal(k8, (N, H8, W8, channels['8']), jnp.float32)
    x16 = jax.random.normal(k16, (N, H16, W16, channels['16']), jnp.float32)
    x32 = jax.random.normal(k32, (N, H32, W32, channels['32']), jnp.float32)
    params = init_params(k_p, channels, num_classes)

    out_nhwc = lightseg_decoder1(params, x4, x8, x16, x32)
    out_nchw = jnp.transpose(out_nhwc, (0, 3, 1, 2))   # back to PyTorch NCHW
    jax.block_until_ready(out_nchw)
    assert out_nchw.shape == (N, num_classes, H4, W4), out_nchw.shape

    ref = _ref_forward(params, x4, x8, x16, x32)
    max_err = float(jnp.max(jnp.abs(out_nhwc - ref)))
    assert jnp.allclose(out_nhwc, ref, atol=1e-3, rtol=1e-3), max_err

    print("KERNEL_OK")
</pallas_src>

<mosaic_0001>
module attributes {stable_mosaic.version = 11 : i64} {
  func.func @_decoder_kernel(%arg0: i32, %arg1: memref<1x4x48xf32, #tpu.memory_space<vmem>>, %arg2: memref<1x16x32xf32, #tpu.memory_space<vmem>>, %arg3: memref<1x64x24xf32, #tpu.memory_space<vmem>>, %arg4: memref<1x256x16xf32, #tpu.memory_space<vmem>>, %arg5: memref<48x64xf32, #tpu.memory_space<vmem>>, %arg6: memref<32x64xf32, #tpu.memory_space<vmem>>, %arg7: memref<24x64xf32, #tpu.memory_space<vmem>>, %arg8: memref<16x8xf32, #tpu.memory_space<vmem>>, %arg9: memref<4x2xf32, #tpu.memory_space<vmem>>, %arg10: memref<4x2xf32, #tpu.memory_space<vmem>>, %arg11: memref<8x4xf32, #tpu.memory_space<vmem>>, %arg12: memref<8x4xf32, #tpu.memory_space<vmem>>, %arg13: memref<16x8xf32, #tpu.memory_space<vmem>>, %arg14: memref<16x8xf32, #tpu.memory_space<vmem>>, %arg15: memref<3x3x64xf32, #tpu.memory_space<vmem>>, %arg16: memref<3x3x64xf32, #tpu.memory_space<vmem>>, %arg17: memref<3x3x64xf32, #tpu.memory_space<vmem>>, %arg18: memref<3x3x8xf32, #tpu.memory_space<vmem>>, %arg19: memref<1x1x64xf32, #tpu.memory_space<vmem>>, %arg20: memref<1x1x8xf32, #tpu.memory_space<vmem>>, %arg21: memref<64x64xf32, #tpu.memory_space<vmem>>, %arg22: memref<8x64xf32, #tpu.memory_space<vmem>>, %arg23: memref<1x64xf32, #tpu.memory_space<vmem>>, %arg24: memref<64x128xf32, #tpu.memory_space<vmem>>, %arg25: memref<1x128xf32, #tpu.memory_space<vmem>>, %arg26: memref<1x256x128xf32, #tpu.memory_space<vmem>>) attributes {dimension_semantics = [#tpu.dimension_semantics<parallel>], iteration_bounds = array<i64: 2>, scalar_prefetch = 0 : i64, scratch_operands = 0 : i64, tpu.core_type = #tpu.core_type<tc>, window_params = [{transform_indices = @transform_0, window_bounds = array<i64: 1, 4, 48>}, {transform_indices = @transform_1, window_bounds = array<i64: 1, 16, 32>}, {transform_indices = @transform_2, window_bounds = array<i64: 1, 64, 24>}, {transform_indices = @transform_3, window_bounds = array<i64: 1, 256, 16>}, {pipeline_mode = #tpu.pipeline_mode<synchronous>, transform_indices = @transform_4, window_bounds = array<i64: 48, 64>}, {pipeline_mode = #tpu.pipeline_mode<synchronous>, transform_indices = @transform_5, window_bounds = array<i64: 32, 64>}, {pipeline_mode = #tpu.pipeline_mode<synchronous>, transform_indices = @transform_6, window_bounds = array<i64: 24, 64>}, {pipeline_mode = #tpu.pipeline_mode<synchronous>, transform_indices = @transform_7, window_bounds = array<i64: 16, 8>}, {pipeline_mode = #tpu.pipeline_mode<synchronous>, transform_indices = @transform_8, window_bounds = array<i64: 4, 2>}, {pipeline_mode = #tpu.pipeline_mode<synchronous>, transform_indices = @transform_9, window_bounds = array<i64: 4, 2>}, {pipeline_mode = #tpu.pipeline_mode<synchronous>, transform_indices = @transform_10, window_bounds = array<i64: 8, 4>}, {pipeline_mode = #tpu.pipeline_mode<synchronous>, transform_indices = @transform_11, window_bounds = array<i64: 8, 4>}, {pipeline_mode = #tpu.pipeline_mode<synchronous>, transform_indices = @transform_12, window_bounds = array<i64: 16, 8>}, {pipeline_mode = #tpu.pipeline_mode<synchronous>, transform_indices = @transform_13, window_bounds = array<i64: 16, 8>}, {pipeline_mode = #tpu.pipeline_mode<synchronous>, transform_indices = @transform_14, window_bounds = array<i64: 3, 3, 64>}, {pipeline_mode = #tpu.pipeline_mode<synchronous>, transform_indices = @transform_15, window_bounds = array<i64: 3, 3, 64>}, {pipeline_mode = #tpu.pipeline_mode<synchronous>, transform_indices = @transform_16, window_bounds = array<i64: 3, 3, 64>}, {pipeline_mode = #tpu.pipeline_mode<synchronous>, transform_indices = @transform_17, window_bounds = array<i64: 3, 3, 8>}, {pipeline_mode = #tpu.pipeline_mode<synchronous>, transform_indices = @transform_18, window_bounds = array<i64: 1, 1, 64>}, {pipeline_mode = #tpu.pipeline_mode<synchronous>, transform_indices = @transform_19, window_bounds = array<i64: 1, 1, 8>}, {pipeline_mode = #tpu.pipeline_mode<synchronous>, transform_indices = @transform_20, window_bounds = array<i64: 64, 64>}, {pipeline_mode = #tpu.pipeline_mode<synchronous>, transform_indices = @transform_21, window_bounds = array<i64: 8, 64>}, {pipeline_mode = #tpu.pipeline_mode<synchronous>, transform_indices = @transform_22, window_bounds = array<i64: 1, 64>}, {pipeline_mode = #tpu.pipeline_mode<synchronous>, transform_indices = @transform_23, window_bounds = array<i64: 64, 128>}, {pipeline_mode = #tpu.pipeline_mode<synchronous>, transform_indices = @transform_24, window_bounds = array<i64: 1, 128>}, {transform_indices = @transform_25, window_bounds = array<i64: 1, 256, 128>}]} {
    %c0 = arith.constant 0 : index
    %c0_0 = arith.constant 0 : index
    %c0_1 = arith.constant 0 : index
    %0 = vector.load %arg1[%c0, %c0_0, %c0_1] : memref<1x4x48xf32, #tpu.memory_space<vmem>>, vector<1x4x48xf32>
    %1 = vector.shape_cast %0 : vector<1x4x48xf32> to vector<4x48xf32>
    %c0_2 = arith.constant 0 : index
    %c0_3 = arith.constant 0 : index
    %2 = vector.load %arg5[%c0_2, %c0_3] : memref<48x64xf32, #tpu.memory_space<vmem>>, vector<48x64xf32>
    %cst = arith.constant dense<0.000000e+00> : vector<4x64xf32>
    %3 = tpu.matmul %1, %2, %cst {dimension_numbers = #tpu.dot_dimension_numbers<[1], [0], [0], [1], [0, 0, 1, 1], [], []>} : vector<4x48xf32>, vector<48x64xf32>, vector<4x64xf32> -> vector<4x64xf32>
    %cst_4 = arith.constant 0.000000e+00 : f32
    %4 = vector.broadcast %cst_4 : f32 to vector<4x64xf32>
    %5 = arith.maximumf %3, %4 : vector<4x64xf32>
    %6 = vector.shape_cast %5 : vector<4x64xf32> to vector<2x2x64xf32>
    %c0_5 = arith.constant 0 : index
    %c0_6 = arith.constant 0 : index
    %c0_7 = arith.constant 0 : index
    %7 = vector.load %arg2[%c0_5, %c0_6, %c0_7] : memref<1x16x32xf32, #tpu.memory_space<vmem>>, vector<1x16x32xf32>
    %8 = vector.shape_cast %7 : vector<1x16x32xf32> to vector<16x32xf32>
    %c0_8 = arith.constant 0 : index
    %c0_9 = arith.constant 0 : index
    %9 = vector.load %arg6[%c0_8, %c0_9] : memref<32x64xf32, #tpu.memory_space<vmem>>, vector<32x64xf32>
    %cst_10 = arith.constant dense<0.000000e+00> : vector<16x64xf32>
    %10 = tpu.matmul %8, %9, %cst_10 {dimension_numbers = #tpu.dot_dimension_numbers<[1], [0], [0], [1], [0, 0, 1, 1], [], []>} : vector<16x32xf32>, vector<32x64xf32>, vector<16x64xf32> -> vector<16x64xf32>
    %cst_11 = arith.constant 0.000000e+00 : f32
    %11 = vector.broadcast %cst_11 : f32 to vector<16x64xf32>
    %12 = arith.maximumf %10, %11 : vector<16x64xf32>
    %13 = vector.shape_cast %12 : vector<16x64xf32> to vector<4x4x64xf32>
    %c0_12 = arith.constant 0 : index
    %c0_13 = arith.constant 0 : index
    %c0_14 = arith.constant 0 : index
    %14 = vector.load %arg3[%c0_12, %c0_13, %c0_14] : memref<1x64x24xf32, #tpu.memory_space<vmem>>, vector<1x64x24xf32>
    %15 = vector.shape_cast %14 : vector<1x64x24xf32> to vector<64x24xf32>
    %c0_15 = arith.constant 0 : index
    %c0_16 = arith.constant 0 : index
    %16 = vector.load %arg7[%c0_15, %c0_16] : memref<24x64xf32, #tpu.memory_space<vmem>>, vector<24x64xf32>
    %cst_17 = arith.constant dense<0.000000e+00> : vector<64x64xf32>
    %17 = tpu.matmul %15, %16, %cst_17 {dimension_numbers = #tpu.dot_dimension_numbers<[1], [0], [0], [1], [0, 0, 1, 1], [], []>} : vector<64x24xf32>, vector<24x64xf32>, vector<64x64xf32> -> vector<64x64xf32>
    %cst_18 = arith.constant 0.000000e+00 : f32
    %18 = vector.broadcast %cst_18 : f32 to vector<64x64xf32>
    %19 = arith.maximumf %17, %18 : vector<64x64xf32>
    %20 = vector.shape_cast %19 : vector<64x64xf32> to vector<8x8x64xf32>
    %c0_19 = arith.constant 0 : index
    %c0_20 = arith.constant 0 : index
    %c0_21 = arith.constant 0 : index
    %21 = vector.load %arg4[%c0_19, %c0_20, %c0_21] : memref<1x256x16xf32, #tpu.memory_space<vmem>>, vector<1x256x16xf32>
    %22 = vector.shape_cast %21 : vector<1x256x16xf32> to vector<256x16xf32>
    %c0_22 = arith.constant 0 : index
    %c0_23 = arith.constant 0 : index
    %23 = vector.load %arg8[%c0_22, %c0_23] : memref<16x8xf32, #tpu.memory_space<vmem>>, vector<16x8xf32>
    %cst_24 = arith.constant dense<0.000000e+00> : vector<256x8xf32>
    %24 = tpu.matmul %22, %23, %cst_24 {dimension_numbers = #tpu.dot_dimension_numbers<[1], [0], [0], [1], [0, 0, 1, 1], [], []>} : vector<256x16xf32>, vector<16x8xf32>, vector<256x8xf32> -> vector<256x8xf32>
    %cst_25 = arith.constant 0.000000e+00 : f32
    %25 = vector.broadcast %cst_25 : f32 to vector<256x8xf32>
    %26 = arith.maximumf %24, %25 : vector<256x8xf32>
    %27 = vector.shape_cast %26 : vector<256x8xf32> to vector<16x16x8xf32>
    %28 = vector.extract_strided_slice %6 {offsets = [0, 0, 0], sizes = [1, 2, 64], strides = [1, 1, 1]} : vector<2x2x64xf32> to vector<1x2x64xf32>
    %29 = vector.extract_strided_slice %6 {offsets = [0, 0, 0], sizes = [1, 2, 64], strides = [1, 1, 1]} : vector<2x2x64xf32> to vector<1x2x64xf32>
    %30 = tpu.concatenate %28, %29 in 0 : vector<1x2x64xf32>, vector<1x2x64xf32> -> vector<2x2x64xf32>
    %31 = vector.extract_strided_slice %6 {offsets = [1, 0, 0], sizes = [1, 2, 64], strides = [1, 1, 1]} : vector<2x2x64xf32> to vector<1x2x64xf32>
    %32 = vector.extract_strided_slice %6 {offsets = [1, 0, 0], sizes = [1, 2, 64], strides = [1, 1, 1]} : vector<2x2x64xf32> to vector<1x2x64xf32>
    %33 = tpu.concatenate %31, %32 in 0 : vector<1x2x64xf32>, vector<1x2x64xf32> -> vector<2x2x64xf32>
    %cst_26 = arith.constant 2.500000e-01 : f32
    %34 = vector.broadcast %cst_26 : f32 to vector<2x2x64xf32>
    %35 = arith.mulf %34, %30 : vector<2x2x64xf32>
    %cst_27 = arith.constant 7.500000e-01 : f32
    %36 = vector.broadcast %cst_27 : f32 to vector<2x2x64xf32>
    %37 = arith.mulf %36, %6 : vector<2x2x64xf32>
    %38 = arith.addf %35, %37 : vector<2x2x64xf32>
    %cst_28 = arith.constant 7.500000e-01 : f32
    %39 = vector.broadcast %cst_28 : f32 to vector<2x2x64xf32>
    %40 = arith.mulf %39, %6 : vector<2x2x64xf32>
    %cst_29 = arith.constant 2.500000e-01 : f32
    %41 = vector.broadcast %cst_29 : f32 to vector<2x2x64xf32>
    %42 = arith.mulf %41, %33 : vector<2x2x64xf32>
    %43 = arith.addf %40, %42 : vector<2x2x64xf32>
    %44 = vector.shape_cast %38 : vector<2x2x64xf32> to vector<2x1x2x64xf32>
    %45 = vector.shape_cast %43 : vector<2x2x64xf32> to vector<2x1x2x64xf32>
    %46 = tpu.concatenate %44, %45 in 1 : vector<2x1x2x64xf32>, vector<2x1x2x64xf32> -> vector<2x2x2x64xf32>
    %47 = vector.shape_cast %46 : vector<2x2x2x64xf32> to vector<4x2x64xf32>
    %c0_30 = arith.constant 0 : index
    %c0_31 = arith.constant 0 : index
    %48 = vector.load %arg10[%c0_30, %c0_31] : memref<4x2xf32, #tpu.memory_space<vmem>>, vector<4x2xf32>
    %49 = vector.shape_cast %48 : vector<4x2xf32> to vector<1x4x2xf32>
    %50 = vector.shape_cast %49 : vector<1x4x2xf32> to vector<1x4x2xf32>
    %51 = vector.broadcast %50 : vector<1x4x2xf32> to vector<4x4x2xf32>
    %cst_32 = arith.constant dense<0.000000e+00> : vector<4x4x64xf32>
    %52 = tpu.matmul %51, %47, %cst_32 {dimension_numbers = #tpu.dot_dimension_numbers<[2], [1], [1], [2], [0, 0, 0, 1, 1, 2], [0], [0]>} : vector<4x4x2xf32>, vector<4x2x64xf32>, vector<4x4x64xf32> -> vector<4x4x64xf32>
    %53 = arith.addf %52, %13 : vector<4x4x64xf32>
    %c0_33 = arith.constant 0 : index
    %c0_34 = arith.constant 0 : index
    %c0_35 = arith.constant 0 : index
    %54 = vector.load %arg15[%c0_33, %c0_34, %c0_35] : memref<3x3x64xf32, #tpu.memory_space<vmem>>, vector<3x3x64xf32>
    %cst_36 = arith.constant 0.000000e+00 : f32
    %55 = vector.broadcast %cst_36 : f32 to vector<1x4x64xf32>
    %56 = tpu.concatenate %55, %53, %55 in 0 : vector<1x4x64xf32>, vector<4x4x64xf32>, vector<1x4x64xf32> -> vector<6x4x64xf32>
    %cst_37 = arith.constant 0.000000e+00 : f32
    %57 = vector.broadcast %cst_37 : f32 to vector<6x1x64xf32>
    %58 = tpu.concatenate %57, %56, %57 in 1 : vector<6x1x64xf32>, vector<6x4x64xf32>, vector<6x1x64xf32> -> vector<6x6x64xf32>
    %59 = vector.extract_strided_slice %58 {offsets = [0, 0, 0], sizes = [4, 4, 64], strides = [1, 1, 1]} : vector<6x6x64xf32> to vector<4x4x64xf32>
    %60 = vector.extract_strided_slice %54 {offsets = [0, 0, 0], sizes = [1, 1, 64], strides = [1, 1, 1]} : vector<3x3x64xf32> to vector<1x1x64xf32>
    %61 = vector.shape_cast %60 : vector<1x1x64xf32> to vector<64xf32>
    %62 = vector.shape_cast %61 : vector<64xf32> to vector<1x1x64xf32>
    %63 = vector.broadcast %62 : vector<1x1x64xf32> to vector<4x4x64xf32>
    %64 = arith.mulf %59, %63 : vector<4x4x64xf32>
    %65 = vector.extract_strided_slice %58 {offsets = [0, 1, 0], sizes = [4, 4, 64], strides = [1, 1, 1]} : vector<6x6x64xf32> to vector<4x4x64xf32>
    %66 = vector.extract_strided_slice %54 {offsets = [0, 1, 0], sizes = [1, 1, 64], strides = [1, 1, 1]} : vector<3x3x64xf32> to vector<1x1x64xf32>
    %67 = vector.shape_cast %66 : vector<1x1x64xf32> to vector<64xf32>
    %68 = vector.shape_cast %67 : vector<64xf32> to vector<1x1x64xf32>
    %69 = vector.broadcast %68 : vector<1x1x64xf32> to vector<4x4x64xf32>
    %70 = arith.mulf %65, %69 : vector<4x4x64xf32>
    %71 = arith.addf %64, %70 : vector<4x4x64xf32>
    %72 = vector.extract_strided_slice %58 {offsets = [0, 2, 0], sizes = [4, 4, 64], strides = [1, 1, 1]} : vector<6x6x64xf32> to vector<4x4x64xf32>
    %73 = vector.extract_strided_slice %54 {offsets = [0, 2, 0], sizes = [1, 1, 64], strides = [1, 1, 1]} : vector<3x3x64xf32> to vector<1x1x64xf32>
    %74 = vector.shape_cast %73 : vector<1x1x64xf32> to vector<64xf32>
    %75 = vector.shape_cast %74 : vector<64xf32> to vector<1x1x64xf32>
    %76 = vector.broadcast %75 : vector<1x1x64xf32> to vector<4x4x64xf32>
    %77 = arith.mulf %72, %76 : vector<4x4x64xf32>
    %78 = arith.addf %71, %77 : vector<4x4x64xf32>
    %79 = vector.extract_strided_slice %58 {offsets = [1, 0, 0], sizes = [4, 4, 64], strides = [1, 1, 1]} : vector<6x6x64xf32> to vector<4x4x64xf32>
    %80 = vector.extract_strided_slice %54 {offsets = [1, 0, 0], sizes = [1, 1, 64], strides = [1, 1, 1]} : vector<3x3x64xf32> to vector<1x1x64xf32>
    %81 = vector.shape_cast %80 : vector<1x1x64xf32> to vector<64xf32>
    %82 = vector.shape_cast %81 : vector<64xf32> to vector<1x1x64xf32>
    %83 = vector.broadcast %82 : vector<1x1x64xf32> to vector<4x4x64xf32>
    %84 = arith.mulf %79, %83 : vector<4x4x64xf32>
    %85 = arith.addf %78, %84 : vector<4x4x64xf32>
    %86 = vector.extract_strided_slice %58 {offsets = [1, 1, 0], sizes = [4, 4, 64], strides = [1, 1, 1]} : vector<6x6x64xf32> to vector<4x4x64xf32>
    %87 = vector.extract_strided_slice %54 {offsets = [1, 1, 0], sizes = [1, 1, 64], strides = [1, 1, 1]} : vector<3x3x64xf32> to vector<1x1x64xf32>
    %88 = vector.shape_cast %87 : vector<1x1x64xf32> to vector<64xf32>
    %89 = vector.shape_cast %88 : vector<64xf32> to vector<1x1x64xf32>
    %90 = vector.broadcast %89 : vector<1x1x64xf32> to vector<4x4x64xf32>
    %91 = arith.mulf %86, %90 : vector<4x4x64xf32>
    %92 = arith.addf %85, %91 : vector<4x4x64xf32>
    %93 = vector.extract_strided_slice %58 {offsets = [1, 2, 0], sizes = [4, 4, 64], strides = [1, 1, 1]} : vector<6x6x64xf32> to vector<4x4x64xf32>
    %94 = vector.extract_strided_slice %54 {offsets = [1, 2, 0], sizes = [1, 1, 64], strides = [1, 1, 1]} : vector<3x3x64xf32> to vector<1x1x64xf32>
    %95 = vector.shape_cast %94 : vector<1x1x64xf32> to vector<64xf32>
    %96 = vector.shape_cast %95 : vector<64xf32> to vector<1x1x64xf32>
    %97 = vector.broadcast %96 : vector<1x1x64xf32> to vector<4x4x64xf32>
    %98 = arith.mulf %93, %97 : vector<4x4x64xf32>
    %99 = arith.addf %92, %98 : vector<4x4x64xf32>
    %100 = vector.extract_strided_slice %58 {offsets = [2, 0, 0], sizes = [4, 4, 64], strides = [1, 1, 1]} : vector<6x6x64xf32> to vector<4x4x64xf32>
    %101 = vector.extract_strided_slice %54 {offsets = [2, 0, 0], sizes = [1, 1, 64], strides = [1, 1, 1]} : vector<3x3x64xf32> to vector<1x1x64xf32>
    %102 = vector.shape_cast %101 : vector<1x1x64xf32> to vector<64xf32>
    %103 = vector.shape_cast %102 : vector<64xf32> to vector<1x1x64xf32>
    %104 = vector.broadcast %103 : vector<1x1x64xf32> to vector<4x4x64xf32>
    %105 = arith.mulf %100, %104 : vector<4x4x64xf32>
    %106 = arith.addf %99, %105 : vector<4x4x64xf32>
    %107 = vector.extract_strided_slice %58 {offsets = [2, 1, 0], sizes = [4, 4, 64], strides = [1, 1, 1]} : vector<6x6x64xf32> to vector<4x4x64xf32>
    %108 = vector.extract_strided_slice %54 {offsets = [2, 1, 0], sizes = [1, 1, 64], strides = [1, 1, 1]} : vector<3x3x64xf32> to vector<1x1x64xf32>
    %109 = vector.shape_cast %108 : vector<1x1x64xf32> to vector<64xf32>
    %110 = vector.shape_cast %109 : vector<64xf32> to vector<1x1x64xf32>
    %111 = vector.broadcast %110 : vector<1x1x64xf32> to vector<4x4x64xf32>
    %112 = arith.mulf %107, %111 : vector<4x4x64xf32>
    %113 = arith.addf %106, %112 : vector<4x4x64xf32>
    %114 = vector.extract_strided_slice %58 {offsets = [2, 2, 0], sizes = [4, 4, 64], strides = [1, 1, 1]} : vector<6x6x64xf32> to vector<4x4x64xf32>
    %115 = vector.extract_strided_slice %54 {offsets = [2, 2, 0], sizes = [1, 1, 64], strides = [1, 1, 1]} : vector<3x3x64xf32> to vector<1x1x64xf32>
    %116 = vector.shape_cast %115 : vector<1x1x64xf32> to vector<64xf32>
    %117 = vector.shape_cast %116 : vector<64xf32> to vector<1x1x64xf32>
    %118 = vector.broadcast %117 : vector<1x1x64xf32> to vector<4x4x64xf32>
    %119 = arith.mulf %114, %118 : vector<4x4x64xf32>
    %120 = arith.addf %113, %119 : vector<4x4x64xf32>
    %cst_38 = arith.constant 0.000000e+00 : f32
    %121 = vector.broadcast %cst_38 : f32 to vector<4x4x64xf32>
    %122 = arith.maximumf %120, %121 : vector<4x4x64xf32>
    %123 = vector.extract_strided_slice %122 {offsets = [0, 0, 0], sizes = [1, 4, 64], strides = [1, 1, 1]} : vector<4x4x64xf32> to vector<1x4x64xf32>
    %124 = vector.extract_strided_slice %122 {offsets = [0, 0, 0], sizes = [3, 4, 64], strides = [1, 1, 1]} : vector<4x4x64xf32> to vector<3x4x64xf32>
    %125 = tpu.concatenate %123, %124 in 0 : vector<1x4x64xf32>, vector<3x4x64xf32> -> vector<4x4x64xf32>
    %126 = vector.extract_strided_slice %122 {offsets = [1, 0, 0], sizes = [3, 4, 64], strides = [1, 1, 1]} : vector<4x4x64xf32> to vector<3x4x64xf32>
    %127 = vector.extract_strided_slice %122 {offsets = [3, 0, 0], sizes = [1, 4, 64], strides = [1, 1, 1]} : vector<4x4x64xf32> to vector<1x4x64xf32>
    %128 = tpu.concatenate %126, %127 in 0 : vector<3x4x64xf32>, vector<1x4x64xf32> -> vector<4x4x64xf32>
    %cst_39 = arith.constant 2.500000e-01 : f32
    %129 = vector.broadcast %cst_39 : f32 to vector<4x4x64xf32>
    %130 = arith.mulf %129, %125 : vector<4x4x64xf32>
    %cst_40 = arith.constant 7.500000e-01 : f32
    %131 = vector.broadcast %cst_40 : f32 to vector<4x4x64xf32>
    %132 = arith.mulf %131, %122 : vector<4x4x64xf32>
    %133 = arith.addf %130, %132 : vector<4x4x64xf32>
    %cst_41 = arith.constant 7.500000e-01 : f32
    %134 = vector.broadcast %cst_41 : f32 to vector<4x4x64xf32>
    %135 = arith.mulf %134, %122 : vector<4x4x64xf32>
    %cst_42 = arith.constant 2.500000e-01 : f32
    %136 = vector.broadcast %cst_42 : f32 to vector<4x4x64xf32>
    %137 = arith.mulf %136, %128 : vector<4x4x64xf32>
    %138 = arith.addf %135, %137 : vector<4x4x64xf32>
    %139 = vector.shape_cast %133 : vector<4x4x64xf32> to vector<4x1x4x64xf32>
    %140 = vector.shape_cast %138 : vector<4x4x64xf32> to vector<4x1x4x64xf32>
    %141 = tpu.concatenate %139, %140 in 1 : vector<4x1x4x64xf32>, vector<4x1x4x64xf32> -> vector<4x2x4x64xf32>
    %142 = vector.shape_cast %141 : vector<4x2x4x64xf32> to vector<8x4x64xf32>
    %c0_43 = arith.constant 0 : index
    %c0_44 = arith.constant 0 : index
    %143 = vector.load %arg12[%c0_43, %c0_44] : memref<8x4xf32, #tpu.memory_space<vmem>>, vector<8x4xf32>
    %144 = vector.shape_cast %143 : vector<8x4xf32> to vector<1x8x4xf32>
    %145 = vector.shape_cast %144 : vector<1x8x4xf32> to vector<1x8x4xf32>
    %146 = vector.broadcast %145 : vector<1x8x4xf32> to vector<8x8x4xf32>
    %cst_45 = arith.constant dense<0.000000e+00> : vector<8x8x64xf32>
    %147 = tpu.matmul %146, %142, %cst_45 {dimension_numbers = #tpu.dot_dimension_numbers<[2], [1], [1], [2], [0, 0, 0, 1, 1, 2], [0], [0]>} : vector<8x8x4xf32>, vector<8x4x64xf32>, vector<8x8x64xf32> -> vector<8x8x64xf32>
    %148 = arith.addf %147, %20 : vector<8x8x64xf32>
    %c0_46 = arith.constant 0 : index
    %c0_47 = arith.constant 0 : index
    %c0_48 = arith.constant 0 : index
    %149 = vector.load %arg16[%c0_46, %c0_47, %c0_48] : memref<3x3x64xf32, #tpu.memory_space<vmem>>, vector<3x3x64xf32>
    %cst_49 = arith.constant 0.000000e+00 : f32
    %150 = vector.broadcast %cst_49 : f32 to vector<1x8x64xf32>
    %151 = tpu.concatenate %150, %148, %150 in 0 : vector<1x8x64xf32>, vector<8x8x64xf32>, vector<1x8x64xf32> -> vector<10x8x64xf32>
    %cst_50 = arith.constant 0.000000e+00 : f32
    %152 = vector.broadcast %cst_50 : f32 to vector<10x1x64xf32>
    %153 = tpu.concatenate %152, %151, %152 in 1 : vector<10x1x64xf32>, vector<10x8x64xf32>, vector<10x1x64xf32> -> vector<10x10x64xf32>
    %154 = vector.extract_strided_slice %153 {offsets = [0, 0, 0], sizes = [8, 8, 64], strides = [1, 1, 1]} : vector<10x10x64xf32> to vector<8x8x64xf32>
    %155 = vector.extract_strided_slice %149 {offsets = [0, 0, 0], sizes = [1, 1, 64], strides = [1, 1, 1]} : vector<3x3x64xf32> to vector<1x1x64xf32>
    %156 = vector.shape_cast %155 : vector<1x1x64xf32> to vector<64xf32>
    %157 = vector.shape_cast %156 : vector<64xf32> to vector<1x1x64xf32>
    %158 = vector.broadcast %157 : vector<1x1x64xf32> to vector<8x8x64xf32>
    %159 = arith.mulf %154, %158 : vector<8x8x64xf32>
    %160 = vector.extract_strided_slice %153 {offsets = [0, 1, 0], sizes = [8, 8, 64], strides = [1, 1, 1]} : vector<10x10x64xf32> to vector<8x8x64xf32>
    %161 = vector.extract_strided_slice %149 {offsets = [0, 1, 0], sizes = [1, 1, 64], strides = [1, 1, 1]} : vector<3x3x64xf32> to vector<1x1x64xf32>
    %162 = vector.shape_cast %161 : vector<1x1x64xf32> to vector<64xf32>
    %163 = vector.shape_cast %162 : vector<64xf32> to vector<1x1x64xf32>
    %164 = vector.broadcast %163 : vector<1x1x64xf32> to vector<8x8x64xf32>
    %165 = arith.mulf %160, %164 : vector<8x8x64xf32>
    %166 = arith.addf %159, %165 : vector<8x8x64xf32>
    %167 = vector.extract_strided_slice %153 {offsets = [0, 2, 0], sizes = [8, 8, 64], strides = [1, 1, 1]} : vector<10x10x64xf32> to vector<8x8x64xf32>
    %168 = vector.extract_strided_slice %149 {offsets = [0, 2, 0], sizes = [1, 1, 64], strides = [1, 1, 1]} : vector<3x3x64xf32> to vector<1x1x64xf32>
    %169 = vector.shape_cast %168 : vector<1x1x64xf32> to vector<64xf32>
    %170 = vector.shape_cast %169 : vector<64xf32> to vector<1x1x64xf32>
    %171 = vector.broadcast %170 : vector<1x1x64xf32> to vector<8x8x64xf32>
    %172 = arith.mulf %167, %171 : vector<8x8x64xf32>
    %173 = arith.addf %166, %172 : vector<8x8x64xf32>
    %174 = vector.extract_strided_slice %153 {offsets = [1, 0, 0], sizes = [8, 8, 64], strides = [1, 1, 1]} : vector<10x10x64xf32> to vector<8x8x64xf32>
    %175 = vector.extract_strided_slice %149 {offsets = [1, 0, 0], sizes = [1, 1, 64], strides = [1, 1, 1]} : vector<3x3x64xf32> to vector<1x1x64xf32>
    %176 = vector.shape_cast %175 : vector<1x1x64xf32> to vector<64xf32>
    %177 = vector.shape_cast %176 : vector<64xf32> to vector<1x1x64xf32>
    %178 = vector.broadcast %177 : vector<1x1x64xf32> to vector<8x8x64xf32>
    %179 = arith.mulf %174, %178 : vector<8x8x64xf32>
    %180 = arith.addf %173, %179 : vector<8x8x64xf32>
    %181 = vector.extract_strided_slice %153 {offsets = [1, 1, 0], sizes = [8, 8, 64], strides = [1, 1, 1]} : vector<10x10x64xf32> to vector<8x8x64xf32>
    %182 = vector.extract_strided_slice %149 {offsets = [1, 1, 0], sizes = [1, 1, 64], strides = [1, 1, 1]} : vector<3x3x64xf32> to vector<1x1x64xf32>
    %183 = vector.shape_cast %182 : vector<1x1x64xf32> to vector<64xf32>
    %184 = vector.shape_cast %183 : vector<64xf32> to vector<1x1x64xf32>
    %185 = vector.broadcast %184 : vector<1x1x64xf32> to vector<8x8x64xf32>
    %186 = arith.mulf %181, %185 : vector<8x8x64xf32>
    %187 = arith.addf %180, %186 : vector<8x8x64xf32>
    %188 = vector.extract_strided_slice %153 {offsets = [1, 2, 0], sizes = [8, 8, 64], strides = [1, 1, 1]} : vector<10x10x64xf32> to vector<8x8x64xf32>
    %189 = vector.extract_strided_slice %149 {offsets = [1, 2, 0], sizes = [1, 1, 64], strides = [1, 1, 1]} : vector<3x3x64xf32> to vector<1x1x64xf32>
    %190 = vector.shape_cast %189 : vector<1x1x64xf32> to vector<64xf32>
    %191 = vector.shape_cast %190 : vector<64xf32> to vector<1x1x64xf32>
    %192 = vector.broadcast %191 : vector<1x1x64xf32> to vector<8x8x64xf32>
    %193 = arith.mulf %188, %192 : vector<8x8x64xf32>
    %194 = arith.addf %187, %193 : vector<8x8x64xf32>
    %195 = vector.extract_strided_slice %153 {offsets = [2, 0, 0], sizes = [8, 8, 64], strides = [1, 1, 1]} : vector<10x10x64xf32> to vector<8x8x64xf32>
    %196 = vector.extract_strided_slice %149 {offsets = [2, 0, 0], sizes = [1, 1, 64], strides = [1, 1, 1]} : vector<3x3x64xf32> to vector<1x1x64xf32>
    %197 = vector.shape_cast %196 : vector<1x1x64xf32> to vector<64xf32>
    %198 = vector.shape_cast %197 : vector<64xf32> to vector<1x1x64xf32>
    %199 = vector.broadcast %198 : vector<1x1x64xf32> to vector<8x8x64xf32>
    %200 = arith.mulf %195, %199 : vector<8x8x64xf32>
    %201 = arith.addf %194, %200 : vector<8x8x64xf32>
    %202 = vector.extract_strided_slice %153 {offsets = [2, 1, 0], sizes = [8, 8, 64], strides = [1, 1, 1]} : vector<10x10x64xf32> to vector<8x8x64xf32>
    %203 = vector.extract_strided_slice %149 {offsets = [2, 1, 0], sizes = [1, 1, 64], strides = [1, 1, 1]} : vector<3x3x64xf32> to vector<1x1x64xf32>
    %204 = vector.shape_cast %203 : vector<1x1x64xf32> to vector<64xf32>
    %205 = vector.shape_cast %204 : vector<64xf32> to vector<1x1x64xf32>
    %206 = vector.broadcast %205 : vector<1x1x64xf32> to vector<8x8x64xf32>
    %207 = arith.mulf %202, %206 : vector<8x8x64xf32>
    %208 = arith.addf %201, %207 : vector<8x8x64xf32>
    %209 = vector.extract_strided_slice %153 {offsets = [2, 2, 0], sizes = [8, 8, 64], strides = [1, 1, 1]} : vector<10x10x64xf32> to vector<8x8x64xf32>
    %210 = vector.extract_strided_slice %149 {offsets = [2, 2, 0], sizes = [1, 1, 64], strides = [1, 1, 1]} : vector<3x3x64xf32> to vector<1x1x64xf32>
    %211 = vector.shape_cast %210 : vector<1x1x64xf32> to vector<64xf32>
    %212 = vector.shape_cast %211 : vector<64xf32> to vector<1x1x64xf32>
    %213 = vector.broadcast %212 : vector<1x1x64xf32> to vector<8x8x64xf32>
    %214 = arith.mulf %209, %213 : vector<8x8x64xf32>
    %215 = arith.addf %208, %214 : vector<8x8x64xf32>
    %cst_51 = arith.constant 0.000000e+00 : f32
    %216 = vector.broadcast %cst_51 : f32 to vector<8x8x64xf32>
    %217 = arith.maximumf %215, %216 : vector<8x8x64xf32>
    %218 = vector.extract_strided_slice %217 {offsets = [0, 0, 0], sizes = [1, 8, 64], strides = [1, 1, 1]} : vector<8x8x64xf32> to vector<1x8x64xf32>
    %219 = vector.extract_strided_slice %217 {offsets = [0, 0, 0], sizes = [7, 8, 64], strides = [1, 1, 1]} : vector<8x8x64xf32> to vector<7x8x64xf32>
    %220 = tpu.concatenate %218, %219 in 0 : vector<1x8x64xf32>, vector<7x8x64xf32> -> vector<8x8x64xf32>
    %221 = vector.extract_strided_slice %217 {offsets = [1, 0, 0], sizes = [7, 8, 64], strides = [1, 1, 1]} : vector<8x8x64xf32> to vector<7x8x64xf32>
    %222 = vector.extract_strided_slice %217 {offsets = [7, 0, 0], sizes = [1, 8, 64], strides = [1, 1, 1]} : vector<8x8x64xf32> to vector<1x8x64xf32>
    %223 = tpu.concatenate %221, %222 in 0 : vector<7x8x64xf32>, vector<1x8x64xf32> -> vector<8x8x64xf32>
    %cst_52 = arith.constant 2.500000e-01 : f32
    %224 = vector.broadcast %cst_52 : f32 to vector<8x8x64xf32>
    %225 = arith.mulf %224, %220 : vector<8x8x64xf32>
    %cst_53 = arith.constant 7.500000e-01 : f32
    %226 = vector.broadcast %cst_53 : f32 to vector<8x8x64xf32>
    %227 = arith.mulf %226, %217 : vector<8x8x64xf32>
    %228 = arith.addf %225, %227 : vector<8x8x64xf32>
    %cst_54 = arith.constant 7.500000e-01 : f32
    %229 = vector.broadcast %cst_54 : f32 to vector<8x8x64xf32>
    %230 = arith.mulf %229, %217 : vector<8x8x64xf32>
    %cst_55 = arith.constant 2.500000e-01 : f32
    %231 = vector.broadcast %cst_55 : f32 to vector<8x8x64xf32>
    %232 = arith.mulf %231, %223 : vector<8x8x64xf32>
    %233 = arith.addf %230, %232 : vector<8x8x64xf32>
    %234 = vector.shape_cast %228 : vector<8x8x64xf32> to vector<8x1x8x64xf32>
    %235 = vector.shape_cast %233 : vector<8x8x64xf32> to vector<8x1x8x64xf32>
    %236 = tpu.concatenate %234, %235 in 1 : vector<8x1x8x64xf32>, vector<8x1x8x64xf32> -> vector<8x2x8x64xf32>
    %237 = vector.shape_cast %236 : vector<8x2x8x64xf32> to vector<16x8x64xf32>
    %c0_56 = arith.constant 0 : index
    %c0_57 = arith.constant 0 : index
    %238 = vector.load %arg14[%c0_56, %c0_57] : memref<16x8xf32, #tpu.memory_space<vmem>>, vector<16x8xf32>
    %239 = vector.shape_cast %238 : vector<16x8xf32> to vector<1x16x8xf32>
    %240 = vector.shape_cast %239 : vector<1x16x8xf32> to vector<1x16x8xf32>
    %241 = vector.broadcast %240 : vector<1x16x8xf32> to vector<16x16x8xf32>
    %cst_58 = arith.constant dense<0.000000e+00> : vector<16x16x64xf32>
    %242 = tpu.matmul %241, %237, %cst_58 {dimension_numbers = #tpu.dot_dimension_numbers<[2], [1], [1], [2], [0, 0, 0, 1, 1, 2], [0], [0]>} : vector<16x16x8xf32>, vector<16x8x64xf32>, vector<16x16x64xf32> -> vector<16x16x64xf32>
    %c0_59 = arith.constant 0 : index
    %c0_60 = arith.constant 0 : index
    %c0_61 = arith.constant 0 : index
    %243 = vector.load %arg17[%c0_59, %c0_60, %c0_61] : memref<3x3x64xf32, #tpu.memory_space<vmem>>, vector<3x3x64xf32>
    %c0_62 = arith.constant 0 : index
    %c0_63 = arith.constant 0 : index
    %c0_64 = arith.constant 0 : index
    %244 = vector.load %arg19[%c0_62, %c0_63, %c0_64] : memref<1x1x64xf32, #tpu.memory_space<vmem>>, vector<1x1x64xf32>
    %cst_65 = arith.constant 0.000000e+00 : f32
    %245 = vector.broadcast %cst_65 : f32 to vector<1x16x64xf32>
    %246 = tpu.concatenate %245, %242, %245 in 0 : vector<1x16x64xf32>, vector<16x16x64xf32>, vector<1x16x64xf32> -> vector<18x16x64xf32>
    %cst_66 = arith.constant 0.000000e+00 : f32
    %247 = vector.broadcast %cst_66 : f32 to vector<18x1x64xf32>
    %248 = tpu.concatenate %247, %246, %247 in 1 : vector<18x1x64xf32>, vector<18x16x64xf32>, vector<18x1x64xf32> -> vector<18x18x64xf32>
    %249 = vector.extract_strided_slice %248 {offsets = [0, 0, 0], sizes = [16, 16, 64], strides = [1, 1, 1]} : vector<18x18x64xf32> to vector<16x16x64xf32>
    %250 = vector.extract_strided_slice %243 {offsets = [0, 0, 0], sizes = [1, 1, 64], strides = [1, 1, 1]} : vector<3x3x64xf32> to vector<1x1x64xf32>
    %251 = vector.shape_cast %250 : vector<1x1x64xf32> to vector<64xf32>
    %252 = vector.shape_cast %251 : vector<64xf32> to vector<1x1x64xf32>
    %253 = vector.broadcast %252 : vector<1x1x64xf32> to vector<16x16x64xf32>
    %254 = arith.mulf %249, %253 : vector<16x16x64xf32>
    %255 = vector.extract_strided_slice %248 {offsets = [0, 1, 0], sizes = [16, 16, 64], strides = [1, 1, 1]} : vector<18x18x64xf32> to vector<16x16x64xf32>
    %256 = vector.extract_strided_slice %243 {offsets = [0, 1, 0], sizes = [1, 1, 64], strides = [1, 1, 1]} : vector<3x3x64xf32> to vector<1x1x64xf32>
    %257 = vector.shape_cast %256 : vector<1x1x64xf32> to vector<64xf32>
    %258 = vector.shape_cast %257 : vector<64xf32> to vector<1x1x64xf32>
    %259 = vector.broadcast %258 : vector<1x1x64xf32> to vector<16x16x64xf32>
    %260 = arith.mulf %255, %259 : vector<16x16x64xf32>
    %261 = arith.addf %254, %260 : vector<16x16x64xf32>
    %262 = vector.extract_strided_slice %248 {offsets = [0, 2, 0], sizes = [16, 16, 64], strides = [1, 1, 1]} : vector<18x18x64xf32> to vector<16x16x64xf32>
    %263 = vector.extract_strided_slice %243 {offsets = [0, 2, 0], sizes = [1, 1, 64], strides = [1, 1, 1]} : vector<3x3x64xf32> to vector<1x1x64xf32>
    %264 = vector.shape_cast %263 : vector<1x1x64xf32> to vector<64xf32>
    %265 = vector.shape_cast %264 : vector<64xf32> to vector<1x1x64xf32>
    %266 = vector.broadcast %265 : vector<1x1x64xf32> to vector<16x16x64xf32>
    %267 = arith.mulf %262, %266 : vector<16x16x64xf32>
    %268 = arith.addf %261, %267 : vector<16x16x64xf32>
    %269 = vector.extract_strided_slice %248 {offsets = [1, 0, 0], sizes = [16, 16, 64], strides = [1, 1, 1]} : vector<18x18x64xf32> to vector<16x16x64xf32>
    %270 = vector.extract_strided_slice %243 {offsets = [1, 0, 0], sizes = [1, 1, 64], strides = [1, 1, 1]} : vector<3x3x64xf32> to vector<1x1x64xf32>
    %271 = vector.shape_cast %270 : vector<1x1x64xf32> to vector<64xf32>
    %272 = vector.shape_cast %271 : vector<64xf32> to vector<1x1x64xf32>
    %273 = vector.broadcast %272 : vector<1x1x64xf32> to vector<16x16x64xf32>
    %274 = arith.mulf %269, %273 : vector<16x16x64xf32>
    %275 = arith.addf %268, %274 : vector<16x16x64xf32>
    %276 = vector.extract_strided_slice %248 {offsets = [1, 1, 0], sizes = [16, 16, 64], strides = [1, 1, 1]} : vector<18x18x64xf32> to vector<16x16x64xf32>
    %277 = vector.extract_strided_slice %243 {offsets = [1, 1, 0], sizes = [1, 1, 64], strides = [1, 1, 1]} : vector<3x3x64xf32> to vector<1x1x64xf32>
    %278 = vector.shape_cast %277 : vector<1x1x64xf32> to vector<64xf32>
    %279 = vector.shape_cast %278 : vector<64xf32> to vector<1x1x64xf32>
    %280 = vector.broadcast %279 : vector<1x1x64xf32> to vector<16x16x64xf32>
    %281 = arith.mulf %276, %280 : vector<16x16x64xf32>
    %282 = arith.addf %275, %281 : vector<16x16x64xf32>
    %283 = vector.extract_strided_slice %248 {offsets = [1, 2, 0], sizes = [16, 16, 64], strides = [1, 1, 1]} : vector<18x18x64xf32> to vector<16x16x64xf32>
    %284 = vector.extract_strided_slice %243 {offsets = [1, 2, 0], sizes = [1, 1, 64], strides = [1, 1, 1]} : vector<3x3x64xf32> to vector<1x1x64xf32>
    %285 = vector.shape_cast %284 : vector<1x1x64xf32> to vector<64xf32>
    %286 = vector.shape_cast %285 : vector<64xf32> to vector<1x1x64xf32>
    %287 = vector.broadcast %286 : vector<1x1x64xf32> to vector<16x16x64xf32>
    %288 = arith.mulf %283, %287 : vector<16x16x64xf32>
    %289 = arith.addf %282, %288 : vector<16x16x64xf32>
    %290 = vector.extract_strided_slice %248 {offsets = [2, 0, 0], sizes = [16, 16, 64], strides = [1, 1, 1]} : vector<18x18x64xf32> to vector<16x16x64xf32>
    %291 = vector.extract_strided_slice %243 {offsets = [2, 0, 0], sizes = [1, 1, 64], strides = [1, 1, 1]} : vector<3x3x64xf32> to vector<1x1x64xf32>
    %292 = vector.shape_cast %291 : vector<1x1x64xf32> to vector<64xf32>
    %293 = vector.shape_cast %292 : vector<64xf32> to vector<1x1x64xf32>
    %294 = vector.broadcast %293 : vector<1x1x64xf32> to vector<16x16x64xf32>
    %295 = arith.mulf %290, %294 : vector<16x16x64xf32>
    %296 = arith.addf %289, %295 : vector<16x16x64xf32>
    %297 = vector.extract_strided_slice %248 {offsets = [2, 1, 0], sizes = [16, 16, 64], strides = [1, 1, 1]} : vector<18x18x64xf32> to vector<16x16x64xf32>
    %298 = vector.extract_strided_slice %243 {offsets = [2, 1, 0], sizes = [1, 1, 64], strides = [1, 1, 1]} : vector<3x3x64xf32> to vector<1x1x64xf32>
    %299 = vector.shape_cast %298 : vector<1x1x64xf32> to vector<64xf32>
    %300 = vector.shape_cast %299 : vector<64xf32> to vector<1x1x64xf32>
    %301 = vector.broadcast %300 : vector<1x1x64xf32> to vector<16x16x64xf32>
    %302 = arith.mulf %297, %301 : vector<16x16x64xf32>
    %303 = arith.addf %296, %302 : vector<16x16x64xf32>
    %304 = vector.extract_strided_slice %248 {offsets = [2, 2, 0], sizes = [16, 16, 64], strides = [1, 1, 1]} : vector<18x18x64xf32> to vector<16x16x64xf32>
    %305 = vector.extract_strided_slice %243 {offsets = [2, 2, 0], sizes = [1, 1, 64], strides = [1, 1, 1]} : vector<3x3x64xf32> to vector<1x1x64xf32>
    %306 = vector.shape_cast %305 : vector<1x1x64xf32> to vector<64xf32>
    %307 = vector.shape_cast %306 : vector<64xf32> to vector<1x1x64xf32>
    %308 = vector.broadcast %307 : vector<1x1x64xf32> to vector<16x16x64xf32>
    %309 = arith.mulf %304, %308 : vector<16x16x64xf32>
    %310 = arith.addf %303, %309 : vector<16x16x64xf32>
    %311 = vector.broadcast %244 : vector<1x1x64xf32> to vector<16x16x64xf32>
    %312 = arith.addf %310, %311 : vector<16x16x64xf32>
    %c0_67 = arith.constant 0 : index
    %c0_68 = arith.constant 0 : index
    %c0_69 = arith.constant 0 : index
    %313 = vector.load %arg18[%c0_67, %c0_68, %c0_69] : memref<3x3x8xf32, #tpu.memory_space<vmem>>, vector<3x3x8xf32>
    %c0_70 = arith.constant 0 : index
    %c0_71 = arith.constant 0 : index
    %c0_72 = arith.constant 0 : index
    %314 = vector.load %arg20[%c0_70, %c0_71, %c0_72] : memref<1x1x8xf32, #tpu.memory_space<vmem>>, vector<1x1x8xf32>
    %cst_73 = arith.constant 0.000000e+00 : f32
    %315 = vector.broadcast %cst_73 : f32 to vector<1x16x8xf32>
    %316 = tpu.concatenate %315, %27, %315 in 0 : vector<1x16x8xf32>, vector<16x16x8xf32>, vector<1x16x8xf32> -> vector<18x16x8xf32>
    %cst_74 = arith.constant 0.000000e+00 : f32
    %317 = vector.broadcast %cst_74 : f32 to vector<18x1x8xf32>
    %318 = tpu.concatenate %317, %316, %317 in 1 : vector<18x1x8xf32>, vector<18x16x8xf32>, vector<18x1x8xf32> -> vector<18x18x8xf32>
    %319 = vector.extract_strided_slice %318 {offsets = [0, 0, 0], sizes = [16, 16, 8], strides = [1, 1, 1]} : vector<18x18x8xf32> to vector<16x16x8xf32>
    %320 = vector.extract_strided_slice %313 {offsets = [0, 0, 0], sizes = [1, 1, 8], strides = [1, 1, 1]} : vector<3x3x8xf32> to vector<1x1x8xf32>
    %321 = vector.shape_cast %320 : vector<1x1x8xf32> to vector<8xf32>
    %322 = vector.shape_cast %321 : vector<8xf32> to vector<1x1x8xf32>
    %323 = vector.broadcast %322 : vector<1x1x8xf32> to vector<16x16x8xf32>
    %324 = arith.mulf %319, %323 : vector<16x16x8xf32>
    %325 = vector.extract_strided_slice %318 {offsets = [0, 1, 0], sizes = [16, 16, 8], strides = [1, 1, 1]} : vector<18x18x8xf32> to vector<16x16x8xf32>
    %326 = vector.extract_strided_slice %313 {offsets = [0, 1, 0], sizes = [1, 1, 8], strides = [1, 1, 1]} : vector<3x3x8xf32> to vector<1x1x8xf32>
    %327 = vector.shape_cast %326 : vector<1x1x8xf32> to vector<8xf32>
    %328 = vector.shape_cast %327 : vector<8xf32> to vector<1x1x8xf32>
    %329 = vector.broadcast %328 : vector<1x1x8xf32> to vector<16x16x8xf32>
    %330 = arith.mulf %325, %329 : vector<16x16x8xf32>
    %331 = arith.addf %324, %330 : vector<16x16x8xf32>
    %332 = vector.extract_strided_slice %318 {offsets = [0, 2, 0], sizes = [16, 16, 8], strides = [1, 1, 1]} : vector<18x18x8xf32> to vector<16x16x8xf32>
    %333 = vector.extract_strided_slice %313 {offsets = [0, 2, 0], sizes = [1, 1, 8], strides = [1, 1, 1]} : vector<3x3x8xf32> to vector<1x1x8xf32>
    %334 = vector.shape_cast %333 : vector<1x1x8xf32> to vector<8xf32>
    %335 = vector.shape_cast %334 : vector<8xf32> to vector<1x1x8xf32>
    %336 = vector.broadcast %335 : vector<1x1x8xf32> to vector<16x16x8xf32>
    %337 = arith.mulf %332, %336 : vector<16x16x8xf32>
    %338 = arith.addf %331, %337 : vector<16x16x8xf32>
    %339 = vector.extract_strided_slice %318 {offsets = [1, 0, 0], sizes = [16, 16, 8], strides = [1, 1, 1]} : vector<18x18x8xf32> to vector<16x16x8xf32>
    %340 = vector.extract_strided_slice %313 {offsets = [1, 0, 0], sizes = [1, 1, 8], strides = [1, 1, 1]} : vector<3x3x8xf32> to vector<1x1x8xf32>
    %341 = vector.shape_cast %340 : vector<1x1x8xf32> to vector<8xf32>
    %342 = vector.shape_cast %341 : vector<8xf32> to vector<1x1x8xf32>
    %343 = vector.broadcast %342 : vector<1x1x8xf32> to vector<16x16x8xf32>
    %344 = arith.mulf %339, %343 : vector<16x16x8xf32>
    %345 = arith.addf %338, %344 : vector<16x16x8xf32>
    %346 = vector.extract_strided_slice %318 {offsets = [1, 1, 0], sizes = [16, 16, 8], strides = [1, 1, 1]} : vector<18x18x8xf32> to vector<16x16x8xf32>
    %347 = vector.extract_strided_slice %313 {offsets = [1, 1, 0], sizes = [1, 1, 8], strides = [1, 1, 1]} : vector<3x3x8xf32> to vector<1x1x8xf32>
    %348 = vector.shape_cast %347 : vector<1x1x8xf32> to vector<8xf32>
    %349 = vector.shape_cast %348 : vector<8xf32> to vector<1x1x8xf32>
    %350 = vector.broadcast %349 : vector<1x1x8xf32> to vector<16x16x8xf32>
    %351 = arith.mulf %346, %350 : vector<16x16x8xf32>
    %352 = arith.addf %345, %351 : vector<16x16x8xf32>
    %353 = vector.extract_strided_slice %318 {offsets = [1, 2, 0], sizes = [16, 16, 8], strides = [1, 1, 1]} : vector<18x18x8xf32> to vector<16x16x8xf32>
    %354 = vector.extract_strided_slice %313 {offsets = [1, 2, 0], sizes = [1, 1, 8], strides = [1, 1, 1]} : vector<3x3x8xf32> to vector<1x1x8xf32>
    %355 = vector.shape_cast %354 : vector<1x1x8xf32> to vector<8xf32>
    %356 = vector.shape_cast %355 : vector<8xf32> to vector<1x1x8xf32>
    %357 = vector.broadcast %356 : vector<1x1x8xf32> to vector<16x16x8xf32>
    %358 = arith.mulf %353, %357 : vector<16x16x8xf32>
    %359 = arith.addf %352, %358 : vector<16x16x8xf32>
    %360 = vector.extract_strided_slice %318 {offsets = [2, 0, 0], sizes = [16, 16, 8], strides = [1, 1, 1]} : vector<18x18x8xf32> to vector<16x16x8xf32>
    %361 = vector.extract_strided_slice %313 {offsets = [2, 0, 0], sizes = [1, 1, 8], strides = [1, 1, 1]} : vector<3x3x8xf32> to vector<1x1x8xf32>
    %362 = vector.shape_cast %361 : vector<1x1x8xf32> to vector<8xf32>
    %363 = vector.shape_cast %362 : vector<8xf32> to vector<1x1x8xf32>
    %364 = vector.broadcast %363 : vector<1x1x8xf32> to vector<16x16x8xf32>
    %365 = arith.mulf %360, %364 : vector<16x16x8xf32>
    %366 = arith.addf %359, %365 : vector<16x16x8xf32>
    %367 = vector.extract_strided_slice %318 {offsets = [2, 1, 0], sizes = [16, 16, 8], strides = [1, 1, 1]} : vector<18x18x8xf32> to vector<16x16x8xf32>
    %368 = vector.extract_strided_slice %313 {offsets = [2, 1, 0], sizes = [1, 1, 8], strides = [1, 1, 1]} : vector<3x3x8xf32> to vector<1x1x8xf32>
    %369 = vector.shape_cast %368 : vector<1x1x8xf32> to vector<8xf32>
    %370 = vector.shape_cast %369 : vector<8xf32> to vector<1x1x8xf32>
    %371 = vector.broadcast %370 : vector<1x1x8xf32> to vector<16x16x8xf32>
    %372 = arith.mulf %367, %371 : vector<16x16x8xf32>
    %373 = arith.addf %366, %372 : vector<16x16x8xf32>
    %374 = vector.extract_strided_slice %318 {offsets = [2, 2, 0], sizes = [16, 16, 8], strides = [1, 1, 1]} : vector<18x18x8xf32> to vector<16x16x8xf32>
    %375 = vector.extract_strided_slice %313 {offsets = [2, 2, 0], sizes = [1, 1, 8], strides = [1, 1, 1]} : vector<3x3x8xf32> to vector<1x1x8xf32>
    %376 = vector.shape_cast %375 : vector<1x1x8xf32> to vector<8xf32>
    %377 = vector.shape_cast %376 : vector<8xf32> to vector<1x1x8xf32>
    %378 = vector.broadcast %377 : vector<1x1x8xf32> to vector<16x16x8xf32>
    %379 = arith.mulf %374, %378 : vector<16x16x8xf32>
    %380 = arith.addf %373, %379 : vector<16x16x8xf32>
    %381 = vector.broadcast %314 : vector<1x1x8xf32> to vector<16x16x8xf32>
    %382 = arith.addf %380, %381 : vector<16x16x8xf32>
    %383 = vector.shape_cast %312 : vector<16x16x64xf32> to vector<256x64xf32>
    %c0_75 = arith.constant 0 : index
    %c0_76 = arith.constant 0 : index
    %384 = vector.load %arg21[%c0_75, %c0_76] : memref<64x64xf32, #tpu.memory_space<vmem>>, vector<64x64xf32>
    %cst_77 = arith.constant dense<0.000000e+00> : vector<256x64xf32>
    %385 = tpu.matmul %383, %384, %cst_77 {dimension_numbers = #tpu.dot_dimension_numbers<[1], [0], [0], [1], [0, 0, 1, 1], [], []>} : vector<256x64xf32>, vector<64x64xf32>, vector<256x64xf32> -> vector<256x64xf32>
    %386 = vector.shape_cast %382 : vector<16x16x8xf32> to vector<256x8xf32>
    %c0_78 = arith.constant 0 : index
    %c0_79 = arith.constant 0 : index
    %387 = vector.load %arg22[%c0_78, %c0_79] : memref<8x64xf32, #tpu.memory_space<vmem>>, vector<8x64xf32>
    %cst_80 = arith.constant dense<0.000000e+00> : vector<256x64xf32>
    %388 = tpu.matmul %386, %387, %cst_80 {dimension_numbers = #tpu.dot_dimension_numbers<[1], [0], [0], [1], [0, 0, 1, 1], [], []>} : vector<256x8xf32>, vector<8x64xf32>, vector<256x64xf32> -> vector<256x64xf32>
    %389 = arith.addf %385, %388 : vector<256x64xf32>
    %c0_81 = arith.constant 0 : index
    %c0_82 = arith.constant 0 : index
    %390 = vector.load %arg23[%c0_81, %c0_82] : memref<1x64xf32, #tpu.memory_space<vmem>>, vector<1x64xf32>
    %391 = vector.broadcast %390 : vector<1x64xf32> to vector<256x64xf32>
    %392 = arith.addf %389, %391 : vector<256x64xf32>
    %cst_83 = arith.constant 0.000000e+00 : f32
    %393 = vector.broadcast %cst_83 : f32 to vector<256x64xf32>
    %394 = arith.maximumf %392, %393 : vector<256x64xf32>
    %c0_84 = arith.constant 0 : index
    %c0_85 = arith.constant 0 : index
    %395 = vector.load %arg24[%c0_84, %c0_85] : memref<64x128xf32, #tpu.memory_space<vmem>>, vector<64x128xf32>
    %cst_86 = arith.constant dense<0.000000e+00> : vector<256x128xf32>
    %396 = tpu.matmul %394, %395, %cst_86 {dimension_numbers = #tpu.dot_dimension_numbers<[1], [0], [0], [1], [0, 0, 1, 1], [], []>} : vector<256x64xf32>, vector<64x128xf32>, vector<256x128xf32> -> vector<256x128xf32>
    %c0_87 = arith.constant 0 : index
    %c0_88 = arith.constant 0 : index
    %397 = vector.load %arg25[%c0_87, %c0_88] : memref<1x128xf32, #tpu.memory_space<vmem>>, vector<1x128xf32>
    %398 = vector.broadcast %397 : vector<1x128xf32> to vector<256x128xf32>
    %399 = arith.addf %396, %398 : vector<256x128xf32>
    %c0_89 = arith.constant 0 : index
    %c0_90 = arith.constant 0 : index
    %c0_91 = arith.constant 0 : index
    %400 = vector.load %arg26[%c0_89, %c0_90, %c0_91] : memref<1x256x128xf32, #tpu.memory_space<vmem>>, vector<1x256x128xf32>
    %401 = vector.shape_cast %400 : vector<1x256x128xf32> to vector<256x128xf32>
    %402 = vector.shape_cast %399 : vector<256x128xf32> to vector<1x256x128xf32>
    tpu.vector_store %arg26[%c0_89, %c0_90, %c0_91], %402 {strides = array<i32>} : memref<1x256x128xf32, #tpu.memory_space<vmem>>, vector<1x256x128xf32>,
    return
  }
  func.func @transform_0(%arg0: i32) -> (i32, i32, i32) {
    %c0_i32 = arith.constant 0 : i32
    %c0_i32_0 = arith.constant 0 : i32
    %c0_i32_1 = arith.constant 0 : i32
    return %arg0, %c0_i32, %c0_i32_0 : i32, i32, i32
  }
  func.func @transform_1(%arg0: i32) -> (i32, i32, i32) {
    %c0_i32 = arith.constant 0 : i32
    %c0_i32_0 = arith.constant 0 : i32
    %c0_i32_1 = arith.constant 0 : i32
    return %arg0, %c0_i32, %c0_i32_0 : i32, i32, i32
  }
  func.func @transform_2(%arg0: i32) -> (i32, i32, i32) {
    %c0_i32 = arith.constant 0 : i32
    %c0_i32_0 = arith.constant 0 : i32
    %c0_i32_1 = arith.constant 0 : i32
    return %arg0, %c0_i32, %c0_i32_0 : i32, i32, i32
  }
  func.func @transform_3(%arg0: i32) -> (i32, i32, i32) {
    %c0_i32 = arith.constant 0 : i32
    %c0_i32_0 = arith.constant 0 : i32
    %c0_i32_1 = arith.constant 0 : i32
    return %arg0, %c0_i32, %c0_i32_0 : i32, i32, i32
  }
  func.func @transform_4(%arg0: i32) -> (i32, i32) {
    %c0_i32 = arith.constant 0 : i32
    %c0_i32_0 = arith.constant 0 : i32
    %c0_i32_1 = arith.constant 0 : i32
    return %c0_i32, %c0_i32_0 : i32, i32
  }
  func.func @transform_5(%arg0: i32) -> (i32, i32) {
    %c0_i32 = arith.constant 0 : i32
    %c0_i32_0 = arith.constant 0 : i32
    %c0_i32_1 = arith.constant 0 : i32
    return %c0_i32, %c0_i32_0 : i32, i32
  }
  func.func @transform_6(%arg0: i32) -> (i32, i32) {
    %c0_i32 = arith.constant 0 : i32
    %c0_i32_0 = arith.constant 0 : i32
    %c0_i32_1 = arith.constant 0 : i32
    return %c0_i32, %c0_i32_0 : i32, i32
  }
  func.func @transform_7(%arg0: i32) -> (i32, i32) {
    %c0_i32 = arith.constant 0 : i32
    %c0_i32_0 = arith.constant 0 : i32
    %c0_i32_1 = arith.constant 0 : i32
    return %c0_i32, %c0_i32_0 : i32, i32
  }
  func.func @transform_8(%arg0: i32) -> (i32, i32) {
    %c0_i32 = arith.constant 0 : i32
    %c0_i32_0 = arith.constant 0 : i32
    %c0_i32_1 = arith.constant 0 : i32
    return %c0_i32, %c0_i32_0 : i32, i32
  }
  func.func @transform_9(%arg0: i32) -> (i32, i32) {
    %c0_i32 = arith.constant 0 : i32
    %c0_i32_0 = arith.constant 0 : i32
    %c0_i32_1 = arith.constant 0 : i32
    return %c0_i32, %c0_i32_0 : i32, i32
  }
  func.func @transform_10(%arg0: i32) -> (i32, i32) {
    %c0_i32 = arith.constant 0 : i32
    %c0_i32_0 = arith.constant 0 : i32
    %c0_i32_1 = arith.constant 0 : i32
    return %c0_i32, %c0_i32_0 : i32, i32
  }
  func.func @transform_11(%arg0: i32) -> (i32, i32) {
    %c0_i32 = arith.constant 0 : i32
    %c0_i32_0 = arith.constant 0 : i32
    %c0_i32_1 = arith.constant 0 : i32
    return %c0_i32, %c0_i32_0 : i32, i32
  }
  func.func @transform_12(%arg0: i32) -> (i32, i32) {
    %c0_i32 = arith.constant 0 : i32
    %c0_i32_0 = arith.constant 0 : i32
    %c0_i32_1 = arith.constant 0 : i32
    return %c0_i32, %c0_i32_0 : i32, i32
  }
  func.func @transform_13(%arg0: i32) -> (i32, i32) {
    %c0_i32 = arith.constant 0 : i32
    %c0_i32_0 = arith.constant 0 : i32
    %c0_i32_1 = arith.constant 0 : i32
    return %c0_i32, %c0_i32_0 : i32, i32
  }
  func.func @transform_14(%arg0: i32) -> (i32, i32, i32) {
    %c0_i32 = arith.constant 0 : i32
    %c0_i32_0 = arith.constant 0 : i32
    %c0_i32_1 = arith.constant 0 : i32
    %c0_i32_2 = arith.constant 0 : i32
    return %c0_i32, %c0_i32_0, %c0_i32_1 : i32, i32, i32
  }
  func.func @transform_15(%arg0: i32) -> (i32, i32, i32) {
    %c0_i32 = arith.constant 0 : i32
    %c0_i32_0 = arith.constant 0 : i32
    %c0_i32_1 = arith.constant 0 : i32
    %c0_i32_2 = arith.constant 0 : i32
    return %c0_i32, %c0_i32_0, %c0_i32_1 : i32, i32, i32
  }
  func.func @transform_16(%arg0: i32) -> (i32, i32, i32) {
    %c0_i32 = arith.constant 0 : i32
    %c0_i32_0 = arith.constant 0 : i32
    %c0_i32_1 = arith.constant 0 : i32
    %c0_i32_2 = arith.constant 0 : i32
    return %c0_i32, %c0_i32_0, %c0_i32_1 : i32, i32, i32
  }
  func.func @transform_17(%arg0: i32) -> (i32, i32, i32) {
    %c0_i32 = arith.constant 0 : i32
    %c0_i32_0 = arith.constant 0 : i32
    %c0_i32_1 = arith.constant 0 : i32
    %c0_i32_2 = arith.constant 0 : i32
    return %c0_i32, %c0_i32_0, %c0_i32_1 : i32, i32, i32
  }
  func.func @transform_18(%arg0: i32) -> (i32, i32, i32) {
    %c0_i32 = arith.constant 0 : i32
    %c0_i32_0 = arith.constant 0 : i32
    %c0_i32_1 = arith.constant 0 : i32
    %c0_i32_2 = arith.constant 0 : i32
    return %c0_i32, %c0_i32_0, %c0_i32_1 : i32, i32, i32
  }
  func.func @transform_19(%arg0: i32) -> (i32, i32, i32) {
    %c0_i32 = arith.constant 0 : i32
    %c0_i32_0 = arith.constant 0 : i32
    %c0_i32_1 = arith.constant 0 : i32
    %c0_i32_2 = arith.constant 0 : i32
    return %c0_i32, %c0_i32_0, %c0_i32_1 : i32, i32, i32
  }
  func.func @transform_20(%arg0: i32) -> (i32, i32) {
    %c0_i32 = arith.constant 0 : i32
    %c0_i32_0 = arith.constant 0 : i32
    %c0_i32_1 = arith.constant 0 : i32
    return %c0_i32, %c0_i32_0 : i32, i32
  }
  func.func @transform_21(%arg0: i32) -> (i32, i32) {
    %c0_i32 = arith.constant 0 : i32
    %c0_i32_0 = arith.constant 0 : i32
    %c0_i32_1 = arith.constant 0 : i32
    return %c0_i32, %c0_i32_0 : i32, i32
  }
  func.func @transform_22(%arg0: i32) -> (i32, i32) {
    %c0_i32 = arith.constant 0 : i32
    %c0_i32_0 = arith.constant 0 : i32
    %c0_i32_1 = arith.constant 0 : i32
    return %c0_i32, %c0_i32_0 : i32, i32
  }
  func.func @transform_23(%arg0: i32) -> (i32, i32) {
    %c0_i32 = arith.constant 0 : i32
    %c0_i32_0 = arith.constant 0 : i32
    %c0_i32_1 = arith.constant 0 : i32
    return %c0_i32, %c0_i32_0 : i32, i32
  }
  func.func @transform_24(%arg0: i32) -> (i32, i32) {
    %c0_i32 = arith.constant 0 : i32
    %c0_i32_0 = arith.constant 0 : i32
    %c0_i32_1 = arith.constant 0 : i32
    return %c0_i32, %c0_i32_0 : i32, i32
  }
  func.func @transform_25(%arg0: i32) -> (i32, i32, i32) {
    %c0_i32 = arith.constant 0 : i32
    %c0_i32_0 = arith.constant 0 : i32
    %c0_i32_1 = arith.constant 0 : i32
    return %arg0, %c0_i32, %c0_i32_0 : i32, i32, i32
  }
}

</mosaic_0001>

<bundles_post_ra>
// kernel: tpu_custom_call.1
= control target key start
LH: loop header
LB: loop body
LE: loop exit
PB: predicated region body
PF: predicated region fallthrough
CT: control target
= control target key end

     0   :  { %s16316_s0 = inlined_call_operand.vmem [shape: f32[2,4,48], index: 0, kind: input, shape index: {}]   ;;  %s16317_s1 = inlined_call_operand.vmem [shape: f32[2,16,32], index: 1, kind: input, shape index: {}]   ;;  %s16318_s2 = inlined_call_operand.vmem [shape: f32[2,64,24], index: 2, kind: input, shape index: {}]   ;;  %s16319_s3 = inlined_call_operand.vmem [shape: f32[2,256,16], index: 3, kind: input, shape index: {}]   ;;  %s16320_s4 = inlined_call_operand.vmem [shape: f32[48,64], index: 4, kind: input, shape index: {}]   ;;  %s16321_s5 = inlined_call_operand.vmem [shape: f32[32,64], index: 5, kind: input, shape index: {}]   ;;  %s16322_s6 = inlined_call_operand.vmem [shape: f32[24,64], index: 6, kind: input, shape index: {}]   ;;  %s16323_s7 = inlined_call_operand.vmem [shape: f32[16,8], index: 7, kind: input, shape index: {}]   ;;  %s16324_s8 = inlined_call_operand.vmem [shape: f32[4,2], index: 8, kind: input, shape index: {}]   ;;  %s16325_s9 = inlined_call_operand.vmem [shape: f32[4,2], index: 9, kind: input, shape index: {}]   ;;  %s16326_s10 = inlined_call_operand.vmem [shape: f32[8,4], index: 10, kind: input, shape index: {}]   ;;  %s16327_s11 = inlined_call_operand.vmem [shape: f32[8,4], index: 11, kind: input, shape index: {}]   ;;  %s16328_s12 = inlined_call_operand.vmem [shape: f32[16,8], index: 12, kind: input, shape index: {}]   ;;  %s16329_s13 = inlined_call_operand.vmem [shape: f32[16,8], index: 13, kind: input, shape index: {}]   ;;  %s16330_s14 = inlined_call_operand.vmem [shape: f32[3,3,64], index: 14, kind: input, shape index: {}]   ;;  %s16331_s15 = inlined_call_operand.vmem [shape: f32[3,3,64], index: 15, kind: input, shape index: {}]   ;;  %s16332_s16 = inlined_call_operand.vmem [shape: f32[3,3,64], index: 16, kind: input, shape index: {}]   ;;  %s16333_s17 = inlined_call_operand.vmem [shape: f32[3,3,8], index: 17, kind: input, shape index: {}]   ;;  %s16334_s18 = inlined_call_operand.vmem [shape: f32[1,1,64], index: 18, kind: input, shape index: {}]   ;;  %s16335_s19 = inlined_call_operand.vmem [shape: f32[1,1,8], index: 19, kind: input, shape index: {}]   ;;  %s16336_s20 = inlined_call_operand.vmem [shape: f32[64,64], index: 20, kind: input, shape index: {}]   ;;  %s16337_s21 = inlined_call_operand.vmem [shape: f32[8,64], index: 21, kind: input, shape index: {}]   ;;  %s16338_s22 = inlined_call_operand.vmem [shape: f32[1,64], index: 22, kind: input, shape index: {}]   ;;  %s16339_s23 = inlined_call_operand.vmem [shape: f32[64,128], index: 23, kind: input, shape index: {}]   ;;  %s16340_s24 = inlined_call_operand.vmem [shape: f32[1,128], index: 24, kind: input, shape index: {}]   ;;  %s16341_s25 = inlined_call_operand.hbm [shape: f32[2,256,128], index: 25, kind: output, shape index: {}]  }
   0x1   :  { %16756 = sst [smem:[#allocation214_spill]] %s16316_s0 }
   0x2   :  { %16757 = sst [smem:[#allocation215_spill]] %s16317_s1 }
   0x3   :  { %16758 = sst [smem:[#allocation216_spill]] %s16318_s2 }
   0x4   :  { %16759 = sst [smem:[#allocation217_spill]] %s16319_s3 }
   0x5   :  { %16760 = sst [smem:[#allocation218_spill]] %s16320_s4 }
   0x6   :  { %16761 = sst [smem:[#allocation219_spill]] %s16321_s5 }
   0x7   :  { %16762 = sst [smem:[#allocation220_spill]] %s16322_s6 }
   0x8   :  { %16763 = sst [smem:[#allocation221_spill]] %s16323_s7 }
   0x9   :  { %16764 = sst [smem:[#allocation222_spill]] %s16325_s9 }
   0xa   :  { %16765 = sst [smem:[#allocation223_spill]] %s16341_s25 }
   0xb   :  { %30 = vsyncpa [#allocation3], 0 }
   0xc   :  { %32 = vsyncpa [#allocation3 + $0x1], 0  ;;  %s10568_s5 = smov 0   ;;  %s10570_s10 = smov 0  }
   0xd   :  { %s10572_s0 = smov 0   ;;  %s10574_s29 = smov 0  }
   0xe LB: > { %16766 = sst [smem:[#allocation5_spill]] %s10417_s5  ;;  %s10589_s6 = sadd.s32 4294967295, %s10429_s29   ;;  %s10429_s29 = sphi %s10574_s29, %s18027_s29   ;;  %s10425_s0 = sphi %s10572_s0, %s18029_s0   ;;  %s10421_s10 = sphi %s10570_s10, %s18031_s10   ;;  %s10417_s5 = sphi %s10568_s5, %s18030_s5  }
   0xf   : > { %16767 = sst [smem:[#allocation6_spill]] %s10425_s0  ;;  %s9352_s12 = sadd.s32 4294967294, %s10429_s29  }
  0x10   : > { %16768 = sst [smem:[#allocation7_spill]] %s10429_s29  ;;  %s10593_s7 = sadd.s32 1, %s10429_s29  }
  0x11   : > { %16769 = sst [smem:[#allocation8_spill]] %s10593_s7  ;;  %s590_s2 = sadd.s32 1, %s10425_s0 }
  0x12   : > { %s587_s30 = ssub.s32 %s10429_s29, %s10593_s7  ;;  %p600_p0 = scmp.ne.s32.totalorder %s10425_s0, %s10421_s10 }
  0x13   : > { %p588_p1 = scmp.eq.s32.totalorder %s587_s30, 0  ;;  %p601_p2 = scmp.eq.s32.totalorder %s10589_s6, 1 }
  0x14   : > { %p606_p3 = scmp.ne.s32.totalorder %s10421_s10, %s10417_s5  ;;  %p607_p4 = scmp.eq.s32.totalorder %s9352_s12, 1 }
  0x15   : > { %s10604_s3 = scalar_select %p588_p1, %s10425_s0, %s590_s2  }
  0x16   : > { %p10606_p5 = por %p601_p2, %p600_p0  ;;  %p10610_p6 = por %p607_p4, %p606_p3 }
  0x17   : > { %16770 = sst [smem:[#allocation9_spill]] %s10604_s3  ;;  %p9355_p7 = scmp.ge.s32.totalorder %s10429_s29, 1 }
  0x18   : > { %s16771_s26 = scalar_select %p10606_p5, 1, 0 }
  0x19   : > { %s16773_s1 = scalar_select %p10610_p6, 1, 0 }
  0x1a   : > { %16772 = sst [smem:[#allocation10_spill]] %s16771_s26  ;;  %p719_p8 = scmp.lt.s32.totalorder %s10429_s29, 3 }
  0x1b   : > { %16774 = sst [smem:[#allocation11_spill]] %s16773_s1 }
  0x1c   : > { %p720_p9 = pnand %p9355_p7, %p719_p8 }
  0x1e   : > { %723 = sbr.rel (%p720_p9) target bundleno = 1807 (0x70f), region = 120 }
  0x25   : > { %s16775_s9 = sld [smem:[#allocation218_spill]]  ;;  %v10431_v3 = vmov 0.0|0.0   ;;  %vm10432_vm0 = vmmov 0   ;;  %v16356_v6 = vmov 0.0   ;;  %p801_p10 = scmp.lt.s32.totalorder %s10589_s6, 1  ;;  %vm827_vm1 = vcmask 392192  }
  0x26   : > { %10229 = vmatprep.subr.bf16.mxu0 %v10431_v3  ;;  %9827 = vmatprep.mubr.msk.f32.mxu0 %vm10432_vm0, %v16356_v6  ;;  %s16776_s4 = sld [smem:[#allocation219_spill]]  ;;  %s16777_s29 = sld [smem:[#allocation221_spill]]  ;;  %vm1192_vm2 = vcmask 130048   ;;  %vm919_vm3 = vcmask 261120   ;;  %vm1020_vm4 = vcmask 195584   ;;  %vm1870_vm5 = vcmask 1040384  }
  0x27   : > { %s10635_s28 = scalar_select %p801_p10, %s10589_s6, 1  ;;  %vm2760_vm6 = vcmask 1046528   ;;  %vm1559_vm7 = vcmask 1041408   ;;  %vm2837_vm8 = vcmask 1045504   ;;  %vm1555_vm9 = vcmask 15360  }
  0x28   : > { %s16779_s8 = sld [smem:[#allocation220_spill]]  ;;  %s16780_s12 = sld [smem:[#allocation214_spill]]  ;;  %vm1876_vm10 = vcmask 1044480   ;;  %vm2083_vm11 = vcmask 1043456   ;;  %vm2079_vm12 = vcmask 31744   ;;  %vm3264_vm13 = vcmask 64512  }
  0x29   : > { %s9357_s3 = sshll.u32 %s10635_s28, 2  ;;  %s9570_s5 = sshll.u32 %s10635_s28, 8  ;;  %vm8479_vm14 = vcmask 523264  }
  0x2a   : > { %s16781_s0 = sld [smem:[#allocation217_spill]]  ;;  %s9568_s26 = sshll.u32 %s10635_s28, 4 }
  0x2b   : > { %v821_v0 = vld [vmem:[%s16775_s9] sm:$0xff]  ;;  %v822_v1 = vld [vmem:[%s16775_s9 + $0x8] sm:$0xff]  ;;  %v823_v2 = vld [vmem:[%s16775_s9 + $0x10] sm:$0xff]  ;;  %s9569_s27 = sshll.u32 %s10635_s28, 6  ;;  %s16782_s1 = sld [smem:[#allocation215_spill]] }
  0x2c   : > { %v10230_v4 = vpack.c.bf16 %v822_v1, %v821_v0  ;;  %v824_v5 = vld [vmem:[%s16775_s9 + $0x18] sm:$0xff]  ;;  %v915_v7 = vld [vmem:[%s16776_s4] sm:$0xff]  ;;  %v916_v9 = vld [vmem:[%s16776_s4 + $0x8] sm:$0xff]  ;;  %s16778_s25 = smov %s16777_s29  ;;  %s16783_s30 = sld [smem:[#allocation216_spill]] }
  0x2d   : > { %v10233_v8 = vpack.c.bf16 %v824_v5, %v823_v2  ;;  %v917_v10 = vld [vmem:[%s16776_s4 + $0x10] sm:$0xff]  ;;  %v918_v11 = vld [vmem:[%s16776_s4 + $0x18] sm:$0xff]  ;;  %v825_v12 = vld [vmem:[%s16775_s9 + $0x20] sm:$0xff]  ;;  %v10238_v15 = vpack.c.bf16 %v916_v9, %v915_v7 }
  0x2e   : > { %10231 = vmatpush3.bf16.msra.mxu0 %v10230_v4  ;;  %v826_v13 = vld [vmem:[%s16775_s9 + $0x28] sm:$0xff]  ;;  %v1190_v14 = vld [vmem:[%s16777_s29] sm:$0xff]  ;;  %v10242_v16 = vpack.c.bf16 %v918_v11, %v917_v10  ;;  %s804_s2 = scalar_lea.vmem %s16780_s12, %s9357_s3  ;;  %v1019_v29 = vld [vmem:[%s16779_s8 + $0x10] sm:$0xff] }
  0x2f   : > { %10232 = vmatprep.subr.bf16.mxu0 %v10431_v3  ;;  %v1191_v17 = vld [vmem:[%s16778_s25 + $0x8] sm:$0xff]  ;;  %v1017_v18 = vld [vmem:[%s16779_s8] sm:$0xff]  ;;  %10239 = vmatprep.subr.bf16.mxu1 %v10238_v15  ;;  %v10236_v20 = vpack.c.bf16 %v826_v13, %v825_v12  ;;  %v10434_v13 = vmov 1983009808  }
  0x30   : > { %v1018_v19 = vld [vmem:[%s16779_s8 + $0x8] sm:$0xff]  ;;  %10241 = vmatpush3.bf16.msra.mxu1 %v10238_v15  ;;  %v10250_v21 = vpack.c.bf16 %v1191_v17, %v1190_v14  ;;  %s10672_s7 = scalar_lea.vmem %s16781_s0, %s9570_s5  ;;  %v820_v23 = vld [vmem:[%s804_s2] sm:$0xf]  ;;  %v904_v14 = vunpack.c.l.s4 %v10434_v13  ;;  %s798_s2 = sand.u32 1, %s10421_s10  }
  0x31   : > { %10243 = vmatprep.subr.bf16.mxu1 %v10242_v16  ;;  %v10246_v22 = vpack.c.bf16 %v1018_v19, %v1017_v18  ;;  %v1158_v24 = vld [vmem:[%s10672_s7] sm:$0xff]  ;;  %s809_s12 = scalar_lea.vmem %s16782_s1, %s9568_s26  ;;  %v1159_v25 = vld [vmem:[%s10672_s7 + $0x8] sm:$0xff]  ;;  %v1160_v28 = vld [vmem:[%s10672_s7 + $0x10] sm:$0xff]  ;;  %s9571_s1 = sshll.u32 %s10589_s6, 12 }
  0x32   : > { %10234 = vmatpush3.bf16.msra.mxu0 %v10233_v8  ;;  %s10683_s0 = scalar_lea.vmem %s16783_s30, %s9569_s27  ;;  %v913_v26 = vld [vmem:[%s809_s12] sm:$0xff]  ;;  %v914_v27 = vld [vmem:[%s809_s12 + $0x8] sm:$0xff]  ;;  %v1161_v31 = vld [vmem:[%s10672_s7 + $0x18] sm:$0xff]  ;;  %v10779_v8 = vrot.slane %v16356_v6, 7  ;;  %s16790_s12 = sld [smem:[#allocation222_spill]] }
  0x33   : > { %10235 = vmatprep.subr.bf16.mxu0 %v10431_v3  ;;  %9838 = vmatprep.mubr.msk.f32.mxu1 %vm919_vm3, %v913_v26  ;;  %v1009_v30 = vld [vmem:[%s10683_s0] sm:$0xff]  ;;  %v1010_v33 = vld [vmem:[%s10683_s0 + $0x8] sm:$0xff]  ;;  %v1011_v34 = vld [vmem:[%s10683_s0 + $0x10] sm:$0xff]  ;;  %v906_v3 = vlaneseq  ;;  %s18023_s30 = sld [smem:[#allocation223_spill]]  ;;  %s16275_s6 = scalar_lea.sflag [#allocation3], %s798_s2 }
  0x34   : > { %10245 = vmatpush3.bf16.msra.mxu1 %v10242_v16  ;;  %v1162_v32 = vld [vmem:[%s10672_s7 + $0x20] sm:$0xff]  ;;  %v1163_v35 = vld [vmem:[%s10672_s7 + $0x28] sm:$0xff]  ;;  %v1164_v36 = vld [vmem:[%s10672_s7 + $0x30] sm:$0xff]  ;;  %16785 = vst [vmem:[#allocation13_spill] sm:$0xff] %v10779_v8  ;;  %v10788_v11 = vsel %vm1870_vm5, 0.0, %v10779_v8  ;;  %v10792_v12 = vsel %vm1870_vm5, %v10779_v8, 0.0 }
  0x35   : > { %10247 = vmatprep.subr.bf16.mxu1 %v10246_v22  ;;  %v1165_v37 = vld [vmem:[%s10672_s7 + $0x38] sm:$0xff]  ;;  %v1166_v38 = vld [vmem:[%s10672_s7 + $0x40] sm:$0xff]  ;;  %v1167_v39 = vld [vmem:[%s10672_s7 + $0x48] sm:$0xff]  ;;  %v907_v4 = vshrl.u32 %v906_v3, 7  ;;  %16787 = vst [vmem:[#allocation15_spill] sm:$0xff] %v10788_v11 }
  0x36   : > { %10237 = vmatpush3.bf16.msra.mxu0 %v10236_v20  ;;  %v1168_v40 = vld [vmem:[%s10672_s7 + $0x50] sm:$0xff]  ;;  %v1169_v41 = vld [vmem:[%s10672_s7 + $0x58] sm:$0xff]  ;;  %v1170_v42 = vld [vmem:[%s10672_s7 + $0x60] sm:$0xff]  ;;  %16788 = vst [vmem:[#allocation16_spill] sm:$0xff] %v10792_v12  ;;  %v905_v20 = vunpack.c.0.s8 %v904_v14 }
  0x37   : > { %10251 = vmatprep.subr.bf16.mxu0 %v10250_v21  ;;  %9839 = vmatmul.mubr.msk.f32.vlgmr.msra.gmra.mrb[0].mxu1 %vm919_vm3, %v914_v27  ;;  %v1171_v43 = vld [vmem:[%s10672_s7 + $0x68] sm:$0xff]  ;;  %v1172_v44 = vld [vmem:[%s10672_s7 + $0x70] sm:$0xff]  ;;  %v1173_v45 = vld [vmem:[%s10672_s7 + $0x78] sm:$0xff]  ;;  %v10773_v5 = vsub.s32 1, %v907_v4  ;;  %v10784_v10 = vsub.s32 2, %v907_v4  ;;  %v10794_v15 = vsub.s32 0, %v907_v4 }
  0x38   : > { %10249 = vmatpush3.bf16.msra.mxu1 %v10246_v22  ;;  %9847 = vmatprep.mubr.msk.f32.mxu1 %vm1020_vm4, %v1009_v30  ;;  %v1174_v46 = vld [vmem:[%s10672_s7 + $0x80] sm:$0xff]  ;;  %v1175_v47 = vld [vmem:[%s10672_s7 + $0x88] sm:$0xff]  ;;  %v1176_v48 = vld [vmem:[%s10672_s7 + $0x90] sm:$0xff] }
  0x39   : > { %9828 = vmatmul.mubr.msk.f32.vlgmr.msra.gmra.mrb[0].mxu0 %vm827_vm1, %v820_v23  ;;  %9845 = vmatprep.subr.mxu1 %v1019_v29  ;;  %v1177_v49 = vld [vmem:[%s10672_s7 + $0x98] sm:$0xff]  ;;  %v1178_v50 = vld [vmem:[%s10672_s7 + $0xa0] sm:$0xff]  ;;  %v1179_v51 = vld [vmem:[%s10672_s7 + $0xa8] sm:$0xff]  ;;  %16784 = vst [vmem:[#allocation12_spill] sm:$0xff] %v10773_v5 }
  0x3a   : > { %10253 = vmatpush3.bf16.msra.mxu0 %v10250_v21  ;;  %9863 = vmatprep.mubr.msk.f32.mxu0 %vm1192_vm2, %v1158_v24  ;;  %v1180_v52 = vld [vmem:[%s10672_s7 + $0xb0] sm:$0xff]  ;;  %v1181_v53 = vld [vmem:[%s10672_s7 + $0xb8] sm:$0xff]  ;;  %v1182_v54 = vld [vmem:[%s10672_s7 + $0xc0] sm:$0xff]  ;;  %16786 = vst [vmem:[#allocation14_spill] sm:$0xff] %v10784_v10 }
  0x3b   : > { %9911 = vmatprep.subr.mxu0 %v16356_v6  ;;  %v1183_v55 = vld [vmem:[%s10672_s7 + $0xc8] sm:$0xff]  ;;  %v1184_v56 = vld [vmem:[%s10672_s7 + $0xd0] sm:$0xff]  ;;  %v1185_v57 = vld [vmem:[%s10672_s7 + $0xd8] sm:$0xff]  ;;  %16789 = vst [vmem:[#allocation17_spill] sm:$0xff] %v10794_v15 }
  0x3c   : > { %9846 = vmatpush3.msra.mxu1 %v1019_v29  ;;  %v1186_v58 = vld [vmem:[%s10672_s7 + $0xe0] sm:$0xff]  ;;  %v1187_v59 = vld [vmem:[%s10672_s7 + $0xe8] sm:$0xff]  ;;  %v1012_v60 = vld [vmem:[%s10683_s0 + $0x18] sm:$0xff] }
  0x3d   : > { %9864 = vmatmul.mubr.msk.f32.vlgmr.msra.gmra.mrb[2].mxu0 %vm1192_vm2, %v1159_v25  ;;  %9848 = vmatmul.mubr.msk.f32.vlgmr.msra.gmra.mrb[2].mxu1 %vm1020_vm4, %v1010_v33  ;;  %v1188_v61 = vld [vmem:[%s10672_s7 + $0xf0] sm:$0xff]  ;;  %v1013_v62 = vld [vmem:[%s10683_s0 + $0x20] sm:$0xff]  ;;  %v1189_v63 = vld [vmem:[%s10672_s7 + $0xf8] sm:$0xff]  ;;  %s9356_s7 = sshll.u32 %s798_s2, 8 }
  0x3e   : > { %9866 = vmatprep.mubr.msk.f32.mxu0 %vm1192_vm2, %v1160_v28  ;;  %9850 = vmatprep.mubr.msk.f32.mxu1 %vm1020_vm4, %v1011_v34  ;;  %v1014_v0 = vld [vmem:[%s10683_s0 + $0x28] sm:$0xff]  ;;  %v1015_v1 = vld [vmem:[%s10683_s0 + $0x30] sm:$0xff]  ;;  %v1016_v2 = vld [vmem:[%s10683_s0 + $0x38] sm:$0xff]  ;;  %v908_v28 = vsub.s32 %v905_v20, %v907_v4  ;;  %s16200_s3 = scalar_lea.vmem [#allocation2], %s9356_s7  ;;  %s16266_s0 = scalar_lea.hbm %s18023_s30, %s9571_s1 }
  0x3f   : > { %9916 = vmatprep.subr.mxu1 %v16356_v6  ;;  %v6311_v7 = vld [vmem:[%s16333_s17] sm:$0x7]  ;;  %v6312_v33 = vld [vmem:[%s16333_s17 + $0x4] sm:$0x7]  ;;  %s10435_s7 = smov [#allocation2]  }
  0x40   : > { %v10782_v9 = vrot.slane %v6311_v7, %v10773_v5  ;;  %v10803_v19 = vrot.slane %v6311_v7, %v10784_v10  ;;  %v10806_v21 = vrot.slane %v6311_v7, %v10794_v15  ;;  %s10371_s26 = sshll.u32 %s10435_s7, 4  ;;  %s10372_s26 = int_to_ptr.vmem [resolvable:$false] %s10371_s26 }
  0x41   : > { %9867 = vmatmul.mubr.msk.f32.gmra.mrb[4].mxu0 %vm1192_vm2, %v1161_v31  ;;  %9851 = vmatmul.mubr.msk.f32.gmra.mrb[4].mxu1 %vm1020_vm4, %v1012_v60  ;;  %s10373_s27 = scalar_lea.vmem %s10372_s26, 8192 }
  0x42   : > { %9869 = vmatprep.mubr.msk.f32.mxu0 %vm1192_vm2, %v1162_v32  ;;  %9853 = vmatprep.mubr.msk.f32.mxu1 %vm1020_vm4, %v1013_v62  ;;  %v6515_v16 = vmul.f32 %v10782_v9, %v10788_v11  ;;  %v6516_v17 = vmul.f32 %v10782_v9, %v10779_v8  ;;  %v6517_v18 = vmul.f32 %v10782_v9, %v10792_v12 }
  0x43   : > { %v6759_v25 = vmul.f32 %v10803_v19, %v10788_v11  ;;  %v6760_v26 = vmul.f32 %v10803_v19, %v10779_v8  ;;  %v6761_v27 = vmul.f32 %v10803_v19, %v10792_v12  ;;  %v6479_v30 = vmul.f32 %v10806_v21, %v10788_v11 }
  0x44   : > { %v6611_v22 = vrot.slane %v6515_v16, 1  ;;  %v6612_v23 = vrot.slane %v6516_v17, 1  ;;  %v6614_v24 = vrot.slane %v6517_v18, 1  ;;  %v6480_v31 = vmul.f32 %v10806_v21, %v10779_v8 }
  0x45   : > { %9870 = vmatmul.mubr.msk.f32.gmra.mrb[6].mxu0 %vm1192_vm2, %v1163_v35  ;;  %9854 = vmatmul.mubr.msk.f32.gmra.mrb[6].mxu1 %vm1020_vm4, %v1014_v0 }
  0x46   : > { %9872 = vmatprep.mubr.msk.f32.mxu0 %vm1192_vm2, %v1164_v36  ;;  %9856 = vmatprep.mubr.msk.f32.mxu1 %vm1020_vm4, %v1015_v1  ;;  %v6613_v35 = vsel %vm2760_vm6, %v6611_v22, %v6612_v23  ;;  %v6615_v36 = vsel %vm2760_vm6, %v6612_v23, %v6614_v24 }
  0x49   : > { %9873 = vmatmul.mubr.msk.f32.gmra.mrb[8].mxu0 %vm1192_vm2, %v1165_v37  ;;  %9857 = vmatmul.mubr.msk.f32.gmra.mrb[8].mxu1 %vm1020_vm4, %v1016_v2  ;;  %v6855_v37 = vrot.slane %v6759_v25, 2 }
  0x4a   : > { %9875 = vmatprep.mubr.msk.f32.mxu0 %vm1192_vm2, %v1166_v38  ;;  %9918 = vmatprep.mubr.msk.f32.mxu1 %vm10432_vm0, %v16356_v6  ;;  %v6856_v38 = vrot.slane %v6760_v26, 2 }
  0x4d   : > { %9876 = vmatmul.mubr.msk.f32.gmra.mrb[10].mxu0 %vm1192_vm2, %v1167_v39  ;;  %v6858_v39 = vrot.slane %v6761_v27, 2 }
  0x4e   : > { %9878 = vmatprep.mubr.msk.f32.mxu0 %vm1192_vm2, %v1168_v40 }
  0x51   : > { %9879 = vmatmul.mubr.msk.f32.gmra.mrb[12].mxu0 %vm1192_vm2, %v1169_v41 }
  0x52   : > { %9881 = vmatprep.mubr.msk.f32.mxu0 %vm1192_vm2, %v1170_v42  ;;  %v10826_v42 = vrot.slane %v6312_v33, %v10773_v5 }
  0x55   : > { %9882 = vmatmul.mubr.msk.f32.gmra.mrb[14].mxu0 %vm1192_vm2, %v1171_v43 }
  0x56   : > { %9884 = vmatprep.mubr.msk.f32.mxu0 %vm1192_vm2, %v1172_v44  ;;  %v6723_v44 = vadd.f32 %v6613_v35, %v6479_v30 }
  0x59   : > { %9885 = vmatmul.mubr.msk.f32.gmra.mrb[16].mxu0 %vm1192_vm2, %v1173_v45  ;;  %v6724_v45 = vadd.f32 %v6615_v36, %v6480_v31 }
  0x5a   : > { %9887 = vmatprep.mubr.msk.f32.mxu0 %vm1192_vm2, %v1174_v46 }
  0x5d   : > { %9888 = vmatmul.mubr.msk.f32.gmra.mrb[18].mxu0 %vm1192_vm2, %v1175_v47 }
  0x5e   : > { %9890 = vmatprep.mubr.msk.f32.mxu0 %vm1192_vm2, %v1176_v48 }
  0x61   : > { %9891 = vmatmul.mubr.msk.f32.gmra.mrb[20].mxu0 %vm1192_vm2, %v1177_v49 }
  0x62   : > { %9893 = vmatprep.mubr.msk.f32.mxu0 %vm1192_vm2, %v1178_v50 }
  0x65   : > { %9894 = vmatmul.mubr.msk.f32.gmra.mrb[22].mxu0 %vm1192_vm2, %v1179_v51 }
  0x66   : > { %9896 = vmatprep.mubr.msk.f32.mxu0 %vm1192_vm2, %v1180_v52  ;;  %v10831_v52 = vrot.slane %v6312_v33, %v10784_v10 }
  0x69   : > { %9897 = vmatmul.mubr.msk.f32.gmra.mrb[24].mxu0 %vm1192_vm2, %v1181_v53 }
  0x6a   : > { %9899 = vmatprep.mubr.msk.f32.mxu0 %vm1192_vm2, %v1182_v54  ;;  %v6857_v54 = vsel %vm2837_vm8, %v6855_v37, %v6856_v38 }
  0x6b   : > { %v6967_v2 = vadd.f32 %v6857_v54, %v6723_v44 }
  0x6d   : > { %9900 = vmatmul.mubr.msk.f32.gmra.mrb[26].mxu0 %vm1192_vm2, %v1183_v55  ;;  %v6859_v55 = vsel %vm2837_vm8, %v6856_v38, %v6858_v39 }
  0x6e   : > { %9902 = vmatprep.mubr.msk.f32.mxu0 %vm1192_vm2, %v1184_v56  ;;  %v6968_v3 = vadd.f32 %v6859_v55, %v6724_v45 }
  0x71   : > { %9903 = vmatmul.mubr.msk.f32.gmra.mrb[28].mxu0 %vm1192_vm2, %v1185_v57 }
  0x72   : > { %9905 = vmatprep.mubr.msk.f32.mxu0 %vm1192_vm2, %v1186_v58 }
  0x75   : > { %9906 = vmatmul.mubr.msk.f32.gmra.mrb[30].mxu0 %vm1192_vm2, %v1187_v59  ;;  %v10838_v59 = vld [vmem:[%s16790_s12] sm:$0xf]  ;;  %s9254_s12 = sshll.u32 %s16200_s3, 4  ;;  %s16268_s12 = int_to_ptr.vmem [resolvable:$true] %s9254_s12 }
  0x76   : > { %9908 = vmatprep.mubr.msk.f32.mxu0 %vm1192_vm2, %v1188_v61  ;;  %v10841_v61 = vrot.slane %v6312_v33, %v10794_v15  ;;  %s10367_s28 = scalar_lea.vmem %s16268_s12, 4096  ;;  %p10374_p0 = scmp.lt.s32.totalorder %s16268_s12, %s10372_s26 }
  0x77   : > { %p10368_p11 = scmp.ne.s32.totalorder %s16268_s12, %s10367_s28  ;;  %p10375_p1 = scmp.lt.s32.totalorder %s10373_s27, %s10367_s28 }
  0x79   : > { %9909 = vmatmul.mubr.msk.f32.gmra.mrb[32].mxu0 %vm1192_vm2, %v1189_v63  ;;  %p10369_p12 = pnand %p10368_p11, %p10606_p5  ;;  %p10376_p2 = por %p10375_p1, %p10374_p0 }
  0x7a   : > { %9913 = vmatprep.mubr.msk.f32.mxu0 %vm10432_vm0, %v16356_v6 }
  0x7b   : > { %p10370_p13 = pneg %p10369_p12 }
  0x7d   : > { %p10377_p3 = pnand %p10376_p2, %p10370_p13 }
 0x10a   : > { %v10823_v41 = vpop.f32.mrb[0].mxu1 }
 0x10b   : > { %v10828_v46 = vpop.f32.mrb[1].mxu1 }
 0x10c   : > { %v897_v29 = vpop.f32.mrb[0].mxu0 }
 0x10d   : > { %v901_v32 = vmax.f32 %v897_v29, 0.0  ;;  %v9829_v34 = vpop.f32.mrb[1].mxu0 }
 0x10f   : > { %v909_v40 = vrot.slane %v901_v32, %v908_v28 }
 0x110   : > { %v9865_v43 = vpop.f32.mrb[2].mxu0  ;;  %v10847_v7 = vpop.f32.mrb[2].mxu1 }
 0x111   : > { %v910_v47 = vcombine.high %v909_v40, %v909_v40  ;;  %v1546_v48 = vmul.f32 0.25, %v909_v40  ;;  %v1547_v49 = vmul.f32 0.75, %v909_v40  ;;  %v1515_v50 = vmax.f32 %v9865_v43, 0.0  ;;  %v1355_v51 = vpop.f32.mrb[3].mxu0  ;;  %16791 = vst [vmem:[#allocation18_spill] sm:$0xff] %v10847_v7  ;;  %v10854_v18 = vpop.f32.mrb[3].mxu1 }
 0x112   : > { %v1514_v53 = vmax.f32 %v1355_v51, 0.0  ;;  %16792 = vst [vmem:[#allocation19_spill] sm:$0xff] %v10854_v18 }
 0x113   : > { %v1548_v56 = vmul.f32 0.75, %v910_v47  ;;  %v1549_v57 = vadd.f32 %v1547_v49, %v1546_v48  ;;  %v1551_v58 = vmul.f32 0.25, %v910_v47  ;;  %v6348_v60 = vrot.slane %v1515_v50, 7 }
 0x114   : > { %v6347_v62 = vrot.slane %v1514_v53, 7  ;;  %v9868_v63 = vpop.f32.mrb[4].mxu0 }
 0x115   : > { %v1552_v0 = vadd.f32 %v1551_v58, %v1547_v49  ;;  %9912 = vmatpush3.msk.msra.mxu0 %vm1559_vm7, %v1549_v57  ;;  %v6459_v1 = vsel %vm1870_vm5, %v6348_v60, 0.0  ;;  %v10845_v4 = vpop.f32.mrb[5].mxu0  ;;  %v1550_v13 = vadd.f32 %v1548_v56, %v1546_v48  ;;  %v1553_v20 = vadd.f32 %v1551_v58, %v1548_v56 }
 0x116   : > { %9914 = vmatmul.mubr.msk.f32.vlgmr.msra.gmra.mrb[34].mxu0 %vm1555_vm9, %v10838_v59  ;;  %v6520_v14 = vmul.f32 %v10782_v9, %v6459_v1  ;;  %v6764_v16 = vmul.f32 %v10803_v19, %v6459_v1  ;;  %v7073_v17 = vmul.f32 %v10826_v42, %v6459_v1  ;;  %v10858_v22 = vmul.f32 %v10831_v52, %v6459_v1 }
 0x117   : > { %9917 = vmatpush3.msk.msra.mxu1 %vm1559_vm7, %v1552_v0  ;;  %v6349_v23 = vsel %vm1870_vm5, %v6347_v62, %v6348_v60  ;;  %v10862_v24 = vsel %vm1870_vm5, 0.0, %v6347_v62  ;;  %v1517_v27 = vmax.f32 %v9868_v63, 0.0  ;;  %v1516_v28 = vmax.f32 %v10845_v4, 0.0 }
 0x118   : > { %9919 = vmatmul.mubr.msk.f32.vlgmr.msra.gmra.mrb[10].mxu1 %vm1555_vm9, %v10838_v59  ;;  %9921 = vmatprep.subr.mxu1 %v16356_v6  ;;  %v6619_v25 = vrot.slane %v6520_v14, 1  ;;  %v6863_v26 = vrot.slane %v6764_v16, 2  ;;  %v9871_v29 = vpop.f32.mrb[6].mxu0  ;;  %v7170_v30 = vrot.slane %v7073_v17, 1  ;;  %v6481_v31 = vmul.f32 %v10806_v21, %v10862_v24 }
 0x119   : > { %9922 = vmatpush3.msk.msra.mxu1 %vm1559_vm7, %v1550_v13  ;;  %9923 = vmatprep.mubr.msk.f32.mxu1 %vm10432_vm0, %v16356_v6  ;;  %v6482_v32 = vmul.f32 %v10806_v21, %v6349_v23  ;;  %v6518_v33 = vmul.f32 %v10782_v9, %v10862_v24  ;;  %v1375_v34 = vpop.f32.mrb[7].mxu0  ;;  %v6519_v35 = vmul.f32 %v10782_v9, %v6349_v23  ;;  %v6351_v55 = vrot.slane %v1517_v27, 7 }
 0x11a   : > { %9926 = vmatprep.subr.mxu1 %v16356_v6  ;;  %v6762_v36 = vmul.f32 %v10803_v19, %v10862_v24  ;;  %v6763_v37 = vmul.f32 %v10803_v19, %v6349_v23  ;;  %v7003_v38 = vmul.f32 %v10841_v61, %v10862_v24  ;;  %v7004_v40 = vmul.f32 %v10841_v61, %v6349_v23 }
 0x11b   : > { %v6616_v39 = vrot.slane %v6518_v33, 1  ;;  %v7071_v43 = vmul.f32 %v10826_v42, %v10862_v24  ;;  %v7072_v44 = vmul.f32 %v10826_v42, %v6349_v23  ;;  %v6617_v45 = vrot.slane %v6519_v35, 1 }
 0x11c   : > { %9924 = vmatmul.mubr.msk.f32.vlgmr.msra.gmra.mrb[12].mxu1 %vm1555_vm9, %v10838_v59  ;;  %v6860_v47 = vrot.slane %v6762_v36, 2  ;;  %v6861_v48 = vrot.slane %v6763_v37, 2  ;;  %v7035_v49 = vadd.f32 %v7003_v38, %v6967_v2  ;;  %v9874_v50 = vpop.f32.mrb[8].mxu0  ;;  %v7036_v51 = vadd.f32 %v7004_v40, %v6968_v3  ;;  %v6313_v37 = vld [vmem:[%s16333_s17 + $0x8] sm:$0x7] }
 0x11d   : > { %9927 = vmatpush3.msk.msra.mxu1 %vm1559_vm7, %v1553_v20  ;;  %9928 = vmatprep.mubr.msk.f32.mxu1 %vm10432_vm0, %v16356_v6  ;;  %v7167_v53 = vrot.slane %v7071_v43, 1  ;;  %v7168_v54 = vrot.slane %v7072_v44, 1  ;;  %v1385_v56 = vpop.f32.mrb[9].mxu0  ;;  %v6618_v57 = vsel %vm2760_vm6, %v6616_v39, %v6617_v45  ;;  %v6620_v58 = vsel %vm2760_vm6, %v6617_v45, %v6619_v25 }
 0x11e   : > { %v6862_v60 = vsel %vm2837_vm8, %v6860_v47, %v6861_v48  ;;  %v6864_v62 = vsel %vm2837_vm8, %v6861_v48, %v6863_v26  ;;  %9931 = vmatprep.subr.mxu1 %v16356_v6  ;;  %v6725_v63 = vadd.f32 %v6618_v57, %v6481_v31  ;;  %v6726_v0 = vadd.f32 %v6620_v58, %v6482_v32 }
 0x11f   : > { %v7169_v1 = vsel %vm2760_vm6, %v7167_v53, %v7168_v54  ;;  %v7171_v2 = vsel %vm2760_vm6, %v7168_v54, %v7170_v30  ;;  %v7414_v3 = vrot.slane %v10858_v22, 2  ;;  %v10907_v14 = vmul.f32 %v10831_v52, %v6349_v23 }
 0x120   : > { %9929 = vmatmul.mubr.msk.f32.vlgmr.msra.gmra.mrb[14].mxu1 %vm1555_vm9, %v10838_v59  ;;  %v10902_v4 = vadd.f32 %v7169_v1, %v7035_v49  ;;  %v10904_v13 = vadd.f32 %v7171_v2, %v7036_v51  ;;  %v9877_v16 = vpop.f32.mrb[10].mxu0  ;;  %v10909_v17 = vadd.f32 %v6862_v60, %v6725_v63  ;;  %v10911_v20 = vadd.f32 %v6864_v62, %v6726_v0 }
 0x121   : > { %16795 = vst [vmem:[#allocation22_spill] sm:$0xff] %v10907_v14  ;;  %v6350_v25 = vrot.slane %v1516_v28, 7  ;;  %v1395_v26 = vpop.f32.mrb[11].mxu0  ;;  %9933 = vmatprep.mubr.msk.f32.mxu1 %vm10432_vm0, %v16356_v6  ;;  %v16358_v59 = vrot.slane %v10907_v14, 2  ;;  %v1519_v31 = vmax.f32 %v9871_v29, 0.0  ;;  %v1518_v28 = vmax.f32 %v1375_v34, 0.0 }
 0x122   : > { %16793 = vst [vmem:[#allocation20_spill] sm:$0xff] %v10902_v4  ;;  %16794 = vst [vmem:[#allocation21_spill] sm:$0xff] %v10904_v13  ;;  %v6460_v39 = vsel %vm1870_vm5, %v6351_v55, 0.0  ;;  %v1521_v40 = vmax.f32 %v9874_v50, 0.0  ;;  %v1520_v43 = vmax.f32 %v1385_v56, 0.0  ;;  %v10942_v29 = vrot.slane %v6313_v37, %v10773_v5 }
 0x123   : > { %16796 = vst [vmem:[#allocation23_spill] sm:$0xff] %v10909_v17  ;;  %16797 = vst [vmem:[#allocation24_spill] sm:$0xff] %v10911_v20  ;;  %v10917_v22 = vsel %vm1870_vm5, %v6350_v25, %v6351_v55  ;;  %v10922_v23 = vsel %vm2837_vm8, %v16358_v59, %v7414_v3  ;;  %v6354_v33 = vrot.slane %v1519_v31, 7  ;;  %v6353_v35 = vrot.slane %v1518_v28, 7 }
 0x124   : > { %16798 = vst [vmem:[#allocation25_spill] sm:$0xff] %v10917_v22  ;;  %16799 = vst [vmem:[#allocation26_spill] sm:$0xff] %v10922_v23  ;;  %v10924_v27 = vpop.f32.mrb[12].mxu0  ;;  %v10945_v34 = vrot.slane %v6313_v37, %v10784_v10  ;;  %v10951_v47 = vmul.f32 %v10831_v52, %v10862_v24  ;;  %v10954_v48 = vmul.f32 %v10782_v9, %v6460_v39  ;;  %v10966_v53 = vsel %vm1870_vm5, 0.0, %v6350_v25 }
 0x125   : > { %v10926_v30 = vpop.f32.mrb[13].mxu0  ;;  %v10936_v38 = vsel %vm1870_vm5, %v6353_v35, %v6354_v33  ;;  %16801 = vst [vmem:[#allocation28_spill] sm:$0xff] %v10942_v29  ;;  %v10957_v49 = vmul.f32 %v10803_v19, %v6460_v39  ;;  %v10960_v50 = vmul.f32 %v10826_v42, %v6460_v39  ;;  %v10963_v51 = vmul.f32 %v10831_v52, %v6460_v39 }
 0x126   : > { %16800 = vst [vmem:[#allocation27_spill] sm:$0xff] %v10936_v38  ;;  %16802 = vst [vmem:[#allocation29_spill] sm:$0xff] %v10945_v34  ;;  %v6357_v54 = vrot.slane %v1521_v40, 7  ;;  %v10968_v55 = vrot.slane %v1520_v43, 7  ;;  %v10973_v56 = vrot.slane %v6313_v37, %v10794_v15  ;;  %v10976_v57 = vmul.f32 %v10942_v29, %v6460_v39 }
 0x127   : > { %16803 = vst [vmem:[#allocation30_spill] sm:$0xff] %v10951_v47  ;;  %16804 = vst [vmem:[#allocation31_spill] sm:$0xff] %v10954_v48  ;;  %v10979_v58 = vmul.f32 %v10945_v34, %v6460_v39  ;;  %v1523_v63 = vmax.f32 %v9877_v16, 0.0  ;;  %v10985_v0 = vmax.f32 %v10823_v41, 0.0  ;;  %v10988_v1 = vmax.f32 %v10828_v46, 0.0 }
 0x128   : > { %v10928_v32 = vpop.f32.mrb[14].mxu0  ;;  %16805 = vst [vmem:[#allocation32_spill] sm:$0xff] %v10957_v49  ;;  %16806 = vst [vmem:[#allocation33_spill] sm:$0xff] %v10960_v50  ;;  %v10994_v25 = vmul.f32 %v10782_v9, %v10966_v53  ;;  %v1522_v31 = vmax.f32 %v1395_v26, 0.0  ;;  %v6461_v16 = vsel %vm1870_vm5, %v6354_v33, 0.0  ;;  %v11001_v41 = vsel %vm1870_vm5, %v10968_v55, %v6357_v54 }
 0x129   : > { %v10930_v36 = vpop.f32.mrb[15].mxu0  ;;  %16807 = vst [vmem:[#allocation34_spill] sm:$0xff] %v10963_v51  ;;  %16808 = vst [vmem:[#allocation35_spill] sm:$0xff] %v10966_v53  ;;  %v11009_v43 = vmul.f32 %v10782_v9, %v10917_v22  ;;  %v11013_v26 = vmul.f32 %v10803_v19, %v10966_v53  ;;  %v11019_v33 = vmul.f32 %v10806_v21, %v10966_v53  ;;  %v6360_v37 = vrot.slane %v1523_v63, 7 }
 0x12a   : > { %16809 = vst [vmem:[#allocation36_spill] sm:$0xff] %v10973_v56  ;;  %16810 = vst [vmem:[#allocation37_spill] sm:$0xff] %v10976_v57  ;;  %v11023_v3 = vmul.f32 %v10803_v19, %v10917_v22  ;;  %v11027_v2 = vmul.f32 %v10826_v42, %v10966_v53  ;;  %v11031_v40 = vmul.f32 %v10782_v9, %v6461_v16  ;;  %v11036_v62 = vrot.slane %v1522_v31, 7 }
 0x12b   : > { %16811 = vst [vmem:[#allocation38_spill] sm:$0xff] %v10979_v58  ;;  %16812 = vst [vmem:[#allocation39_spill] sm:$0xff] %v10985_v0  ;;  %v11034_v39 = vmul.f32 %v10803_v19, %v6461_v16  ;;  %v11039_v59 = vmul.f32 %v10826_v42, %v6461_v16  ;;  %v11042_v8 = vmul.f32 %v10831_v52, %v6461_v16  ;;  %v11048_v63 = vsel %vm1870_vm5, 0.0, %v6353_v35 }
 0x12c   : > { %v10939_v44 = vpop.f32.mrb[16].mxu0  ;;  %16813 = vst [vmem:[#allocation40_spill] sm:$0xff] %v10988_v1  ;;  %16814 = vst [vmem:[#allocation41_spill] sm:$0xff] %v10994_v25  ;;  %v11045_v7 = vmul.f32 %v10942_v29, %v6461_v16  ;;  %v11055_v31 = vmul.f32 %v10945_v34, %v6461_v16  ;;  %v1525_v49 = vmax.f32 %v10924_v27, 0.0  ;;  %v11063_v25 = vmul.f32 %v10806_v21, %v11048_v63 }
 0x12d   : > { %v10947_v45 = vpop.f32.mrb[17].mxu0  ;;  %16815 = vst [vmem:[#allocation42_spill] sm:$0xff] %v11001_v41  ;;  %16816 = vst [vmem:[#allocation43_spill] sm:$0xff] %v11009_v43  ;;  %v11067_v35 = vsel %vm1870_vm5, %v11036_v62, %v6360_v37  ;;  %v1524_v18 = vmax.f32 %v10926_v30, 0.0  ;;  %v11074_v27 = vmul.f32 %v10782_v9, %v11048_v63  ;;  %v11082_v43 = vmul.f32 %v10782_v9, %v10936_v38 }
 0x12e   : > { %16817 = vst [vmem:[#allocation44_spill] sm:$0xff] %v11013_v26  ;;  %16818 = vst [vmem:[#allocation45_spill] sm:$0xff] %v11019_v33  ;;  %v6462_v33 = vsel %vm1870_vm5, %v6357_v54, 0.0  ;;  %v11089_v12 = vmul.f32 %v10803_v19, %v11048_v63  ;;  %v11093_v54 = vmul.f32 %v10803_v19, %v10936_v38  ;;  %v6363_v26 = vrot.slane %v1525_v49, 7 }
 0x12f   : > { %16819 = vst [vmem:[#allocation46_spill] sm:$0xff] %v11023_v3  ;;  %16820 = vst [vmem:[#allocation47_spill] sm:$0xff] %v11027_v2  ;;  %v11098_v3 = vmul.f32 %v10782_v9, %v6462_v33  ;;  %v11106_v16 = vrot.slane %v1524_v18, 7  ;;  %v11113_v49 = vmul.f32 %v10942_v29, %v6462_v33  ;;  %v11122_v20 = vmul.f32 %v10826_v42, %v11048_v63 }
 0x130   : > { %v10970_v24 = vpop.f32.mrb[18].mxu0  ;;  %16821 = vst [vmem:[#allocation48_spill] sm:$0xff] %v11031_v40  ;;  %16822 = vst [vmem:[#allocation49_spill] sm:$0xff] %v11034_v39  ;;  %v11101_v39 = vmul.f32 %v10803_v19, %v6462_v33  ;;  %v11104_v40 = vmul.f32 %v10826_v42, %v6462_v33  ;;  %v11125_v18 = vmul.f32 %v10945_v34, %v6462_v33 }
 0x131   : > { %v10981_v60 = vpop.f32.mrb[19].mxu0  ;;  %16823 = vst [vmem:[#allocation50_spill] sm:$0xff] %v11039_v59  ;;  %16824 = vst [vmem:[#allocation51_spill] sm:$0xff] %v11042_v8  ;;  %v11110_v59 = vmul.f32 %v10831_v52, %v6462_v33  ;;  %v1527_v8 = vmax.f32 %v10928_v32, 0.0  ;;  %v11150_v50 = vmul.f32 %v10782_v9, %v11001_v41  ;;  %v1526_v33 = vmax.f32 %v10930_v36, 0.0 }
 0x132   : > { %16825 = vst [vmem:[#allocation52_spill] sm:$0xff] %v11045_v7  ;;  %16826 = vst [vmem:[#allocation53_spill] sm:$0xff] %v11048_v63  ;;  %v11135_v7 = vsel %vm1870_vm5, %v11106_v16, %v6363_v26  ;;  %v11194_v36 = vsel %vm1870_vm5, 0.0, %v11036_v62  ;;  %v6464_v63 = vsel %vm1870_vm5, %v6363_v26, 0.0  ;;  %v11240_v26 = vmul.f32 %v10803_v19, %v11067_v35 }
 0x133   : > { %16827 = vst [vmem:[#allocation54_spill] sm:$0xff] %v11055_v31  ;;  %16828 = vst [vmem:[#allocation55_spill] sm:$0xff] %v11063_v25  ;;  %v11117_v31 = vsel %vm1870_vm5, 0.0, %v10968_v55  ;;  %v6463_v55 = vsel %vm1870_vm5, %v6360_v37, 0.0  ;;  %v6366_v51 = vrot.slane %v1527_v8, 7  ;;  %v11215_v8 = vmul.f32 %v10782_v9, %v11067_v35 }
 0x134   : > { %v11003_v46 = vpop.f32.mrb[20].mxu0  ;;  %16829 = vst [vmem:[#allocation56_spill] sm:$0xff] %v11067_v35  ;;  %16830 = vst [vmem:[#allocation57_spill] sm:$0xff] %v11074_v27  ;;  %v11144_v38 = vmul.f32 %v10782_v9, %v11117_v31  ;;  %v11162_v32 = vmul.f32 %v10782_v9, %v6463_v55  ;;  %v11167_v37 = vmul.f32 %v10803_v19, %v6463_v55  ;;  %v11271_v35 = vsel %vm1870_vm5, 0.0, %v11106_v16 }
 0x135   : > { %v11015_v6 = vpop.f32.mrb[21].mxu0  ;;  %16831 = vst [vmem:[#allocation58_spill] sm:$0xff] %v11082_v43  ;;  %16832 = vst [vmem:[#allocation59_spill] sm:$0xff] %v11089_v12  ;;  %v11154_v12 = vmul.f32 %v10803_v19, %v11117_v31  ;;  %v11286_v16 = vmul.f32 %v10782_v9, %v11271_v35  ;;  %v11306_v17 = vmul.f32 %v10803_v19, %v11135_v7 }
 0x136   : > { %16833 = vst [vmem:[#allocation60_spill] sm:$0xff] %v11093_v54  ;;  %16834 = vst [vmem:[#allocation61_spill] sm:$0xff] %v11098_v3  ;;  %v11170_v3 = vmul.f32 %v10826_v42, %v6463_v55  ;;  %v11180_v54 = vmul.f32 %v10806_v21, %v11117_v31 }
 0x137   : > { %16835 = vst [vmem:[#allocation62_spill] sm:$0xff] %v11101_v39  ;;  %16836 = vst [vmem:[#allocation63_spill] sm:$0xff] %v11104_v40 }
 0x138   : > { %v11050_v28 = vpop.f32.mrb[22].mxu0  ;;  %16837 = vst [vmem:[#allocation64_spill] sm:$0xff] %v11110_v59  ;;  %16838 = vst [vmem:[#allocation65_spill] sm:$0xff] %v11113_v49  ;;  %v11173_v59 = vmul.f32 %v10831_v52, %v6463_v55  ;;  %v11188_v49 = vsel %vm1870_vm5, %v6366_v51, 0.0 }
 0x139   : > { %v11058_v48 = vpop.f32.mrb[23].mxu0  ;;  %16839 = vst [vmem:[#allocation66_spill] sm:$0xff] %v11117_v31  ;;  %16840 = vst [vmem:[#allocation67_spill] sm:$0xff] %v11122_v20  ;;  %v11159_v20 = vmul.f32 %v10803_v19, %v11001_v41 }
 0x13a   : > { %16841 = vst [vmem:[#allocation68_spill] sm:$0xff] %v11125_v18  ;;  %16842 = vst [vmem:[#allocation69_spill] sm:$0xff] %v11135_v7  ;;  %v11185_v18 = vmul.f32 %v10826_v42, %v11117_v31  ;;  %v6365_v31 = vrot.slane %v1526_v33, 7 }
 0x13b   : > { %16843 = vst [vmem:[#allocation70_spill] sm:$0xff] %v11144_v38  ;;  %16844 = vst [vmem:[#allocation71_spill] sm:$0xff] %v11150_v50  ;;  %v11200_v38 = vmul.f32 %v10942_v29, %v6463_v55  ;;  %v11211_v50 = vmul.f32 %v10782_v9, %v11194_v36 }
 0x13c   : > { %v11084_v30 = vpop.f32.mrb[24].mxu0  ;;  %16845 = vst [vmem:[#allocation72_spill] sm:$0xff] %v11154_v12  ;;  %16846 = vst [vmem:[#allocation73_spill] sm:$0xff] %v11159_v20  ;;  %v11222_v33 = vsel %vm1870_vm5, %v6365_v31, %v6366_v51  ;;  %v1529_v12 = vmax.f32 %v10939_v44, 0.0  ;;  %v11256_v20 = vmul.f32 %v10826_v42, %v6464_v63 }
 0x13d   : > { %v11095_v25 = vpop.f32.mrb[25].mxu0  ;;  %16847 = vst [vmem:[#allocation74_spill] sm:$0xff] %v11162_v32  ;;  %16848 = vst [vmem:[#allocation75_spill] sm:$0xff] %v11167_v37  ;;  %v11227_v62 = vmul.f32 %v10782_v9, %v11222_v33  ;;  %v6494_v51 = vmul.f32 %v10806_v21, %v11222_v33  ;;  %v1528_v37 = vmax.f32 %v10947_v45, 0.0  ;;  %v11264_v32 = vmul.f32 %v10831_v52, %v6464_v63 }
 0x13e   : > { %16849 = vst [vmem:[#allocation76_spill] sm:$0xff] %v11170_v3  ;;  %16850 = vst [vmem:[#allocation77_spill] sm:$0xff] %v11173_v59  ;;  %v11234_v59 = vmul.f32 %v10806_v21, %v11194_v36  ;;  %v11250_v3 = vmul.f32 %v10782_v9, %v6464_v63  ;;  %v6369_v45 = vrot.slane %v1529_v12, 7  ;;  %v1530_v12 = vmax.f32 %v10981_v60, 0.0 }
 0x13f   : > { %16851 = vst [vmem:[#allocation78_spill] sm:$0xff] %v11180_v54  ;;  %16852 = vst [vmem:[#allocation79_spill] sm:$0xff] %v11185_v18  ;;  %v6538_v54 = vmul.f32 %v10782_v9, %v11188_v49  ;;  %v11203_v18 = vmul.f32 %v10945_v34, %v6463_v55  ;;  %v11219_v55 = vmul.f32 %v10803_v19, %v11194_v36  ;;  %v16417_v44 = vrot.slane %v11227_v62, 1 }
 0x140   : > { %v11128_v27 = vpop.f32.mrb[26].mxu0  ;;  %16853 = vst [vmem:[#allocation80_spill] sm:$0xff] %v11194_v36  ;;  %16854 = vst [vmem:[#allocation81_spill] sm:$0xff] %v11200_v38  ;;  %v6368_v38 = vrot.slane %v1528_v37, 7  ;;  %v11318_v37 = vmul.f32 %v10806_v21, %v11271_v35  ;;  %v1537_v1 = vmax.f32 %v11084_v30, 0.0 }
 0x141   : > { %v11137_v43 = vpop.f32.mrb[27].mxu0  ;;  %16855 = vst [vmem:[#allocation82_spill] sm:$0xff] %v11203_v18  ;;  %16856 = vst [vmem:[#allocation83_spill] sm:$0xff] %v11211_v50  ;;  %v6649_v41 = vrot.slane %v6538_v54, 1  ;;  %v11244_v54 = vmul.f32 %v10826_v42, %v11194_v36  ;;  %v11267_v50 = vmul.f32 %v10942_v29, %v6464_v63  ;;  %v11276_v18 = vmul.f32 %v10945_v34, %v6464_v63 }
 0x142   : > { %16857 = vst [vmem:[#allocation84_spill] sm:$0xff] %v11215_v8  ;;  %16858 = vst [vmem:[#allocation85_spill] sm:$0xff] %v11219_v55  ;;  %v1531_v55 = vmax.f32 %v10970_v24, 0.0  ;;  %v11294_v24 = vmul.f32 %v10803_v19, %v11271_v35  ;;  %v11297_v60 = vsel %vm1870_vm5, %v6368_v38, %v6369_v45  ;;  %v11301_v8 = vrot.slane %v1530_v12, 7 }
 0x143   : > { %16859 = vst [vmem:[#allocation86_spill] sm:$0xff] %v11222_v33  ;;  %16860 = vst [vmem:[#allocation87_spill] sm:$0xff] %v11234_v59  ;;  %v11253_v59 = vmul.f32 %v10803_v19, %v6464_v63  ;;  %v11290_v63 = vmul.f32 %v10782_v9, %v11135_v7  ;;  %v11326_v12 = vmul.f32 %v10831_v52, %v11188_v49 }
 0x144   : > { %v11164_v39 = vpop.f32.mrb[28].mxu0  ;;  %16861 = vst [vmem:[#allocation88_spill] sm:$0xff] %v11240_v26  ;;  %16862 = vst [vmem:[#allocation89_spill] sm:$0xff] %v11244_v54  ;;  %v6650_v54 = vsel %vm2760_vm6, %v16417_v44, %v6649_v41  ;;  %v11310_v41 = vmul.f32 %v10803_v19, %v11188_v49  ;;  %v11330_v44 = vmul.f32 %v10942_v29, %v11188_v49  ;;  %v11470_v13 = vsel %vm1870_vm5, 0.0, %v11301_v8 }
 0x145   : > { %v11176_v40 = vpop.f32.mrb[29].mxu0  ;;  %16863 = vst [vmem:[#allocation90_spill] sm:$0xff] %v11250_v3  ;;  %16864 = vst [vmem:[#allocation91_spill] sm:$0xff] %v11253_v59  ;;  %v11273_v36 = vadd.f32 %v6650_v54, %v6494_v51  ;;  %v6372_v54 = vrot.slane %v1531_v55, 7  ;;  %v11314_v59 = vmul.f32 %v10826_v42, %v11188_v49  ;;  %v11322_v55 = vmul.f32 %v10826_v42, %v11271_v35 }
 0x146   : > { %16865 = vst [vmem:[#allocation92_spill] sm:$0xff] %v11256_v20  ;;  %16866 = vst [vmem:[#allocation93_spill] sm:$0xff] %v11264_v32  ;;  %v6466_v20 = vsel %vm1870_vm5, %v6369_v45, 0.0  ;;  %v11500_v4 = vmul.f32 %v10803_v19, %v11470_v13 }
 0x147   : > { %16867 = vst [vmem:[#allocation94_spill] sm:$0xff] %v11267_v50  ;;  %16868 = vst [vmem:[#allocation95_spill] sm:$0xff] %v11271_v35  ;;  %v11341_v26 = vsel %vm1870_vm5, %v11301_v8, %v6372_v54  ;;  %v1532_v50 = vmax.f32 %v11015_v6, 0.0  ;;  %v11367_v3 = vmul.f32 %v10782_v9, %v6466_v20  ;;  %v11373_v45 = vmul.f32 %v10826_v42, %v6466_v20  ;;  %v11412_v35 = vpop.f32.mrb[4].mxu1 }
 0x148   : > { %16869 = vst [vmem:[#allocation96_spill] sm:$0xff] %v11276_v18  ;;  %16870 = vst [vmem:[#allocation97_spill] sm:$0xff] %v11286_v16  ;;  %v1533_v18 = vmax.f32 %v11003_v46, 0.0  ;;  %v11364_v46 = vmul.f32 %v10803_v19, %v11222_v33  ;;  %v11379_v32 = vmul.f32 %v10942_v29, %v6466_v20  ;;  %v11402_v7 = vmul.f32 %v10945_v34, %v6466_v20  ;;  %v11472_v0 = vpop.f32.mrb[5].mxu1 }
 0x149   : > { %16871 = vst [vmem:[#allocation98_spill] sm:$0xff] %v11290_v63  ;;  %16872 = vst [vmem:[#allocation99_spill] sm:$0xff] %v11294_v24  ;;  %v11485_v8 = vmul.f32 %v10782_v9, %v11470_v13  ;;  %v11495_v58 = vmul.f32 %v10782_v9, %v11341_v26 }
 0x14a   : > { %16873 = vst [vmem:[#allocation100_spill] sm:$0xff] %v11297_v60  ;;  %16874 = vst [vmem:[#allocation101_spill] sm:$0xff] %v11306_v17  ;;  %v6375_v51 = vrot.slane %v1533_v18, 7 }
 0x14b   : > { %16875 = vst [vmem:[#allocation102_spill] sm:$0xff] %v11314_v59  ;;  %16876 = vst [vmem:[#allocation103_spill] sm:$0xff] %v11318_v37  ;;  %v11336_v37 = vsel %vm1870_vm5, 0.0, %v6365_v31  ;;  %v11350_v31 = vmul.f32 %v10945_v34, %v11188_v49  ;;  %v11370_v49 = vmul.f32 %v10803_v19, %v6466_v20  ;;  %v11383_v59 = vpop.f32.mrb[30].mxu0 }
 0x14c   : > { %16877 = vst [vmem:[#allocation104_spill] sm:$0xff] %v11322_v55  ;;  %16878 = vst [vmem:[#allocation105_spill] sm:$0xff] %v11326_v12  ;;  %v11356_v24 = vmul.f32 %v10782_v9, %v11336_v37  ;;  %v11360_v6 = vmul.f32 %v10803_v19, %v11336_v37  ;;  %v11376_v55 = vmul.f32 %v10831_v52, %v6466_v20  ;;  %v11381_v12 = vrot.slane %v1532_v50, 7  ;;  %v11397_v33 = vpop.f32.mrb[31].mxu0 }
 0x14d   : > { %16879 = vst [vmem:[#allocation106_spill] sm:$0xff] %v11330_v44  ;;  %16880 = vst [vmem:[#allocation107_spill] sm:$0xff] %v11336_v37  ;;  %v11388_v16 = vmul.f32 %v10806_v21, %v11336_v37  ;;  %v11392_v63 = vmul.f32 %v10826_v42, %v11336_v37  ;;  %v11395_v44 = vsel %vm1870_vm5, 0.0, %v6368_v38  ;;  %v6467_v37 = vsel %vm1870_vm5, %v6372_v54, 0.0 }
 0x14e   : > { %16881 = vst [vmem:[#allocation108_spill] sm:$0xff] %v11350_v31  ;;  %16882 = vst [vmem:[#allocation109_spill] sm:$0xff] %v11367_v3  ;;  %v11406_v17 = vsel %vm1870_vm5, %v11381_v12, %v6375_v51  ;;  %v11419_v2 = vmul.f32 %v10782_v9, %v11395_v44  ;;  %v11423_v31 = vmul.f32 %v10782_v9, %v11297_v60 }
 0x14f   : > { %16883 = vst [vmem:[#allocation110_spill] sm:$0xff] %v11370_v49  ;;  %16884 = vst [vmem:[#allocation111_spill] sm:$0xff] %v11379_v32  ;;  %v11427_v38 = vmul.f32 %v10803_v19, %v11395_v44  ;;  %v11431_v54 = vmul.f32 %v10803_v19, %v11297_v60  ;;  %v11436_v18 = vmul.f32 %v10782_v9, %v6467_v37  ;;  %v11444_v32 = vpop.f32.mrb[32].mxu0 }
 0x150   : > { %16885 = vst [vmem:[#allocation112_spill] sm:$0xff] %v11392_v63  ;;  %16886 = vst [vmem:[#allocation113_spill] sm:$0xff] %v11395_v44  ;;  %v1535_v63 = vmax.f32 %v11050_v28, 0.0  ;;  %v11439_v50 = vmul.f32 %v10803_v19, %v6467_v37  ;;  %v11448_v49 = vmul.f32 %v10806_v21, %v11395_v44  ;;  %v11452_v28 = vmul.f32 %v10841_v61, %v11297_v60  ;;  %v11459_v3 = vpop.f32.mrb[33].mxu0 }
 0x151   : > { %16887 = vst [vmem:[#allocation114_spill] sm:$0xff] %v11402_v7  ;;  %16888 = vst [vmem:[#allocation115_spill] sm:$0xff] %v11412_v35  ;;  %v11442_v35 = vmul.f32 %v10826_v42, %v6467_v37  ;;  %v11456_v20 = vmul.f32 %v10826_v42, %v11395_v44  ;;  %v1534_v7 = vmax.f32 %v11058_v48, 0.0  ;;  %v11463_v57 = vmul.f32 %v10831_v52, %v6467_v37 }
 0x152   : > { %16889 = vst [vmem:[#allocation116_spill] sm:$0xff] %v11419_v2  ;;  %16890 = vst [vmem:[#allocation117_spill] sm:$0xff] %v11423_v31  ;;  %v11466_v23 = vmul.f32 %v10942_v29, %v6467_v37  ;;  %v6378_v22 = vrot.slane %v1535_v63, 7  ;;  %v11481_v53 = vmul.f32 %v10945_v34, %v6467_v37  ;;  %v1536_v48 = vmax.f32 %v11095_v25, 0.0 }
 0x153   : > { %16891 = vst [vmem:[#allocation118_spill] sm:$0xff] %v11427_v38  ;;  %16892 = vst [vmem:[#allocation119_spill] sm:$0xff] %v11431_v54  ;;  %v6468_v37 = vsel %vm1870_vm5, %v6375_v51, 0.0  ;;  %v6381_v25 = vrot.slane %v1537_v1, 7  ;;  %v11512_v2 = vmul.f32 %v10806_v21, %v11470_v13  ;;  %v11516_v51 = vmul.f32 %v10803_v19, %v11341_v26 }
 0x154   : > { %16893 = vst [vmem:[#allocation120_spill] sm:$0xff] %v11436_v18  ;;  %16894 = vst [vmem:[#allocation121_spill] sm:$0xff] %v11439_v50  ;;  %v11505_v30 = vrot.slane %v1536_v48, 7  ;;  %v11520_v50 = vmul.f32 %v10826_v42, %v11470_v13  ;;  %v11526_v48 = vmul.f32 %v10782_v9, %v6468_v37  ;;  %v11529_v63 = vmul.f32 %v10803_v19, %v6468_v37 }
 0x155   : > { %16895 = vst [vmem:[#allocation122_spill] sm:$0xff] %v11442_v35  ;;  %16896 = vst [vmem:[#allocation123_spill] sm:$0xff] %v11448_v49  ;;  %v11489_v49 = vpop.f32.mrb[6].mxu1  ;;  %v11541_v35 = vmul.f32 %v10831_v52, %v6468_v37  ;;  %v11544_v1 = vmul.f32 %v10942_v29, %v6468_v37  ;;  %v11553_v38 = vmul.f32 %v10945_v34, %v6468_v37  ;;  %v6469_v47 = vsel %vm1870_vm5, %v6378_v22, 0.0 }
 0x156   : > { %16897 = vst [vmem:[#allocation124_spill] sm:$0xff] %v11463_v57  ;;  %16898 = vst [vmem:[#allocation125_spill] sm:$0xff] %v11472_v0  ;;  %v6377_v0 = vrot.slane %v1534_v7, 7  ;;  %v11538_v57 = vmul.f32 %v10826_v42, %v6468_v37  ;;  %v11583_v14 = vmul.f32 %v10803_v19, %v11406_v17  ;;  %v11592_v54 = vmul.f32 %v10826_v42, %v6469_v47 }
 0x157   : > { %16899 = vst [vmem:[#allocation126_spill] sm:$0xff] %v11485_v8  ;;  %16900 = vst [vmem:[#allocation127_spill] sm:$0xff] %v11489_v49  ;;  %v11507_v49 = vpop.f32.mrb[7].mxu1 }
 0x158   : > { %16901 = vst [vmem:[#allocation128_spill] sm:$0xff] %v11495_v58  ;;  %16902 = vst [vmem:[#allocation129_spill] sm:$0xff] %v11500_v4  ;;  %v11503_v7 = vsel %vm1870_vm5, %v6377_v0, %v6378_v22  ;;  %v11522_v18 = vpop.f32.mrb[8].mxu1  ;;  %v11595_v22 = vmul.f32 %v10831_v52, %v6469_v47  ;;  %v11613_v58 = vsel %vm1870_vm5, 0.0, %v6377_v0  ;;  %v6470_v0 = vsel %vm1870_vm5, %v6381_v25, 0.0 }
 0x159   : > { %16903 = vst [vmem:[#allocation130_spill] sm:$0xff] %v11503_v7  ;;  %16904 = vst [vmem:[#allocation131_spill] sm:$0xff] %v11507_v49  ;;  %v11533_v49 = vsel %vm1870_vm5, %v11505_v30, %v6381_v25  ;;  %v11630_v8 = vmul.f32 %v10782_v9, %v11613_v58  ;;  %v11647_v25 = vmul.f32 %v10803_v19, %v11503_v7 }
 0x15a   : > { %16905 = vst [vmem:[#allocation132_spill] sm:$0xff] %v11512_v2  ;;  %16906 = vst [vmem:[#allocation133_spill] sm:$0xff] %v11516_v51  ;;  %v11535_v2 = vpop.f32.mrb[9].mxu1  ;;  %v11610_v51 = vmul.f32 %v10945_v34, %v6469_v47 }
 0x15b   : > { %16907 = vst [vmem:[#allocation134_spill] sm:$0xff] %v11520_v50  ;;  %16908 = vst [vmem:[#allocation135_spill] sm:$0xff] %v11522_v18  ;;  %v11548_v18 = vsel %vm1870_vm5, 0.0, %v11381_v12  ;;  %v1538_v12 = vmax.f32 %v11137_v43, 0.0  ;;  %v11589_v50 = vmul.f32 %v10803_v19, %v6469_v47 }
 0x15c   : > { %16909 = vst [vmem:[#allocation136_spill] sm:$0xff] %v11526_v48  ;;  %16910 = vst [vmem:[#allocation137_spill] sm:$0xff] %v11529_v63  ;;  %v11559_v31 = vmul.f32 %v10806_v21, %v11548_v18  ;;  %v11567_v37 = vmul.f32 %v10782_v9, %v11548_v18  ;;  %v11578_v43 = vmul.f32 %v10803_v19, %v11548_v18 }
 0x15d   : > { %16911 = vst [vmem:[#allocation138_spill] sm:$0xff] %v11533_v49  ;;  %16912 = vst [vmem:[#allocation139_spill] sm:$0xff] %v11535_v2  ;;  %v1539_v2 = vmax.f32 %v11128_v27, 0.0  ;;  %v11571_v27 = vmul.f32 %v10782_v9, %v11406_v17  ;;  %v11586_v63 = vmul.f32 %v10782_v9, %v6469_v47 }
 0x15e   : > { %16913 = vst [vmem:[#allocation140_spill] sm:$0xff] %v11538_v57  ;;  %16914 = vst [vmem:[#allocation141_spill] sm:$0xff] %v11541_v35  ;;  %v11603_v57 = vmul.f32 %v10826_v42, %v11548_v18  ;;  %v11634_v35 = vmul.f32 %v10782_v9, %v11503_v7  ;;  %v11682_v7 = vmul.f32 %v10945_v34, %v6470_v0 }
 0x15f   : > { %16915 = vst [vmem:[#allocation142_spill] sm:$0xff] %v11559_v31  ;;  %16916 = vst [vmem:[#allocation143_spill] sm:$0xff] %v11567_v37  ;;  %v6384_v48 = vrot.slane %v1539_v2, 7  ;;  %v11597_v31 = vrot.slane %v1538_v12, 7  ;;  %v11606_v2 = vmul.f32 %v10942_v29, %v6469_v47  ;;  %v1541_v12 = vmax.f32 %v11164_v39, 0.0 }
 0x160   : > { %16917 = vst [vmem:[#allocation144_spill] sm:$0xff] %v11571_v27  ;;  %16918 = vst [vmem:[#allocation145_spill] sm:$0xff] %v11578_v43  ;;  %v1540_v27 = vmax.f32 %v11176_v40, 0.0  ;;  %v11638_v40 = vmul.f32 %v10803_v19, %v11613_v58  ;;  %v11643_v43 = vmul.f32 %v10806_v21, %v11613_v58  ;;  %v11652_v39 = vmul.f32 %v10782_v9, %v6470_v0 }
 0x161   : > { %16919 = vst [vmem:[#allocation146_spill] sm:$0xff] %v11583_v14  ;;  %16920 = vst [vmem:[#allocation147_spill] sm:$0xff] %v11586_v63  ;;  %v11620_v37 = vsel %vm1870_vm5, %v11597_v31, %v6384_v48  ;;  %v11649_v47 = vrot.slane %v1541_v12, 7  ;;  %v11658_v63 = vmul.f32 %v10826_v42, %v6470_v0  ;;  %v11670_v12 = vmul.f32 %v10942_v29, %v6470_v0 }
 0x162   : > { %16921 = vst [vmem:[#allocation148_spill] sm:$0xff] %v11589_v50  ;;  %16922 = vst [vmem:[#allocation149_spill] sm:$0xff] %v11592_v54  ;;  %v11655_v50 = vmul.f32 %v10803_v19, %v6470_v0  ;;  %v11660_v4 = vrot.slane %v1540_v27, 7  ;;  %v11674_v54 = vsel %vm1870_vm5, 0.0, %v11505_v30  ;;  %v11713_v14 = vmul.f32 %v10803_v19, %v11533_v49 }
 0x163   : > { %16923 = vst [vmem:[#allocation150_spill] sm:$0xff] %v11595_v22  ;;  %16924 = vst [vmem:[#allocation151_spill] sm:$0xff] %v11606_v2  ;;  %v11667_v22 = vmul.f32 %v10831_v52, %v6470_v0  ;;  %v1543_v2 = vmax.f32 %v11383_v59, 0.0  ;;  %v11695_v59 = vmul.f32 %v10782_v9, %v11674_v54 }
 0x164   : > { %16925 = vst [vmem:[#allocation152_spill] sm:$0xff] %v11610_v51  ;;  %16926 = vst [vmem:[#allocation153_spill] sm:$0xff] %v11613_v58  ;;  %v11688_v30 = vsel %vm1870_vm5, %v11660_v4, %v11649_v47  ;;  %v11709_v51 = vmul.f32 %v10803_v19, %v11674_v54 }
 0x165   : > { %16927 = vst [vmem:[#allocation154_spill] sm:$0xff] %v11620_v37  ;;  %16928 = vst [vmem:[#allocation155_spill] sm:$0xff] %v11630_v8  ;;  %v6390_v27 = vrot.slane %v1543_v2, 7 }
 0x166   : > { %16929 = vst [vmem:[#allocation156_spill] sm:$0xff] %v11634_v35  ;;  %16930 = vst [vmem:[#allocation157_spill] sm:$0xff] %v11638_v40  ;;  %v11705_v40 = vmul.f32 %v10782_v9, %v11533_v49  ;;  %v11777_v49 = vmul.f32 %v10782_v9, %v11620_v37 }
 0x167   : > { %16931 = vst [vmem:[#allocation158_spill] sm:$0xff] %v11643_v43  ;;  %16932 = vst [vmem:[#allocation159_spill] sm:$0xff] %v11647_v25  ;;  %v11664_v43 = vmul.f32 %v10826_v42, %v11613_v58  ;;  %v6471_v58 = vsel %vm1870_vm5, %v6384_v48, 0.0  ;;  %v11701_v48 = vmul.f32 %v10806_v21, %v11674_v54  ;;  %v11735_v2 = vsel %vm1870_vm5, %v6390_v27, 0.0 }
 0x168   : > { %16933 = vst [vmem:[#allocation160_spill] sm:$0xff] %v11652_v39  ;;  %16934 = vst [vmem:[#allocation161_spill] sm:$0xff] %v11655_v50  ;;  %v11716_v0 = vmul.f32 %v10782_v9, %v6471_v58  ;;  %v11720_v50 = vmul.f32 %v10803_v19, %v6471_v58  ;;  %v11723_v39 = vmul.f32 %v10826_v42, %v6471_v58 }
 0x169   : > { %16935 = vst [vmem:[#allocation162_spill] sm:$0xff] %v11658_v63  ;;  %16936 = vst [vmem:[#allocation163_spill] sm:$0xff] %v11664_v43  ;;  %v11729_v63 = vmul.f32 %v10826_v42, %v11674_v54  ;;  %v11732_v25 = vmul.f32 %v10831_v52, %v6471_v58  ;;  %v11739_v8 = vmul.f32 %v10942_v29, %v6471_v58 }
 0x16a   : > { %16937 = vst [vmem:[#allocation164_spill] sm:$0xff] %v11667_v22  ;;  %16938 = vst [vmem:[#allocation165_spill] sm:$0xff] %v11670_v12  ;;  %v11742_v35 = vmul.f32 %v10945_v34, %v6471_v58  ;;  %v1545_v58 = vmax.f32 %v11444_v32, 0.0 }
 0x16b   : > { %16939 = vst [vmem:[#allocation166_spill] sm:$0xff] %v11674_v54  ;;  %16940 = vst [vmem:[#allocation167_spill] sm:$0xff] %v11682_v7  ;;  %v11846_v54 = vsel %vm1870_vm5, 0.0, %v11660_v4 }
 0x16c   : > { %16941 = vst [vmem:[#allocation168_spill] sm:$0xff] %v11688_v30  ;;  %16942 = vst [vmem:[#allocation169_spill] sm:$0xff] %v11695_v59  ;;  %v6806_v59 = vmul.f32 %v10803_v19, %v11735_v2  ;;  %v6393_v12 = vrot.slane %v1545_v58, 7 }
 0x16d   : > { %16943 = vst [vmem:[#allocation170_spill] sm:$0xff] %v11701_v48  ;;  %16944 = vst [vmem:[#allocation171_spill] sm:$0xff] %v11705_v40  ;;  %v1542_v48 = vmax.f32 %v11397_v33, 0.0  ;;  %v11746_v33 = vsel %vm1870_vm5, 0.0, %v11597_v31  ;;  %v6562_v40 = vmul.f32 %v10782_v9, %v11735_v2 }
 0x16e   : > { %16945 = vst [vmem:[#allocation172_spill] sm:$0xff] %v11709_v51  ;;  %16946 = vst [vmem:[#allocation173_spill] sm:$0xff] %v11713_v14  ;;  %v11759_v31 = vmul.f32 %v10782_v9, %v11746_v33  ;;  %v11771_v43 = vmul.f32 %v10806_v21, %v11746_v33 }
 0x16f   : > { %16947 = vst [vmem:[#allocation174_spill] sm:$0xff] %v11716_v0  ;;  %16948 = vst [vmem:[#allocation175_spill] sm:$0xff] %v11720_v50  ;;  %v6389_v7 = vrot.slane %v1542_v48, 7  ;;  %v1544_v50 = vmax.f32 %v11459_v3, 0.0 }
 0x170   : > { %16949 = vst [vmem:[#allocation176_spill] sm:$0xff] %v11723_v39  ;;  %16950 = vst [vmem:[#allocation177_spill] sm:$0xff] %v11729_v63  ;;  %v6689_v63 = vrot.slane %v6562_v40, 1 }
 0x171   : > { %16951 = vst [vmem:[#allocation178_spill] sm:$0xff] %v11732_v25  ;;  %16952 = vst [vmem:[#allocation179_spill] sm:$0xff] %v11739_v8  ;;  %v11762_v22 = vsel %vm1870_vm5, %v6389_v7, %v6390_v27  ;;  %v11765_v48 = vsel %vm1870_vm5, 0.0, %v6389_v7  ;;  %v11781_v27 = vmul.f32 %v10803_v19, %v11746_v33  ;;  %v11785_v7 = vmul.f32 %v10803_v19, %v11620_v37 }
 0x172   : > { %16953 = vst [vmem:[#allocation180_spill] sm:$0xff] %v11742_v35  ;;  %16954 = vst [vmem:[#allocation181_spill] sm:$0xff] %v11746_v33  ;;  %v6560_v32 = vmul.f32 %v10782_v9, %v11765_v48  ;;  %v6561_v0 = vmul.f32 %v10782_v9, %v11762_v22  ;;  %v11795_v25 = vmul.f32 %v10826_v42, %v11746_v33  ;;  %v6392_v14 = vrot.slane %v1544_v50, 7 }
 0x173   : > { %16955 = vst [vmem:[#allocation182_spill] sm:$0xff] %v11759_v31  ;;  %16956 = vst [vmem:[#allocation183_spill] sm:$0xff] %v11762_v22  ;;  %v6509_v39 = vmul.f32 %v10806_v21, %v11765_v48  ;;  %v6510_v51 = vmul.f32 %v10806_v21, %v11762_v22  ;;  %v6804_v3 = vmul.f32 %v10803_v19, %v11765_v48  ;;  %v6933_v31 = vrot.slane %v6806_v59, 2 }
 0x174   : > { %16957 = vst [vmem:[#allocation184_spill] sm:$0xff] %v11765_v48  ;;  %16958 = vst [vmem:[#allocation185_spill] sm:$0xff] %v11771_v43  ;;  %v6686_v40 = vrot.slane %v6560_v32, 1  ;;  %v6687_v58 = vrot.slane %v6561_v0, 1  ;;  %v6472_v43 = vsel %vm1870_vm5, %v11649_v47, 0.0  ;;  %v11809_v8 = vsel %vm1870_vm5, %v6392_v14, %v6393_v12 }
 0x175   : > { %16959 = vst [vmem:[#allocation186_spill] sm:$0xff] %v11777_v49  ;;  %16960 = vst [vmem:[#allocation187_spill] sm:$0xff] %v11781_v27  ;;  %v11812_v37 = vsel %vm1870_vm5, 0.0, %v6392_v14  ;;  %v6930_v35 = vrot.slane %v6804_v3, 2  ;;  %v7034_v59 = vmul.f32 %v10841_v61, %v11809_v8  ;;  %v11824_v14 = vmul.f32 %v10826_v42, %v11809_v8 }
 0x176   : > { %16961 = vst [vmem:[#allocation188_spill] sm:$0xff] %v11785_v7  ;;  %16962 = vst [vmem:[#allocation189_spill] sm:$0xff] %v11795_v25  ;;  %v6805_v25 = vmul.f32 %v10803_v19, %v11762_v22  ;;  %v6688_v50 = vsel %vm2760_vm6, %v6686_v40, %v6687_v58  ;;  %v6690_v0 = vsel %vm2760_vm6, %v6687_v58, %v6689_v63 }
 0x177   : > { %16963 = vst [vmem:[#allocation190_spill] sm:$0xff] %v11809_v8  ;;  %16964 = vst [vmem:[#allocation191_spill] sm:$0xff] %v11812_v37  ;;  %v6753_v32 = vadd.f32 %v6688_v50, %v6509_v39  ;;  %v6754_v33 = vadd.f32 %v6690_v0, %v6510_v51  ;;  %v7033_v47 = vmul.f32 %v10841_v61, %v11812_v37  ;;  %v16542_v50 = vrot.slane %v11824_v14, 1 }
 0x178   : > { %v6931_v49 = vrot.slane %v6805_v25, 2  ;;  %v7116_v22 = vmul.f32 %v10826_v42, %v11812_v37  ;;  %16965 = vst [vmem:[#allocation192_spill] sm:$0xff] %v11824_v14  ;;  %v11827_v40 = vmul.f32 %v10782_v9, %v6472_v43  ;;  %v11830_v63 = vmul.f32 %v10803_v19, %v6472_v43  ;;  %16971 = vst [vmem:[#allocation198_spill] sm:$0xff] %v11846_v54 }
 0x179   : > { %v11836_v0 = vmul.f32 %v10826_v42, %v6472_v43  ;;  %v11839_v8 = vmul.f32 %v10831_v52, %v6472_v43  ;;  %v11842_v37 = vmul.f32 %v10942_v29, %v6472_v43  ;;  %v11937_v14 = vmul.f32 %v10826_v42, %v11765_v48 }
 0x17a   : > { %16966 = vst [vmem:[#allocation193_spill] sm:$0xff] %v11827_v40  ;;  %16967 = vst [vmem:[#allocation194_spill] sm:$0xff] %v11830_v63  ;;  %v6932_v51 = vsel %vm2837_vm8, %v6930_v35, %v6931_v49  ;;  %v6934_v39 = vsel %vm2837_vm8, %v6931_v49, %v6933_v31  ;;  %v7242_v3 = vrot.slane %v7116_v22, 1  ;;  %v11849_v35 = vmul.f32 %v10945_v34, %v6472_v43  ;;  %v1852_v31 = vld [vmem:[%s16330_s14] sm:$0x7] }
 0x17b   : > { %v6997_v25 = vadd.f32 %v6932_v51, %v6753_v32  ;;  %v6998_v58 = vadd.f32 %v6934_v39, %v6754_v33  ;;  %16968 = vst [vmem:[#allocation195_spill] sm:$0xff] %v11836_v0  ;;  %16969 = vst [vmem:[#allocation196_spill] sm:$0xff] %v11839_v8  ;;  %v11864_v43 = vmul.f32 %v10782_v9, %v11846_v54  ;;  %v16987_v63 = vrot.slane %v11227_v62, 1 }
 0x17c   : > { %16970 = vst [vmem:[#allocation197_spill] sm:$0xff] %v11842_v37  ;;  %16972 = vst [vmem:[#allocation199_spill] sm:$0xff] %v11849_v35  ;;  %v7244_v33 = vsel %vm2760_vm6, %v7242_v3, %v16542_v50  ;;  %v11880_v50 = vrot.slane %v1852_v31, %v10773_v5  ;;  %v11886_v32 = vmul.f32 %v10806_v21, %v11846_v54  ;;  %v11901_v3 = vsel %vm1870_vm5, %v6393_v12, 0.0 }
 0x17d   : > { %v7065_v49 = vadd.f32 %v7033_v47, %v6997_v25  ;;  %v11851_v22 = vadd.f32 %v7034_v59, %v6998_v58  ;;  %16974 = vst [vmem:[#allocation201_spill] sm:$0xff] %v11864_v43  ;;  %v11868_v47 = vmul.f32 %v10782_v9, %v11688_v30  ;;  %v11872_v59 = vmul.f32 %v10803_v19, %v11846_v54 }
 0x17e   : > { %16978 = vst [vmem:[#allocation205_spill] sm:$0xff] %v11886_v32  ;;  %v11898_v25 = vmul.f32 %v10826_v42, %v11846_v54  ;;  %16980 = vst [vmem:[#allocation207_spill] sm:$0xff] %v11901_v3  ;;  %v11904_v58 = vrot.slane %v1852_v31, %v10794_v15  ;;  %v11918_v12 = vmul.f32 %v10831_v52, %v11735_v2  ;;  %v16988_v40 = vrot.slane %v11356_v24, 1  ;;  %v17009_v54 = vld [vmem:[#allocation123_spill] sm:$0xff] }
 0x17f   : > { %16973 = vst [vmem:[#allocation200_spill] sm:$0xff] %v11851_v22  ;;  %16975 = vst [vmem:[#allocation202_spill] sm:$0xff] %v11868_v47  ;;  %v11874_v39 = vadd.f32 %v7244_v33, %v7065_v49  ;;  %v11890_v49 = vsel %vm1876_vm10, %v10788_v11, 0.0  ;;  %v11894_v33 = vmul.f32 %v10803_v19, %v11688_v30  ;;  %v11911_v19 = vmul.f32 %v10826_v42, %v11735_v2  ;;  %v1853_v11 = vld [vmem:[%s16330_s14 + $0x4] sm:$0x7] }
 0x180   : > { %16976 = vst [vmem:[#allocation203_spill] sm:$0xff] %v11872_v59  ;;  %16979 = vst [vmem:[#allocation206_spill] sm:$0xff] %v11898_v25  ;;  %v11922_v22 = vmul.f32 %v10942_v29, %v11735_v2  ;;  %v11926_v51 = vmul.f32 %v11880_v50, %v11890_v49  ;;  %v11929_v4 = vrot.slane %v1852_v31, %v10784_v10  ;;  %v16989_v62 = vrot.slane %v11364_v46, 2 }
 0x181   : > { %16977 = vst [vmem:[#allocation204_spill] sm:$0xff] %v11874_v39  ;;  %16981 = vst [vmem:[#allocation208_spill] sm:$0xff] %v11911_v19  ;;  %v11933_v9 = vmul.f32 %v10945_v34, %v11735_v2  ;;  %v11941_v39 = vmul.f32 %v10942_v29, %v11901_v3  ;;  %v11950_v31 = vmul.f32 %v11904_v58, %v11890_v49  ;;  %v16990_v24 = vrot.slane %v11360_v6, 2 }
 0x182   : > { %16982 = vst [vmem:[#allocation209_spill] sm:$0xff] %v11918_v12  ;;  %16983 = vst [vmem:[#allocation210_spill] sm:$0xff] %v11922_v22  ;;  %v6648_v12 = vsel %vm2760_vm6, %v16988_v40, %v16987_v63  ;;  %v11953_v2 = vrot.slane %v1853_v11, %v10794_v15  ;;  %v11956_v59 = vrot.slane %v1853_v11, %v10773_v5  ;;  %v16991_v35 = vrot.slane %v11310_v41, 2 }
 0x183   : > { %16984 = vst [vmem:[#allocation211_spill] sm:$0xff] %v11933_v9  ;;  %16985 = vst [vmem:[#allocation212_spill] sm:$0xff] %v11937_v14  ;;  %v6737_v14 = vadd.f32 %v6648_v12, %v11388_v16  ;;  %v6892_v40 = vsel %vm2837_vm8, %v16990_v24, %v16989_v62  ;;  %v7017_v63 = vmul.f32 %v10841_v61, %v11395_v44  ;;  %v7202_v12 = vrot.slane %v11456_v20, 1  ;;  %v17012_v9 = vld [vmem:[#allocation118_spill] sm:$0xff] }
 0x184   : > { %16986 = vst [vmem:[#allocation213_spill] sm:$0xff] %v11941_v39  ;;  %v11960_v39 = vrot.slane %v1853_v11, %v10784_v10  ;;  %v7093_v3 = vmul.f32 %v10826_v42, %v11297_v60  ;;  %v11974_v16 = vmul.f32 %v11929_v4, %v11890_v49  ;;  %v7336_v6 = vmul.f32 %v10831_v52, %v11395_v44 }
 0x185   : > { %v6981_v11 = vadd.f32 %v6892_v40, %v6737_v14  ;;  %v7337_v62 = vmul.f32 %v10831_v52, %v11297_v60  ;;  %v7573_v24 = vmul.f32 %v10973_v56, %v11470_v13  ;;  %v7648_v32 = vmul.f32 %v10942_v29, %v11470_v13 }
 0x186   : > { %v7203_v43 = vrot.slane %v7093_v3, 1  ;;  %v7649_v8 = vmul.f32 %v10942_v29, %v11341_v26  ;;  %v7892_v20 = vmul.f32 %v10945_v34, %v11470_v13  ;;  %v7446_v3 = vrot.slane %v7336_v6, 2 }
 0x187   : > { %v7049_v47 = vadd.f32 %v7017_v63, %v6981_v11  ;;  %v7447_v40 = vrot.slane %v7337_v62, 2  ;;  %v7893_v44 = vmul.f32 %v10945_v34, %v11341_v26  ;;  %v7758_v48 = vrot.slane %v7648_v32, 1 }
 0x188   : > { %v7204_v14 = vsel %vm2760_vm6, %v7202_v12, %v7203_v43  ;;  %v7759_v27 = vrot.slane %v7649_v8, 1  ;;  %v8002_v63 = vrot.slane %v7892_v20, 2  ;;  %v16992_v37 = vrot.slane %v11364_v46, 2 }
 0x189   : > { %v7293_v0 = vadd.f32 %v7204_v14, %v7049_v47  ;;  %v7448_v11 = vsel %vm2837_vm8, %v7446_v3, %v7447_v40  ;;  %v8003_v7 = vrot.slane %v7893_v44, 2  ;;  %v16993_v12 = vrot.slane %v11373_v45, 1  ;;  %v17001_v14 = vld [vmem:[#allocation35_spill] sm:$0xff] }
 0x18a   : > { %v6894_v25 = vsel %vm2837_vm8, %v16992_v37, %v16991_v35  ;;  %v7760_v30 = vsel %vm2760_vm6, %v7758_v48, %v7759_v27  ;;  %v16994_v8 = vrot.slane %v11376_v55, 2  ;;  %v7574_v41 = vmul.f32 %v10973_v56, %v11341_v26  ;;  %v16997_v35 = vld [vmem:[#allocation22_spill] sm:$0xff] }
 0x18b   : > { %v7206_v6 = vsel %vm2760_vm6, %v7203_v43, %v16993_v12  ;;  %v7537_v62 = vadd.f32 %v7448_v11, %v7293_v0  ;;  %v6982_v32 = vadd.f32 %v6894_v25, %v11273_v36  ;;  %v8004_v44 = vsel %vm2837_vm8, %v8002_v63, %v8003_v7  ;;  %v16999_v43 = vld [vmem:[#allocation30_spill] sm:$0xff]  ;;  %v17004_v12 = vld [vmem:[#allocation117_spill] sm:$0xff] }
 0x18c   : > { %v7450_v47 = vsel %vm2837_vm8, %v7447_v40, %v16994_v8  ;;  %v16995_v46 = vrot.slane %v11466_v23, 1  ;;  %v16996_v37 = vrot.slane %v11481_v53, 2  ;;  %v16998_v55 = vrot.slane %v16997_v35, 2  ;;  %v17002_v40 = vld [vmem:[#allocation20_spill] sm:$0xff]  ;;  %v17003_v53 = vld [vmem:[#allocation25_spill] sm:$0xff] }
 0x18d   : > { %v7605_v48 = vadd.f32 %v7573_v24, %v7537_v62  ;;  %v7050_v36 = vadd.f32 %v11452_v28, %v6982_v32  ;;  %v17000_v25 = vrot.slane %v16999_v43, 2  ;;  %v7559_v3 = vmul.f32 %v10973_v56, %v17001_v14  ;;  %v17006_v32 = vld [vmem:[#allocation116_spill] sm:$0xff] }
 0x18e   : > { %v7762_v45 = vsel %vm2760_vm6, %v7759_v27, %v16995_v46  ;;  %v8006_v0 = vsel %vm2837_vm8, %v8003_v7, %v16996_v37  ;;  %v7627_v27 = vmul.f32 %v10942_v29, %v17001_v14  ;;  %v7628_v7 = vmul.f32 %v10942_v29, %v17003_v53 }
 0x18f   : > { %v7413_v20 = vsel %vm2837_vm8, %v17000_v25, %v16998_v55  ;;  %v7871_v28 = vmul.f32 %v10945_v34, %v17001_v14  ;;  %v7849_v24 = vadd.f32 %v7760_v30, %v7605_v48  ;;  %v7294_v63 = vadd.f32 %v7206_v6, %v7050_v36  ;;  %v17010_v48 = vld [vmem:[#allocation119_spill] sm:$0xff] }
 0x190   : > { %v7523_v23 = vadd.f32 %v7413_v20, %v17002_v40  ;;  %v7872_v11 = vmul.f32 %v10945_v34, %v17003_v53  ;;  %v17005_v62 = vrot.slane %v17004_v12, 1  ;;  %v17007_v8 = vrot.slane %v17006_v32, 1 }
 0x191   : > { %v7723_v35 = vrot.slane %v7627_v27, 1  ;;  %v7724_v55 = vrot.slane %v7628_v7, 1  ;;  %v7967_v43 = vrot.slane %v7871_v28, 2  ;;  %v12037_v25 = vadd.f32 %v8004_v44, %v7849_v24  ;;  %v17014_v44 = vld [vmem:[#allocation40_spill] sm:$0xff]  ;;  %v17015_v24 = vld [vmem:[#allocation134_spill] sm:$0xff] }
 0x192   : > { %v6653_v46 = vsel %vm2760_vm6, %v17007_v8, %v17005_v62  ;;  %v7591_v37 = vadd.f32 %v7559_v3, %v7523_v23  ;;  %v7538_v20 = vadd.f32 %v7450_v47, %v7294_v63  ;;  %v7968_v40 = vrot.slane %v7872_v11, 2 }
 0x193   : > { %17008 = vst [vmem:[#allocation22_spill] sm:$0xff] %v12037_v25  ;;  %v6739_v30 = vadd.f32 %v6653_v46, %v17009_v54  ;;  %v7725_v6 = vsel %vm2760_vm6, %v7723_v35, %v7724_v55  ;;  %v17011_v36 = vrot.slane %v17010_v48, 2  ;;  %v17013_v22 = vrot.slane %v17012_v9, 2  ;;  %v17016_v9 = vld [vmem:[#allocation39_spill] sm:$0xff] }
 0x194   : > { %v7019_v3 = vmul.f32 %v10841_v61, %v11470_v13  ;;  %v7096_v23 = vmul.f32 %v10826_v42, %v11341_v26  ;;  %v7606_v27 = vadd.f32 %v7574_v41, %v7538_v20  ;;  %v7835_v7 = vadd.f32 %v7725_v6, %v7591_v37 }
 0x195   : > { %v6897_v32 = vsel %vm2837_vm8, %v17013_v22, %v17011_v36  ;;  %v7969_v54 = vsel %vm2837_vm8, %v7967_v43, %v7968_v40  ;;  %v7207_v63 = vrot.slane %v17015_v24, 1  ;;  %v7339_v22 = vmul.f32 %v10831_v52, %v11470_v13 }
 0x196   : > { %v6983_v28 = vadd.f32 %v6897_v32, %v6739_v30  ;;  %v7208_v11 = vrot.slane %v7096_v23, 1  ;;  %v7850_v8 = vadd.f32 %v7762_v45, %v7606_v27  ;;  %v12058_v46 = vadd.f32 %v7969_v54, %v7835_v7  ;;  %v17019_v54 = vld [vmem:[#allocation21_spill] sm:$0xff] }
 0x197   : > { %v7340_v35 = vmul.f32 %v10831_v52, %v11341_v26  ;;  %v7451_v43 = vrot.slane %v7339_v22, 2  ;;  %v7651_v20 = vmul.f32 %v10942_v29, %v11548_v18  ;;  %v7575_v13 = vmul.f32 %v10973_v56, %v11548_v18 }
 0x198   : > { %17017 = vst [vmem:[#allocation30_spill] sm:$0xff] %v12058_v46  ;;  %v7051_v41 = vadd.f32 %v7019_v3, %v6983_v28  ;;  %v7209_v37 = vsel %vm2760_vm6, %v7207_v63, %v7208_v11  ;;  %v12065_v30 = vadd.f32 %v8006_v0, %v7850_v8  ;;  %v7652_v45 = vmul.f32 %v10942_v29, %v11406_v17  ;;  %v17020_v28 = vld [vmem:[#allocation26_spill] sm:$0xff] }
 0x199   : > { %v7452_v6 = vrot.slane %v7340_v35, 2  ;;  %v7763_v32 = vrot.slane %v7651_v20, 1  ;;  %v7895_v3 = vmul.f32 %v10945_v34, %v11548_v18  ;;  %v7896_v23 = vmul.f32 %v10945_v34, %v11406_v17  ;;  %v17021_v20 = vld [vmem:[#allocation37_spill] sm:$0xff] }
 0x19a   : > { %17018 = vst [vmem:[#allocation35_spill] sm:$0xff] %v12065_v30  ;;  %v7295_v36 = vadd.f32 %v7209_v37, %v7051_v41  ;;  %v7764_v7 = vrot.slane %v7652_v45, 1  ;;  %v7524_v24 = vadd.f32 %v17020_v28, %v17019_v54  ;;  %v7560_v35 = vmul.f32 %v10973_v56, %v17003_v53  ;;  %v1854_v41 = vld [vmem:[%s16330_s14 + $0x8] sm:$0x7]  ;;  %v17023_v45 = vld [vmem:[#allocation38_spill] sm:$0xff] }
 0x19b   : > { %v7453_v0 = vsel %vm2837_vm8, %v7451_v43, %v7452_v6  ;;  %v8007_v22 = vrot.slane %v7895_v3, 2  ;;  %v8008_v8 = vrot.slane %v7896_v23, 2  ;;  %v17022_v62 = vrot.slane %v17021_v20, 1  ;;  %v17025_v28 = vld [vmem:[#allocation109_spill] sm:$0xff]  ;;  %v17028_v30 = vld [vmem:[#allocation110_spill] sm:$0xff] }
 0x19c   : > { %v7539_v63 = vadd.f32 %v7453_v0, %v7295_v36  ;;  %v7765_v37 = vsel %vm2760_vm6, %v7763_v32, %v7764_v7  ;;  %v17024_v47 = vrot.slane %v17023_v45, 2  ;;  %v6496_v36 = vmul.f32 %v10806_v21, %v11297_v60  ;;  %v17048_v60 = vld [vmem:[#allocation133_spill] sm:$0xff] }
 0x19d   : > { %v7727_v43 = vsel %vm2760_vm6, %v7724_v55, %v17022_v62  ;;  %v8009_v23 = vsel %vm2837_vm8, %v8007_v22, %v8008_v8  ;;  %v7592_v0 = vadd.f32 %v7560_v35, %v7524_v24  ;;  %v17026_v27 = vrot.slane %v17025_v28, 1 }
 0x19e   : > { %v7971_v54 = vsel %vm2837_vm8, %v7968_v40, %v17024_v47  ;;  %v7607_v3 = vadd.f32 %v7575_v13, %v7539_v63  ;;  %v17027_v46 = vrot.slane %v17004_v12, 1  ;;  %v17029_v55 = vrot.slane %v17028_v30, 2  ;;  %v17031_v13 = vld [vmem:[#allocation122_spill] sm:$0xff] }
 0x19f   : > { %v17030_v62 = vrot.slane %v17010_v48, 2  ;;  %v7020_v47 = vmul.f32 %v10841_v61, %v11341_v26  ;;  %v17032_v63 = vrot.slane %v17031_v13, 1  ;;  %v12110_v22 = vrot.slane %v1854_v41, %v10794_v15  ;;  %v17047_v15 = vld [vmem:[#allocation132_spill] sm:$0xff] }
 0x1a0   : > { %v6655_v32 = vsel %vm2760_vm6, %v17027_v46, %v17026_v27  ;;  %v7851_v12 = vadd.f32 %v7765_v37, %v7607_v3  ;;  %v7836_v35 = vadd.f32 %v7727_v43, %v7592_v0  ;;  %v17033_v46 = vld [vmem:[#allocation124_spill] sm:$0xff]  ;;  %v17035_v48 = vrot.slane %v11544_v1, 1  ;;  %v17040_v0 = vld [vmem:[#allocation23_spill] sm:$0xff] }
 0x1a1   : > { %v6740_v20 = vadd.f32 %v6655_v32, %v6496_v36  ;;  %v6899_v40 = vsel %vm2837_vm8, %v17030_v62, %v17029_v55  ;;  %v7211_v24 = vsel %vm2760_vm6, %v7208_v11, %v17032_v63  ;;  %v17034_v27 = vrot.slane %v17033_v46, 2  ;;  %v17041_v62 = vld [vmem:[#allocation53_spill] sm:$0xff] }
 0x1a2   : > { %v7767_v36 = vsel %vm2760_vm6, %v7764_v7, %v17035_v48  ;;  %v17036_v28 = vrot.slane %v11553_v38, 2  ;;  %v7005_v11 = vmul.f32 %v10841_v61, %v17001_v14  ;;  %v12123_v55 = vadd.f32 %v8009_v23, %v7851_v12 }
 0x1a3   : > { %v7455_v30 = vsel %vm2837_vm8, %v7452_v6, %v17034_v27  ;;  %v6984_v45 = vadd.f32 %v6899_v40, %v6740_v20  ;;  %v12125_v37 = vadd.f32 %v7971_v54, %v7836_v35  ;;  %v12129_v43 = vmul.f32 %v10826_v42, %v17003_v53  ;;  %v17039_v6 = vld [vmem:[#allocation47_spill] sm:$0xff] }
 0x1a4   : > { %v8011_v32 = vsel %vm2837_vm8, %v8008_v8, %v17036_v28  ;;  %17037 = vst [vmem:[#allocation20_spill] sm:$0xff] %v12123_v55  ;;  %v7172_v3 = vrot.slane %v17039_v6, 1  ;;  %v7037_v7 = vadd.f32 %v7005_v11, %v17040_v0  ;;  %v7318_v38 = vmul.f32 %v10831_v52, %v17001_v14  ;;  %v17042_v35 = vld [vmem:[#allocation27_spill] sm:$0xff]  ;;  %v17043_v0 = vld [vmem:[#allocation128_spill] sm:$0xff] }
 0x1a5   : > { %17038 = vst [vmem:[#allocation25_spill] sm:$0xff] %v12125_v37  ;;  %v7052_v1 = vadd.f32 %v7020_v47, %v6984_v45  ;;  %v7319_v8 = vmul.f32 %v10831_v52, %v17003_v53  ;;  %v12138_v23 = vrot.slane %v1854_v41, %v10773_v5  ;;  %v7576_v54 = vmul.f32 %v10973_v56, %v11406_v17 }
 0x1a6   : > { %v7173_v20 = vrot.slane %v12129_v43, 1  ;;  %v7561_v40 = vmul.f32 %v10973_v56, %v17041_v62  ;;  %v7416_v13 = vrot.slane %v7318_v38, 2  ;;  %v7630_v14 = vmul.f32 %v10942_v29, %v17041_v62 }
 0x1a7   : > { %v7296_v47 = vadd.f32 %v7211_v24, %v7052_v1  ;;  %v7417_v63 = vrot.slane %v7319_v8, 2  ;;  %v7631_v46 = vmul.f32 %v10942_v29, %v17042_v35  ;;  %v7874_v27 = vmul.f32 %v10945_v34, %v17041_v62 }
 0x1a8   : > { %v7174_v12 = vsel %vm2760_vm6, %v7172_v3, %v7173_v20  ;;  %v7875_v45 = vmul.f32 %v10945_v34, %v17042_v35  ;;  %v7728_v11 = vrot.slane %v7630_v14, 1  ;;  %v17044_v38 = vrot.slane %v17043_v0, 1  ;;  %v17045_v3 = vld [vmem:[#allocation126_spill] sm:$0xff] }
 0x1a9   : > { %v7540_v48 = vadd.f32 %v7455_v30, %v7296_v47  ;;  %v7281_v28 = vadd.f32 %v7174_v12, %v7037_v7  ;;  %v7418_v24 = vsel %vm2837_vm8, %v7416_v13, %v7417_v63  ;;  %v7729_v43 = vrot.slane %v7631_v46, 1  ;;  %v17050_v30 = vld [vmem:[#allocation129_spill] sm:$0xff] }
 0x1aa   : > { %v7972_v6 = vrot.slane %v7874_v27, 2  ;;  %v7973_v1 = vrot.slane %v7875_v45, 2  ;;  %v17046_v8 = vrot.slane %v17045_v3, 1  ;;  %v17049_v19 = vrot.slane %v17048_v60, 2 }
 0x1ab   : > { %v7608_v55 = vadd.f32 %v7576_v54, %v7540_v48  ;;  %v7525_v25 = vadd.f32 %v7418_v24, %v7281_v28  ;;  %v17051_v7 = vrot.slane %v17050_v30, 2  ;;  %v7730_v13 = vsel %vm2760_vm6, %v7728_v11, %v7729_v43 }
 0x1ac   : > { %v6658_v37 = vsel %vm2760_vm6, %v17046_v8, %v17044_v38  ;;  %v7974_v14 = vsel %vm2837_vm8, %v7972_v6, %v7973_v1  ;;  %v7021_v12 = vmul.f32 %v10841_v61, %v11548_v18  ;;  %v7099_v46 = vmul.f32 %v10826_v42, %v11406_v17  ;;  %v17053_v38 = vld [vmem:[#allocation153_spill] sm:$0xff] }
 0x1ad   : > { %v6741_v5 = vadd.f32 %v6658_v37, %v17047_v15  ;;  %v6902_v47 = vsel %vm2837_vm8, %v17051_v7, %v17049_v19  ;;  %v7852_v54 = vadd.f32 %v7767_v36, %v7608_v55  ;;  %v7593_v27 = vadd.f32 %v7561_v40, %v7525_v25 }
 0x1ae   : > { %v7212_v15 = vrot.slane %v11603_v57, 1  ;;  %v12174_v37 = vrot.slane %v1854_v41, %v10784_v10  ;;  %v7213_v48 = vrot.slane %v7099_v46, 1  ;;  %v7342_v19 = vmul.f32 %v10831_v52, %v11548_v18  ;;  %v17054_v41 = vld [vmem:[#allocation130_spill] sm:$0xff] }
 0x1af   : > { %v6985_v45 = vadd.f32 %v6902_v47, %v6741_v5  ;;  %v7343_v28 = vmul.f32 %v10831_v52, %v11406_v17  ;;  %v12180_v24 = vadd.f32 %v8011_v32, %v7852_v54  ;;  %v7837_v11 = vadd.f32 %v7730_v13, %v7593_v27  ;;  %v17057_v54 = vld [vmem:[#allocation33_spill] sm:$0xff] }
 0x1b0   : > { %v7654_v25 = vmul.f32 %v10942_v29, %v17053_v38  ;;  %v7214_v5 = vsel %vm2760_vm6, %v7212_v15, %v7213_v48  ;;  %v7456_v57 = vrot.slane %v7342_v19, 2  ;;  %v7655_v55 = vmul.f32 %v10942_v29, %v17054_v41 }
 0x1b1   : > { %17052 = vst [vmem:[#allocation117_spill] sm:$0xff] %v12180_v24  ;;  %v7053_v6 = vadd.f32 %v7021_v12, %v6985_v45  ;;  %v7457_v36 = vrot.slane %v7343_v28, 2  ;;  %v12187_v40 = vadd.f32 %v7974_v14, %v7837_v11  ;;  %v7577_v3 = vmul.f32 %v10973_v56, %v17053_v38  ;;  %v17059_v11 = vld [vmem:[#allocation34_spill] sm:$0xff] }
 0x1b2   : > { %v7768_v32 = vrot.slane %v7654_v25, 1  ;;  %v7769_v30 = vrot.slane %v7655_v55, 1  ;;  %v7898_v7 = vmul.f32 %v10945_v34, %v17053_v38  ;;  %v7899_v47 = vmul.f32 %v10945_v34, %v17054_v41  ;;  %v17062_v55 = vld [vmem:[#allocation52_spill] sm:$0xff] }
 0x1b3   : > { %17055 = vst [vmem:[#allocation116_spill] sm:$0xff] %v12187_v40  ;;  %v7297_v18 = vadd.f32 %v7214_v5, %v7053_v6  ;;  %v7458_v8 = vsel %vm2837_vm8, %v7456_v57, %v7457_v36  ;;  %v17056_v13 = vrot.slane %v11926_v51, 1  ;;  %v7006_v46 = vmul.f32 %v10841_v61, %v17003_v53  ;;  %v17061_v5 = vld [vmem:[#allocation24_spill] sm:$0xff]  ;;  %v17102_v40 = vld [vmem:[#allocation142_spill] sm:$0xff] }
 0x1b4   : > { %v17058_v27 = vrot.slane %v17057_v54, 1  ;;  %v7770_v15 = vsel %vm2760_vm6, %v7768_v32, %v7769_v30  ;;  %v8012_v19 = vrot.slane %v7898_v7, 2  ;;  %v8013_v28 = vrot.slane %v7899_v47, 2  ;;  %v17064_v32 = vld [vmem:[#allocation54_spill] sm:$0xff] }
 0x1b5   : > { %v12199_v12 = vadd.f32 %v17056_v13, %v11950_v31  ;;  %v7541_v14 = vadd.f32 %v7458_v8, %v7297_v18  ;;  %v17060_v6 = vrot.slane %v17059_v11, 2  ;;  %v12212_v51 = vmul.f32 %v12110_v22, %v11890_v49  ;;  %v17066_v13 = vld [vmem:[#allocation120_spill] sm:$0xff]  ;;  %v17069_v11 = vld [vmem:[#allocation121_spill] sm:$0xff] }
 0x1b6   : > { %v7176_v45 = vsel %vm2760_vm6, %v7173_v20, %v17058_v27  ;;  %v7038_v57 = vadd.f32 %v7006_v46, %v17061_v5  ;;  %v17063_v18 = vrot.slane %v17062_v55, 1  ;;  %v8014_v20 = vsel %vm2837_vm8, %v8012_v19, %v8013_v28  ;;  %v17072_v55 = vld [vmem:[#allocation140_spill] sm:$0xff] }
 0x1b7   : > { %v7420_v25 = vsel %vm2837_vm8, %v7417_v63, %v17060_v6  ;;  %v7609_v31 = vadd.f32 %v7577_v3, %v7541_v14  ;;  %v17065_v7 = vrot.slane %v17064_v32, 2  ;;  %v6498_v63 = vmul.f32 %v10806_v21, %v11341_v26  ;;  %v17074_v32 = vld [vmem:[#allocation141_spill] sm:$0xff] }
 0x1b8   : > { %v7732_v8 = vsel %vm2760_vm6, %v7729_v43, %v17063_v18  ;;  %v17067_v54 = vrot.slane %v17066_v13, 1  ;;  %v17068_v27 = vrot.slane %v17043_v0, 1  ;;  %v7282_v46 = vadd.f32 %v7176_v45, %v7038_v57 }
 0x1b9   : > { %v7976_v47 = vsel %vm2837_vm8, %v7973_v1, %v17065_v7  ;;  %v7853_v14 = vadd.f32 %v7770_v15, %v7609_v31  ;;  %v7562_v43 = vmul.f32 %v10973_v56, %v17042_v35  ;;  %v17070_v19 = vrot.slane %v17069_v11, 2  ;;  %v17077_v7 = vld [vmem:[#allocation151_spill] sm:$0xff] }
 0x1ba   : > { %v6660_v3 = vsel %vm2760_vm6, %v17068_v27, %v17067_v54  ;;  %v17071_v6 = vrot.slane %v17048_v60, 2  ;;  %v7022_v26 = vmul.f32 %v10841_v61, %v11406_v17  ;;  %v17073_v18 = vrot.slane %v17072_v55, 1  ;;  %v17079_v54 = vld [vmem:[#allocation152_spill] sm:$0xff]  ;;  %v17081_v11 = vld [vmem:[#allocation43_spill] sm:$0xff] }
 0x1bb   : > { %v6742_v5 = vadd.f32 %v6660_v3, %v6498_v63  ;;  %v17075_v15 = vrot.slane %v17074_v32, 2  ;;  %v12244_v31 = vadd.f32 %v8014_v20, %v7853_v14  ;;  %v7526_v57 = vadd.f32 %v7420_v25, %v7282_v46  ;;  %v17085_v25 = vld [vmem:[#allocation46_spill] sm:$0xff]  ;;  %v17087_v46 = vld [vmem:[#allocation44_spill] sm:$0xff]  ;;  %v17089_v32 = vld [vmem:[#allocation45_spill] sm:$0xff] }
 0x1bc   : > { %v6904_v1 = vsel %vm2837_vm8, %v17071_v6, %v17070_v19  ;;  %v7216_v0 = vsel %vm2760_vm6, %v7213_v48, %v17073_v18  ;;  %v17078_v13 = vrot.slane %v17077_v7, 1  ;;  %v17080_v63 = vrot.slane %v17079_v54, 2  ;;  %v17083_v6 = vld [vmem:[#allocation41_spill] sm:$0xff]  ;;  %v17090_v7 = vld [vmem:[#allocation67_spill] sm:$0xff] }
 0x1bd   : > { %v7460_v45 = vsel %vm2837_vm8, %v7457_v36, %v17075_v15  ;;  %17076 = vst [vmem:[#allocation123_spill] sm:$0xff] %v12244_v31  ;;  %v12254_v3 = vmul.f32 %v12138_v23, %v11890_v49  ;;  %v6986_v48 = vadd.f32 %v6904_v1, %v6742_v5  ;;  %v17082_v19 = vrot.slane %v17081_v11, 1 }
 0x1be   : > { %v7772_v60 = vsel %vm2760_vm6, %v7769_v30, %v17078_v13  ;;  %v8016_v27 = vsel %vm2837_vm8, %v8013_v28, %v17080_v63  ;;  %v17084_v36 = vrot.slane %v17083_v6, 1  ;;  %v17086_v14 = vrot.slane %v17085_v25, 2 }
 0x1bf   : > { %v17088_v55 = vrot.slane %v17087_v46, 2  ;;  %v7594_v18 = vadd.f32 %v7562_v43, %v7526_v57  ;;  %v7007_v15 = vmul.f32 %v10841_v61, %v17041_v62  ;;  %v12271_v1 = vmul.f32 %v10826_v42, %v17042_v35 }
 0x1c0   : > { %v6623_v20 = vsel %vm2760_vm6, %v17084_v36, %v17082_v19  ;;  %v7054_v5 = vadd.f32 %v7022_v26, %v6986_v48  ;;  %v7177_v13 = vrot.slane %v17090_v7, 1  ;;  %v7321_v54 = vmul.f32 %v10831_v52, %v17041_v62  ;;  %v17091_v48 = vld [vmem:[#allocation66_spill] sm:$0xff] }
 0x1c1   : > { %v6867_v30 = vsel %vm2837_vm8, %v17088_v55, %v17086_v14  ;;  %v6727_v28 = vadd.f32 %v6623_v20, %v17089_v32  ;;  %v12278_v63 = vmul.f32 %v10831_v52, %v17042_v35  ;;  %v7838_v43 = vadd.f32 %v7732_v8, %v7594_v18  ;;  %v17093_v55 = vld [vmem:[#allocation42_spill] sm:$0xff] }
 0x1c2   : > { %v7578_v57 = vmul.f32 %v10973_v56, %v17054_v41  ;;  %v16579_v6 = vrot.slane %v12271_v1, 1  ;;  %v7298_v36 = vadd.f32 %v7216_v0, %v7054_v5  ;;  %v7421_v20 = vrot.slane %v7321_v54, 2 }
 0x1c3   : > { %v6971_v19 = vadd.f32 %v6867_v30, %v6727_v28  ;;  %v7422_v26 = vrot.slane %v12278_v63, 2  ;;  %v7633_v14 = vmul.f32 %v10942_v29, %v17091_v48  ;;  %v12286_v46 = vadd.f32 %v7976_v47, %v7838_v43  ;;  %v17094_v63 = vld [vmem:[#allocation144_spill] sm:$0xff] }
 0x1c4   : > { %v7179_v8 = vsel %vm2760_vm6, %v7177_v13, %v16579_v6  ;;  %v7634_v18 = vmul.f32 %v10942_v29, %v17093_v55  ;;  %v7542_v30 = vadd.f32 %v7460_v45, %v7298_v36  ;;  %v7877_v28 = vmul.f32 %v10945_v34, %v17091_v48  ;;  %v17100_v6 = vld [vmem:[#allocation145_spill] sm:$0xff] }
 0x1c5   : > { %17092 = vst [vmem:[#allocation119_spill] sm:$0xff] %v12286_v46  ;;  %v7039_v62 = vadd.f32 %v7007_v15, %v6971_v19  ;;  %v7423_v32 = vsel %vm2837_vm8, %v7421_v20, %v7422_v26  ;;  %v7733_v0 = vrot.slane %v7633_v14, 1  ;;  %v7563_v47 = vmul.f32 %v10973_v56, %v17091_v48  ;;  %v17096_v19 = vld [vmem:[#allocation143_spill] sm:$0xff]  ;;  %v17098_v20 = vld [vmem:[#allocation146_spill] sm:$0xff] }
 0x1c6   : > { %v7734_v7 = vrot.slane %v7634_v18, 1  ;;  %v7878_v15 = vmul.f32 %v10945_v34, %v17093_v55  ;;  %v7610_v54 = vadd.f32 %v7578_v57, %v7542_v30  ;;  %v7977_v13 = vrot.slane %v7877_v28, 2 }
 0x1c7   : > { %v7283_v5 = vadd.f32 %v7179_v8, %v7039_v62  ;;  %v17095_v43 = vrot.slane %v17094_v63, 1  ;;  %v17097_v45 = vrot.slane %v17096_v19, 1  ;;  %v17099_v14 = vrot.slane %v17098_v20, 2 }
 0x1c8   : > { %v17101_v46 = vrot.slane %v17100_v6, 2  ;;  %v7735_v18 = vsel %vm2760_vm6, %v7733_v0, %v7734_v7  ;;  %v7978_v31 = vrot.slane %v7878_v15, 2  ;;  %v7854_v57 = vadd.f32 %v7772_v60, %v7610_v54 }
 0x1c9   : > { %v6663_v36 = vsel %vm2760_vm6, %v17097_v45, %v17095_v43  ;;  %v7527_v8 = vadd.f32 %v7423_v32, %v7283_v5  ;;  %v7023_v30 = vmul.f32 %v10841_v61, %v17053_v38  ;;  %v7102_v28 = vmul.f32 %v10826_v42, %v17054_v41  ;;  %v17103_v43 = vld [vmem:[#allocation163_spill] sm:$0xff] }
 0x1ca   : > { %v6907_v62 = vsel %vm2837_vm8, %v17101_v46, %v17099_v14  ;;  %v6743_v24 = vadd.f32 %v6663_v36, %v17102_v40  ;;  %v7217_v19 = vrot.slane %v17103_v43, 1  ;;  %v7979_v6 = vsel %vm2837_vm8, %v7977_v13, %v7978_v31 }
 0x1cb   : > { %v7595_v45 = vadd.f32 %v7563_v47, %v7527_v8  ;;  %v7345_v46 = vmul.f32 %v10831_v52, %v17053_v38  ;;  %v12322_v32 = vmul.f32 %v12174_v37, %v11890_v49  ;;  %v12324_v40 = vadd.f32 %v8016_v27, %v7854_v57  ;;  %v17105_v47 = vld [vmem:[#allocation166_spill] sm:$0xff] }
 0x1cc   : > { %v6987_v10 = vadd.f32 %v6907_v62, %v6743_v24  ;;  %v7218_v60 = vrot.slane %v7102_v28, 1  ;;  %v7346_v0 = vmul.f32 %v10831_v52, %v17054_v41  ;;  %v7657_v13 = vmul.f32 %v10942_v29, %v17105_v47  ;;  %v17106_v49 = vld [vmem:[#allocation138_spill] sm:$0xff] }
 0x1cd   : > { %17104 = vst [vmem:[#allocation118_spill] sm:$0xff] %v12324_v40  ;;  %v7839_v5 = vadd.f32 %v7735_v18, %v7595_v45  ;;  %v7461_v54 = vrot.slane %v7345_v46, 2  ;;  %v7579_v38 = vmul.f32 %v10973_v56, %v17105_v47  ;;  %v7658_v27 = vmul.f32 %v10942_v29, %v17106_v49  ;;  %v17109_v46 = vld [vmem:[#allocation31_spill] sm:$0xff] }
 0x1ce   : > { %v7055_v15 = vadd.f32 %v7023_v30, %v6987_v10  ;;  %v7219_v24 = vsel %vm2760_vm6, %v7217_v19, %v7218_v60  ;;  %v7462_v36 = vrot.slane %v7346_v0, 2  ;;  %v7773_v8 = vrot.slane %v7657_v13, 1 }
 0x1cf   : > { %v12335_v14 = vadd.f32 %v7979_v6, %v7839_v5  ;;  %v7901_v10 = vmul.f32 %v10945_v34, %v17105_v47  ;;  %v7774_v57 = vrot.slane %v7658_v27, 1  ;;  %v7902_v30 = vmul.f32 %v10945_v34, %v17106_v49  ;;  %v17112_v27 = vld [vmem:[#allocation32_spill] sm:$0xff] }
 0x1d0   : > { %v7299_v62 = vadd.f32 %v7219_v24, %v7055_v15  ;;  %v7463_v18 = vsel %vm2837_vm8, %v7461_v54, %v7462_v36  ;;  %v6484_v28 = vmul.f32 %v10806_v21, %v17003_v53  ;;  %v17108_v43 = vrot.slane %v11974_v16, 2 }
 0x1d1   : > { %17107 = vst [vmem:[#allocation40_spill] sm:$0xff] %v12335_v14  ;;  %v8017_v6 = vrot.slane %v7901_v10, 2  ;;  %v17110_v0 = vrot.slane %v17109_v46, 1  ;;  %v17111_v5 = vrot.slane %v17081_v11, 1  ;;  %v7775_v54 = vsel %vm2760_vm6, %v7773_v8, %v7774_v57  ;;  %v17115_v10 = vld [vmem:[#allocation50_spill] sm:$0xff]  ;;  %v17118_v46 = vld [vmem:[#allocation51_spill] sm:$0xff] }
 0x1d2   : > { %v12347_v19 = vadd.f32 %v17108_v43, %v12199_v12  ;;  %v7543_v45 = vadd.f32 %v7463_v18, %v7299_v62  ;;  %v8018_v13 = vrot.slane %v7902_v30, 2  ;;  %v17113_v14 = vrot.slane %v17112_v27, 2 }
 0x1d3   : > { %v6625_v15 = vsel %vm2760_vm6, %v17111_v5, %v17110_v0  ;;  %v17114_v53 = vrot.slane %v17085_v25, 2  ;;  %v7008_v62 = vmul.f32 %v10841_v61, %v17042_v35  ;;  %v17116_v18 = vrot.slane %v17115_v10, 1  ;;  %v17124_v10 = vld [vmem:[#allocation136_spill] sm:$0xff] }
 0x1d4   : > { %v6728_v24 = vadd.f32 %v6625_v15, %v6484_v28  ;;  %v7611_v12 = vadd.f32 %v7579_v38, %v7543_v45  ;;  %v17117_v11 = vrot.slane %v12271_v1, 1  ;;  %v17119_v8 = vrot.slane %v17118_v46, 2  ;;  %v17122_v15 = vld [vmem:[#allocation68_spill] sm:$0xff] }
 0x1d5   : > { %v6869_v16 = vsel %vm2837_vm8, %v17114_v53, %v17113_v14  ;;  %v8019_v25 = vsel %vm2837_vm8, %v8017_v6, %v8018_v13  ;;  %v17120_v14 = vld [vmem:[#allocation65_spill] sm:$0xff]  ;;  %v17123_v27 = vrot.slane %v17122_v15, 2  ;;  %v6500_v53 = vmul.f32 %v10806_v21, %v11406_v17 }
 0x1d6   : > { %v7181_v43 = vsel %vm2760_vm6, %v17117_v11, %v17116_v18  ;;  %v7425_v30 = vsel %vm2837_vm8, %v7422_v26, %v17119_v8  ;;  %v6972_v0 = vadd.f32 %v6869_v16, %v6728_v24  ;;  %v17121_v38 = vrot.slane %v17120_v14, 1  ;;  %v17127_v16 = vld [vmem:[#allocation137_spill] sm:$0xff] }
 0x1d7   : > { %v7855_v5 = vadd.f32 %v7775_v54, %v7611_v12  ;;  %v7981_v1 = vsel %vm2837_vm8, %v7978_v31, %v17123_v27  ;;  %v17125_v18 = vrot.slane %v17124_v10, 1  ;;  %v17126_v26 = vrot.slane %v17094_v63, 1  ;;  %v17130_v31 = vld [vmem:[#allocation149_spill] sm:$0xff] }
 0x1d8   : > { %v7737_v45 = vsel %vm2760_vm6, %v7734_v7, %v17121_v38  ;;  %v7040_v6 = vadd.f32 %v7008_v62, %v6972_v0  ;;  %v7564_v24 = vmul.f32 %v10973_v56, %v17093_v55  ;;  %v17128_v7 = vrot.slane %v17127_v16, 2  ;;  %v17133_v62 = vld [vmem:[#allocation150_spill] sm:$0xff]  ;;  %v17135_v27 = vld [vmem:[#allocation165_spill] sm:$0xff] }
 0x1d9   : > { %v6665_v11 = vsel %vm2760_vm6, %v17126_v26, %v17125_v18  ;;  %v17129_v54 = vrot.slane %v17098_v20, 2  ;;  %v17131_v46 = vrot.slane %v17130_v31, 1  ;;  %v12395_v8 = vadd.f32 %v8019_v25, %v7855_v5  ;;  %v17137_v18 = vld [vmem:[#allocation167_spill] sm:$0xff]  ;;  %v17139_v25 = vld [vmem:[#allocation58_spill] sm:$0xff] }
 0x1da   : > { %v6744_v14 = vadd.f32 %v6665_v11, %v6500_v53  ;;  %v7024_v63 = vmul.f32 %v10841_v61, %v17054_v41  ;;  %v17134_v0 = vrot.slane %v17133_v62, 2  ;;  %v7284_v15 = vadd.f32 %v7181_v43, %v7040_v6  ;;  %v17141_v53 = vld [vmem:[#allocation57_spill] sm:$0xff]  ;;  %v17143_v43 = vld [vmem:[#allocation55_spill] sm:$0xff] }
 0x1db   : > { %v6909_v12 = vsel %vm2837_vm8, %v17129_v54, %v17128_v7  ;;  %v7221_v17 = vsel %vm2760_vm6, %v7218_v60, %v17131_v46  ;;  %17132 = vst [vmem:[#allocation134_spill] sm:$0xff] %v12395_v8  ;;  %v17136_v10 = vrot.slane %v17135_v27, 1  ;;  %v17138_v26 = vrot.slane %v17137_v18, 2  ;;  %v17144_v54 = vld [vmem:[#allocation60_spill] sm:$0xff] }
 0x1dc   : > { %v7465_v38 = vsel %vm2837_vm8, %v7462_v36, %v17134_v0  ;;  %v17140_v5 = vrot.slane %v17139_v25, 1  ;;  %v17142_v11 = vrot.slane %v17141_v53, 1  ;;  %v6988_v36 = vadd.f32 %v6909_v12, %v6744_v14 }
 0x1dd   : > { %v12405_v20 = vsel %vm2760_vm6, %v7774_v57, %v17136_v10  ;;  %v12410_v60 = vsel %vm2837_vm8, %v8018_v13, %v17138_v26  ;;  %v17145_v31 = vrot.slane %v17144_v54, 2  ;;  %v17146_v57 = vld [vmem:[#allocation59_spill] sm:$0xff]  ;;  %v7528_v0 = vadd.f32 %v7425_v30, %v7284_v15 }
 0x1de   : > { %v6628_v16 = vsel %vm2760_vm6, %v17142_v11, %v17140_v5  ;;  %v17147_v46 = vrot.slane %v17146_v57, 2  ;;  %v7009_v13 = vmul.f32 %v10841_v61, %v17091_v48  ;;  %v12428_v27 = vmul.f32 %v10826_v42, %v17093_v55  ;;  %v17148_v10 = vld [vmem:[#allocation79_spill] sm:$0xff] }
 0x1df   : > { %v6729_v6 = vadd.f32 %v6628_v16, %v17143_v43  ;;  %v7182_v18 = vrot.slane %v17148_v10, 1  ;;  %v7056_v12 = vadd.f32 %v7024_v63, %v6988_v36  ;;  %v7324_v5 = vmul.f32 %v10831_v52, %v17091_v48 }
 0x1e0   : > { %v6872_v62 = vsel %vm2837_vm8, %v17147_v46, %v17145_v31  ;;  %v12435_v53 = vmul.f32 %v10831_v52, %v17093_v55  ;;  %v7596_v11 = vadd.f32 %v7564_v24, %v7528_v0  ;;  %v7580_v16 = vmul.f32 %v10973_v56, %v17106_v49 }
 0x1e1   : > { %v6973_v14 = vadd.f32 %v6872_v62, %v6729_v6  ;;  %v16583_v43 = vrot.slane %v12428_v27, 1  ;;  %v7300_v57 = vadd.f32 %v7221_v17, %v7056_v12  ;;  %v7426_v36 = vrot.slane %v7324_v5, 2 }
 0x1e2   : > { %17149 = vst [vmem:[#allocation39_spill] sm:$0xff] %v12435_v53  ;;  %v16582_v6 = vrot.slane %v12435_v53, 2  ;;  %v17150_v46 = vcombine.high %v17014_v44, %v17014_v44 }
 0x1e3   : > { %v7041_v63 = vadd.f32 %v7009_v13, %v6973_v14  ;;  %v7184_v24 = vsel %vm2760_vm6, %v7182_v18, %v16583_v43  ;;  %v7544_v0 = vadd.f32 %v7465_v38, %v7300_v57  ;;  %v17151_v13 = vld [vmem:[#allocation80_spill] sm:$0xff] }
 0x1e4   : > { %v7428_v17 = vsel %vm2837_vm8, %v7426_v36, %v16582_v6  ;;  %v12453_v12 = vmul.f32 %v10942_v29, %v17151_v13 }
 0x1e9   : > { %v1629_v26 = vpop.f32.mrb[34].mxu0 }
 0x1ea   : > { %v1630_v30 = vadd.f32 %v1629_v26, %v17014_v44  ;;  %v9915_v15 = vpop.f32.mrb[35].mxu0  ;;  %v7840_v26 = vadd.f32 %v7737_v45, %v7596_v11  ;;  %v12460_v45 = vmul.f32 %v10973_v56, %v17151_v13 }
 0x1eb   : > { %v1702_v31 = vpop.f32.mrb[10].mxu1  ;;  %v7285_v15 = vadd.f32 %v7184_v24, %v7041_v63 }
 0x1ec   : > { %v1861_v48 = vrot.slane %v1630_v30, 7  ;;  %v1703_v62 = vadd.f32 %v1702_v31, %v17150_v46  ;;  %v9920_v10 = vpop.f32.mrb[11].mxu1  ;;  %v12456_v5 = vadd.f32 %v7981_v1, %v7840_v26  ;;  %v12463_v30 = vadd.f32 %v7580_v16, %v7544_v0  ;;  %v17153_v31 = vld [vmem:[#allocation56_spill] sm:$0xff] }
 0x1ed   : > { %v12465_v11 = vadd.f32 %v7428_v17, %v7285_v15  ;;  %v12469_v57 = vmul.f32 %v10942_v29, %v17153_v31 }
 0x1ee   : > { %v1872_v14 = vsel %vm1870_vm5, 0.0, %v1861_v48  ;;  %v1862_v44 = vrot.slane %v1703_v62, 7  ;;  %17152 = vst [vmem:[#allocation21_spill] sm:$0xff] %v12456_v5 }
 0x1ef   : > { %v1878_v38 = vsel %vm1876_vm10, %v1872_v14, 0.0  ;;  %v1775_v18 = vpop.f32.mrb[12].mxu1 }
 0x1f0   : > { %v1895_v63 = vmul.f32 %v11880_v50, %v1878_v38  ;;  %v1919_v1 = vmul.f32 %v11929_v4, %v1878_v38  ;;  %v1942_v36 = vmul.f32 %v11953_v2, %v1878_v38  ;;  %v9925_v48 = vpop.f32.mrb[13].mxu1  ;;  %v1954_v62 = vmul.f32 %v11956_v59, %v1878_v38 }
 0x1f1   : > { %v1978_v16 = vmul.f32 %v11960_v39, %v1878_v38  ;;  %v1873_v10 = vsel %vm1870_vm5, 0.0, %v1862_v44  ;;  %v1776_v26 = vadd.f32 %v1775_v18, %v17016_v9  ;;  %v1887_v24 = vmul.f32 %v11904_v58, %v1878_v38 }
 0x1f2   : > { %v1903_v0 = vrot.slane %v1895_v63, 1  ;;  %v1946_v15 = vadd.f32 %v1942_v36, %v12347_v19  ;;  %v1879_v17 = vsel %vm1876_vm10, %v1873_v10, 0.0  ;;  %v1927_v14 = vrot.slane %v1919_v1, 2 }
 0x1f3   : > { %v1962_v6 = vrot.slane %v1954_v62, 1  ;;  %v1986_v48 = vrot.slane %v1978_v16, 2  ;;  %v1896_v43 = vmul.f32 %v11880_v50, %v1879_v17  ;;  %v1848_v7 = vpop.f32.mrb[14].mxu1  ;;  %v1888_v46 = vmul.f32 %v11904_v58, %v1879_v17 }
 0x1f4   : > { %v1911_v28 = vadd.f32 %v1903_v0, %v1887_v24  ;;  %v1920_v44 = vmul.f32 %v11929_v4, %v1879_v17  ;;  %v1955_v18 = vmul.f32 %v11956_v59, %v1879_v17  ;;  %v9930_v5 = vpop.f32.mrb[15].mxu1  ;;  %v1943_v19 = vmul.f32 %v11953_v2, %v1879_v17 }
 0x1f5   : > { %v1970_v38 = vadd.f32 %v1962_v6, %v1946_v15  ;;  %v1904_v63 = vrot.slane %v1896_v43, 1  ;;  %v1863_v36 = vrot.slane %v1776_v26, 7  ;;  %v1979_v62 = vmul.f32 %v11960_v39, %v1879_v17 }
 0x1f6   : > { %v1935_v10 = vadd.f32 %v1927_v14, %v1911_v28  ;;  %v1928_v1 = vrot.slane %v1920_v44, 2  ;;  %v17154_v16 = vcombine.high %v17016_v9, %v17016_v9  ;;  %v1963_v8 = vrot.slane %v1955_v18, 1 }
 0x1f7   : > { %v1994_v0 = vadd.f32 %v1986_v48, %v1970_v38  ;;  %v1874_v40 = vsel %vm1870_vm5, 0.0, %v1863_v36  ;;  %v1912_v41 = vadd.f32 %v1904_v63, %v1888_v46  ;;  %v2002_v5 = vmul.f32 %v12110_v22, %v1879_v17 }
 0x1f8   : > { %v1849_v24 = vadd.f32 %v1848_v7, %v17154_v16  ;;  %v1947_v53 = vadd.f32 %v1943_v19, %v1935_v10  ;;  %v1880_v6 = vsel %vm1876_vm10, %v1874_v40, 0.0  ;;  %v2014_v14 = vmul.f32 %v12138_v23, %v1879_v17 }
 0x1f9   : > { %v1897_v28 = vmul.f32 %v11880_v50, %v1880_v6  ;;  %v1921_v26 = vmul.f32 %v11929_v4, %v1880_v6  ;;  %v1936_v15 = vadd.f32 %v1928_v1, %v1912_v41  ;;  %v1944_v7 = vmul.f32 %v11953_v2, %v1880_v6 }
 0x1fa   : > { %v1864_v43 = vrot.slane %v1849_v24, 7  ;;  %v1956_v48 = vmul.f32 %v11956_v59, %v1880_v6  ;;  %v1980_v46 = vmul.f32 %v11960_v39, %v1880_v6  ;;  %v1889_v44 = vmul.f32 %v11904_v58, %v1880_v6 }
 0x1fb   : > { %v1905_v18 = vrot.slane %v1897_v28, 1  ;;  %v2006_v38 = vadd.f32 %v2002_v5, %v1994_v0  ;;  %v1929_v50 = vrot.slane %v1921_v26, 2  ;;  %v1948_v63 = vadd.f32 %v1944_v7, %v1936_v15 }
 0x1fc   : > { %v1875_v9 = vsel %vm1870_vm5, 0.0, %v1864_v43  ;;  %v1964_v41 = vrot.slane %v1956_v48, 1  ;;  %v1988_v1 = vrot.slane %v1980_v46, 2  ;;  %v2022_v5 = vrot.slane %v2014_v14, 1 }
 0x1fd   : > { %v1881_v40 = vsel %vm1876_vm10, %v1875_v9, 0.0  ;;  %v1913_v19 = vadd.f32 %v1905_v18, %v1889_v44  ;;  %v2038_v26 = vmul.f32 %v12174_v37, %v1879_v17  ;;  %v1987_v46 = vrot.slane %v1979_v62, 2 }
 0x1fe   : > { %v1957_v4 = vmul.f32 %v11956_v59, %v1881_v40  ;;  %v1945_v36 = vmul.f32 %v11953_v2, %v1881_v40  ;;  %v1981_v10 = vmul.f32 %v11960_v39, %v1881_v40  ;;  %v1972_v16 = vadd.f32 %v1964_v41, %v1948_v63 }
 0x1ff   : > { %v2004_v24 = vmul.f32 %v12110_v22, %v1881_v40  ;;  %v2016_v43 = vmul.f32 %v12138_v23, %v1881_v40  ;;  %v2040_v58 = vmul.f32 %v12174_v37, %v1881_v40  ;;  %v1937_v28 = vadd.f32 %v1929_v50, %v1913_v19 }
 0x200   : > { %v1965_v0 = vrot.slane %v1957_v4, 1  ;;  %v1989_v59 = vrot.slane %v1981_v10, 2  ;;  %v1996_v15 = vadd.f32 %v1988_v1, %v1972_v16  ;;  %v1971_v2 = vadd.f32 %v1963_v8, %v1947_v53 }
 0x201   : > { %v2024_v9 = vrot.slane %v2016_v43, 1  ;;  %v1949_v7 = vadd.f32 %v1945_v36, %v1937_v28  ;;  %v2030_v39 = vadd.f32 %v2022_v5, %v2006_v38  ;;  %v2046_v48 = vrot.slane %v2038_v26, 2 }
 0x202   : > { %v2008_v44 = vadd.f32 %v2004_v24, %v1996_v15  ;;  %v2048_v18 = vrot.slane %v2040_v58, 2  ;;  %v2015_v63 = vmul.f32 %v12138_v23, %v1880_v6  ;;  %v2039_v40 = vmul.f32 %v12174_v37, %v1880_v6 }
 0x203   : > { %v1973_v50 = vadd.f32 %v1965_v0, %v1949_v7  ;;  %v2054_v4 = vadd.f32 %v2046_v48, %v2030_v39  ;;  %v1995_v14 = vadd.f32 %v1987_v46, %v1971_v2  ;;  %v2003_v17 = vmul.f32 %v12110_v22, %v1880_v6  ;;  %v17159_v39 = vld [vmem:[#allocation156_spill] sm:$0xff]  ;;  %v17161_v46 = vld [vmem:[#allocation155_spill] sm:$0xff] }
 0x204   : > { %v2032_v41 = vadd.f32 %v2024_v9, %v2008_v44  ;;  %v2023_v19 = vrot.slane %v2015_v63, 1  ;;  %v2047_v10 = vrot.slane %v2039_v40, 2  ;;  %v7856_v8 = vadd.f32 %v12405_v20, %v12463_v30  ;;  %v17165_v40 = vld [vmem:[#allocation157_spill] sm:$0xff] }
 0x205   : > { %v1997_v53 = vadd.f32 %v1989_v59, %v1973_v50  ;;  %v2058_v38 = vmax.f32 %v2054_v4, 0.0  ;;  %v2007_v62 = vadd.f32 %v2003_v17, %v1995_v14  ;;  %v7597_v36 = vadd.f32 %v12460_v45, %v12465_v11  ;;  %v17168_v17 = vld [vmem:[#allocation158_spill] sm:$0xff] }
 0x206   : > { %v2056_v23 = vadd.f32 %v2048_v18, %v2032_v41  ;;  %v12518_v37 = vadd.f32 %v12410_v60, %v7856_v8  ;;  %v7739_v1 = vrot.slane %v12469_v57, 1  ;;  %v7880_v22 = vmul.f32 %v10945_v34, %v17151_v13 }
 0x207   : > { %v2009_v6 = vadd.f32 %v12212_v51, %v1997_v53  ;;  %v2062_v16 = vmul.f32 0.25, %v2058_v38  ;;  %v2065_v24 = vmul.f32 0.75, %v2058_v38  ;;  %v2031_v20 = vadd.f32 %v2023_v19, %v2007_v62  ;;  %v12536_v51 = vld [vmem:[%s16327_s11] sm:$0xff] }
 0x208   : > { %17155 = vst [vmem:[#allocation26_spill] sm:$0xff] %v12518_v37  ;;  %v2060_v30 = vmax.f32 %v2056_v23, 0.0  ;;  %v17156_v45 = vrot.slane %v12453_v12, 1  ;;  %v12531_v60 = vmul.f32 %v10945_v34, %v17153_v31  ;;  %v17157_v28 = vrot.slane %v12254_v3, 1  ;;  %v17163_v3 = vld [vmem:[#allocation159_spill] sm:$0xff] }
 0x209   : > { %v2069_v43 = vadd.f32 %v2065_v24, %v2062_v16  ;;  %v2055_v58 = vadd.f32 %v2047_v10, %v2031_v20  ;;  %v7982_v12 = vrot.slane %v7880_v22, 2  ;;  %v17158_v2 = vrot.slane %v12322_v32, 2  ;;  %v17169_v10 = vld [vmem:[#allocation177_spill] sm:$0xff] }
 0x20a   : > { %v7740_v11 = vsel %vm2760_vm6, %v17156_v45, %v7739_v1  ;;  %v2033_v0 = vadd.f32 %v17157_v28, %v2009_v6  ;;  %v2064_v26 = vmul.f32 0.25, %v2060_v30  ;;  %v2067_v59 = vmul.f32 0.75, %v2060_v30 }
 0x20b   : > { %v7841_v5 = vadd.f32 %v7740_v11, %v7597_v36  ;;  %v7983_v15 = vrot.slane %v12531_v60, 2  ;;  %9932 = vmatpush3.msk.msra.mxu1 %vm2083_vm11, %v2069_v43  ;;  %v2059_v9 = vmax.f32 %v2055_v58, 0.0  ;;  %v17160_v48 = vrot.slane %v17159_v39, 1  ;;  %v17171_v58 = vld [vmem:[#allocation191_spill] sm:$0xff] }
 0x20c   : > { %v2057_v7 = vadd.f32 %v17158_v2, %v2033_v0  ;;  %v17162_v44 = vrot.slane %v17161_v46, 1  ;;  %v17164_v63 = vrot.slane %v17163_v3, 2  ;;  %v17166_v50 = vrot.slane %v17165_v40, 2  ;;  %9934 = vmatmul.mubr.msk.f32.vlgmr.msra.gmra.mrb[16].mxu1 %vm2079_vm12, %v12536_v51 }
 0x20d   : > { %v17167_v14 = vmov 0.0   ;;  %v7984_v32 = vsel %vm2837_vm8, %v7982_v12, %v7983_v15  ;;  %v7025_v19 = vmul.f32 %v10841_v61, %v17105_v47  ;;  %v7222_v8 = vrot.slane %v17169_v10, 1 }
 0x20e   : > { %v6668_v18 = vsel %vm2760_vm6, %v17162_v44, %v17160_v48  ;;  %v6912_v4 = vsel %vm2837_vm8, %v17166_v50, %v17164_v63  ;;  %9936 = vmatprep.subr.mxu1 %v17167_v14  ;;  %v2063_v53 = vmul.f32 0.25, %v2059_v9  ;;  %9938 = vmatprep.mubr.msk.f32.mxu1 %vm10432_vm0, %v17167_v14  ;;  %v2066_v38 = vmul.f32 0.75, %v2059_v9  ;;  %v17172_v9 = vld [vmem:[#allocation190_spill] sm:$0xff]  ;;  %v17173_v44 = vld [vmem:[#allocation181_spill] sm:$0xff]  ;;  %v17174_v63 = vld [vmem:[#allocation208_spill] sm:$0xff] }
 0x20f   : > { %v6745_v41 = vadd.f32 %v6668_v18, %v17168_v17  ;;  %v2061_v62 = vmax.f32 %v2057_v7, 0.0  ;;  %v12566_v36 = vadd.f32 %v7984_v32, %v7841_v5  ;;  %v12570_v22 = vmul.f32 %v10826_v42, %v17106_v49  ;;  %v17175_v32 = vld [vmem:[#allocation154_spill] sm:$0xff] }
 0x210   : > { %v7348_v6 = vmul.f32 %v10831_v52, %v17105_v47  ;;  %v12576_v20 = vmul.f32 %v10831_v52, %v17106_v49  ;;  %v2074_v30 = vadd.f32 %v2065_v24, %v2063_v53  ;;  %v2070_v45 = vadd.f32 %v2066_v38, %v2062_v16 }
 0x211   : > { %17170 = vst [vmem:[#allocation37_spill] sm:$0xff] %v12566_v36  ;;  %v6989_v23 = vadd.f32 %v6912_v4, %v6745_v41  ;;  %v2075_v11 = vadd.f32 %v2066_v38, %v2064_v26  ;;  %v2071_v43 = vadd.f32 %v2067_v59, %v2063_v53  ;;  %v12580_v28 = vmul.f32 %v10942_v29, %v17171_v58  ;;  %v17176_v53 = vld [vmem:[#allocation48_spill] sm:$0xff] }
 0x212   : > { %v2073_v0 = vmul.f32 0.25, %v2061_v62  ;;  %v2068_v5 = vmul.f32 0.75, %v2061_v62  ;;  %v12584_v2 = vmul.f32 %v10942_v29, %v17172_v9  ;;  %9937 = vmatpush3.msk.msra.mxu1 %vm2083_vm11, %v2074_v30  ;;  %v7223_v47 = vrot.slane %v12570_v22, 1  ;;  %v17179_v22 = vld [vmem:[#allocation49_spill] sm:$0xff] }
 0x213   : > { %v7057_v12 = vadd.f32 %v7025_v19, %v6989_v23  ;;  %v7466_v7 = vrot.slane %v7348_v6, 2  ;;  %v7467_v16 = vrot.slane %v12576_v20, 2  ;;  %9939 = vmatmul.mubr.msk.f32.vlgmr.msra.gmra.mrb[18].mxu1 %vm2079_vm12, %v12536_v51  ;;  %9941 = vmatprep.subr.mxu1 %v17167_v14  ;;  %v7581_v18 = vmul.f32 %v10973_v56, %v17173_v44 }
 0x214   : > { %v12593_v48 = vadd.f32 %v2073_v0, %v2067_v59  ;;  %v12595_v46 = vadd.f32 %v2068_v5, %v2064_v26  ;;  %9942 = vmatpush3.msk.msra.mxu1 %vm2083_vm11, %v2070_v45  ;;  %9943 = vmatprep.mubr.msk.f32.mxu1 %vm10432_vm0, %v17167_v14  ;;  %v7224_v50 = vsel %vm2760_vm6, %v7222_v8, %v7223_v47  ;;  %v17177_v38 = vrot.slane %v17176_v53, 1  ;;  %v17183_v53 = vld [vmem:[#allocation63_spill] sm:$0xff] }
 0x215   : > { %v7468_v4 = vsel %vm2837_vm8, %v7466_v7, %v7467_v16  ;;  %v7660_v59 = vmul.f32 %v10942_v29, %v17173_v44  ;;  %9946 = vmatprep.subr.mxu1 %v17167_v14  ;;  %v7301_v26 = vadd.f32 %v7224_v50, %v7057_v12  ;;  %v7661_v17 = vmul.f32 %v10942_v29, %v17175_v32 }
 0x216   : > { %v7904_v41 = vmul.f32 %v10945_v34, %v17173_v44  ;;  %v7905_v19 = vmul.f32 %v10945_v34, %v17175_v32  ;;  %v6486_v8 = vmul.f32 %v10806_v21, %v17042_v35  ;;  %v17178_v62 = vrot.slane %v17139_v25, 1  ;;  %v17182_v35 = vld [vmem:[#allocation210_spill] sm:$0xff] }
 0x217   : > { %v7778_v10 = vrot.slane %v7660_v59, 1  ;;  %v17180_v6 = vrot.slane %v17179_v22, 2  ;;  %v17181_v20 = vrot.slane %v17144_v54, 2  ;;  %9944 = vmatmul.mubr.msk.f32.vlgmr.msra.gmra.mrb[20].mxu1 %vm2079_vm12, %v12536_v51  ;;  %v7545_v45 = vadd.f32 %v7468_v4, %v7301_v26  ;;  %v17188_v22 = vld [vmem:[#allocation39_spill] sm:$0xff] }
 0x218   : > { %v6630_v23 = vsel %vm2760_vm6, %v17178_v62, %v17177_v38  ;;  %v7779_v12 = vrot.slane %v7661_v17, 1  ;;  %v8022_v7 = vrot.slane %v7904_v41, 2  ;;  %v8023_v50 = vrot.slane %v7905_v19, 2  ;;  %9947 = vmatpush3.msk.msra.mxu1 %vm2083_vm11, %v2075_v11  ;;  %9948 = vmatprep.mubr.msk.f32.mxu1 %vm10432_vm0, %v17167_v14  ;;  %v17186_v41 = vld [vmem:[#allocation64_spill] sm:$0xff] }
 0x219   : > { %v6874_v30 = vsel %vm2837_vm8, %v17181_v20, %v17180_v6  ;;  %v6730_v25 = vadd.f32 %v6630_v23, %v6486_v8  ;;  %v7010_v54 = vmul.f32 %v10841_v61, %v17093_v55  ;;  %v17184_v38 = vrot.slane %v17183_v53, 1  ;;  %9951 = vmatprep.subr.mxu1 %v17167_v14  ;;  %v17190_v53 = vld [vmem:[#allocation81_spill] sm:$0xff] }
 0x21a   : > { %v17185_v62 = vrot.slane %v12428_v27, 1  ;;  %v7613_v26 = vadd.f32 %v7581_v18, %v7545_v45  ;;  %v7780_v17 = vsel %vm2760_vm6, %v7778_v10, %v7779_v12  ;;  %v8024_v11 = vsel %vm2837_vm8, %v8022_v7, %v8023_v50  ;;  %v17192_v18 = vld [vmem:[#allocation82_spill] sm:$0xff] }
 0x21b   : > { %v17187_v19 = vrot.slane %v17186_v41, 2  ;;  %v17189_v8 = vrot.slane %v17188_v22, 2  ;;  %v12647_v6 = vadd.f32 %v2073_v0, %v2068_v5  ;;  %v6974_v20 = vadd.f32 %v6874_v30, %v6730_v25  ;;  %9949 = vmatmul.mubr.msk.f32.vlgmr.msra.gmra.mrb[22].mxu1 %vm2079_vm12, %v12536_v51  ;;  %v17195_v5 = vld [vmem:[#allocation147_spill] sm:$0xff] }
 0x21c   : > { %v7186_v4 = vsel %vm2760_vm6, %v17185_v62, %v17184_v38  ;;  %v17191_v27 = vrot.slane %v17190_v53, 1  ;;  %v17193_v45 = vrot.slane %v17192_v18, 2  ;;  %v7857_v7 = vadd.f32 %v7780_v17, %v7613_v26  ;;  %v17194_v62 = vld [vmem:[#allocation130_spill] sm:$0xff]  ;;  %9952 = vmatpush3.msk.msra.mxu1 %vm2083_vm11, %v2071_v43  ;;  %9953 = vmatprep.mubr.msk.f32.mxu1 %vm10432_vm0, %v17167_v14  ;;  %v17205_v43 = vld [vmem:[#allocation164_spill] sm:$0xff] }
 0x21d   : > { %v7430_v23 = vsel %vm2837_vm8, %v17189_v8, %v17187_v19  ;;  %v6502_v0 = vmul.f32 %v10806_v21, %v17194_v62  ;;  %v17196_v30 = vrot.slane %v17195_v5, 1  ;;  %v17197_v25 = vrot.slane %v17159_v39, 1  ;;  %v17202_v39 = vld [vmem:[#allocation162_spill] sm:$0xff]  ;;  %9956 = vmatprep.subr.mxu1 %v17167_v14 }
 0x21e   : > { %v7742_v38 = vsel %vm2760_vm6, %v7739_v1, %v17191_v27  ;;  %v7986_v10 = vsel %vm2837_vm8, %v7983_v15, %v17193_v45  ;;  %v17198_v1 = vld [vmem:[#allocation148_spill] sm:$0xff]  ;;  %v17200_v19 = vrot.slane %v17163_v3, 2  ;;  %v17201_v15 = vld [vmem:[#allocation211_spill] sm:$0xff]  ;;  %v7042_v26 = vadd.f32 %v7010_v54, %v6974_v20 }
 0x21f   : > { %v6670_v57 = vsel %vm2760_vm6, %v17197_v25, %v17196_v30  ;;  %v17199_v41 = vrot.slane %v17198_v1, 2  ;;  %v7566_v17 = vmul.f32 %v10973_v56, %v17153_v31  ;;  %v17203_v8 = vrot.slane %v17202_v39, 1  ;;  %v17207_v20 = vld [vmem:[#allocation179_spill] sm:$0xff]  ;;  %v17209_v25 = vld [vmem:[#allocation180_spill] sm:$0xff]  ;;  %9954 = vmatmul.mubr.msk.f32.vlgmr.msra.gmra.mrb[24].mxu1 %vm2079_vm12, %v12536_v51 }
 0x220   : > { %v12683_v3 = vadd.f32 %v8024_v11, %v7857_v7  ;;  %v6746_v27 = vadd.f32 %v6670_v57, %v6502_v0  ;;  %v7026_v18 = vmul.f32 %v10841_v61, %v17106_v49  ;;  %v17206_v45 = vrot.slane %v17205_v43, 2  ;;  %v17211_v11 = vld [vmem:[#allocation71_spill] sm:$0xff]  ;;  %v17213_v0 = vld [vmem:[#allocation70_spill] sm:$0xff]  ;;  %9957 = vmatpush3.msk.msra.mxu1 %vm2083_vm11, %v12593_v48  ;;  %9958 = vmatprep.mubr.msk.f32.mxu1 %vm10432_vm0, %v17167_v14 }
 0x221   : > { %v6914_v60 = vsel %vm2837_vm8, %v17200_v19, %v17199_v41  ;;  %v7226_v53 = vsel %vm2760_vm6, %v7223_v47, %v17203_v8  ;;  %v7286_v54 = vadd.f32 %v7186_v4, %v7042_v26  ;;  %v17208_v5 = vrot.slane %v17207_v20, 1  ;;  %v17215_v19 = vld [vmem:[#allocation78_spill] sm:$0xff]  ;;  %v17216_v26 = vld [vmem:[#allocation73_spill] sm:$0xff]  ;;  %v17218_v8 = vld [vmem:[#allocation72_spill] sm:$0xff]  ;;  %9961 = vmatprep.subr.mxu1 %v17167_v14 }
 0x222   : > { %17204 = vst [vmem:[#allocation38_spill] sm:$0xff] %v12683_v3  ;;  %v7470_v62 = vsel %vm2837_vm8, %v7467_v16, %v17206_v45  ;;  %v17210_v1 = vrot.slane %v17209_v25, 2  ;;  %v17212_v7 = vrot.slane %v17211_v11, 1  ;;  %v17214_v57 = vrot.slane %v17213_v0, 1  ;;  %v17220_v20 = vld [vmem:[#allocation89_spill] sm:$0xff]  ;;  %v17221_v0 = vld [vmem:[#allocation95_spill] sm:$0xff] }
 0x223   : > { %v7782_v30 = vsel %vm2760_vm6, %v7779_v12, %v17208_v5  ;;  %v6990_v16 = vadd.f32 %v6914_v60, %v6746_v27  ;;  %v7582_v4 = vmul.f32 %v10973_v56, %v17175_v32  ;;  %v17217_v39 = vrot.slane %v17216_v26, 2  ;;  %9959 = vmatmul.mubr.msk.f32.vlgmr.msra.gmra.mrb[26].mxu1 %vm2079_vm12, %v12536_v51 }
 0x224   : > { %v12696_v47 = vsel %vm2837_vm8, %v8023_v50, %v17210_v1  ;;  %v6633_v41 = vsel %vm2760_vm6, %v17214_v57, %v17212_v7  ;;  %v17219_v50 = vrot.slane %v17218_v8, 2  ;;  %v7530_v45 = vadd.f32 %v7430_v23, %v7286_v54  ;;  %9962 = vmatpush3.msk.msra.mxu1 %vm2083_vm11, %v12595_v46  ;;  %9963 = vmatprep.mubr.msk.f32.mxu1 %vm10432_vm0, %v17167_v14 }
 0x225   : > { %v6731_v12 = vadd.f32 %v6633_v41, %v17215_v19  ;;  %v7011_v60 = vmul.f32 %v10841_v61, %v17151_v13  ;;  %v12721_v27 = vmul.f32 %v10826_v42, %v17153_v31  ;;  %v7187_v5 = vrot.slane %v17220_v20, 1  ;;  %9966 = vmatprep.subr.mxu1 %v17167_v14 }
 0x226   : > { %v6877_v43 = vsel %vm2837_vm8, %v17219_v50, %v17217_v39  ;;  %v7058_v25 = vadd.f32 %v7026_v18, %v6990_v16  ;;  %v7327_v48 = vmul.f32 %v10831_v52, %v17151_v13  ;;  %v12729_v7 = vmul.f32 %v10831_v52, %v17153_v31  ;;  %v17222_v39 = vld [vmem:[#allocation69_spill] sm:$0xff] }
 0x227   : > { %v6975_v1 = vadd.f32 %v6877_v43, %v6731_v12  ;;  %v7598_v23 = vadd.f32 %v7566_v17, %v7530_v45  ;;  %v7188_v54 = vrot.slane %v12721_v27, 1  ;;  %v7567_v57 = vmul.f32 %v10973_v56, %v17221_v0  ;;  %9964 = vmatmul.mubr.msk.f32.vlgmr.msra.gmra.mrb[28].mxu1 %vm2079_vm12, %v12536_v51 }
 0x228   : > { %v7639_v41 = vmul.f32 %v10942_v29, %v17221_v0  ;;  %v7302_v18 = vadd.f32 %v7226_v53, %v7058_v25  ;;  %v7431_v19 = vrot.slane %v7327_v48, 2  ;;  %v7432_v13 = vrot.slane %v12729_v7, 2  ;;  %9967 = vmatpush3.msk.msra.mxu1 %vm2083_vm11, %v12647_v6  ;;  %9968 = vmatprep.mubr.msk.f32.mxu1 %vm10432_vm0, %v17167_v14 }
 0x229   : > { %v7043_v16 = vadd.f32 %v7011_v60, %v6975_v1  ;;  %v7842_v17 = vadd.f32 %v7742_v38, %v7598_v23  ;;  %v7189_v12 = vsel %vm2760_vm6, %v7187_v5, %v7188_v54  ;;  %v12748_v8 = vmul.f32 %v10942_v29, %v17222_v39  ;;  %v17224_v5 = vld [vmem:[#allocation171_spill] sm:$0xff]  ;;  %v17226_v1 = vld [vmem:[#allocation169_spill] sm:$0xff] }
 0x22a   : > { %v7743_v53 = vrot.slane %v7639_v41, 1  ;;  %v7546_v50 = vadd.f32 %v7470_v62, %v7302_v18  ;;  %v7433_v46 = vsel %vm2837_vm8, %v7431_v19, %v7432_v13  ;;  %v7883_v38 = vmul.f32 %v10945_v34, %v17221_v0 }
 0x22b   : > { %v7287_v43 = vadd.f32 %v7189_v12, %v7043_v16  ;;  %v12756_v45 = vadd.f32 %v7986_v10, %v7842_v17  ;;  %v7744_v60 = vrot.slane %v12748_v8, 1  ;;  %v7884_v20 = vmul.f32 %v10945_v34, %v17222_v39  ;;  %v17228_v16 = vld [vmem:[#allocation170_spill] sm:$0xff]  ;;  %v17229_v12 = vld [vmem:[#allocation173_spill] sm:$0xff]  ;;  %9969 = vmatmul.mubr.msk.f32.vlgmr.msra.gmra.mrb[30].mxu1 %vm2079_vm12, %v12536_v51  ;;  %v17238_v51 = vld [vmem:[#allocation104_spill] sm:$0xff] }
 0x22c   : > { %v17225_v25 = vrot.slane %v17224_v5, 1  ;;  %v17227_v48 = vrot.slane %v17226_v1, 1  ;;  %v7614_v23 = vadd.f32 %v7582_v4, %v7546_v50  ;;  %v7987_v18 = vrot.slane %v7883_v38, 2  ;;  %v17233_v4 = vld [vmem:[#allocation189_spill] sm:$0xff] }
 0x22d   : > { %17223 = vst [vmem:[#allocation109_spill] sm:$0xff] %v12756_v45  ;;  %v7531_v41 = vadd.f32 %v7433_v46, %v7287_v43  ;;  %v7745_v19 = vsel %vm2760_vm6, %v7743_v53, %v7744_v60  ;;  %v7988_v17 = vrot.slane %v7884_v20, 2  ;;  %v17230_v8 = vrot.slane %v17229_v12, 2 }
 0x22e   : > { %v6673_v62 = vsel %vm2760_vm6, %v17227_v48, %v17225_v25  ;;  %v17231_v25 = vld [vmem:[#allocation172_spill] sm:$0xff]  ;;  %v7227_v50 = vrot.slane %v17233_v4, 1  ;;  %v7858_v43 = vadd.f32 %v7782_v30, %v7614_v23  ;;  %v7027_v6 = vmul.f32 %v10841_v61, %v17173_v44 }
 0x22f   : > { %v6747_v10 = vadd.f32 %v6673_v62, %v17228_v16  ;;  %v17232_v1 = vrot.slane %v17231_v25, 2  ;;  %v7599_v46 = vadd.f32 %v7567_v57, %v7531_v41  ;;  %v7989_v62 = vsel %vm2837_vm8, %v7987_v18, %v7988_v17 }
 0x230   : > { %v7108_v14 = vmul.f32 %v10826_v42, %v17175_v32  ;;  %v7351_v53 = vmul.f32 %v10831_v52, %v17173_v44  ;;  %v7352_v20 = vmul.f32 %v10831_v52, %v17175_v32  ;;  %v12791_v16 = vmul.f32 %v10945_v34, %v17171_v58 }
 0x231   : > { %v6917_v48 = vsel %vm2837_vm8, %v17232_v1, %v17230_v8  ;;  %v12796_v30 = vadd.f32 %v12696_v47, %v7858_v43  ;;  %v7843_v57 = vadd.f32 %v7745_v19, %v7599_v46  ;;  %v17235_v8 = vld [vmem:[#allocation198_spill] sm:$0xff]  ;;  %v17237_v1 = vld [vmem:[#allocation168_spill] sm:$0xff]  ;;  %v7192_v40 = vrot.slane %v17238_v51, 1 }
 0x232   : > { %v6991_v38 = vadd.f32 %v6917_v48, %v6747_v10  ;;  %v7228_v41 = vrot.slane %v7108_v14, 1  ;;  %v7471_v18 = vrot.slane %v7351_v53, 2  ;;  %v7472_v10 = vrot.slane %v7352_v20, 2 }
 0x233   : > { %17234 = vst [vmem:[#allocation110_spill] sm:$0xff] %v12796_v30  ;;  %v7663_v44 = vmul.f32 %v10942_v29, %v17235_v8  ;;  %v12800_v25 = vadd.f32 %v7989_v62, %v7843_v57  ;;  %v7664_v48 = vmul.f32 %v10942_v29, %v17237_v1  ;;  %v7907_v4 = vmul.f32 %v10945_v34, %v17235_v8  ;;  %v17239_v57 = vld [vmem:[#allocation61_spill] sm:$0xff] }
 0x234   : > { %v7059_v23 = vadd.f32 %v7027_v6, %v6991_v38  ;;  %v7229_v47 = vsel %vm2760_vm6, %v7227_v50, %v7228_v41  ;;  %v7473_v19 = vsel %vm2837_vm8, %v7471_v18, %v7472_v10  ;;  %v7908_v46 = vmul.f32 %v10945_v34, %v17237_v1 }
 0x235   : > { %17236 = vst [vmem:[#allocation122_spill] sm:$0xff] %v12800_v25  ;;  %v7783_v43 = vrot.slane %v7663_v44, 1  ;;  %v7583_v6 = vmul.f32 %v10973_v56, %v17235_v8  ;;  %v7784_v62 = vrot.slane %v7664_v48, 1  ;;  %v8027_v14 = vrot.slane %v7907_v4, 2  ;;  %v17242_v44 = vld [vmem:[#allocation62_spill] sm:$0xff]  ;;  %v17245_v4 = vld [vmem:[#allocation76_spill] sm:$0xff] }
 0x236   : > { %v7303_v38 = vadd.f32 %v7229_v47, %v7059_v23  ;;  %v8028_v53 = vrot.slane %v7908_v46, 2  ;;  %v6488_v20 = vmul.f32 %v10806_v21, %v17093_v55  ;;  %v17240_v51 = vrot.slane %v17239_v57, 1  ;;  %v17247_v57 = vld [vmem:[#allocation206_spill] sm:$0xff] }
 0x237   : > { %v17241_v50 = vrot.slane %v17211_v11, 1  ;;  %v17243_v24 = vrot.slane %v17242_v44, 2  ;;  %v17244_v22 = vrot.slane %v17216_v26, 2  ;;  %v7785_v48 = vsel %vm2760_vm6, %v7783_v43, %v7784_v62  ;;  %v17248_v26 = vld [vmem:[#allocation77_spill] sm:$0xff] }
 0x238   : > { %v7547_v47 = vadd.f32 %v7473_v19, %v7303_v38  ;;  %v17246_v46 = vrot.slane %v17245_v4, 1  ;;  %v8029_v11 = vsel %vm2837_vm8, %v8027_v14, %v8028_v53  ;;  %v17249_v44 = vrot.slane %v17248_v26, 2  ;;  %v17250_v19 = vld [vmem:[#allocation94_spill] sm:$0xff] }
 0x239   : > { %v6635_v18 = vsel %vm2760_vm6, %v17241_v50, %v17240_v51  ;;  %v6879_v23 = vsel %vm2837_vm8, %v17244_v22, %v17243_v24  ;;  %v7012_v50 = vmul.f32 %v10841_v61, %v17153_v31  ;;  %v17251_v43 = vrot.slane %v17250_v19, 1 }
 0x23a   : > { %v7191_v55 = vsel %vm2760_vm6, %v7188_v54, %v17246_v46  ;;  %v6732_v51 = vadd.f32 %v6635_v18, %v6488_v20  ;;  %v7435_v24 = vsel %vm2837_vm8, %v7432_v13, %v17249_v44  ;;  %v7615_v22 = vadd.f32 %v7583_v6, %v7547_v47  ;;  %v17252_v54 = vld [vmem:[#allocation96_spill] sm:$0xff]  ;;  %v17257_v13 = vld [vmem:[#allocation161_spill] sm:$0xff] }
 0x23b   : > { %v7747_v27 = vsel %vm2760_vm6, %v7744_v60, %v17251_v43  ;;  %v17253_v38 = vrot.slane %v17252_v54, 2  ;;  %v6504_v14 = vmul.f32 %v10806_v21, %v17106_v49  ;;  %v17254_v18 = vld [vmem:[#allocation160_spill] sm:$0xff]  ;;  %v17256_v26 = vrot.slane %v17224_v5, 1 }
 0x23c   : > { %v6976_v20 = vadd.f32 %v6879_v23, %v6732_v51  ;;  %v17255_v46 = vrot.slane %v17254_v18, 1  ;;  %v17258_v6 = vrot.slane %v17257_v13, 2  ;;  %v17259_v47 = vrot.slane %v17229_v12, 2  ;;  %v17260_v43 = vld [vmem:[#allocation176_spill] sm:$0xff]  ;;  %v17262_v51 = vld [vmem:[#allocation178_spill] sm:$0xff]  ;;  %v17264_v12 = vld [vmem:[#allocation197_spill] sm:$0xff] }
 0x23d   : > { %v7991_v4 = vsel %vm2837_vm8, %v7988_v17, %v17253_v38  ;;  %v7028_v44 = vmul.f32 %v10841_v61, %v17175_v32  ;;  %v7859_v17 = vadd.f32 %v7785_v48, %v7615_v22  ;;  %v17261_v49 = vrot.slane %v17260_v43, 1  ;;  %v17266_v13 = vld [vmem:[#allocation199_spill] sm:$0xff] }
 0x23e   : > { %v6675_v7 = vsel %vm2760_vm6, %v17256_v26, %v17255_v46  ;;  %v6919_v60 = vsel %vm2837_vm8, %v17259_v47, %v17258_v6  ;;  %v17263_v54 = vrot.slane %v17262_v51, 2  ;;  %v7044_v38 = vadd.f32 %v7012_v50, %v6976_v20  ;;  %v17271_v47 = vld [vmem:[#allocation83_spill] sm:$0xff]  ;;  %v17273_v50 = vld [vmem:[#allocation88_spill] sm:$0xff] }
 0x23f   : > { %v6748_v19 = vadd.f32 %v6675_v7, %v6504_v14  ;;  %v7231_v23 = vsel %vm2760_vm6, %v7228_v41, %v17261_v49  ;;  %v7568_v18 = vmul.f32 %v10973_v56, %v17222_v39  ;;  %v17265_v46 = vrot.slane %v17264_v12, 1  ;;  %v17269_v41 = vld [vmem:[#allocation84_spill] sm:$0xff]  ;;  %v17275_v49 = vld [vmem:[#allocation85_spill] sm:$0xff]  ;;  %v17277_v12 = vld [vmem:[#allocation87_spill] sm:$0xff] }
 0x240   : > { %v7475_v5 = vsel %vm2837_vm8, %v7472_v10, %v17263_v54  ;;  %v17267_v6 = vrot.slane %v17266_v13, 2  ;;  %v12874_v22 = vadd.f32 %v8029_v11, %v7859_v17  ;;  %v17270_v7 = vrot.slane %v17269_v41, 1 }
 0x241   : > { %v7787_v26 = vsel %vm2760_vm6, %v7784_v62, %v17265_v46  ;;  %v6992_v14 = vadd.f32 %v6919_v60, %v6748_v19  ;;  %v17272_v43 = vrot.slane %v17271_v47, 1  ;;  %v17274_v20 = vrot.slane %v17273_v50, 2 }
 0x242   : > { %v8031_v48 = vsel %vm2837_vm8, %v8028_v53, %v17267_v6  ;;  %17268 = vst [vmem:[#allocation124_spill] sm:$0xff] %v12874_v22  ;;  %v17276_v51 = vrot.slane %v17275_v49, 2  ;;  %v7288_v62 = vadd.f32 %v7191_v55, %v7044_v38  ;;  %v7013_v53 = vmul.f32 %v10841_v61, %v17221_v0 }
 0x243   : > { %v6638_v10 = vsel %vm2760_vm6, %v17272_v43, %v17270_v7  ;;  %v12891_v11 = vmul.f32 %v10826_v42, %v17222_v39  ;;  %v7060_v60 = vadd.f32 %v7028_v44, %v6992_v14  ;;  %v7584_v17 = vmul.f32 %v10973_v56, %v17237_v1  ;;  %v17278_v7 = vld [vmem:[#allocation107_spill] sm:$0xff] }
 0x244   : > { %v6882_v54 = vsel %vm2837_vm8, %v17276_v51, %v17274_v20  ;;  %v6733_v46 = vadd.f32 %v6638_v10, %v17277_v12  ;;  %v7330_v19 = vmul.f32 %v10831_v52, %v17221_v0  ;;  %v12899_v13 = vmul.f32 %v10831_v52, %v17222_v39 }
 0x245   : > { %v7532_v55 = vadd.f32 %v7435_v24, %v7288_v62  ;;  %v16586_v6 = vrot.slane %v12891_v11, 1  ;;  %v7569_v47 = vmul.f32 %v10973_v56, %v17278_v7  ;;  %v7304_v43 = vadd.f32 %v7231_v23, %v7060_v60  ;;  %v17279_v24 = vld [vmem:[#allocation86_spill] sm:$0xff] }
 0x246   : > { %v6977_v38 = vadd.f32 %v6882_v54, %v6733_v46  ;;  %v7436_v10 = vrot.slane %v7330_v19, 2  ;;  %v7437_v44 = vrot.slane %v12899_v13, 2  ;;  %v7642_v14 = vmul.f32 %v10942_v29, %v17278_v7  ;;  %v17280_v13 = vld [vmem:[#allocation186_spill] sm:$0xff] }
 0x247   : > { %v7600_v20 = vadd.f32 %v7568_v18, %v7532_v55  ;;  %v7194_v49 = vsel %vm2760_vm6, %v7192_v40, %v16586_v6  ;;  %v12912_v51 = vmul.f32 %v10942_v29, %v17279_v24  ;;  %v7548_v54 = vadd.f32 %v7475_v5, %v7304_v43  ;;  %v17284_v43 = vld [vmem:[#allocation188_spill] sm:$0xff] }
 0x248   : > { %v7045_v0 = vadd.f32 %v7013_v53, %v6977_v38  ;;  %v7438_v62 = vsel %vm2837_vm8, %v7436_v10, %v7437_v44  ;;  %v7748_v23 = vrot.slane %v7642_v14, 1  ;;  %v7886_v12 = vmul.f32 %v10945_v34, %v17278_v7  ;;  %v17282_v38 = vld [vmem:[#allocation182_spill] sm:$0xff]  ;;  %v17286_v14 = vld [vmem:[#allocation187_spill] sm:$0xff] }
 0x249   : > { %v7844_v46 = vadd.f32 %v7747_v27, %v7600_v20  ;;  %v7749_v18 = vrot.slane %v12912_v51, 1  ;;  %v7887_v53 = vmul.f32 %v10945_v34, %v17279_v24  ;;  %v7616_v19 = vadd.f32 %v7584_v17, %v7548_v54  ;;  %v17289_v54 = vld [vmem:[#allocation185_spill] sm:$0xff] }
 0x24a   : > { %v7289_v60 = vadd.f32 %v7194_v49, %v7045_v0  ;;  %v7992_v40 = vrot.slane %v7886_v12, 2  ;;  %v17281_v55 = vrot.slane %v17280_v13, 1  ;;  %v17283_v6 = vrot.slane %v17282_v38, 1 }
 0x24b   : > { %v17285_v10 = vrot.slane %v17284_v43, 2  ;;  %v17287_v59 = vrot.slane %v17286_v14, 2  ;;  %v12930_v20 = vadd.f32 %v7991_v4, %v7844_v46  ;;  %v7750_v49 = vsel %vm2760_vm6, %v7748_v23, %v7749_v18 }
 0x24c   : > { %v6678_v5 = vsel %vm2760_vm6, %v17283_v6, %v17281_v55  ;;  %v7533_v0 = vadd.f32 %v7438_v62, %v7289_v60  ;;  %v7993_v51 = vrot.slane %v7887_v53, 2  ;;  %v7860_v17 = vadd.f32 %v7787_v26, %v7616_v19 }
 0x24d   : > { %v6922_v27 = vsel %vm2837_vm8, %v17287_v59, %v17285_v10  ;;  %17288 = vst [vmem:[#allocation47_spill] sm:$0xff] %v12930_v20  ;;  %v6749_v12 = vadd.f32 %v6678_v5, %v17289_v54  ;;  %v7029_v38 = vmul.f32 %v10841_v61, %v17235_v8  ;;  %v7111_v6 = vmul.f32 %v10826_v42, %v17237_v1  ;;  %v17291_v10 = vld [vmem:[#allocation184_spill] sm:$0xff] }
 0x24e   : > { %v12940_v55 = vmul.f32 %v10945_v34, %v17172_v9  ;;  %v7601_v59 = vadd.f32 %v7569_v47, %v7533_v0  ;;  %v7994_v4 = vsel %vm2837_vm8, %v7992_v40, %v7993_v51  ;;  %v7354_v62 = vmul.f32 %v10831_v52, %v17235_v8 }
 0x24f   : > { %v12945_v23 = vadd.f32 %v8031_v48, %v7860_v17  ;;  %v6993_v26 = vadd.f32 %v6922_v27, %v6749_v12  ;;  %v7233_v46 = vrot.slane %v7111_v6, 1  ;;  %v7355_v60 = vmul.f32 %v10831_v52, %v17237_v1  ;;  %v17294_v17 = vld [vmem:[#allocation183_spill] sm:$0xff] }
 0x250   : > { %v7845_v19 = vadd.f32 %v7750_v49, %v7601_v59  ;;  %v7476_v5 = vrot.slane %v7354_v62, 2  ;;  %v7666_v14 = vmul.f32 %v10942_v29, %v17291_v10  ;;  %v17292_v40 = vrot.slane %v17247_v57, 1  ;;  %v17309_v62 = vld [vmem:[#allocation108_spill] sm:$0xff] }
 0x251   : > { %17290 = vst [vmem:[#allocation23_spill] sm:$0xff] %v12945_v23  ;;  %v7061_v47 = vadd.f32 %v7029_v38, %v6993_v26  ;;  %v7477_v8 = vrot.slane %v7355_v60, 2  ;;  %v7585_v48 = vmul.f32 %v10973_v56, %v17291_v10  ;;  %v7667_v54 = vmul.f32 %v10942_v29, %v17294_v17  ;;  %v17295_v60 = vld [vmem:[#allocation74_spill] sm:$0xff] }
 0x252   : > { %v7234_v0 = vsel %vm2760_vm6, %v17292_v40, %v7233_v46  ;;  %v12957_v27 = vadd.f32 %v7994_v4, %v7845_v19  ;;  %v7788_v12 = vrot.slane %v7666_v14, 1  ;;  %v7910_v49 = vmul.f32 %v10945_v34, %v17291_v10 }
 0x253   : > { %v7305_v6 = vadd.f32 %v7234_v0, %v7061_v47  ;;  %v7478_v38 = vsel %vm2837_vm8, %v7476_v5, %v7477_v8  ;;  %v7911_v57 = vmul.f32 %v10945_v34, %v17294_v17  ;;  %v6490_v59 = vmul.f32 %v10806_v21, %v17153_v31  ;;  %v17298_v5 = vld [vmem:[#allocation75_spill] sm:$0xff] }
 0x254   : > { %17293 = vst [vmem:[#allocation53_spill] sm:$0xff] %v12957_v27  ;;  %v7789_v4 = vrot.slane %v7667_v54, 1  ;;  %v8032_v26 = vrot.slane %v7910_v49, 2  ;;  %v17296_v19 = vrot.slane %v17295_v60, 1  ;;  %v17297_v14 = vrot.slane %v17269_v41, 1  ;;  %v17301_v49 = vld [vmem:[#allocation92_spill] sm:$0xff] }
 0x255   : > { %v7549_v53 = vadd.f32 %v7478_v38, %v7305_v6  ;;  %v8033_v47 = vrot.slane %v7911_v57, 2  ;;  %v17299_v27 = vrot.slane %v17298_v5, 2  ;;  %v17300_v23 = vrot.slane %v17273_v50, 2  ;;  %v17304_v6 = vld [vmem:[#allocation93_spill] sm:$0xff] }
 0x256   : > { %v6640_v40 = vsel %vm2760_vm6, %v17297_v14, %v17296_v19  ;;  %v7790_v31 = vsel %vm2760_vm6, %v7788_v12, %v7789_v4  ;;  %v7014_v54 = vmul.f32 %v10841_v61, %v17222_v39  ;;  %v17302_v60 = vrot.slane %v17301_v49, 1  ;;  %v17307_v12 = vld [vmem:[#allocation106_spill] sm:$0xff] }
 0x257   : > { %v6734_v0 = vadd.f32 %v6640_v40, %v6490_v59  ;;  %v6884_v20 = vsel %vm2837_vm8, %v17300_v23, %v17299_v27  ;;  %v17303_v41 = vrot.slane %v12891_v11, 1  ;;  %v17305_v38 = vrot.slane %v17304_v6, 2  ;;  %v17306_v23 = vld [vmem:[#allocation112_spill] sm:$0xff] }
 0x258   : > { %v7617_v59 = vadd.f32 %v7585_v48, %v7549_v53  ;;  %v8034_v50 = vsel %vm2837_vm8, %v8032_v26, %v8033_v47  ;;  %v7197_v27 = vrot.slane %v17306_v23, 1  ;;  %v17308_v40 = vrot.slane %v17307_v12, 1  ;;  %v17317_v23 = vld [vmem:[#allocation195_spill] sm:$0xff] }
 0x259   : > { %v7196_v19 = vsel %vm2760_vm6, %v17303_v41, %v17302_v60  ;;  %v7440_v57 = vsel %vm2837_vm8, %v7437_v44, %v17305_v38  ;;  %v6978_v14 = vadd.f32 %v6884_v20, %v6734_v0  ;;  %v17310_v49 = vrot.slane %v17309_v62, 2  ;;  %v17311_v41 = vld [vmem:[#allocation174_spill] sm:$0xff]  ;;  %v17314_v0 = vld [vmem:[#allocation175_spill] sm:$0xff] }
 0x25a   : > { %v7752_v5 = vsel %vm2760_vm6, %v7749_v18, %v17308_v40  ;;  %v6506_v60 = vmul.f32 %v10806_v21, %v17175_v32  ;;  %v17312_v6 = vrot.slane %v17311_v41, 1  ;;  %v17313_v44 = vrot.slane %v17280_v13, 1  ;;  %v17319_v40 = vld [vmem:[#allocation196_spill] sm:$0xff] }
 0x25b   : > { %v7996_v11 = vsel %vm2837_vm8, %v7993_v51, %v17310_v49  ;;  %v7861_v20 = vadd.f32 %v7790_v31, %v7617_v59  ;;  %v7046_v48 = vadd.f32 %v7014_v54, %v6978_v14  ;;  %v7570_v26 = vmul.f32 %v10973_v56, %v17279_v24 }
 0x25c   : > { %v6680_v53 = vsel %vm2760_vm6, %v17313_v44, %v17312_v6  ;;  %v17315_v18 = vrot.slane %v17314_v0, 2  ;;  %v17316_v62 = vrot.slane %v17284_v43, 2  ;;  %v7030_v32 = vmul.f32 %v10841_v61, %v17237_v1  ;;  %v17326_v0 = vld [vmem:[#allocation97_spill] sm:$0xff] }
 0x25d   : > { %v6750_v38 = vadd.f32 %v6680_v53, %v6506_v60  ;;  %v17318_v12 = vrot.slane %v17317_v23, 1  ;;  %v17320_v31 = vrot.slane %v17319_v40, 2  ;;  %v13020_v59 = vadd.f32 %v8034_v50, %v7861_v20  ;;  %v17328_v50 = vld [vmem:[#allocation101_spill] sm:$0xff]  ;;  %v17330_v20 = vld [vmem:[#allocation99_spill] sm:$0xff] }
 0x25e   : > { %v6924_v51 = vsel %vm2837_vm8, %v17316_v62, %v17315_v18  ;;  %v7290_v14 = vadd.f32 %v7196_v19, %v7046_v48  ;;  %v17322_v49 = vrot.slane %v17182_v35, 1  ;;  %v17323_v60 = vrot.slane %v17201_v15, 2  ;;  %v17332_v15 = vld [vmem:[#allocation103_spill] sm:$0xff]  ;;  %v17333_v40 = vld [vmem:[#allocation113_spill] sm:$0xff] }
 0x25f   : > { %v7236_v13 = vsel %vm2760_vm6, %v7233_v46, %v17318_v12  ;;  %v7480_v54 = vsel %vm2837_vm8, %v7477_v8, %v17320_v31  ;;  %17321 = vst [vmem:[#allocation27_spill] sm:$0xff] %v13020_v59  ;;  %v6994_v6 = vadd.f32 %v6924_v51, %v6750_v38  ;;  %v7586_v44 = vmul.f32 %v10973_v56, %v17294_v17  ;;  %v17324_v46 = vld [vmem:[#allocation98_spill] sm:$0xff] }
 0x260   : > { %v7792_v43 = vsel %vm2760_vm6, %v7789_v4, %v17322_v49  ;;  %v8036_v41 = vsel %vm2837_vm8, %v8033_v47, %v17323_v60  ;;  %v17325_v53 = vrot.slane %v17324_v46, 1  ;;  %v17327_v18 = vrot.slane %v17326_v0, 1 }
 0x261   : > { %v17329_v19 = vrot.slane %v17328_v50, 2  ;;  %v17331_v35 = vrot.slane %v17330_v20, 2  ;;  %v7534_v48 = vadd.f32 %v7440_v57, %v7290_v14  ;;  %v7015_v47 = vmul.f32 %v10841_v61, %v17278_v7 }
 0x262   : > { %v6643_v8 = vsel %vm2760_vm6, %v17327_v18, %v17325_v53  ;;  %v13045_v51 = vmul.f32 %v10826_v42, %v17279_v24  ;;  %v7062_v38 = vadd.f32 %v7030_v32, %v6994_v6  ;;  %v7333_v23 = vmul.f32 %v10831_v52, %v17278_v7  ;;  %v17334_v6 = vld [vmem:[#allocation100_spill] sm:$0xff] }
 0x263   : > { %v6887_v4 = vsel %vm2837_vm8, %v17331_v35, %v17329_v19  ;;  %v6735_v62 = vadd.f32 %v6643_v8, %v17332_v15  ;;  %v13051_v12 = vmul.f32 %v10831_v52, %v17279_v24  ;;  %v7571_v57 = vmul.f32 %v10973_v56, %v17333_v40 }
 0x264   : > { %v7602_v31 = vadd.f32 %v7570_v26, %v7534_v48  ;;  %v7198_v49 = vrot.slane %v13045_v51, 1  ;;  %v7645_v60 = vmul.f32 %v10942_v29, %v17333_v40  ;;  %v7306_v53 = vadd.f32 %v7236_v13, %v7062_v38  ;;  %v17336_v51 = vld [vmem:[#allocation202_spill] sm:$0xff] }
 0x265   : > { %v6979_v14 = vadd.f32 %v6887_v4, %v6735_v62  ;;  %v7441_v0 = vrot.slane %v7333_v23, 2  ;;  %v7442_v32 = vrot.slane %v13051_v12, 2  ;;  %v7646_v7 = vmul.f32 %v10942_v29, %v17334_v6 }
 0x266   : > { %v7846_v18 = vadd.f32 %v7752_v5, %v7602_v31  ;;  %v7199_v19 = vsel %vm2760_vm6, %v7197_v27, %v7198_v49  ;;  %v7753_v20 = vrot.slane %v7645_v60, 1  ;;  %v7550_v35 = vadd.f32 %v7480_v54, %v7306_v53  ;;  %v17338_v5 = vld [vmem:[#allocation201_spill] sm:$0xff] }
 0x267   : > { %v7047_v8 = vadd.f32 %v7015_v47, %v6979_v14  ;;  %v7443_v26 = vsel %vm2837_vm8, %v7441_v0, %v7442_v32  ;;  %v7754_v4 = vrot.slane %v7646_v7, 1  ;;  %v7889_v48 = vmul.f32 %v10945_v34, %v17333_v40  ;;  %v17340_v31 = vld [vmem:[#allocation205_spill] sm:$0xff]  ;;  %v17342_v0 = vld [vmem:[#allocation203_spill] sm:$0xff] }
 0x268   : > { %v13065_v15 = vadd.f32 %v7996_v11, %v7846_v18  ;;  %v7890_v62 = vmul.f32 %v10945_v34, %v17334_v6  ;;  %v17337_v38 = vrot.slane %v17336_v51, 1  ;;  %v17339_v47 = vrot.slane %v17338_v5, 1 }
 0x269   : > { %v7291_v13 = vadd.f32 %v7199_v19, %v7047_v8  ;;  %v7618_v23 = vadd.f32 %v7586_v44, %v7550_v35  ;;  %v7755_v54 = vsel %vm2760_vm6, %v7753_v20, %v7754_v4  ;;  %v7997_v12 = vrot.slane %v7889_v48, 2 }
 0x26a   : > { %17335 = vst [vmem:[#allocation128_spill] sm:$0xff] %v13065_v15  ;;  %v6683_v27 = vsel %vm2760_vm6, %v17339_v47, %v17337_v38  ;;  %v8037_v40 = vrot.slane %v12791_v16, 2  ;;  %v7998_v60 = vrot.slane %v7890_v62, 2  ;;  %v17341_v53 = vrot.slane %v11894_v33, 2  ;;  %v17344_v16 = vld [vmem:[#allocation212_spill] sm:$0xff] }
 0x26b   : > { %v6751_v14 = vadd.f32 %v6683_v27, %v17340_v31  ;;  %v7535_v11 = vadd.f32 %v7443_v26, %v7291_v13  ;;  %v17343_v7 = vrot.slane %v17342_v0, 2  ;;  %v7862_v8 = vadd.f32 %v7792_v43, %v7618_v23 }
 0x26c   : > { %v7031_v44 = vmul.f32 %v10841_v61, %v17291_v10  ;;  %v7114_v20 = vmul.f32 %v10826_v42, %v17294_v17  ;;  %v7999_v48 = vsel %vm2837_vm8, %v7997_v12, %v7998_v60  ;;  %v7237_v26 = vrot.slane %v17344_v16, 1  ;;  %v17355_v16 = vld [vmem:[#allocation207_spill] sm:$0xff] }
 0x26d   : > { %v6927_v18 = vsel %vm2837_vm8, %v17343_v7, %v17341_v53  ;;  %v7603_v35 = vadd.f32 %v7571_v57, %v7535_v11  ;;  %v7357_v13 = vmul.f32 %v10831_v52, %v17291_v10  ;;  %v13090_v62 = vadd.f32 %v8036_v41, %v7862_v8  ;;  %v17349_v7 = vld [vmem:[#allocation90_spill] sm:$0xff] }
 0x26e   : > { %v6995_v19 = vadd.f32 %v6927_v18, %v6751_v14  ;;  %v7238_v5 = vrot.slane %v7114_v20, 1  ;;  %v7358_v43 = vmul.f32 %v10831_v52, %v17294_v17  ;;  %v17346_v23 = vrot.slane %v12584_v2, 1 }
 0x26f   : > { %17345 = vst [vmem:[#allocation126_spill] sm:$0xff] %v13090_v62  ;;  %v7847_v47 = vadd.f32 %v7755_v54, %v7603_v35  ;;  %v7481_v27 = vrot.slane %v7357_v13, 2  ;;  %v17347_v57 = vrot.slane %v12580_v28, 1  ;;  %v8038_v31 = vrot.slane %v12940_v55, 2  ;;  %v17356_v13 = vld [vmem:[#allocation102_spill] sm:$0xff] }
 0x270   : > { %v7063_v38 = vadd.f32 %v7031_v44, %v6995_v19  ;;  %v7587_v10 = vmul.f32 %v10973_v56, %v17171_v58  ;;  %v7239_v41 = vsel %vm2760_vm6, %v7237_v26, %v7238_v5  ;;  %v7482_v14 = vrot.slane %v7358_v43, 2  ;;  %v17352_v44 = vld [vmem:[#allocation91_spill] sm:$0xff]  ;;  %v17358_v43 = vld [vmem:[#allocation105_spill] sm:$0xff] }
 0x271   : > { %v7795_v12 = vsel %vm2760_vm6, %v17347_v57, %v17346_v23  ;;  %v6492_v11 = vmul.f32 %v10806_v21, %v17222_v39  ;;  %v13105_v53 = vadd.f32 %v7999_v48, %v7847_v47  ;;  %v8039_v0 = vsel %vm2837_vm8, %v8037_v40, %v8038_v31  ;;  %v17360_v23 = vld [vmem:[#allocation209_spill] sm:$0xff] }
 0x272   : > { %v7307_v54 = vadd.f32 %v7239_v41, %v7063_v38  ;;  %v17350_v28 = vrot.slane %v17349_v7, 1  ;;  %v17351_v18 = vrot.slane %v17324_v46, 1  ;;  %v7483_v8 = vsel %vm2837_vm8, %v7481_v27, %v7482_v14  ;;  %v17361_v41 = vld [vmem:[#allocation111_spill] sm:$0xff] }
 0x273   : > { %17348 = vst [vmem:[#allocation132_spill] sm:$0xff] %v13105_v53  ;;  %v17353_v20 = vrot.slane %v17352_v44, 2  ;;  %v17354_v35 = vrot.slane %v17328_v50, 2  ;;  %v7016_v48 = vmul.f32 %v10841_v61, %v17279_v24  ;;  %v7915_v40 = vmul.f32 %v10945_v34, %v17355_v16  ;;  %v17363_v24 = vld [vmem:[#allocation114_spill] sm:$0xff] }
 0x274   : > { %v6645_v55 = vsel %vm2760_vm6, %v17351_v18, %v17350_v28  ;;  %v7551_v26 = vadd.f32 %v7483_v8, %v7307_v54  ;;  %v17357_v46 = vrot.slane %v17356_v13, 1  ;;  %v17359_v47 = vrot.slane %v17358_v43, 2  ;;  %v17365_v8 = vld [vmem:[#allocation193_spill] sm:$0xff] }
 0x275   : > { %v6736_v19 = vadd.f32 %v6645_v55, %v6492_v11  ;;  %v6889_v39 = vsel %vm2837_vm8, %v17354_v35, %v17353_v20  ;;  %v7484_v57 = vrot.slane %v17360_v23, 2  ;;  %v17362_v11 = vrot.slane %v17361_v41, 1  ;;  %v17368_v35 = vld [vmem:[#allocation194_spill] sm:$0xff] }
 0x276   : > { %v7201_v38 = vsel %vm2760_vm6, %v7198_v49, %v17357_v46  ;;  %v7445_v27 = vsel %vm2837_vm8, %v7442_v32, %v17359_v47  ;;  %v17364_v28 = vrot.slane %v17363_v24, 2  ;;  %v7360_v54 = vmul.f32 %v10831_v52, %v17171_v58 }
 0x277   : > { %v6980_v50 = vadd.f32 %v6889_v39, %v6736_v19  ;;  %v7757_v7 = vsel %vm2760_vm6, %v7754_v4, %v17362_v11  ;;  %v7619_v55 = vadd.f32 %v7587_v10, %v7551_v26  ;;  %v6508_v49 = vmul.f32 %v10806_v21, %v17237_v1  ;;  %v17372_v1 = vld [vmem:[#allocation213_spill] sm:$0xff] }
 0x278   : > { %v8001_v18 = vsel %vm2837_vm8, %v7998_v60, %v17364_v28  ;;  %v17366_v32 = vrot.slane %v17365_v8, 1  ;;  %v17367_v44 = vrot.slane %v17336_v51, 1  ;;  %v7361_v4 = vmul.f32 %v10831_v52, %v17172_v9  ;;  %v17380_v8 = vld [vmem:[#allocation200_spill] sm:$0xff] }
 0x279   : > { %v7048_v20 = vadd.f32 %v7016_v48, %v6980_v50  ;;  %v17369_v39 = vrot.slane %v17368_v35, 2  ;;  %v17370_v60 = vrot.slane %v11894_v33, 2  ;;  %v17371_v10 = vrot.slane %v17174_v63, 1 }
 0x27a   : > { %v6685_v19 = vsel %vm2760_vm6, %v17367_v44, %v17366_v32  ;;  %v7796_v26 = vrot.slane %v17372_v1, 1  ;;  %v8040_v13 = vrot.slane %v7915_v40, 2  ;;  %v7863_v51 = vadd.f32 %v7795_v12, %v7619_v55  ;;  %v17378_v55 = vld [vmem:[#allocation192_spill] sm:$0xff] }
 0x27b   : > { %v6929_v58 = vsel %vm2837_vm8, %v17370_v60, %v17369_v39  ;;  %v7241_v21 = vsel %vm2760_vm6, %v7238_v5, %v17371_v10  ;;  %v7292_v46 = vadd.f32 %v7201_v38, %v7048_v20  ;;  %v6752_v43 = vadd.f32 %v6685_v19, %v6508_v49  ;;  %v17383_v20 = vld [vmem:[#allocation12_spill] sm:$0xff]  ;;  %v17384_v39 = vld [vmem:[#allocation15_spill] sm:$0xff] }
 0x27c   : > { %v7485_v47 = vsel %vm2837_vm8, %v7482_v14, %v7484_v57  ;;  %v7118_v48 = vmul.f32 %v10826_v42, %v17355_v16  ;;  %v7486_v23 = vrot.slane %v7360_v54, 2  ;;  %v7572_v33 = vmul.f32 %v10973_v56, %v17334_v6 }
 0x27d   : > { %v7032_v63 = vmul.f32 %v10841_v61, %v17294_v17  ;;  %v7487_v50 = vrot.slane %v7361_v4, 2  ;;  %v13163_v5 = vadd.f32 %v8039_v0, %v7863_v51  ;;  %v7536_v41 = vadd.f32 %v7445_v27, %v7292_v46  ;;  %v17375_v27 = vld [vmem:[#allocation204_spill] sm:$0xff] }
 0x27e   : > { %v6996_v40 = vadd.f32 %v6929_v58, %v6752_v43  ;;  %v17374_v12 = vrot.slane %v12584_v2, 1  ;;  %v8041_v14 = vsel %vm2837_vm8, %v8038_v31, %v8040_v13  ;;  %v7362_v42 = vmul.f32 %v10831_v52, %v17355_v16  ;;  %v2668_v4 = vld [vmem:[%s16331_s15] sm:$0x7] }
 0x27f   : > { %17373 = vst [vmem:[#allocation133_spill] sm:$0xff] %v13163_v5  ;;  %v7245_v57 = vrot.slane %v7118_v48, 1  ;;  %v7604_v11 = vadd.f32 %v7572_v33, %v7536_v41  ;;  %v7488_v24 = vsel %vm2837_vm8, %v7486_v23, %v7487_v50  ;;  %v7588_v61 = vmul.f32 %v10973_v56, %v17172_v9  ;;  %v17385_v58 = vld [vmem:[#allocation16_spill] sm:$0xff] }
 0x280   : > { %v7797_v38 = vsel %vm2760_vm6, %v17374_v12, %v7796_v26  ;;  %v7064_v6 = vadd.f32 %v7032_v63, %v6996_v40  ;;  %v13175_v28 = vadd.f32 %v7488_v24, %v17375_v27  ;;  %v7489_v2 = vrot.slane %v7362_v42, 2  ;;  %v17387_v26 = vld [vmem:[#allocation17_spill] sm:$0xff]  ;;  %v2669_v12 = vld [vmem:[%s16331_s15 + $0x4] sm:$0x7] }
 0x281   : > { %v7848_v17 = vadd.f32 %v7757_v7, %v7604_v11  ;;  %v17379_v49 = vrot.slane %v17378_v55, 1  ;;  %v13201_v35 = vrot.slane %v2668_v4, %v17383_v20  ;;  %v13211_v13 = vrot.slane %v2668_v4, %v17387_v26  ;;  %v2670_v24 = vld [vmem:[%s16331_s15 + $0x8] sm:$0x7]  ;;  %v17393_v55 = vld [vmem:[#allocation131_spill] sm:$0xff] }
 0x282   : > { %v7308_v0 = vadd.f32 %v7241_v21, %v7064_v6  ;;  %17376 = vst [vmem:[#allocation129_spill] sm:$0xff] %v13175_v28  ;;  %v7490_v44 = vsel %vm2837_vm8, %v7487_v50, %v7489_v2  ;;  %v17386_v21 = vld [vmem:[#allocation14_spill] sm:$0xff]  ;;  %v17388_v50 = vld [vmem:[#allocation19_spill] sm:$0xff] }
 0x283   : > { %v13177_v54 = vadd.f32 %v8001_v18, %v7848_v17  ;;  %v7246_v52 = vsel %vm2760_vm6, %v17379_v49, %v7245_v57  ;;  %v13191_v18 = vld [vmem:[%s16329_s13] sm:$0xff]  ;;  %v2728_v60 = vmul.f32 %v13201_v35, %v17384_v39  ;;  %v2729_v10 = vmul.f32 %v13201_v35, %v17385_v58  ;;  %v17392_v2 = vld [vmem:[#allocation127_spill] sm:$0xff] }
 0x284   : > { %v7552_v31 = vadd.f32 %v7485_v47, %v7308_v0  ;;  %v7310_v32 = vadd.f32 %v7246_v52, %v17380_v8  ;;  %9973 = vmatprep.mubr.msk.f32.mxu1 %vm3264_vm13, %v13191_v18  ;;  %9978 = vmatprep.mubr.msk.f32.mxu0 %vm3264_vm13, %v13191_v18  ;;  %v13208_v1 = vrot.slane %v2668_v4, %v17386_v21  ;;  %v1150_v41 = vmax.f32 %v17388_v50, 0.0  ;;  %v17391_v0 = vld [vmem:[#allocation125_spill] sm:$0xff]  ;;  %v17394_v52 = vld [vmem:[#allocation135_spill] sm:$0xff] }
 0x285   : > { %17377 = vst [vmem:[#allocation153_spill] sm:$0xff] %v13177_v54  ;;  %v2761_v51 = vrot.slane %v2728_v60, 1  ;;  %v2762_v46 = vrot.slane %v2729_v10, 1  ;;  %v2716_v48 = vmul.f32 %v13211_v13, %v17384_v39  ;;  %v1152_v27 = vmax.f32 %v17391_v0, 0.0 }
 0x286   : > { %v7620_v16 = vadd.f32 %v7588_v61, %v7552_v31  ;;  %v13184_v9 = vadd.f32 %v7490_v44, %v7310_v32  ;;  %v2805_v43 = vmul.f32 %v13208_v1, %v17384_v39  ;;  %v2806_v47 = vmul.f32 %v13208_v1, %v17385_v58  ;;  %v17390_v61 = vld [vmem:[#allocation115_spill] sm:$0xff] }
 0x287   : > { %v2763_v23 = vsel %vm2760_vm6, %v2761_v51, %v2762_v46  ;;  %v13235_v32 = vrot.slane %v2669_v12, %v17387_v26  ;;  %v13238_v44 = vrot.slane %v2669_v12, %v17383_v20  ;;  %v13242_v10 = vrot.slane %v2669_v12, %v17386_v21 }
 0x288   : > { %v7864_v19 = vadd.f32 %v7797_v38, %v7620_v16  ;;  %17381 = vst [vmem:[#allocation33_spill] sm:$0xff] %v13184_v9  ;;  %v2838_v33 = vrot.slane %v2805_v43, 2  ;;  %v2839_v63 = vrot.slane %v2806_v47, 2  ;;  %v2793_v38 = vadd.f32 %v2763_v23, %v2716_v48 }
 0x289   : > { %v13245_v51 = vrot.slane %v2670_v24, %v17383_v20  ;;  %v13250_v47 = vrot.slane %v2670_v24, %v17386_v21  ;;  %v13253_v48 = vrot.slane %v2670_v24, %v17387_v26 }
 0x28a   : > { %v13186_v7 = vadd.f32 %v8041_v14, %v7864_v19  ;;  %v17389_v14 = vld [vmem:[#allocation18_spill] sm:$0xff]  ;;  %v2840_v11 = vsel %vm2837_vm8, %v2838_v33, %v2839_v63  ;;  %v17395_v19 = vld [vmem:[#allocation139_spill] sm:$0xff] }
 0x28b   : > { %v1151_v42 = vmax.f32 %v17389_v14, 0.0  ;;  %v2870_v60 = vadd.f32 %v2840_v11, %v2793_v38  ;;  %v3088_v50 = vmul.f32 %v13245_v51, %v17384_v39  ;;  %v3165_v0 = vmul.f32 %v13250_v47, %v17385_v58 }
 0x28c   : > { %17382 = vst [vmem:[#allocation34_spill] sm:$0xff] %v13186_v7  ;;  %v13274_v26 = vmul.f32 %v13253_v48, %v17384_v39 }
 0x28d   : > { %v3204_v62 = vrot.slane %v3165_v0, 2 }
 0x28e   : > { %17396 = vst [vmem:[#allocation24_spill] sm:$0xff] %v13274_v26 }
 0x2df   : > { %v2153_v40 = vpop.f32.mrb[16].mxu1 }
 0x2e0   : > { %v2154_v57 = vadd.f32 %v2153_v40, %v1150_v41  ;;  %v9935_v6 = vpop.f32.mrb[17].mxu1  ;;  %v3089_v41 = vmul.f32 %v13245_v51, %v17385_v58 }
 0x2e2   : > { %v2679_v8 = vrot.slane %v2154_v57, 7  ;;  %v3164_v57 = vmul.f32 %v13250_v47, %v17384_v39  ;;  %v3128_v54 = vrot.slane %v3089_v41, 1 }
 0x2e4   : > { %v2695_v46 = vsel %vm1870_vm5, 0.0, %v2679_v8  ;;  %v2704_v43 = vsel %vm1870_vm5, %v2679_v8, 0.0  ;;  %v3203_v53 = vrot.slane %v3164_v57, 2 }
 0x2e5   : > { %v2730_v23 = vmul.f32 %v13201_v35, %v2695_v46  ;;  %v2731_v33 = vmul.f32 %v13201_v35, %v2704_v43  ;;  %v2882_v40 = vmul.f32 %v13235_v32, %v2695_v46  ;;  %v2902_v12 = vmul.f32 %v13238_v44, %v2695_v46 }
 0x2e6   : > { %v2226_v63 = vpop.f32.mrb[18].mxu1  ;;  %v2903_v38 = vmul.f32 %v13238_v44, %v2704_v43  ;;  %v2807_v24 = vmul.f32 %v13208_v1, %v2695_v46  ;;  %v2808_v8 = vmul.f32 %v13208_v1, %v2704_v43  ;;  %v2978_v31 = vmul.f32 %v13242_v10, %v2695_v46 }
 0x2e7   : > { %v9940_v14 = vpop.f32.mrb[19].mxu1  ;;  %v2764_v11 = vrot.slane %v2730_v23, 1  ;;  %v2765_v6 = vrot.slane %v2731_v33, 1  ;;  %v2934_v16 = vrot.slane %v2902_v12, 1  ;;  %v2979_v49 = vmul.f32 %v13242_v10, %v2704_v43 }
 0x2e8   : > { %v2935_v4 = vrot.slane %v2903_v38, 1  ;;  %v2227_v17 = vadd.f32 %v2226_v63, %v1151_v42  ;;  %v3127_v23 = vrot.slane %v3088_v50, 1  ;;  %v2890_v21 = vadd.f32 %v2882_v40, %v2870_v60 }
 0x2e9   : > { %v2766_v33 = vsel %vm2760_vm6, %v2764_v11, %v2765_v6  ;;  %v2717_v12 = vmul.f32 %v13211_v13, %v2695_v46  ;;  %v2841_v43 = vrot.slane %v2807_v24, 2  ;;  %v2842_v42 = vrot.slane %v2808_v8, 2 }
 0x2ea   : > { %v2299_v14 = vpop.f32.mrb[20].mxu1  ;;  %v2936_v38 = vsel %vm2760_vm6, %v2934_v16, %v2935_v4  ;;  %v2680_v5 = vrot.slane %v2227_v17, 7  ;;  %v3010_v63 = vrot.slane %v2978_v31, 2  ;;  %v3011_v59 = vrot.slane %v2979_v49, 2 }
 0x2eb   : > { %v2300_v20 = vadd.f32 %v2299_v14, %v1152_v27  ;;  %v9945_v7 = vpop.f32.mrb[21].mxu1  ;;  %v2794_v15 = vadd.f32 %v2766_v33, %v2717_v12  ;;  %v13296_v11 = vsel %vm2760_vm6, %v3127_v23, %v3128_v54  ;;  %v13304_v8 = vsel %vm2837_vm8, %v3203_v53, %v3204_v62 }
 0x2ec   : > { %v13280_v50 = vsel %vm1870_vm5, 0.0, %v2680_v5  ;;  %v2705_v60 = vsel %vm1870_vm5, %v2680_v5, 0.0  ;;  %v2966_v7 = vadd.f32 %v2936_v38, %v2890_v21  ;;  %17397 = vst [vmem:[#allocation52_spill] sm:$0xff] %v13296_v11  ;;  %v3012_v6 = vsel %vm2837_vm8, %v3010_v63, %v3011_v59  ;;  %17398 = vst [vmem:[#allocation54_spill] sm:$0xff] %v13304_v8 }
 0x2ed   : > { %v2732_v46 = vmul.f32 %v13201_v35, %v13280_v50  ;;  %v2733_v16 = vmul.f32 %v13201_v35, %v2705_v60  ;;  %v2681_v17 = vrot.slane %v2300_v20, 7  ;;  %v2809_v31 = vmul.f32 %v13208_v1, %v13280_v50 }
 0x2ee   : > { %v2372_v27 = vpop.f32.mrb[22].mxu1  ;;  %v2810_v41 = vmul.f32 %v13208_v1, %v2705_v60  ;;  %v2904_v49 = vmul.f32 %v13238_v44, %v13280_v50  ;;  %v2905_v40 = vmul.f32 %v13238_v44, %v2705_v60  ;;  %v13293_v21 = vmul.f32 %v13242_v10, %v2705_v60 }
 0x2ef   : > { %v9950_v4 = vpop.f32.mrb[23].mxu1  ;;  %v2767_v5 = vrot.slane %v2732_v46, 1  ;;  %v2768_v57 = vrot.slane %v2733_v16, 1  ;;  %v2843_v20 = vsel %vm2837_vm8, %v2841_v43, %v2842_v42  ;;  %v13301_v24 = vmul.f32 %v13245_v51, %v2705_v60 }
 0x2f0   : > { %v13306_v14 = vadd.f32 %v2843_v20, %v2794_v15  ;;  %v13308_v33 = vadd.f32 %v3012_v6, %v2966_v7  ;;  %v2718_v12 = vmul.f32 %v13211_v13, %v13280_v50  ;;  %v2844_v54 = vrot.slane %v2809_v31, 2 }
 0x2f1   : > { %v2845_v38 = vrot.slane %v2810_v41, 2  ;;  %v2937_v43 = vrot.slane %v2904_v49, 1  ;;  %v2938_v42 = vrot.slane %v2905_v40, 1  ;;  %v13313_v59 = vsel %vm1870_vm5, 0.0, %v2681_v17 }
 0x2f2   : > { %v2445_v0 = vpop.f32.mrb[24].mxu1  ;;  %v2769_v63 = vsel %vm2760_vm6, %v2767_v5, %v2768_v57  ;;  %v2706_v15 = vsel %vm1870_vm5, %v2681_v17, 0.0  ;;  %v2734_v53 = vmul.f32 %v13201_v35, %v13313_v59  ;;  %v2811_v16 = vmul.f32 %v13208_v1, %v13313_v59 }
 0x2f3   : > { %v9955_v23 = vpop.f32.mrb[25].mxu1  ;;  %v2735_v46 = vmul.f32 %v13201_v35, %v2706_v15  ;;  %v2812_v4 = vmul.f32 %v13208_v1, %v2706_v15  ;;  %v13326_v41 = vmul.f32 %v13250_v47, %v2705_v60  ;;  %v2906_v17 = vmul.f32 %v13238_v44, %v13313_v59 }
 0x2f4   : > { %v2770_v49 = vrot.slane %v2734_v53, 1  ;;  %v2907_v40 = vmul.f32 %v13238_v44, %v2706_v15  ;;  %v2795_v57 = vadd.f32 %v2769_v63, %v2718_v12  ;;  %v2846_v20 = vsel %vm2837_vm8, %v2844_v54, %v2845_v38 }
 0x2f5   : > { %v2771_v6 = vrot.slane %v2735_v46, 1  ;;  %v13333_v23 = vmul.f32 %v13242_v10, %v2706_v15  ;;  %v2847_v62 = vrot.slane %v2811_v16, 2  ;;  %v2848_v7 = vrot.slane %v2812_v4, 2 }
 0x2f6   : > { %v2518_v31 = vpop.f32.mrb[26].mxu1  ;;  %v2940_v9 = vrot.slane %v2906_v17, 1  ;;  %v13336_v60 = vmul.f32 %v13245_v51, %v2706_v15  ;;  %v2941_v28 = vrot.slane %v2907_v40, 1  ;;  %v13340_v22 = vmul.f32 %v13250_v47, %v2706_v15 }
 0x2f7   : > { %v9960_v5 = vpop.f32.mrb[27].mxu1  ;;  %v2772_v53 = vsel %vm2760_vm6, %v2770_v49, %v2771_v6  ;;  %v17399_v12 = vmax.f32 %v17390_v61, 0.0  ;;  %v13345_v38 = vsel %vm2760_vm6, %v2937_v43, %v2938_v42  ;;  %v2719_v16 = vmul.f32 %v13211_v13, %v13313_v59 }
 0x2f8   : > { %v17400_v4 = vmax.f32 %v17393_v55, 0.0  ;;  %v13352_v40 = vadd.f32 %v2846_v20, %v2795_v57  ;;  %v17401_v5 = vmax.f32 %v17392_v2, 0.0  ;;  %v2849_v6 = vsel %vm2837_vm8, %v2847_v62, %v2848_v7 }
 0x2f9   : > { %v2373_v63 = vadd.f32 %v2372_v27, %v17399_v12  ;;  %v17402_v27 = vmax.f32 %v17395_v19, 0.0  ;;  %v2796_v42 = vadd.f32 %v2772_v53, %v2719_v16  ;;  %v13386_v16 = vmul.f32 %v13253_v48, %v13280_v50 }
 0x2fa   : > { %v2591_v54 = vpop.f32.mrb[28].mxu1  ;;  %v2446_v17 = vadd.f32 %v2445_v0, %v17400_v4  ;;  %v13356_v61 = vadd.f32 %v2518_v31, %v17401_v5  ;;  %v13366_v0 = vsel %vm2760_vm6, %v2940_v9, %v2941_v28  ;;  %v13392_v5 = vmul.f32 %v13245_v51, %v13280_v50 }
 0x2fb   : > { %v9965_v49 = vpop.f32.mrb[29].mxu1  ;;  %v2682_v15 = vrot.slane %v2373_v63, 7  ;;  %v13360_v43 = vadd.f32 %v2591_v54, %v17402_v27  ;;  %v13388_v4 = vadd.f32 %v2849_v6, %v2796_v42  ;;  %v13402_v12 = vmul.f32 %v13250_v47, %v13280_v50 }
 0x2fc   : > { %v2683_v53 = vrot.slane %v2446_v17, 7 }
 0x2fd   : > { %v13370_v2 = vsel %vm1870_vm5, 0.0, %v2682_v15  ;;  %v2707_v31 = vsel %vm1870_vm5, %v2682_v15, 0.0 }
 0x2fe   : > { %v13373_v19 = vpop.f32.mrb[30].mxu1  ;;  %v2736_v20 = vmul.f32 %v13201_v35, %v13370_v2  ;;  %v2737_v62 = vmul.f32 %v13201_v35, %v2707_v31  ;;  %v2813_v7 = vmul.f32 %v13208_v1, %v13370_v2  ;;  %v2814_v9 = vmul.f32 %v13208_v1, %v2707_v31 }
 0x2ff   : > { %v9970_v28 = vpop.f32.mrb[31].mxu1  ;;  %v2908_v63 = vmul.f32 %v13238_v44, %v13370_v2  ;;  %v2909_v54 = vmul.f32 %v13238_v44, %v2707_v31  ;;  %v2720_v17 = vmul.f32 %v13211_v13, %v13370_v2  ;;  %v13397_v27 = vmul.f32 %v13242_v10, %v2707_v31 }
 0x300   : > { %v2773_v49 = vrot.slane %v2736_v20, 1  ;;  %v2774_v15 = vrot.slane %v2737_v62, 1  ;;  %v2684_v28 = vrot.slane %v13356_v61, 7  ;;  %v2850_v6 = vrot.slane %v2813_v7, 2 }
 0x301   : > { %v13406_v20 = vmul.f32 %v13245_v51, %v2707_v31  ;;  %v13409_v62 = vsel %vm1870_vm5, 0.0, %v2683_v53  ;;  %v2851_v57 = vrot.slane %v2814_v9, 2  ;;  %v2943_v55 = vrot.slane %v2908_v63, 1 }
 0x302   : > { %v2775_v42 = vsel %vm2760_vm6, %v2773_v49, %v2774_v15  ;;  %v2944_v46 = vrot.slane %v2909_v54, 1  ;;  %v2708_v25 = vsel %vm1870_vm5, %v2683_v53, 0.0  ;;  %v13413_v61 = vmul.f32 %v13250_v47, %v2707_v31 }
 0x303   : > { %v2797_v30 = vadd.f32 %v2775_v42, %v2720_v17  ;;  %v2738_v45 = vmul.f32 %v13201_v35, %v13409_v62  ;;  %v2739_v7 = vmul.f32 %v13201_v35, %v2708_v25  ;;  %v2815_v15 = vmul.f32 %v13208_v1, %v13409_v62 }
 0x304   : > { %v2816_v9 = vmul.f32 %v13208_v1, %v2708_v25  ;;  %v2685_v63 = vrot.slane %v13360_v43, 7  ;;  %v2910_v31 = vmul.f32 %v13238_v44, %v13409_v62  ;;  %v2911_v17 = vmul.f32 %v13238_v44, %v2708_v25 }
 0x305   : > { %v2776_v54 = vrot.slane %v2738_v45, 1  ;;  %v2777_v53 = vrot.slane %v2739_v7, 1  ;;  %v2852_v42 = vsel %vm2837_vm8, %v2850_v6, %v2851_v57  ;;  %v13428_v34 = vsel %vm2760_vm6, %v2943_v55, %v2944_v46 }
 0x306   : > { %v13432_v58 = vmul.f32 %v13242_v10, %v2708_v25  ;;  %v13434_v56 = vadd.f32 %v2852_v42, %v2797_v30  ;;  %v2721_v43 = vmul.f32 %v13211_v13, %v13409_v62  ;;  %v2853_v7 = vrot.slane %v2815_v15, 2 }
 0x307   : > { %v2778_v3 = vsel %vm2760_vm6, %v2776_v54, %v2777_v53  ;;  %v2854_v36 = vrot.slane %v2816_v9, 2  ;;  %v13441_v57 = vmul.f32 %v13245_v51, %v2708_v25  ;;  %v13444_v46 = vsel %vm1870_vm5, 0.0, %v2684_v28 }
 0x308   : > { %17403 = vst [vmem:[#allocation120_spill] sm:$0xff] %v13432_v58  ;;  %v2946_v55 = vrot.slane %v2910_v31, 1  ;;  %v2947_v6 = vrot.slane %v2911_v17, 1  ;;  %v13447_v30 = vmul.f32 %v13250_v47, %v2708_v25  ;;  %v2709_v42 = vsel %vm1870_vm5, %v2684_v28, 0.0 }
 0x309   : > { %v2740_v15 = vmul.f32 %v13201_v35, %v13444_v46  ;;  %v2741_v9 = vmul.f32 %v13201_v35, %v2709_v42  ;;  %v2817_v54 = vmul.f32 %v13208_v1, %v13444_v46  ;;  %v2798_v53 = vadd.f32 %v2778_v3, %v2721_v43 }
 0x30a   : > { %v2818_v49 = vmul.f32 %v13208_v1, %v2709_v42  ;;  %v2912_v31 = vmul.f32 %v13238_v44, %v13444_v46  ;;  %v2913_v25 = vmul.f32 %v13238_v44, %v2709_v42  ;;  %v2855_v28 = vsel %vm2837_vm8, %v2853_v7, %v2854_v36 }
 0x30b   : > { %v2779_v45 = vrot.slane %v2740_v15, 1  ;;  %v2780_v37 = vrot.slane %v2741_v9, 1  ;;  %v13463_v29 = vsel %vm2760_vm6, %v2946_v55, %v2947_v6  ;;  %v13467_v3 = vmul.f32 %v13242_v10, %v2709_v42 }
 0x30c   : > { %17404 = vst [vmem:[#allocation121_spill] sm:$0xff] %v13463_v29  ;;  %v13470_v43 = vmul.f32 %v13245_v51, %v2709_v42  ;;  %v2856_v8 = vrot.slane %v2817_v54, 2  ;;  %v2857_v11 = vrot.slane %v2818_v49, 2  ;;  %v2949_v26 = vrot.slane %v2912_v31, 1 }
 0x30d   : > { %v13473_v36 = vsel %vm1870_vm5, 0.0, %v2685_v63  ;;  %v2781_v7 = vsel %vm2760_vm6, %v2779_v45, %v2780_v37  ;;  %v2950_v15 = vrot.slane %v2913_v25, 1  ;;  %v13477_v55 = vmul.f32 %v13250_v47, %v2709_v42 }
 0x30e   : > { %v2710_v6 = vsel %vm1870_vm5, %v2685_v63, 0.0  ;;  %v2722_v9 = vmul.f32 %v13211_v13, %v13444_v46  ;;  %v2742_v39 = vmul.f32 %v13201_v35, %v13473_v36  ;;  %v13486_v31 = vadd.f32 %v2855_v28, %v2798_v53 }
 0x30f   : > { %v2743_v49 = vmul.f32 %v13201_v35, %v2710_v6  ;;  %v2820_v54 = vmul.f32 %v13208_v1, %v2710_v6  ;;  %v2914_v42 = vmul.f32 %v13238_v44, %v13473_v36  ;;  %v2858_v25 = vsel %vm2837_vm8, %v2856_v8, %v2857_v11 }
 0x310   : > { %v2799_v63 = vadd.f32 %v2781_v7, %v2722_v9  ;;  %v2782_v17 = vrot.slane %v2742_v39, 1  ;;  %v13494_v29 = vsel %vm2760_vm6, %v2949_v26, %v2950_v15  ;;  %v2915_v53 = vmul.f32 %v13238_v44, %v2710_v6 }
 0x311   : > { %v2783_v58 = vrot.slane %v2743_v49, 1  ;;  %v13499_v28 = vmul.f32 %v13242_v10, %v2710_v6  ;;  %v2860_v37 = vrot.slane %v2820_v54, 2  ;;  %v13502_v45 = vmul.f32 %v13245_v51, %v2710_v6 }
 0x312   : > { %v3062_v7 = vadd.f32 %v13386_v16, %v13308_v33  ;;  %v3106_v39 = vrot.slane %v13392_v5, 1  ;;  %v2952_v26 = vrot.slane %v2914_v42, 1  ;;  %v3182_v8 = vrot.slane %v13402_v12, 2 }
 0x313   : > { %v2784_v11 = vsel %vm2760_vm6, %v2782_v17, %v2783_v58  ;;  %v17405_v15 = vmax.f32 %v17394_v52, 0.0  ;;  %v17406_v49 = vrot.slane %v13301_v24, 1  ;;  %v2723_v35 = vmul.f32 %v13211_v13, %v13473_v36 }
 0x314   : > { %v2819_v33 = vmul.f32 %v13208_v1, %v13473_v36  ;;  %v2883_v58 = vmul.f32 %v13235_v32, %v13280_v50  ;;  %v2953_v16 = vrot.slane %v2915_v53, 1  ;;  %v17407_v12 = vrot.slane %v13326_v41, 2 }
 0x315   : > { %v2665_v9 = vadd.f32 %v13373_v19, %v17405_v15  ;;  %v3108_v54 = vsel %vm2760_vm6, %v3106_v39, %v17406_v49  ;;  %v2800_v17 = vadd.f32 %v2784_v11, %v2723_v35  ;;  %v2980_v13 = vmul.f32 %v13242_v10, %v13280_v50 }
 0x316   : > { %v3138_v5 = vadd.f32 %v3108_v54, %v3062_v7  ;;  %v3184_v52 = vsel %vm2837_vm8, %v3182_v8, %v17407_v12  ;;  %v2859_v24 = vrot.slane %v2819_v33, 2  ;;  %v2891_v42 = vadd.f32 %v2883_v58, %v13306_v14 }
 0x317   : > { %v2686_v19 = vrot.slane %v2665_v9, 7  ;;  %v13528_v39 = vmul.f32 %v13250_v47, %v2710_v6  ;;  %v13547_v9 = vadd.f32 %v2858_v25, %v2799_v63  ;;  %v3013_v54 = vrot.slane %v2980_v13, 2 }
 0x318   : > { %v3214_v1 = vadd.f32 %v3184_v52, %v3138_v5  ;;  %v2861_v41 = vsel %vm2837_vm8, %v2859_v24, %v2860_v37  ;;  %v3122_v52 = vrot.slane %v13502_v45, 1  ;;  %v13557_v24 = vsel %vm2760_vm6, %v2952_v26, %v2953_v16 }
 0x319   : > { %v13531_v15 = vsel %vm1870_vm5, 0.0, %v2686_v19  ;;  %v13534_v53 = vsel %vm1870_vm5, %v2686_v19, 0.0  ;;  %v2877_v7 = vadd.f32 %v2861_v41, %v2800_v17  ;;  %v3198_v63 = vrot.slane %v13528_v39, 2 }
 0x31a   : > { %v2889_v35 = vmul.f32 %v13235_v32, %v13531_v15  ;;  %v2916_v14 = vmul.f32 %v13238_v44, %v13531_v15  ;;  %v2917_v50 = vmul.f32 %v13238_v44, %v13534_v53  ;;  %v3222_v6 = vmax.f32 %v3214_v1, 0.0  ;;  %v13565_v1 = vld [vmem:[%s16329_s13 + $0x8] sm:$0xff] }
 0x31b   : > { %v2992_v11 = vmul.f32 %v13242_v10, %v13531_v15  ;;  %v2993_v8 = vmul.f32 %v13242_v10, %v13534_v53  ;;  %v3029_v44 = vrot.slane %v13499_v28, 2  ;;  %v2967_v26 = vadd.f32 %v13345_v38, %v2891_v42 }
 0x31c   : > { %v2955_v37 = vrot.slane %v2916_v14, 1  ;;  %v2956_v49 = vrot.slane %v2917_v50, 1  ;;  %v13549_v33 = vmul.f32 0.25, %v3222_v6  ;;  %v13551_v58 = vmul.f32 0.75, %v3222_v6 }
 0x31d   : > { %v2897_v5 = vadd.f32 %v2889_v35, %v2877_v7  ;;  %v3031_v12 = vrot.slane %v2992_v11, 2  ;;  %v3032_v17 = vrot.slane %v2993_v8, 2  ;;  %v13570_v35 = vmul.f32 %v13245_v51, %v13531_v15 }
 0x31e   : > { %v2957_v19 = vsel %vm2760_vm6, %v2955_v37, %v2956_v49  ;;  %v3245_v25 = vadd.f32 %v13551_v58, %v13549_v33  ;;  %v3055_v16 = vmul.f32 %v13253_v48, %v13313_v59  ;;  %v13579_v50 = vmul.f32 %v13245_v51, %v13534_v53 }
 0x31f   : > { %v2973_v13 = vadd.f32 %v2957_v19, %v2897_v5  ;;  %v3033_v41 = vsel %vm2837_vm8, %v3031_v12, %v3032_v17  ;;  %v17408_v6 = vrot.slane %v13293_v21, 2  ;;  %v3076_v11 = vmul.f32 %v13245_v51, %v13313_v59 }
 0x320   : > { %9971 = vmatprep.subr.mxu1 %v3245_v25  ;;  %v3152_v38 = vmul.f32 %v13250_v47, %v13313_v59  ;;  %v2884_v42 = vmul.f32 %v13235_v32, %v13313_v59  ;;  %v2982_v37 = vmul.f32 %v13242_v10, %v13313_v59  ;;  %v3056_v49 = vmul.f32 %v13253_v48, %v13370_v2 }
 0x321   : > { %v13575_v14 = vadd.f32 %v3033_v41, %v2973_v13  ;;  %v3015_v7 = vsel %vm2837_vm8, %v3013_v54, %v17408_v6  ;;  %9972 = vmatpush3.msra.mxu1 %v3245_v25  ;;  %v3109_v21 = vrot.slane %v3076_v11, 1  ;;  %v3078_v54 = vmul.f32 %v13245_v51, %v13370_v2 }
 0x322   : > { %v3043_v8 = vadd.f32 %v3015_v7, %v2967_v26  ;;  %9974 = vmatmul.mubr.msk.f32.vlgmr.msra.gmra.mrb[32].mxu1 %vm3264_vm13, %v13565_v1  ;;  %v3154_v5 = vmul.f32 %v13250_v47, %v13370_v2  ;;  %v3185_v19 = vrot.slane %v3152_v38, 2  ;;  %v2892_v59 = vadd.f32 %v2884_v42, %v13352_v40 }
 0x323   : > { %9983 = vmatprep.mubr.msk.f32.mxu1 %vm3264_vm13, %v13191_v18  ;;  %v3016_v17 = vrot.slane %v2982_v37, 2  ;;  %v17409_v25 = vrot.slane %v13336_v60, 1  ;;  %v3112_v41 = vrot.slane %v3078_v54, 1  ;;  %v2885_v6 = vmul.f32 %v13235_v32, %v13370_v2 }
 0x324   : > { %v3063_v12 = vadd.f32 %v3055_v16, %v3043_v8  ;;  %v3188_v26 = vrot.slane %v3154_v5, 2  ;;  %v17410_v11 = vrot.slane %v13340_v22, 2  ;;  %v2968_v8 = vadd.f32 %v13366_v0, %v2892_v59 }
 0x325   : > { %v3111_v13 = vsel %vm2760_vm6, %v3109_v21, %v17409_v25  ;;  %v17411_v38 = vrot.slane %v13333_v23, 2  ;;  %v17412_v60 = vrot.slane %v13406_v20, 1  ;;  %v17413_v37 = vrot.slane %v13413_v61, 2 }
 0x326   : > { %v3139_v7 = vadd.f32 %v3111_v13, %v3063_v12  ;;  %v3187_v16 = vsel %vm2837_vm8, %v3185_v19, %v17410_v11  ;;  %v2893_v54 = vadd.f32 %v2885_v6, %v13388_v4  ;;  %v2984_v22 = vmul.f32 %v13242_v10, %v13370_v2 }
 0x327   : > { %v3018_v40 = vsel %vm2837_vm8, %v3016_v17, %v17411_v38  ;;  %v3114_v42 = vsel %vm2760_vm6, %v3112_v41, %v17412_v60  ;;  %v3190_v21 = vsel %vm2837_vm8, %v3188_v26, %v17413_v37  ;;  %v3057_v23 = vmul.f32 %v13253_v48, %v13409_v62 }
 0x328   : > { %v3215_v5 = vadd.f32 %v3187_v16, %v3139_v7  ;;  %v3044_v12 = vadd.f32 %v3018_v40, %v2968_v8  ;;  %v3080_v0 = vmul.f32 %v13245_v51, %v13409_v62  ;;  %v2969_v20 = vadd.f32 %v13428_v34, %v2893_v54  ;;  %v17417_v40 = vld [vmem:[#allocation121_spill] sm:$0xff] }
 0x329   : > { %v3019_v19 = vrot.slane %v2984_v22, 2  ;;  %v3156_v61 = vmul.f32 %v13250_v47, %v13409_v62  ;;  %v2886_v4 = vmul.f32 %v13235_v32, %v13409_v62  ;;  %v2986_v25 = vmul.f32 %v13242_v10, %v13409_v62 }
 0x32a   : > { %v3223_v59 = vmax.f32 %v3215_v5, 0.0  ;;  %v3064_v17 = vadd.f32 %v3056_v49, %v3044_v12  ;;  %v3115_v2 = vrot.slane %v3080_v0, 1  ;;  %v17414_v13 = vrot.slane %v13397_v27, 2  ;;  %v17418_v12 = vld [vmem:[#allocation120_spill] sm:$0xff] }
 0x32b   : > { %v3191_v26 = vrot.slane %v3156_v61, 2  ;;  %v2894_v34 = vadd.f32 %v2886_v4, %v13434_v56  ;;  %v3058_v6 = vmul.f32 %v13253_v48, %v13444_v46  ;;  %v17415_v49 = vrot.slane %v13441_v57, 1 }
 0x32c   : > { %v3021_v41 = vsel %vm2837_vm8, %v3019_v19, %v17414_v13  ;;  %v3231_v7 = vmul.f32 0.25, %v3223_v59  ;;  %v3238_v11 = vmul.f32 0.75, %v3223_v59  ;;  %v3140_v16 = vadd.f32 %v3114_v42, %v3064_v17 }
 0x32d   : > { %v3045_v8 = vadd.f32 %v3021_v41, %v2969_v20  ;;  %v3117_v38 = vsel %vm2760_vm6, %v3115_v2, %v17415_v49  ;;  %v17416_v62 = vrot.slane %v13447_v30, 2  ;;  %v2970_v60 = vadd.f32 %v17417_v40, %v2894_v34 }
 0x32e   : > { %v3022_v37 = vrot.slane %v2986_v25, 2  ;;  %v3254_v56 = vadd.f32 %v13551_v58, %v3231_v7  ;;  %v3246_v54 = vadd.f32 %v3238_v11, %v13549_v33  ;;  %v3216_v22 = vadd.f32 %v3190_v21, %v3140_v16 }
 0x32f   : > { %v3193_v27 = vsel %vm2837_vm8, %v3191_v26, %v17416_v62  ;;  %v3065_v5 = vadd.f32 %v3057_v23, %v3045_v8  ;;  %v17419_v42 = vrot.slane %v17418_v12, 2  ;;  %v3082_v57 = vmul.f32 %v13245_v51, %v13444_v46 }
 0x330   : > { %v3158_v30 = vmul.f32 %v13250_v47, %v13444_v46  ;;  %v2887_v20 = vmul.f32 %v13235_v32, %v13444_v46  ;;  %9976 = vmatprep.subr.mxu0 %v3254_v56  ;;  %9981 = vmatprep.subr.mxu1 %v3246_v54  ;;  %v3224_v58 = vmax.f32 %v3216_v22, 0.0  ;;  %v2988_v21 = vmul.f32 %v13242_v10, %v13444_v46 }
 0x331   : > { %v3024_v0 = vsel %vm2837_vm8, %v3022_v37, %v17419_v42  ;;  %v3141_v19 = vadd.f32 %v3117_v38, %v3065_v5  ;;  %9977 = vmatpush3.msra.mxu0 %v3254_v56  ;;  %9982 = vmatpush3.msra.mxu1 %v3246_v54  ;;  %v3118_v23 = vrot.slane %v3082_v57, 1  ;;  %v3059_v59 = vmul.f32 %v13253_v48, %v13473_v36 }
 0x332   : > { %v3046_v33 = vadd.f32 %v3024_v0, %v2970_v60  ;;  %v3194_v61 = vrot.slane %v3158_v30, 2  ;;  %v2895_v4 = vadd.f32 %v2887_v20, %v13486_v31  ;;  %9979 = vmatmul.mubr.msk.f32.vlgmr.msra.gmra.mrb[36].mxu0 %vm3264_vm13, %v13565_v1  ;;  %9984 = vmatmul.mubr.msk.f32.vlgmr.msra.gmra.mrb[34].mxu1 %vm3264_vm13, %v13565_v1  ;;  %v3232_v17 = vmul.f32 0.25, %v3224_v58 }
 0x333   : > { %v3239_v2 = vmul.f32 0.75, %v3224_v58  ;;  %v3217_v25 = vadd.f32 %v3193_v27, %v3141_v19  ;;  %9988 = vmatprep.mubr.msk.f32.mxu0 %vm3264_vm13, %v13191_v18  ;;  %9993 = vmatprep.mubr.msk.f32.mxu1 %vm3264_vm13, %v13191_v18  ;;  %v17420_v46 = vrot.slane %v13470_v43, 1  ;;  %v17421_v41 = vrot.slane %v13477_v55, 2 }
 0x334   : > { %v3066_v13 = vadd.f32 %v3058_v6, %v3046_v33  ;;  %v2971_v34 = vadd.f32 %v13494_v29, %v2895_v4  ;;  %v3025_v16 = vrot.slane %v2988_v21, 2  ;;  %v3255_v8 = vadd.f32 %v3238_v11, %v3232_v17 }
 0x335   : > { %v3120_v31 = vsel %vm2760_vm6, %v3118_v23, %v17420_v46  ;;  %v3196_v26 = vsel %vm2837_vm8, %v3194_v61, %v17421_v41  ;;  %v3247_v49 = vadd.f32 %v3239_v2, %v3231_v7  ;;  %v3225_v6 = vmax.f32 %v3217_v25, 0.0  ;;  %v17425_v23 = vld [vmem:[#allocation54_spill] sm:$0xff] }
 0x336   : > { %v3142_v38 = vadd.f32 %v3120_v31, %v3066_v13  ;;  %v17422_v62 = vrot.slane %v13467_v3, 2  ;;  %v3084_v43 = vmul.f32 %v13245_v51, %v13473_v36  ;;  %v3160_v40 = vmul.f32 %v13250_v47, %v13473_v36  ;;  %9986 = vmatprep.subr.mxu0 %v3255_v8 }
 0x337   : > { %v2888_v55 = vmul.f32 %v13235_v32, %v13473_v36  ;;  %9991 = vmatprep.subr.mxu1 %v3247_v49  ;;  %v3233_v29 = vmul.f32 0.25, %v3225_v6  ;;  %v3240_v11 = vmul.f32 0.75, %v3225_v6  ;;  %9987 = vmatpush3.msra.mxu0 %v3255_v8  ;;  %v2990_v51 = vmul.f32 %v13242_v10, %v13473_v36 }
 0x338   : > { %v3027_v27 = vsel %vm2837_vm8, %v3025_v16, %v17422_v62  ;;  %v3218_v7 = vadd.f32 %v3196_v26, %v3142_v38  ;;  %9992 = vmatpush3.msra.mxu1 %v3247_v49  ;;  %v3121_v3 = vrot.slane %v3084_v43, 1  ;;  %v3197_v37 = vrot.slane %v3160_v40, 2  ;;  %9989 = vmatmul.mubr.msk.f32.vlgmr.msra.gmra.mrb[38].mxu0 %vm3264_vm13, %v13565_v1  ;;  %v13756_v62 = vld [vmem:[%s16335_s19] ss:$0 sm:$0xff]  ;;  %v17426_v43 = vld [vmem:[#allocation22_spill] sm:$0xff] }
 0x339   : > { %v3047_v60 = vadd.f32 %v3027_v27, %v2971_v34  ;;  %v2896_v56 = vadd.f32 %v2888_v55, %v13547_v9  ;;  %9994 = vmatmul.mubr.msk.f32.vlgmr.msra.gmra.mrb[36].mxu1 %vm3264_vm13, %v13565_v1  ;;  %v3256_v32 = vadd.f32 %v3239_v2, %v3233_v29  ;;  %v3248_v54 = vadd.f32 %v3240_v11, %v3232_v17  ;;  %v8157_v55 = vld [vmem:[%s16337_s21] sm:$0xff] }
 0x33a   : > { %v3226_v22 = vmax.f32 %v3218_v7, 0.0  ;;  %v3162_v12 = vmul.f32 %v13250_v47, %v13531_v15  ;;  %9998 = vmatprep.mubr.msk.f32.mxu0 %vm3264_vm13, %v13191_v18  ;;  %10003 = vmatprep.mubr.msk.f32.mxu1 %vm3264_vm13, %v13191_v18  ;;  %v3123_v10 = vsel %vm2760_vm6, %v3121_v3, %v3122_v52  ;;  %v3028_v9 = vrot.slane %v2990_v51, 2  ;;  %v17428_v7 = vld [vmem:[#allocation30_spill] sm:$0xff]  ;;  %v17429_v3 = vld [vmem:[#allocation20_spill] sm:$0xff]  ;;  %v17431_v51 = vld [vmem:[#allocation117_spill] sm:$0xff] }
 0x33b   : > { %v3067_v5 = vadd.f32 %v3059_v59, %v3047_v60  ;;  %v2972_v36 = vadd.f32 %v13557_v24, %v2896_v56  ;;  %v3163_v42 = vmul.f32 %v13250_v47, %v13534_v53  ;;  %9996 = vmatprep.subr.mxu0 %v3256_v32  ;;  %10001 = vmatprep.subr.mxu1 %v3248_v54  ;;  %v3124_v20 = vrot.slane %v13570_v35, 1  ;;  %v17423_v24 = vld [vmem:[#allocation24_spill] sm:$0xff]  ;;  %v17430_v56 = vld [vmem:[#allocation25_spill] sm:$0xff] }
 0x33c   : > { %v3234_v0 = vmul.f32 0.25, %v3226_v22  ;;  %v3241_v57 = vmul.f32 0.75, %v3226_v22  ;;  %9997 = vmatpush3.msra.mxu0 %v3256_v32  ;;  %10002 = vmatpush3.msra.mxu1 %v3248_v54  ;;  %v3199_v45 = vsel %vm2837_vm8, %v3197_v37, %v3198_v63  ;;  %v3030_v52 = vsel %vm2837_vm8, %v3028_v9, %v3029_v44  ;;  %v17424_v44 = vld [vmem:[#allocation52_spill] sm:$0xff] }
 0x33d   : > { %v3143_v30 = vadd.f32 %v3123_v10, %v3067_v5  ;;  %v3069_v47 = vadd.f32 %v17423_v24, %v13575_v14  ;;  %v3125_v53 = vrot.slane %v13579_v50, 1  ;;  %9999 = vmatmul.mubr.msk.f32.vlgmr.msra.gmra.mrb[40].mxu0 %vm3264_vm13, %v13565_v1  ;;  %10004 = vmatmul.mubr.msk.f32.vlgmr.msra.gmra.mrb[38].mxu1 %vm3264_vm13, %v13565_v1  ;;  %v3060_v63 = vmul.f32 %v13253_v48, %v13531_v15  ;;  %v17432_v54 = vld [vmem:[#allocation116_spill] sm:$0xff]  ;;  %v17433_v5 = vld [vmem:[#allocation123_spill] sm:$0xff]  ;;  %v17440_v24 = vld [vmem:[#allocation13_spill] sm:$0xff] }
 0x33e   : > { %v3257_v35 = vadd.f32 %v3240_v11, %v3234_v0  ;;  %v3249_v58 = vadd.f32 %v3241_v57, %v3233_v29  ;;  %10008 = vmatprep.mubr.msk.f32.mxu0 %vm3264_vm13, %v13191_v18  ;;  %10013 = vmatprep.mubr.msk.f32.mxu1 %vm3264_vm13, %v13191_v18  ;;  %v3048_v28 = vadd.f32 %v3030_v52, %v2972_v36  ;;  %v3200_v50 = vrot.slane %v3162_v12, 2  ;;  %v17427_v29 = vld [vmem:[#allocation35_spill] sm:$0xff]  ;;  %v17435_v36 = vld [vmem:[#allocation118_spill] sm:$0xff] }
 0x33f   : > { %v3219_v39 = vadd.f32 %v3199_v45, %v3143_v30  ;;  %v3145_v14 = vadd.f32 %v17424_v44, %v3069_v47  ;;  %v3201_v19 = vrot.slane %v3163_v42, 2  ;;  %v3126_v4 = vsel %vm2760_vm6, %v3124_v20, %v3125_v53  ;;  %v17434_v12 = vld [vmem:[#allocation119_spill] sm:$0xff]  ;;  %v17436_v42 = vld [vmem:[#allocation40_spill] sm:$0xff]  ;;  %v17441_v53 = vld [vmem:[#allocation21_spill] sm:$0xff] }
 0x340   : > { %10006 = vmatprep.subr.mxu0 %v3257_v35  ;;  %10011 = vmatprep.subr.mxu1 %v3249_v58  ;;  %v3068_v21 = vadd.f32 %v3060_v63, %v3048_v28  ;;  %v8131_v40 = vadd.f32 %v13756_v62, %v17426_v43  ;;  %v8132_v11 = vadd.f32 %v13756_v62, %v17427_v29  ;;  %v17438_v20 = vld [vmem:[#allocation15_spill] sm:$0xff]  ;;  %v17439_v45 = vld [vmem:[#allocation28_spill] sm:$0xff]  ;;  %v17443_v63 = vld [vmem:[#allocation37_spill] sm:$0xff] }
 0x341   : > { %v3227_v33 = vmax.f32 %v3219_v39, 0.0  ;;  %10007 = vmatpush3.msra.mxu0 %v3257_v35  ;;  %10012 = vmatpush3.msra.mxu1 %v3249_v58  ;;  %v3221_v61 = vadd.f32 %v17425_v23, %v3145_v14  ;;  %v3202_v13 = vsel %vm2837_vm8, %v3200_v50, %v3201_v19  ;;  %v8117_v60 = vadd.f32 %v13756_v62, %v17428_v7  ;;  %v17442_v58 = vld [vmem:[#allocation26_spill] sm:$0xff]  ;;  %v17445_v50 = vld [vmem:[#allocation36_spill] sm:$0xff]  ;;  %v17453_v43 = vld [vmem:[#allocation47_spill] sm:$0xff] }
 0x342   : > { %10009 = vmatmul.mubr.msk.f32.vlgmr.msra.gmra.mrb[42].mxu0 %vm3264_vm13, %v13565_v1  ;;  %10014 = vmatmul.mubr.msk.f32.vlgmr.msra.gmra.mrb[40].mxu1 %vm3264_vm13, %v13565_v1  ;;  %v3144_v59 = vadd.f32 %v3126_v4, %v3068_v21  ;;  %v8133_v37 = vadd.f32 %v13756_v62, %v17429_v3  ;;  %v8134_v32 = vadd.f32 %v13756_v62, %v17431_v51  ;;  %v17444_v44 = vld [vmem:[#allocation38_spill] sm:$0xff] }
 0x343   : > { %v3235_v48 = vmul.f32 0.25, %v3227_v33  ;;  %v3242_v15 = vmul.f32 0.75, %v3227_v33  ;;  %10018 = vmatprep.mubr.msk.f32.mxu0 %vm3264_vm13, %v13191_v18  ;;  %10023 = vmatprep.mubr.msk.f32.mxu1 %vm3264_vm13, %v13191_v18  ;;  %v3229_v17 = vmax.f32 %v3221_v61, 0.0  ;;  %v8119_v22 = vadd.f32 %v13756_v62, %v17432_v54  ;;  %v17446_v33 = vld [vmem:[#allocation16_spill] sm:$0xff] }
 0x344   : > { %v3220_v46 = vadd.f32 %v3202_v13, %v3144_v59  ;;  %v8120_v10 = vadd.f32 %v13756_v62, %v17434_v12  ;;  %v8136_v9 = vadd.f32 %v13756_v62, %v17435_v36  ;;  %v7672_v52 = vmul.f32 %v17439_v45, %v17438_v20  ;;  %v17448_v59 = vld [vmem:[#allocation109_spill] sm:$0xff]  ;;  %v17450_v13 = vld [vmem:[#allocation122_spill] sm:$0xff]  ;;  %v17460_v36 = vld [vmem:[#allocation132_spill] sm:$0xff] }
 0x345   : > { %v3258_v2 = vadd.f32 %v3241_v57, %v3235_v48  ;;  %v3250_v25 = vadd.f32 %v3242_v15, %v3234_v0  ;;  %v3253_v41 = vmul.f32 0.25, %v3229_v17  ;;  %v3244_v26 = vmul.f32 0.75, %v3229_v17  ;;  %v17437_v57 = vld [vmem:[#allocation134_spill] sm:$0xff] }
 0x346   : > { %v3228_v31 = vmax.f32 %v3220_v46, 0.0  ;;  %v8121_v0 = vadd.f32 %v13756_v62, %v17436_v42  ;;  %v8137_v30 = vadd.f32 %v13756_v62, %v17437_v57  ;;  %v7673_v47 = vmul.f32 %v17439_v45, %v17440_v24  ;;  %v17461_v42 = vld [vmem:[#allocation133_spill] sm:$0xff] }
 0x347   : > { %10016 = vmatprep.subr.mxu0 %v3258_v2  ;;  %10021 = vmatprep.subr.mxu1 %v3250_v25  ;;  %v3261_v27 = vadd.f32 %v3253_v41, %v3244_v26  ;;  %v8122_v35 = vadd.f32 %v13756_v62, %v17441_v53  ;;  %v8138_v39 = vadd.f32 %v13756_v62, %v17442_v58  ;;  %v7798_v23 = vrot.slane %v7672_v52, 1 }
 0x348   : > { %10017 = vmatpush3.msra.mxu0 %v3258_v2  ;;  %10022 = vmatpush3.msra.mxu1 %v3250_v25  ;;  %v3236_v34 = vmul.f32 0.25, %v3228_v31  ;;  %v3243_v16 = vmul.f32 0.75, %v3228_v31  ;;  %v8123_v28 = vadd.f32 %v13756_v62, %v17443_v63  ;;  %v8139_v14 = vadd.f32 %v13756_v62, %v17444_v44  ;;  %v17449_v2 = vld [vmem:[#allocation110_spill] sm:$0xff]  ;;  %v8149_v63 = vld [vmem:[%s16336_s20] sm:$0xff] }
 0x349   : > { %10019 = vmatmul.mubr.msk.f32.vlgmr.msra.gmra.mrb[44].mxu0 %vm3264_vm13, %v13565_v1  ;;  %10024 = vmatmul.mubr.msk.f32.vlgmr.msra.gmra.mrb[42].mxu1 %vm3264_vm13, %v13565_v1  ;;  %v7589_v19 = vmul.f32 %v17445_v50, %v17438_v20  ;;  %v7674_v21 = vmul.f32 %v17439_v45, %v17446_v33  ;;  %v7799_v61 = vrot.slane %v7673_v47, 1  ;;  %v8124_v17 = vadd.f32 %v13756_v62, %v17448_v59  ;;  %v17462_v45 = vld [vmem:[#allocation153_spill] sm:$0xff]  ;;  %v17463_v47 = vld [vmem:[#allocation34_spill] sm:$0xff]  ;;  %v17464_v59 = vld [vmem:[#allocation12_spill] sm:$0xff] }
 0x34a   : > { %10028 = vmatprep.mubr.msk.f32.mxu0 %vm3264_vm13, %v13191_v18  ;;  %10033 = vmatprep.mubr.msk.f32.mxu1 %vm3264_vm13, %v13191_v18  ;;  %v3259_v8 = vadd.f32 %v3242_v15, %v3236_v34  ;;  %v3251_v49 = vadd.f32 %v3243_v16, %v3235_v48  ;;  %v3260_v6 = vadd.f32 %v3253_v41, %v3243_v16  ;;  %v17447_v48 = vld [vmem:[#allocation29_spill] sm:$0xff]  ;;  %v17451_v41 = vld [vmem:[#allocation124_spill] sm:$0xff] }
 0x34b   : > { %v3252_v38 = vadd.f32 %v3244_v26, %v3236_v34  ;;  %v7916_v15 = vmul.f32 %v17447_v48, %v17438_v20  ;;  %v7917_v4 = vmul.f32 %v17447_v48, %v17440_v24  ;;  %v8140_v25 = vadd.f32 %v13756_v62, %v17449_v2  ;;  %v17452_v34 = vld [vmem:[#allocation129_spill] sm:$0xff] }
 0x34c   : > { %10026 = vmatprep.subr.mxu0 %v3259_v8  ;;  %10031 = vmatprep.subr.mxu1 %v3251_v49  ;;  %v8125_v46 = vadd.f32 %v13756_v62, %v17450_v13  ;;  %v7590_v31 = vmul.f32 %v17445_v50, %v17440_v24  ;;  %v8141_v26 = vadd.f32 %v13756_v62, %v17451_v41  ;;  %v17465_v13 = vld [vmem:[#allocation14_spill] sm:$0xff]  ;;  %v17466_v41 = vld [vmem:[#allocation17_spill] sm:$0xff] }
 0x34d   : > { %10027 = vmatpush3.msra.mxu0 %v3259_v8  ;;  %10032 = vmatpush3.msra.mxu1 %v3251_v49  ;;  %v7621_v16 = vadd.f32 %v7589_v19, %v17452_v34  ;;  %v7801_v8 = vrot.slane %v7674_v21, 1  ;;  %v7918_v49 = vmul.f32 %v17447_v48, %v17446_v33  ;;  %v8130_v52 = vadd.f32 %v13756_v62, %v17462_v45  ;;  %v8153_v19 = vld [vmem:[%s16336_s20 + $0x20] sm:$0xff]  ;;  %v8154_v21 = vld [vmem:[%s16336_s20 + $0x28] sm:$0xff]  ;;  %v8156_v48 = vld [vmem:[%s16336_s20 + $0x38] sm:$0xff] }
 0x34e   : > { %10029 = vmatmul.mubr.msk.f32.vlgmr.msra.gmra.mrb[46].mxu0 %vm3264_vm13, %v13565_v1  ;;  %10034 = vmatmul.mubr.msk.f32.vlgmr.msra.gmra.mrb[44].mxu1 %vm3264_vm13, %v13565_v1  ;;  %v8146_v53 = vadd.f32 %v13756_v62, %v17463_v47 }
 0x34f   : > { %10036 = vmatprep.subr.mxu0 %v3260_v6  ;;  %10041 = vmatprep.subr.mxu1 %v3252_v38  ;;  %v7802_v51 = vsel %vm2760_vm6, %v7799_v61, %v7801_v8 }
 0x350   : > { %10037 = vmatpush3.msra.mxu0 %v3260_v6  ;;  %10038 = vmatprep.mubr.msk.f32.mxu0 %vm3264_vm13, %v13191_v18  ;;  %v7800_v6 = vsel %vm2760_vm6, %v7798_v23, %v7799_v61  ;;  %v10262_v23 = vpack.c.bf16 %v8154_v21, %v8153_v19  ;;  %v8155_v61 = vld [vmem:[%s16336_s20 + $0x30] sm:$0xff] }
 0x351   : > { %10042 = vmatpush3.msra.mxu1 %v3252_v38  ;;  %10043 = vmatprep.mubr.msk.f32.mxu1 %vm3264_vm13, %v13191_v18  ;;  %v8042_v38 = vrot.slane %v7916_v15, 2  ;;  %v10266_v15 = vpack.c.bf16 %v8156_v48, %v8155_v61 }
 0x352   : > { %10039 = vmatmul.mubr.msk.f32.vlgmr.msra.gmra.mrb[48].mxu0 %vm3264_vm13, %v13565_v1  ;;  %10044 = vmatmul.mubr.msk.f32.vlgmr.msra.gmra.mrb[46].mxu1 %vm3264_vm13, %v13565_v1 }
 0x353   : > { %10046 = vmatprep.subr.mxu0 %v3261_v27  ;;  %10074 = vmatprep.mubr.msk.f32.mxu1 %vm3264_vm13, %v8131_v40  ;;  %v8126_v40 = vadd.f32 %v13756_v62, %v17453_v43 }
 0x354   : > { %10047 = vmatpush3.msra.mxu0 %v3261_v27  ;;  %10286 = vmatprep.subr.mxu1 %v8157_v55  ;;  %v8043_v27 = vrot.slane %v7917_v4, 2  ;;  %v4471_v4 = vld [vmem:[%s16332_s16] sm:$0x7] }
 0x355   : > { %10048 = vmatprep.mubr.msk.f32.mxu0 %vm3264_vm13, %v13191_v18  ;;  %10287 = vmatpush3.msra.mxu1 %v8157_v55  ;;  %v8118_v18 = vadd.f32 %v13756_v62, %v17430_v56 }
 0x356   : > { %10049 = vmatmul.mubr.msk.f32.vlgmr.msra.gmra.mrb[50].mxu0 %vm3264_vm13, %v13565_v1  ;;  %10075 = vmatmul.mubr.msk.f32.vlgmr.msra.gmra.mrb[48].mxu1 %vm3264_vm13, %v8132_v11  ;;  %v8135_v1 = vadd.f32 %v13756_v62, %v17433_v5  ;;  %v17455_v11 = vld [vmem:[#allocation53_spill] sm:$0xff]  ;;  %v8044_v54 = vsel %vm2837_vm8, %v8042_v38, %v8043_v27 }
 0x357   : > { %10053 = vmatprep.mubr.msk.f32.mxu0 %vm3264_vm13, %v8117_v60  ;;  %10077 = vmatprep.mubr.msk.f32.mxu1 %vm3264_vm13, %v8133_v37  ;;  %v8127_v7 = vadd.f32 %v13756_v62, %v17455_v11  ;;  %v17456_v60 = vld [vmem:[#allocation33_spill] sm:$0xff]  ;;  %v17457_v37 = vld [vmem:[#allocation27_spill] sm:$0xff] }
 0x358   : > { %10051 = vmatprep.subr.mxu0 %v8157_v55  ;;  %v7622_v3 = vadd.f32 %v7590_v31, %v17456_v60  ;;  %v8143_v56 = vadd.f32 %v13756_v62, %v17457_v37 }
 0x359   : > { %10052 = vmatpush3.msra.mxu0 %v8157_v55  ;;  %v17454_v55 = vld [vmem:[#allocation23_spill] sm:$0xff] }
 0x35a   : > { %10054 = vmatmul.mubr.msk.f32.vlgmr.msra.gmra.mrb[52].mxu0 %vm3264_vm13, %v8118_v18  ;;  %10078 = vmatmul.mubr.msk.f32.gmra.mrb[50].mxu1 %vm3264_vm13, %v8134_v32  ;;  %v8142_v29 = vadd.f32 %v13756_v62, %v17454_v55  ;;  %v7865_v18 = vadd.f32 %v7800_v6, %v7621_v16  ;;  %v8045_v32 = vrot.slane %v7918_v49, 2 }
 0x35b   : > { %10056 = vmatprep.mubr.msk.f32.mxu0 %vm3264_vm13, %v8119_v22  ;;  %10080 = vmatprep.mubr.msk.f32.mxu1 %vm3264_vm13, %v8135_v1  ;;  %v17458_v22 = vld [vmem:[#allocation128_spill] sm:$0xff]  ;;  %v17459_v1 = vld [vmem:[#allocation126_spill] sm:$0xff] }
 0x35c   : > { %v8128_v5 = vadd.f32 %v13756_v62, %v17458_v22  ;;  %v8144_v12 = vadd.f32 %v13756_v62, %v17459_v1  ;;  %v8109_v57 = vadd.f32 %v8044_v54, %v7865_v18 }
 0x35e   : > { %10057 = vmatmul.mubr.msk.f32.gmra.mrb[54].mxu0 %vm3264_vm13, %v8120_v10  ;;  %10081 = vmatmul.mubr.msk.f32.gmra.mrb[52].mxu1 %vm3264_vm13, %v8136_v9  ;;  %v7866_v10 = vadd.f32 %v7802_v51, %v7622_v3  ;;  %v8129_v9 = vadd.f32 %v13756_v62, %v17460_v36  ;;  %v8147_v58 = vadd.f32 %v13756_v62, %v8109_v57 }
 0x35f   : > { %10059 = vmatprep.mubr.msk.f32.mxu0 %vm3264_vm13, %v8121_v0  ;;  %10083 = vmatprep.mubr.msk.f32.mxu1 %vm3264_vm13, %v8137_v30  ;;  %v8145_v0 = vadd.f32 %v13756_v62, %v17461_v42  ;;  %v8046_v30 = vsel %vm2837_vm8, %v8043_v27, %v8045_v32  ;;  %v4472_v27 = vld [vmem:[%s16332_s16 + $0x4] sm:$0x7] }
 0x360   : > { %v13945_v3 = vrot.slane %v4472_v27, %v17464_v59  ;;  %v13948_v37 = vrot.slane %v4472_v27, %v17465_v13 }
 0x362   : > { %10060 = vmatmul.mubr.msk.f32.gmra.mrb[56].mxu0 %vm3264_vm13, %v8122_v35  ;;  %10084 = vmatmul.mubr.msk.f32.gmra.mrb[54].mxu1 %vm3264_vm13, %v8138_v39  ;;  %v8110_v35 = vadd.f32 %v8046_v30, %v7866_v10 }
 0x363   : > { %10062 = vmatprep.mubr.msk.f32.mxu0 %vm3264_vm13, %v8123_v28  ;;  %10086 = vmatprep.mubr.msk.f32.mxu1 %vm3264_vm13, %v8139_v14  ;;  %v8150_v28 = vld [vmem:[%s16336_s20 + $0x8] sm:$0xff]  ;;  %v8151_v14 = vld [vmem:[%s16336_s20 + $0x10] sm:$0xff] }
 0x364   : > { %v8148_v39 = vadd.f32 %v13756_v62, %v8110_v35  ;;  %v10254_v44 = vpack.c.bf16 %v8150_v28, %v8149_v63  ;;  %v8152_v62 = vld [vmem:[%s16336_s20 + $0x18] sm:$0xff] }
 0x365   : > { %v10258_v50 = vpack.c.bf16 %v8152_v62, %v8151_v14 }
 0x366   : > { %10063 = vmatmul.mubr.msk.f32.gmra.mrb[58].mxu0 %vm3264_vm13, %v8124_v17  ;;  %10087 = vmatmul.mubr.msk.f32.gmra.mrb[56].mxu1 %vm3264_vm13, %v8140_v25  ;;  %v13915_v17 = vrot.slane %v4471_v4, %v17464_v59 }
 0x367   : > { %10065 = vmatprep.mubr.msk.f32.mxu0 %vm3264_vm13, %v8125_v46  ;;  %10089 = vmatprep.mubr.msk.f32.mxu1 %vm3264_vm13, %v8141_v26  ;;  %v13922_v46 = vrot.slane %v4471_v4, %v17465_v13  ;;  %v13927_v26 = vrot.slane %v4471_v4, %v17466_v41 }
 0x368   : > { %10255 = vmatprep.subr.bf16.mxu1 %v10254_v44  ;;  %v4677_v2 = vmul.f32 %v13915_v17, %v17438_v20  ;;  %v4678_v25 = vmul.f32 %v13915_v17, %v17440_v24  ;;  %v4679_v31 = vmul.f32 %v13915_v17, %v17446_v33 }
 0x369   : > { %10257 = vmatpush3.bf16.msra.mxu1 %v10254_v44  ;;  %17467 = vst [vmem:[#allocation140_spill] sm:$0xff] %v13927_v26  ;;  %v4921_v49 = vmul.f32 %v13922_v46, %v17438_v20  ;;  %v4922_v6 = vmul.f32 %v13922_v46, %v17440_v24  ;;  %v4923_v38 = vmul.f32 %v13922_v46, %v17446_v33 }
 0x36a   : > { %10066 = vmatmul.mubr.msk.f32.gmra.mrb[60].mxu0 %vm3264_vm13, %v8126_v40  ;;  %10090 = vmatmul.mubr.msk.f32.gmra.mrb[58].mxu1 %vm3264_vm13, %v8142_v29  ;;  %v4773_v34 = vrot.slane %v4677_v2, 1  ;;  %v4774_v16 = vrot.slane %v4678_v25, 1  ;;  %v4776_v8 = vrot.slane %v4679_v31, 1  ;;  %v4641_v43 = vmul.f32 %v13927_v26, %v17438_v20 }
 0x36b   : > { %10068 = vmatprep.mubr.msk.f32.mxu0 %vm3264_vm13, %v8127_v7  ;;  %10092 = vmatprep.mubr.msk.f32.mxu1 %vm3264_vm13, %v8143_v56  ;;  %v4642_v40 = vmul.f32 %v13927_v26, %v17440_v24  ;;  %v5017_v11 = vrot.slane %v4921_v49, 2  ;;  %v5018_v7 = vrot.slane %v4922_v6, 2  ;;  %v5020_v60 = vrot.slane %v4923_v38, 2 }
 0x36c   : > { %10259 = vmatprep.subr.bf16.mxu1 %v10258_v50  ;;  %v4775_v55 = vsel %vm2760_vm6, %v4773_v34, %v4774_v16  ;;  %v4777_v29 = vsel %vm2760_vm6, %v4774_v16, %v4776_v8 }
 0x36d   : > { %10261 = vmatpush3.bf16.msra.mxu1 %v10258_v50  ;;  %v4885_v32 = vadd.f32 %v4775_v55, %v4641_v43  ;;  %v4886_v54 = vadd.f32 %v4777_v29, %v4642_v40  ;;  %v5021_v1 = vsel %vm2837_vm8, %v5018_v7, %v5020_v60  ;;  %v4473_v43 = vld [vmem:[%s16332_s16 + $0x8] sm:$0x7] }
 0x36e   : > { %10069 = vmatmul.mubr.msk.f32.gmra.mrb[62].mxu0 %vm3264_vm13, %v8128_v5  ;;  %10093 = vmatmul.mubr.msk.f32.gmra.mrb[60].mxu1 %vm3264_vm13, %v8144_v12  ;;  %v5019_v5 = vsel %vm2837_vm8, %v5017_v11, %v5018_v7  ;;  %v13953_v12 = vrot.slane %v4472_v27, %v17466_v41 }
 0x36f   : > { %10071 = vmatprep.mubr.msk.f32.mxu0 %vm3264_vm13, %v8129_v9  ;;  %10095 = vmatprep.mubr.msk.f32.mxu1 %vm3264_vm13, %v8145_v0  ;;  %v5129_v45 = vadd.f32 %v5019_v5, %v4885_v32  ;;  %v13988_v5 = vrot.slane %v4473_v43, %v17464_v59 }
 0x370   : > { %10263 = vmatprep.subr.bf16.mxu1 %v10262_v23 }
 0x371   : > { %10265 = vmatpush3.bf16.msra.mxu1 %v10262_v23 }
 0x372   : > { %10072 = vmatmul.mubr.msk.f32.gmra.mrb[64].mxu0 %vm3264_vm13, %v8130_v52  ;;  %10096 = vmatmul.mubr.msk.f32.gmra.mrb[62].mxu1 %vm3264_vm13, %v8146_v53  ;;  %v5130_v52 = vadd.f32 %v5021_v1, %v4886_v54  ;;  %v13991_v1 = vrot.slane %v4473_v43, %v17465_v13 }
 0x373   : > { %10098 = vmatprep.mubr.msk.f32.mxu1 %vm3264_vm13, %v8147_v58  ;;  %10267 = vmatprep.subr.bf16.mxu1 %v10266_v15 }
 0x375   : > { %10269 = vmatpush3.bf16.msra.mxu1 %v10266_v15 }
 0x376   : > { %10099 = vmatmul.mubr.msk.f32.gmra.mrb[64].mxu1 %vm3264_vm13, %v8148_v39 }
 0x3f5   : > { %v9975_v56 = vpop.f32.mrb[32].mxu1 }
 0x3f6   : > { %v4509_v18 = vrot.slane %v9975_v56, 7  ;;  %v3337_v51 = vpop.f32.mrb[33].mxu1 }
 0x3f7   : > { %v4508_v22 = vrot.slane %v3337_v51, 7 }
 0x3f8   : > { %v4621_v10 = vsel %vm1870_vm5, %v4509_v18, 0.0 }
 0x3f9   : > { %v4682_v36 = vmul.f32 %v13915_v17, %v4621_v10  ;;  %v4926_v9 = vmul.f32 %v13922_v46, %v4621_v10  ;;  %v5235_v42 = vmul.f32 %v13945_v3, %v4621_v10  ;;  %v5479_v0 = vmul.f32 %v13948_v37, %v4621_v10 }
 0x3fa   : > { %v4510_v57 = vsel %vm1870_vm5, %v4508_v22, %v4509_v18  ;;  %v4605_v30 = vsel %vm1870_vm5, 0.0, %v4508_v22 }
 0x3fb   : > { %v4781_v47 = vrot.slane %v4682_v36, 1  ;;  %v5025_v53 = vrot.slane %v4926_v9, 2  ;;  %v5332_v35 = vrot.slane %v5235_v42, 1  ;;  %v5576_v58 = vrot.slane %v5479_v0, 2 }
 0x3fc   : > { %v4643_v39 = vmul.f32 %v13927_v26, %v4605_v30  ;;  %v4644_v63 = vmul.f32 %v13927_v26, %v4510_v57  ;;  %v4680_v28 = vmul.f32 %v13915_v17, %v4605_v30  ;;  %v4681_v44 = vmul.f32 %v13915_v17, %v4510_v57 }
 0x3fd   : > { %v4924_v14 = vmul.f32 %v13922_v46, %v4605_v30  ;;  %v4925_v62 = vmul.f32 %v13922_v46, %v4510_v57  ;;  %v5165_v50 = vmul.f32 %v13953_v12, %v4605_v30  ;;  %v5166_v19 = vmul.f32 %v13953_v12, %v4510_v57 }
 0x3fe   : > { %v4778_v21 = vrot.slane %v4680_v28, 1  ;;  %v4779_v23 = vrot.slane %v4681_v44, 1  ;;  %v5233_v61 = vmul.f32 %v13945_v3, %v4605_v30  ;;  %v5234_v48 = vmul.f32 %v13945_v3, %v4510_v57 }
 0x3ff   : > { %v5022_v15 = vrot.slane %v4924_v14, 2  ;;  %v5023_v4 = vrot.slane %v4925_v62, 2  ;;  %v5197_v2 = vadd.f32 %v5165_v50, %v5129_v45  ;;  %v5198_v25 = vadd.f32 %v5166_v19, %v5130_v52 }
 0x400   : > { %v4780_v31 = vsel %vm2760_vm6, %v4778_v21, %v4779_v23  ;;  %v4782_v34 = vsel %vm2760_vm6, %v4779_v23, %v4781_v47  ;;  %v5329_v16 = vrot.slane %v5233_v61, 1  ;;  %v5330_v8 = vrot.slane %v5234_v48, 1 }
 0x401   : > { %v4887_v49 = vadd.f32 %v4780_v31, %v4643_v39  ;;  %v4888_v6 = vadd.f32 %v4782_v34, %v4644_v63  ;;  %v5024_v38 = vsel %vm2837_vm8, %v5022_v15, %v5023_v4  ;;  %v5026_v27 = vsel %vm2837_vm8, %v5023_v4, %v5025_v53 }
 0x402   : > { %v5331_v40 = vsel %vm2760_vm6, %v5329_v16, %v5330_v8  ;;  %v5333_v55 = vsel %vm2760_vm6, %v5330_v8, %v5332_v35  ;;  %v5477_v29 = vmul.f32 %v13948_v37, %v4605_v30  ;;  %v5478_v11 = vmul.f32 %v13948_v37, %v4510_v57 }
 0x403   : > { %v13983_v7 = vadd.f32 %v5024_v38, %v4887_v49  ;;  %v13985_v60 = vadd.f32 %v5026_v27, %v4888_v6  ;;  %v5441_v56 = vadd.f32 %v5331_v40, %v5197_v2  ;;  %v5442_v18 = vadd.f32 %v5333_v55, %v5198_v25 }
 0x404   : > { %v5573_v51 = vrot.slane %v5477_v29, 2  ;;  %v5574_v32 = vrot.slane %v5478_v11, 2  ;;  %v13996_v45 = vrot.slane %v4473_v43, %v17466_v41 }
 0x405   : > { %v9980_v54 = vpop.f32.mrb[36].mxu0  ;;  %v9985_v22 = vpop.f32.mrb[34].mxu1 }
 0x406   : > { %v4512_v10 = vrot.slane %v9980_v54, 7  ;;  %v3412_v36 = vpop.f32.mrb[37].mxu0  ;;  %v3487_v9 = vpop.f32.mrb[35].mxu1  ;;  %v5577_v42 = vsel %vm2837_vm8, %v5574_v32, %v5576_v58  ;;  %v4515_v57 = vrot.slane %v9985_v22, 7  ;;  %v5575_v30 = vsel %vm2837_vm8, %v5573_v51, %v5574_v32 }
 0x407   : > { %v4511_v0 = vrot.slane %v3412_v36, 7  ;;  %v13998_v52 = vadd.f32 %v5577_v42, %v5442_v18  ;;  %v14001_v47 = vadd.f32 %v5575_v30, %v5441_v56  ;;  %v4514_v50 = vrot.slane %v3487_v9, 7 }
 0x408   : > { %v4622_v59 = vsel %vm1870_vm5, %v4512_v10, 0.0  ;;  %v4623_v62 = vsel %vm1870_vm5, %v4515_v57, 0.0 }
 0x409   : > { %v14004_v13 = vmul.f32 %v13915_v17, %v4622_v59  ;;  %v14007_v53 = vmul.f32 %v13922_v46, %v4622_v59  ;;  %v14010_v35 = vmul.f32 %v13945_v3, %v4622_v59  ;;  %v14013_v58 = vmul.f32 %v13948_v37, %v4622_v59 }
 0x40a   : > { %v14016_v41 = vmul.f32 %v13988_v5, %v4622_v59  ;;  %v14019_v39 = vmul.f32 %v13991_v1, %v4622_v59  ;;  %v14022_v63 = vsel %vm1870_vm5, %v4511_v0, %v4512_v10  ;;  %v14025_v28 = vsel %vm1870_vm5, 0.0, %v4511_v0 }
 0x40b   : > { %17468 = vst [vmem:[#allocation141_spill] sm:$0xff] %v14004_v13  ;;  %17469 = vst [vmem:[#allocation151_spill] sm:$0xff] %v14007_v53  ;;  %v14030_v19 = vpop.f32.mrb[38].mxu0  ;;  %v14042_v25 = vmul.f32 %v13915_v17, %v14025_v28  ;;  %v14046_v31 = vmul.f32 %v13915_v17, %v14022_v63  ;;  %v14050_v34 = vmul.f32 %v13922_v46, %v14025_v28  ;;  %v14106_v42 = vsel %vm1870_vm5, 0.0, %v4514_v50 }
 0x40c   : > { %v14032_v21 = vpop.f32.mrb[36].mxu1  ;;  %v3562_v4 = vpop.f32.mrb[39].mxu0  ;;  %v14054_v16 = vmul.f32 %v13922_v46, %v14022_v63  ;;  %v14058_v8 = vmul.f32 %v13927_v26, %v14025_v28  ;;  %v14062_v49 = vmul.f32 %v13927_v26, %v14022_v63  ;;  %v14065_v6 = vmul.f32 %v13915_v17, %v4623_v62 }
 0x40d   : > { %v14038_v2 = vpop.f32.mrb[37].mxu1  ;;  %v14068_v38 = vmul.f32 %v13922_v46, %v4623_v62  ;;  %v14074_v40 = vmul.f32 %v13945_v3, %v14025_v28  ;;  %v14078_v55 = vmul.f32 %v13996_v45, %v14022_v63  ;;  %v14087_v51 = vmul.f32 %v13945_v3, %v4623_v62 }
 0x40e   : > { %17470 = vst [vmem:[#allocation152_spill] sm:$0xff] %v14062_v49  ;;  %17471 = vst [vmem:[#allocation43_spill] sm:$0xff] %v14065_v6  ;;  %v14090_v32 = vmul.f32 %v13948_v37, %v4623_v62  ;;  %v14097_v10 = vmul.f32 %v13988_v5, %v4623_v62  ;;  %v14100_v36 = vmul.f32 %v13991_v1, %v4623_v62  ;;  %v4518_v18 = vrot.slane %v14030_v19, 7 }
 0x40f   : > { %17472 = vst [vmem:[#allocation41_spill] sm:$0xff] %v14068_v38  ;;  %17473 = vst [vmem:[#allocation46_spill] sm:$0xff] %v14087_v51  ;;  %v14103_v9 = vsel %vm1870_vm5, %v4514_v50, %v4515_v57  ;;  %v14114_v44 = vmul.f32 %v13927_v26, %v14106_v42  ;;  %v14122_v57 = vmul.f32 %v13915_v17, %v14106_v42  ;;  %v4517_v59 = vrot.slane %v3562_v4, 7 }
 0x410   : > { %v14080_v29 = vpop.f32.mrb[40].mxu0  ;;  %v14082_v11 = vpop.f32.mrb[38].mxu1  ;;  %17474 = vst [vmem:[#allocation44_spill] sm:$0xff] %v14090_v32  ;;  %v14118_v62 = vmul.f32 %v13927_v26, %v14103_v9  ;;  %v14126_v50 = vmul.f32 %v13915_v17, %v14103_v9  ;;  %v14136_v56 = vmul.f32 %v13922_v46, %v14106_v42  ;;  %v14146_v23 = vmul.f32 %v13922_v46, %v14103_v9 }
 0x411   : > { %v14092_v54 = vpop.f32.mrb[41].mxu0  ;;  %v14094_v22 = vpop.f32.mrb[39].mxu1  ;;  %17475 = vst [vmem:[#allocation45_spill] sm:$0xff] %v14114_v44  ;;  %17477 = vst [vmem:[#allocation66_spill] sm:$0xff] %v14122_v57  ;;  %v14150_v14 = vmul.f32 %v13945_v3, %v14106_v42  ;;  %v4624_v48 = vsel %vm1870_vm5, %v4518_v18, 0.0  ;;  %v4521_v19 = vrot.slane %v14032_v21, 7  ;;  %v14175_v21 = vsel %vm1870_vm5, %v4517_v59, %v4518_v18 }
 0x412   : > { %17476 = vst [vmem:[#allocation67_spill] sm:$0xff] %v14118_v62  ;;  %17478 = vst [vmem:[#allocation42_spill] sm:$0xff] %v14126_v50  ;;  %v4520_v33 = vrot.slane %v14038_v2, 7  ;;  %v14157_v24 = vmul.f32 %v13915_v17, %v4624_v48  ;;  %v14160_v61 = vmul.f32 %v13922_v46, %v4624_v48  ;;  %v14163_v20 = vmul.f32 %v13945_v3, %v4624_v48 }
 0x413   : > { %17479 = vst [vmem:[#allocation144_spill] sm:$0xff] %v14136_v56  ;;  %17480 = vst [vmem:[#allocation143_spill] sm:$0xff] %v14146_v23  ;;  %v14166_v38 = vmul.f32 %v13948_v37, %v4624_v48  ;;  %v14169_v4 = vmul.f32 %v13988_v5, %v4624_v48  ;;  %v14172_v15 = vmul.f32 %v13991_v1, %v4624_v48  ;;  %v14178_v2 = vsel %vm1870_vm5, 0.0, %v4517_v59 }
 0x414   : > { %17481 = vst [vmem:[#allocation146_spill] sm:$0xff] %v14157_v24  ;;  %17482 = vst [vmem:[#allocation145_spill] sm:$0xff] %v14160_v61  ;;  %v14198_v44 = vmul.f32 %v13915_v17, %v14178_v2  ;;  %v14202_v57 = vmul.f32 %v13915_v17, %v14175_v21  ;;  %v14206_v48 = vmul.f32 %v13922_v46, %v14178_v2  ;;  %v4625_v51 = vsel %vm1870_vm5, %v4521_v19, 0.0 }
 0x415   : > { %v14128_v30 = vpop.f32.mrb[42].mxu0  ;;  %v14130_v0 = vpop.f32.mrb[40].mxu1  ;;  %17483 = vst [vmem:[#allocation142_spill] sm:$0xff] %v14163_v20  ;;  %17484 = vst [vmem:[#allocation163_spill] sm:$0xff] %v14166_v38  ;;  %v14210_v18 = vmul.f32 %v13922_v46, %v14175_v21  ;;  %v14214_v6 = vmul.f32 %v13927_v26, %v14178_v2  ;;  %v14218_v59 = vmul.f32 %v13927_v26, %v14175_v21  ;;  %v14231_v38 = vsel %vm1870_vm5, 0.0, %v4520_v33 }
 0x416   : > { %v14139_v27 = vpop.f32.mrb[43].mxu0  ;;  %v14141_v43 = vpop.f32.mrb[41].mxu1  ;;  %17485 = vst [vmem:[#allocation166_spill] sm:$0xff] %v14169_v4  ;;  %17486 = vst [vmem:[#allocation138_spill] sm:$0xff] %v14172_v15  ;;  %v14222_v61 = vsel %vm1870_vm5, %v4520_v33, %v4521_v19  ;;  %v14240_v19 = vmul.f32 %v13945_v3, %v4625_v51  ;;  %v14243_v24 = vmul.f32 %v13948_v37, %v4625_v51  ;;  %v4523_v49 = vrot.slane %v14092_v54, 7 }
 0x417   : > { %17489 = vst [vmem:[#allocation50_spill] sm:$0xff] %v14198_v44  ;;  %17490 = vst [vmem:[#allocation51_spill] sm:$0xff] %v14202_v57  ;;  %v14248_v57 = vmul.f32 %v13988_v5, %v4625_v51  ;;  %v14251_v33 = vmul.f32 %v13991_v1, %v4625_v51  ;;  %v14257_v56 = vmul.f32 %v13927_v26, %v14231_v38 }
 0x418   : > { %17491 = vst [vmem:[#allocation65_spill] sm:$0xff] %v14206_v48  ;;  %17492 = vst [vmem:[#allocation68_spill] sm:$0xff] %v14210_v18  ;;  %v14261_v23 = vmul.f32 %v13927_v26, %v14222_v61  ;;  %v4524_v48 = vrot.slane %v14080_v29, 7  ;;  %v14286_v44 = vmul.f32 %v13922_v46, %v14222_v61  ;;  %v5790_v18 = vmul.f32 %v13988_v5, %v14022_v63 }
 0x419   : > { %17493 = vst [vmem:[#allocation136_spill] sm:$0xff] %v14214_v6  ;;  %17494 = vst [vmem:[#allocation137_spill] sm:$0xff] %v14218_v59  ;;  %v14234_v6 = vmul.f32 %v13915_v17, %v4625_v51  ;;  %v14237_v59 = vmul.f32 %v13922_v46, %v4625_v51  ;;  %v14269_v51 = vmul.f32 %v13915_v17, %v14231_v38  ;;  %v14351_v54 = vsel %vm1870_vm5, 0.0, %v4523_v49 }
 0x41a   : > { %17495 = vst [vmem:[#allocation149_spill] sm:$0xff] %v14222_v61  ;;  %17497 = vst [vmem:[#allocation165_spill] sm:$0xff] %v14231_v38  ;;  %v4626_v29 = vsel %vm1870_vm5, %v4524_v48, 0.0 }
 0x41b   : > { %17498 = vst [vmem:[#allocation167_spill] sm:$0xff] %v14234_v6  ;;  %17499 = vst [vmem:[#allocation58_spill] sm:$0xff] %v14237_v59  ;;  %v14281_v6 = vmul.f32 %v13922_v46, %v14231_v38  ;;  %v14313_v59 = vmul.f32 %v13948_v37, %v4626_v29  ;;  %v14326_v13 = vmul.f32 %v13991_v1, %v4626_v29 }
 0x41c   : > { %v14184_v50 = vpop.f32.mrb[44].mxu0  ;;  %v14186_v32 = vpop.f32.mrb[42].mxu1  ;;  %17500 = vst [vmem:[#allocation57_spill] sm:$0xff] %v14240_v19  ;;  %17501 = vst [vmem:[#allocation55_spill] sm:$0xff] %v14243_v24  ;;  %v5721_v24 = vmul.f32 %v13996_v45, %v14025_v28 }
 0x41d   : > { %17487 = vst [vmem:[#allocation31_spill] sm:$0xff] %v14186_v32  ;;  %v14192_v53 = vpop.f32.mrb[45].mxu0  ;;  %v14194_v62 = vpop.f32.mrb[43].mxu1  ;;  %v14228_v32 = vmul.f32 %v13945_v3, %v14178_v2  ;;  %17502 = vst [vmem:[#allocation60_spill] sm:$0xff] %v14248_v57  ;;  %v14304_v57 = vmul.f32 %v13915_v17, %v4626_v29 }
 0x41e   : > { %17488 = vst [vmem:[#allocation32_spill] sm:$0xff] %v14194_v62  ;;  %17503 = vst [vmem:[#allocation59_spill] sm:$0xff] %v14251_v33 }
 0x41f   : > { %17496 = vst [vmem:[#allocation150_spill] sm:$0xff] %v14228_v32  ;;  %17504 = vst [vmem:[#allocation79_spill] sm:$0xff] %v14257_v56  ;;  %v14273_v32 = vmul.f32 %v13915_v17, %v14222_v61  ;;  %v14290_v56 = vmul.f32 %v13945_v3, %v14231_v38  ;;  %v14310_v61 = vmul.f32 %v13945_v3, %v4626_v29 }
 0x420   : > { %17505 = vst [vmem:[#allocation80_spill] sm:$0xff] %v14261_v23  ;;  %17506 = vst [vmem:[#allocation56_spill] sm:$0xff] %v14269_v51  ;;  %v5789_v23 = vmul.f32 %v13988_v5, %v14025_v28  ;;  %v5753_v38 = vadd.f32 %v5721_v24, %v14001_v47 }
 0x421   : > { %v14263_v62 = vpop.f32.mrb[46].mxu0  ;;  %17507 = vst [vmem:[#allocation156_spill] sm:$0xff] %v14273_v32  ;;  %17509 = vst [vmem:[#allocation159_spill] sm:$0xff] %v14281_v6  ;;  %v14319_v32 = vmul.f32 %v13988_v5, %v4626_v29  ;;  %v5886_v6 = vrot.slane %v5790_v18, 1  ;;  %v17517_v18 = vrot.slane %v14016_v41, 1 }
 0x422   : > { %v14275_v20 = vpop.f32.mrb[47].mxu0  ;;  %17510 = vst [vmem:[#allocation157_spill] sm:$0xff] %v14290_v56  ;;  %17512 = vst [vmem:[#allocation177_spill] sm:$0xff] %v14304_v57  ;;  %v14307_v56 = vmul.f32 %v13922_v46, %v4626_v29  ;;  %v5754_v29 = vadd.f32 %v14078_v55, %v13998_v52  ;;  %v14356_v55 = vmul.f32 %v13915_v17, %v14351_v54 }
 0x423   : > { %17508 = vst [vmem:[#allocation155_spill] sm:$0xff] %v14275_v20  ;;  %17514 = vst [vmem:[#allocation190_spill] sm:$0xff] %v14310_v61  ;;  %v6033_v20 = vmul.f32 %v13991_v1, %v14025_v28  ;;  %v5167_v61 = vmul.f32 %v13953_v12, %v14025_v28 }
 0x424   : > { %17513 = vst [vmem:[#allocation191_spill] sm:$0xff] %v14307_v56  ;;  %17515 = vst [vmem:[#allocation181_spill] sm:$0xff] %v14313_v59  ;;  %v4527_v56 = vrot.slane %v14082_v11, 7  ;;  %v14348_v59 = vsel %vm1870_vm5, %v4523_v49, %v4524_v48  ;;  %v17521_v11 = vrot.slane %v14019_v39, 2 }
 0x425   : > { %v14301_v33 = vpop.f32.mrb[48].mxu0  ;;  %v6129_v15 = vrot.slane %v6033_v20, 2  ;;  %17518 = vst [vmem:[#allocation154_spill] sm:$0xff] %v14356_v55  ;;  %v14360_v41 = vmul.f32 %v13915_v17, %v14348_v59  ;;  %v4526_v20 = vrot.slane %v14094_v22, 7  ;;  %v14380_v22 = vmul.f32 %v13927_v26, %v14348_v59 }
 0x426   : > { %17511 = vst [vmem:[#allocation158_spill] sm:$0xff] %v14301_v33  ;;  %v14315_v19 = vpop.f32.mrb[49].mxu0  ;;  %v5885_v33 = vrot.slane %v5789_v23, 1  ;;  %v6034_v23 = vmul.f32 %v13991_v1, %v14022_v63  ;;  %v14391_v39 = vmul.f32 %v13922_v46, %v14348_v59 }
 0x427   : > { %17516 = vst [vmem:[#allocation208_spill] sm:$0xff] %v14315_v19  ;;  %v5889_v19 = vsel %vm2760_vm6, %v5886_v6, %v17517_v18  ;;  %17519 = vst [vmem:[#allocation48_spill] sm:$0xff] %v14360_v41 }
 0x428   : > { %v5887_v51 = vsel %vm2760_vm6, %v5885_v33, %v5886_v6  ;;  %v6130_v57 = vrot.slane %v6034_v23, 2  ;;  %v14376_v33 = vmul.f32 %v13927_v26, %v14351_v54  ;;  %17523 = vst [vmem:[#allocation63_spill] sm:$0xff] %v14380_v22  ;;  %17526 = vst [vmem:[#allocation81_spill] sm:$0xff] %v14391_v39  ;;  %v5998_v52 = vadd.f32 %v5889_v19, %v5754_v29 }
 0x429   : > { %v14332_v24 = vpop.f32.mrb[50].mxu0  ;;  %v5997_v47 = vadd.f32 %v5887_v51, %v5753_v38  ;;  %v14368_v38 = vld [vmem:[%s16334_s18] ss:$0 sm:$0xff] }
 0x42a   : > { %v14340_v4 = vpop.f32.mrb[51].mxu0  ;;  %v6131_v49 = vsel %vm2837_vm8, %v6129_v15, %v6130_v57  ;;  %v6133_v48 = vsel %vm2837_vm8, %v6130_v57, %v17521_v11  ;;  %17522 = vst [vmem:[#allocation210_spill] sm:$0xff] %v14376_v33  ;;  %v14387_v15 = vmul.f32 %v13922_v46, %v14351_v54  ;;  %v14396_v11 = vmul.f32 %v13945_v3, %v14351_v54  ;;  %v14411_v57 = vpop.f32.mrb[44].mxu1 }
 0x42b   : > { %v6241_v23 = vadd.f32 %v6131_v49, %v5997_v47  ;;  %17532 = vst [vmem:[#allocation162_spill] sm:$0xff] %v14411_v57  ;;  %v6242_v33 = vadd.f32 %v6133_v48, %v5998_v52  ;;  %v14429_v52 = vsel %vm1870_vm5, %v4526_v20, %v4527_v56 }
 0x42c   : > { %17525 = vst [vmem:[#allocation39_spill] sm:$0xff] %v14387_v15  ;;  %17527 = vst [vmem:[#allocation82_spill] sm:$0xff] %v14396_v11  ;;  %v14441_v41 = vmul.f32 %v13915_v17, %v14429_v52  ;;  %v5792_v15 = vmul.f32 %v13988_v5, %v14106_v42 }
 0x42d   : > { %v14363_v6 = vpop.f32.mrb[52].mxu0  ;;  %v6279_v47 = vadd.f32 %v14368_v38, %v6241_v23  ;;  %17537 = vst [vmem:[#allocation70_spill] sm:$0xff] %v14429_v52  ;;  %v6280_v48 = vadd.f32 %v14368_v38, %v6242_v33 }
 0x42e   : > { %17520 = vst [vmem:[#allocation49_spill] sm:$0xff] %v14363_v6  ;;  %v14382_v51 = vpop.f32.mrb[53].mxu0  ;;  %17538 = vst [vmem:[#allocation78_spill] sm:$0xff] %v14441_v41 }
 0x42f   : > { %17524 = vst [vmem:[#allocation64_spill] sm:$0xff] %v14382_v51  ;;  %v4627_v51 = vsel %vm1870_vm5, %v4527_v56, 0.0  ;;  %10117 = vmatprep.mubr.msk.f32.mxu1 %vm8479_vm14, %v6279_v47  ;;  %v14437_v47 = vsel %vm1870_vm5, 0.0, %v4526_v20  ;;  %v14445_v56 = vmul.f32 %v13922_v46, %v14429_v52  ;;  %v14457_v20 = vmul.f32 %v13927_v26, %v14429_v52 }
 0x430   : > { %v14401_v49 = vmul.f32 %v13915_v17, %v4627_v51  ;;  %v14404_v18 = vmul.f32 %v13922_v46, %v4627_v51  ;;  %v14407_v6 = vmul.f32 %v13945_v3, %v4627_v51  ;;  %v14414_v19 = vmul.f32 %v13948_v37, %v4627_v51  ;;  %10118 = vmatmul.mubr.msk.f32.vlgmr.msra.gmra.mrb[66].mxu1 %vm8479_vm14, %v6280_v48 }
 0x431   : > { %v14409_v22 = vpop.f32.mrb[54].mxu0  ;;  %v14417_v29 = vmul.f32 %v13988_v5, %v4627_v51  ;;  %v14420_v23 = vmul.f32 %v13991_v1, %v4627_v51  ;;  %17539 = vst [vmem:[#allocation73_spill] sm:$0xff] %v14445_v56  ;;  %v14453_v57 = vmul.f32 %v13927_v26, %v14437_v47  ;;  %17542 = vst [vmem:[#allocation95_spill] sm:$0xff] %v14457_v20 }
 0x432   : > { %17528 = vst [vmem:[#allocation130_spill] sm:$0xff] %v14401_v49  ;;  %17529 = vst [vmem:[#allocation147_spill] sm:$0xff] %v14404_v18  ;;  %v14422_v55 = vpop.f32.mrb[55].mxu0  ;;  %v14461_v11 = vmul.f32 %v13915_v17, %v14437_v47  ;;  %v14471_v48 = vmul.f32 %v13945_v3, %v14437_v47  ;;  %v5480_v18 = vmul.f32 %v13948_v37, %v14025_v28 }
 0x433   : > { %17530 = vst [vmem:[#allocation148_spill] sm:$0xff] %v14407_v6  ;;  %17531 = vst [vmem:[#allocation211_spill] sm:$0xff] %v14409_v22  ;;  %v14467_v22 = vmul.f32 %v13922_v46, %v14437_v47  ;;  %v5481_v6 = vmul.f32 %v13948_v37, %v14022_v63  ;;  %v5793_v20 = vmul.f32 %v13988_v5, %v14103_v9 }
 0x434   : > { %17533 = vst [vmem:[#allocation164_spill] sm:$0xff] %v14414_v19  ;;  %17534 = vst [vmem:[#allocation179_spill] sm:$0xff] %v14417_v29  ;;  %v5723_v52 = vmul.f32 %v13996_v45, %v14106_v42 }
 0x435   : > { %17535 = vst [vmem:[#allocation180_spill] sm:$0xff] %v14420_v23  ;;  %17536 = vst [vmem:[#allocation71_spill] sm:$0xff] %v14422_v55  ;;  %v14447_v33 = vpop.f32.mrb[56].mxu0  ;;  %v5237_v55 = vmul.f32 %v13945_v3, %v14022_v63  ;;  %v5579_v49 = vrot.slane %v5481_v6, 2  ;;  %v5891_v56 = vrot.slane %v5793_v20, 1 }
 0x436   : > { %17540 = vst [vmem:[#allocation72_spill] sm:$0xff] %v14447_v33  ;;  %17541 = vst [vmem:[#allocation89_spill] sm:$0xff] %v14453_v57  ;;  %v14463_v51 = vpop.f32.mrb[57].mxu0  ;;  %v5199_v57 = vadd.f32 %v5167_v61, %v13983_v7  ;;  %v14492_v33 = vpop.f32.mrb[45].mxu1  ;;  %v6037_v7 = vmul.f32 %v13991_v1, %v14103_v9  ;;  %v5168_v61 = vmul.f32 %v13953_v12, %v14022_v63  ;;  %v17548_v63 = vrot.slane %v14013_v58, 2 }
 0x437   : > { %17543 = vst [vmem:[#allocation69_spill] sm:$0xff] %v14461_v11  ;;  %17544 = vst [vmem:[#allocation171_spill] sm:$0xff] %v14463_v51  ;;  %v5334_v51 = vrot.slane %v14074_v40, 1  ;;  %v5335_v19 = vrot.slane %v5237_v55, 1  ;;  %v6036_v40 = vmul.f32 %v13991_v1, %v14106_v42 }
 0x438   : > { %17545 = vst [vmem:[#allocation169_spill] sm:$0xff] %v14471_v48  ;;  %v5578_v48 = vrot.slane %v5480_v18, 2  ;;  %17546 = vst [vmem:[#allocation170_spill] sm:$0xff] %v14492_v33  ;;  %v5890_v18 = vrot.slane %v5792_v15, 1  ;;  %v6135_v39 = vrot.slane %v6037_v7, 2  ;;  %v5200_v23 = vadd.f32 %v5168_v61, %v13985_v60 }
 0x439   : > { %v5336_v28 = vsel %vm2760_vm6, %v5334_v51, %v5335_v19  ;;  %v6134_v11 = vrot.slane %v6036_v40, 2  ;;  %v17547_v33 = vrot.slane %v14010_v35, 1  ;;  %v5582_v15 = vsel %vm2837_vm8, %v5579_v49, %v17548_v63 }
 0x43a   : > { %v5443_v55 = vadd.f32 %v5336_v28, %v5199_v57  ;;  %v5580_v41 = vsel %vm2837_vm8, %v5578_v48, %v5579_v49  ;;  %v5892_v57 = vsel %vm2760_vm6, %v5890_v18, %v5891_v56  ;;  %v5724_v60 = vmul.f32 %v13996_v45, %v14103_v9 }
 0x43b   : > { %v5338_v51 = vsel %vm2760_vm6, %v5335_v19, %v17547_v33  ;;  %v6136_v20 = vsel %vm2837_vm8, %v6134_v11, %v6135_v39  ;;  %v17549_v19 = vrot.slane %v14097_v10, 1  ;;  %v4530_v33 = vrot.slane %v14128_v30, 7 }
 0x43c   : > { %v5687_v29 = vadd.f32 %v5580_v41, %v5443_v55  ;;  %v5444_v48 = vadd.f32 %v5338_v51, %v5200_v23  ;;  %v4529_v40 = vrot.slane %v14139_v27, 7  ;;  %v17550_v49 = vrot.slane %v14100_v36, 2 }
 0x43d   : > { %v5894_v41 = vsel %vm2760_vm6, %v5891_v56, %v17549_v19  ;;  %v4536_v11 = vrot.slane %v14184_v50, 7  ;;  %v4535_v23 = vrot.slane %v14192_v53, 7 }
 0x43e   : > { %v5755_v35 = vadd.f32 %v5723_v52, %v5687_v29  ;;  %v5688_v58 = vadd.f32 %v5582_v15, %v5444_v48  ;;  %v6138_v28 = vsel %vm2837_vm8, %v6135_v39, %v17550_v49  ;;  %v4628_v29 = vsel %vm1870_vm5, %v4530_v33, 0.0  ;;  %v14552_v15 = vpop.f32.mrb[58].mxu0 }
 0x43f   : > { %v14526_v10 = vsel %vm1870_vm5, %v4529_v40, %v4530_v33  ;;  %v14529_v52 = vsel %vm1870_vm5, 0.0, %v4529_v40  ;;  %v14532_v27 = vmul.f32 %v13915_v17, %v4628_v29  ;;  %v14535_v36 = vmul.f32 %v13922_v46, %v4628_v29  ;;  %17553 = vst [vmem:[#allocation189_spill] sm:$0xff] %v14552_v15 }
 0x440   : > { %v5999_v7 = vadd.f32 %v5892_v57, %v5755_v35  ;;  %v5756_v30 = vadd.f32 %v5724_v60, %v5688_v58  ;;  %v14538_v50 = vmul.f32 %v13945_v3, %v4628_v29  ;;  %v14541_v39 = vmul.f32 %v13948_v37, %v4628_v29  ;;  %v14558_v35 = vpop.f32.mrb[59].mxu0 }
 0x441   : > { %17551 = vst [vmem:[#allocation173_spill] sm:$0xff] %v14532_v27  ;;  %17552 = vst [vmem:[#allocation172_spill] sm:$0xff] %v14535_v36  ;;  %v14544_v56 = vmul.f32 %v13988_v5, %v4628_v29  ;;  %v14547_v61 = vmul.f32 %v13991_v1, %v4628_v29  ;;  %v14564_v40 = vmul.f32 %v13915_v17, %v14529_v52 }
 0x442   : > { %v6243_v53 = vadd.f32 %v6136_v20, %v5999_v7  ;;  %v6000_v55 = vadd.f32 %v5894_v41, %v5756_v30  ;;  %17554 = vst [vmem:[#allocation198_spill] sm:$0xff] %v14558_v35  ;;  %v14569_v58 = vmul.f32 %v13927_v26, %v14529_v52  ;;  %v14573_v49 = vmul.f32 %v13915_v17, %v14526_v10 }
 0x443   : > { %17555 = vst [vmem:[#allocation168_spill] sm:$0xff] %v14564_v40  ;;  %v14581_v7 = vmul.f32 %v13922_v46, %v14526_v10  ;;  %v14586_v30 = vmul.f32 %v13927_v26, %v14526_v10  ;;  %v14596_v18 = vmul.f32 %v13945_v3, %v14529_v52  ;;  %v17573_v20 = vrot.slane %v14130_v0, 7  ;;  %v17713_v40 = vld [vmem:[#allocation145_spill] sm:$0xff] }
 0x444   : > { %v6281_v57 = vadd.f32 %v14368_v38, %v6243_v53  ;;  %v6244_v19 = vadd.f32 %v6138_v28, %v6000_v55  ;;  %17556 = vst [vmem:[#allocation104_spill] sm:$0xff] %v14569_v58  ;;  %v14577_v28 = vmul.f32 %v13922_v46, %v14529_v52  ;;  %v4630_v53 = vsel %vm1870_vm5, %v4536_v11, 0.0 }
 0x445   : > { %17558 = vst [vmem:[#allocation62_spill] sm:$0xff] %v14581_v7  ;;  %17559 = vst [vmem:[#allocation76_spill] sm:$0xff] %v14586_v30  ;;  %v14590_v55 = vsel %vm1870_vm5, %v4535_v23, %v4536_v11  ;;  %v14599_v60 = vmul.f32 %v13915_v17, %v4630_v53  ;;  %v14606_v48 = vmul.f32 %v13945_v3, %v4630_v53  ;;  %v4629_v6 = vsel %vm1870_vm5, %v17573_v20, 0.0 }
 0x446   : > { %10120 = vmatprep.mubr.msk.f32.mxu1 %vm8479_vm14, %v6281_v57  ;;  %17557 = vst [vmem:[#allocation61_spill] sm:$0xff] %v14577_v28  ;;  %v6282_v29 = vadd.f32 %v14368_v38, %v6244_v19  ;;  %17560 = vst [vmem:[#allocation206_spill] sm:$0xff] %v14590_v55  ;;  %v14603_v19 = vmul.f32 %v13922_v46, %v4630_v53  ;;  %v14609_v11 = vmul.f32 %v13948_v37, %v4630_v53 }
 0x447   : > { %17561 = vst [vmem:[#allocation77_spill] sm:$0xff] %v14599_v60  ;;  %17563 = vst [vmem:[#allocation96_spill] sm:$0xff] %v14606_v48  ;;  %v14612_v57 = vmul.f32 %v13988_v5, %v4630_v53  ;;  %v14617_v33 = vmul.f32 %v13991_v1, %v4630_v53  ;;  %v14627_v35 = vmul.f32 %v13927_v26, %v14590_v55 }
 0x448   : > { %10121 = vmatmul.mubr.msk.f32.gmra.mrb[68].mxu1 %vm8479_vm14, %v6282_v29  ;;  %17562 = vst [vmem:[#allocation94_spill] sm:$0xff] %v14603_v19  ;;  %17564 = vst [vmem:[#allocation160_spill] sm:$0xff] %v14609_v11  ;;  %v14620_v29 = vsel %vm1870_vm5, 0.0, %v4535_v23  ;;  %v14637_v23 = vmul.f32 %v13915_v17, %v14590_v55  ;;  %v14646_v51 = vmul.f32 %v13922_v46, %v14590_v55 }
 0x449   : > { %17565 = vst [vmem:[#allocation161_spill] sm:$0xff] %v14612_v57  ;;  %17566 = vst [vmem:[#allocation176_spill] sm:$0xff] %v14617_v33  ;;  %v14633_v53 = vmul.f32 %v13915_v17, %v14620_v29  ;;  %v14642_v41 = vmul.f32 %v13922_v46, %v14620_v29  ;;  %v14653_v15 = vmul.f32 %v13927_v26, %v14620_v29  ;;  %v14675_v33 = vpop.f32.mrb[46].mxu1  ;;  %v17584_v57 = vrot.slane %v14042_v25, 1 }
 0x44a   : > { %17567 = vst [vmem:[#allocation178_spill] sm:$0xff] %v14620_v29  ;;  %17568 = vst [vmem:[#allocation197_spill] sm:$0xff] %v14627_v35  ;;  %v14657_v19 = vmul.f32 %v13945_v3, %v14620_v29  ;;  %v14660_v63 = vmul.f32 %v13915_v17, %v4629_v6  ;;  %v14663_v35 = vmul.f32 %v13922_v46, %v4629_v6 }
 0x44b   : > { %17569 = vst [vmem:[#allocation199_spill] sm:$0xff] %v14633_v53  ;;  %17570 = vst [vmem:[#allocation84_spill] sm:$0xff] %v14637_v23  ;;  %v14668_v20 = vmul.f32 %v13945_v3, %v4629_v6  ;;  %v14671_v48 = vmul.f32 %v13948_v37, %v4629_v6  ;;  %v14680_v36 = vmul.f32 %v13988_v5, %v4629_v6  ;;  %v17592_v23 = vrot.slane %v14050_v34, 2 }
 0x44c   : > { %17571 = vst [vmem:[#allocation83_spill] sm:$0xff] %v14642_v41  ;;  %17572 = vst [vmem:[#allocation88_spill] sm:$0xff] %v14646_v51  ;;  %v14683_v60 = vmul.f32 %v13991_v1, %v4629_v6  ;;  %v17591_v51 = vrot.slane %v14054_v16, 2  ;;  %v5339_v34 = vrot.slane %v14150_v14, 1  ;;  %v5796_v14 = vmul.f32 %v13988_v5, %v14175_v21 }
 0x44d   : > { %17574 = vst [vmem:[#allocation85_spill] sm:$0xff] %v14653_v15  ;;  %17575 = vst [vmem:[#allocation87_spill] sm:$0xff] %v14657_v19  ;;  %v14673_v15 = vpop.f32.mrb[60].mxu0  ;;  %v17583_v19 = vrot.slane %v14046_v31, 1  ;;  %v6039_v55 = vmul.f32 %v13991_v1, %v14178_v2 }
 0x44e   : > { %17576 = vst [vmem:[#allocation107_spill] sm:$0xff] %v14660_v63  ;;  %17577 = vst [vmem:[#allocation86_spill] sm:$0xff] %v14663_v35  ;;  %v14685_v11 = vpop.f32.mrb[61].mxu0  ;;  %v5029_v63 = vsel %vm2837_vm8, %v17592_v23, %v17591_v51  ;;  %v14741_v23 = vmul.f32 %v13948_v37, %v14103_v9 }
 0x44f   : > { %17578 = vst [vmem:[#allocation186_spill] sm:$0xff] %v14668_v20  ;;  %17579 = vst [vmem:[#allocation182_spill] sm:$0xff] %v14671_v48  ;;  %v4785_v41 = vsel %vm2760_vm6, %v17584_v57, %v17583_v19 }
 0x450   : > { %17580 = vst [vmem:[#allocation188_spill] sm:$0xff] %v14673_v15  ;;  %17581 = vst [vmem:[#allocation187_spill] sm:$0xff] %v14685_v11  ;;  %v17582_v15 = vrot.slane %v14263_v62, 7  ;;  %v4889_v6 = vadd.f32 %v4785_v41, %v14058_v8  ;;  %v14733_v8 = vmul.f32 %v13945_v3, %v14103_v9  ;;  %v5483_v41 = vmul.f32 %v13948_v37, %v14106_v42 }
 0x452   : > { %v4632_v30 = vsel %vm1870_vm5, %v17582_v15, 0.0  ;;  %v5133_v57 = vadd.f32 %v5029_v63, %v4889_v6  ;;  %v5795_v63 = vmul.f32 %v13988_v5, %v14178_v2  ;;  %v14745_v6 = vpop.f32.mrb[47].mxu1  ;;  %v5340_v48 = vrot.slane %v14733_v8, 1 }
 0x453   : > { %v14700_v11 = vmul.f32 %v13915_v17, %v4632_v30  ;;  %v14703_v53 = vmul.f32 %v13922_v46, %v4632_v30  ;;  %v14707_v15 = vmul.f32 %v13945_v3, %v4632_v30  ;;  %v14710_v35 = vmul.f32 %v13948_v37, %v4632_v30  ;;  %17593 = vst [vmem:[#allocation93_spill] sm:$0xff] %v14745_v6  ;;  %v17594_v6 = vld [vmem:[#allocation155_spill] sm:$0xff] }
 0x454   : > { %v14713_v25 = vmul.f32 %v13988_v5, %v4632_v30  ;;  %v14717_v19 = vmul.f32 %v13991_v1, %v4632_v30  ;;  %v5169_v30 = vmul.f32 %v13953_v12, %v14106_v42  ;;  %v5583_v27 = vrot.slane %v5483_v41, 2 }
 0x455   : > { %17585 = vst [vmem:[#allocation185_spill] sm:$0xff] %v14700_v11  ;;  %17586 = vst [vmem:[#allocation184_spill] sm:$0xff] %v14703_v53  ;;  %v5584_v42 = vrot.slane %v14741_v23, 2  ;;  %v5895_v51 = vrot.slane %v5795_v63, 1  ;;  %v6040_v53 = vmul.f32 %v13991_v1, %v14175_v21  ;;  %v5341_v11 = vsel %vm2760_vm6, %v5339_v34, %v5340_v48  ;;  %v17596_v34 = vld [vmem:[#allocation141_spill] sm:$0xff] }
 0x456   : > { %17587 = vst [vmem:[#allocation183_spill] sm:$0xff] %v14707_v15  ;;  %17588 = vst [vmem:[#allocation74_spill] sm:$0xff] %v14710_v35  ;;  %v5201_v20 = vadd.f32 %v5169_v30, %v5133_v57  ;;  %v5896_v35 = vrot.slane %v5796_v14, 1  ;;  %v6139_v15 = vrot.slane %v6039_v55, 2  ;;  %v4532_v57 = vrot.slane %v14141_v43, 7 }
 0x457   : > { %17589 = vst [vmem:[#allocation75_spill] sm:$0xff] %v14713_v25  ;;  %17590 = vst [vmem:[#allocation92_spill] sm:$0xff] %v14717_v19  ;;  %v5585_v8 = vsel %vm2837_vm8, %v5583_v27, %v5584_v42  ;;  %v6140_v25 = vrot.slane %v6040_v53, 2  ;;  %v4541_v29 = vrot.slane %v17594_v6, 7  ;;  %v17595_v23 = vrot.slane %v14130_v0, 7  ;;  %v14821_v27 = vpop.f32.mrb[62].mxu0 }
 0x458   : > { %v5445_v30 = vadd.f32 %v5341_v11, %v5201_v20  ;;  %v5897_v41 = vsel %vm2760_vm6, %v5895_v51, %v5896_v35  ;;  %v14766_v28 = vsel %vm1870_vm5, 0.0, %v4532_v57  ;;  %v17597_v55 = vrot.slane %v17596_v34, 1  ;;  %17610 = vst [vmem:[#allocation99_spill] sm:$0xff] %v14821_v27 }
 0x459   : > { %v14763_v63 = vsel %vm1870_vm5, %v4532_v57, %v17595_v23  ;;  %v17598_v43 = vrot.slane %v14046_v31, 1  ;;  %v5725_v20 = vmul.f32 %v13996_v45, %v14178_v2  ;;  %v6141_v0 = vsel %vm2837_vm8, %v6139_v15, %v6140_v25 }
 0x45a   : > { %v5689_v53 = vadd.f32 %v5585_v8, %v5445_v30  ;;  %v14779_v51 = vmul.f32 %v13915_v17, %v14766_v28  ;;  %v14783_v6 = vmul.f32 %v13915_v17, %v14763_v63  ;;  %v14787_v31 = vmul.f32 %v13922_v46, %v14766_v28 }
 0x45b   : > { %v4787_v11 = vsel %vm2760_vm6, %v17598_v43, %v17597_v55  ;;  %v14791_v14 = vmul.f32 %v13922_v46, %v14763_v63  ;;  %v14795_v15 = vmul.f32 %v13927_v26, %v14766_v28  ;;  %v17604_v30 = vrot.slane %v14263_v62, 7  ;;  %v14839_v62 = vpop.f32.mrb[63].mxu0 }
 0x45c   : > { %17599 = vst [vmem:[#allocation112_spill] sm:$0xff] %v14779_v51  ;;  %17600 = vst [vmem:[#allocation106_spill] sm:$0xff] %v14783_v6  ;;  %v5757_v57 = vadd.f32 %v5725_v20, %v5689_v53  ;;  %v14803_v23 = vsel %vm1870_vm5, 0.0, %v4541_v29  ;;  %v14807_v34 = vmul.f32 %v13927_v26, %v14763_v63  ;;  %v14813_v53 = vmul.f32 %v13945_v3, %v14766_v28  ;;  %v17624_v51 = vld [vmem:[#allocation166_spill] sm:$0xff] }
 0x45d   : > { %17601 = vst [vmem:[#allocation108_spill] sm:$0xff] %v14787_v31  ;;  %17602 = vst [vmem:[#allocation174_spill] sm:$0xff] %v14791_v14  ;;  %v14800_v8 = vsel %vm1870_vm5, %v4541_v29, %v17604_v30  ;;  %v14819_v29 = vmul.f32 %v13915_v17, %v14803_v23  ;;  %v14825_v55 = vmul.f32 %v13927_v26, %v14803_v23  ;;  %v17620_v14 = vrot.slane %v14054_v16, 2 }
 0x45e   : > { %17603 = vst [vmem:[#allocation175_spill] sm:$0xff] %v14795_v15  ;;  %17605 = vst [vmem:[#allocation195_spill] sm:$0xff] %v14800_v8  ;;  %v6001_v20 = vadd.f32 %v5897_v41, %v5757_v57  ;;  %v14829_v43 = vmul.f32 %v13915_v17, %v14800_v8  ;;  %v14833_v41 = vmul.f32 %v13922_v46, %v14803_v23  ;;  %v17625_v6 = vrot.slane %v17624_v51, 1  ;;  %v17634_v51 = vld [vmem:[#allocation66_spill] sm:$0xff] }
 0x45f   : > { %17606 = vst [vmem:[#allocation196_spill] sm:$0xff] %v14803_v23  ;;  %17607 = vst [vmem:[#allocation98_spill] sm:$0xff] %v14807_v34  ;;  %v14837_v57 = vmul.f32 %v13922_v46, %v14800_v8  ;;  %v14843_v27 = vmul.f32 %v13927_v26, %v14800_v8  ;;  %v17618_v34 = vld [vmem:[#allocation151_spill] sm:$0xff]  ;;  %v5170_v16 = vmul.f32 %v13953_v12, %v14103_v9 }
 0x460   : > { %17608 = vst [vmem:[#allocation97_spill] sm:$0xff] %v14813_v53  ;;  %17609 = vst [vmem:[#allocation101_spill] sm:$0xff] %v14819_v29  ;;  %v6245_v30 = vadd.f32 %v6141_v0, %v6001_v20  ;;  %v17619_v31 = vrot.slane %v17618_v34, 2  ;;  %v14856_v0 = vmul.f32 %v13945_v3, %v14803_v23  ;;  %v17622_v34 = vld [vmem:[#allocation46_spill] sm:$0xff]  ;;  %v5899_v53 = vsel %vm2760_vm6, %v5896_v35, %v17625_v6 }
 0x461   : > { %17611 = vst [vmem:[#allocation103_spill] sm:$0xff] %v14825_v55  ;;  %17612 = vst [vmem:[#allocation113_spill] sm:$0xff] %v14829_v43  ;;  %v17617_v55 = vld [vmem:[#allocation152_spill] sm:$0xff]  ;;  %v17628_v29 = vld [vmem:[#allocation158_spill] sm:$0xff]  ;;  %v17635_v43 = vrot.slane %v17634_v51, 1  ;;  %v17655_v23 = vrot.slane %v14332_v24, 7 }
 0x462   : > { %17613 = vst [vmem:[#allocation100_spill] sm:$0xff] %v14833_v41  ;;  %17614 = vst [vmem:[#allocation202_spill] sm:$0xff] %v14837_v57  ;;  %v4890_v19 = vadd.f32 %v4787_v11, %v17617_v55  ;;  %v5031_v15 = vsel %vm2837_vm8, %v17620_v14, %v17619_v31  ;;  %v6283_v20 = vadd.f32 %v14368_v38, %v6245_v30  ;;  %v17623_v31 = vrot.slane %v17622_v34, 1  ;;  %v17631_v34 = vld [vmem:[#allocation208_spill] sm:$0xff] }
 0x463   : > { %17615 = vst [vmem:[#allocation201_spill] sm:$0xff] %v14839_v62  ;;  %17616 = vst [vmem:[#allocation205_spill] sm:$0xff] %v14843_v27  ;;  %v17626_v62 = vld [vmem:[#allocation138_spill] sm:$0xff]  ;;  %v4548_v30 = vrot.slane %v17628_v29, 7  ;;  %v4547_v57 = vrot.slane %v17631_v34, 7 }
 0x464   : > { %17621 = vst [vmem:[#allocation203_spill] sm:$0xff] %v14856_v0  ;;  %v5134_v55 = vadd.f32 %v5031_v15, %v4890_v19  ;;  %v5343_v14 = vsel %vm2760_vm6, %v5340_v48, %v17623_v31  ;;  %v17627_v27 = vrot.slane %v17626_v62, 2  ;;  %10123 = vmatprep.mubr.msk.f32.mxu1 %vm8479_vm14, %v6283_v20  ;;  %v17629_v15 = vld [vmem:[#allocation44_spill] sm:$0xff]  ;;  %v17632_v48 = vld [vmem:[#allocation42_spill] sm:$0xff]  ;;  %v17636_v62 = vld [vmem:[#allocation45_spill] sm:$0xff]  ;;  %v5171_v0 = vmul.f32 %v13953_v12, %v14178_v2 }
 0x465   : > { %v17630_v11 = vrot.slane %v17629_v15, 2  ;;  %v17633_v31 = vrot.slane %v17632_v48, 1 }
 0x466   : > { %v6143_v41 = vsel %vm2837_vm8, %v6140_v25, %v17627_v27  ;;  %v5202_v19 = vadd.f32 %v5170_v16, %v5134_v55  ;;  %v5726_v25 = vmul.f32 %v13996_v45, %v14175_v21  ;;  %v4634_v27 = vsel %vm1870_vm5, %v4548_v30, 0.0 }
 0x467   : > { %v5587_v9 = vsel %vm2837_vm8, %v5584_v42, %v17630_v11  ;;  %v4790_v35 = vsel %vm2760_vm6, %v17635_v43, %v17633_v31  ;;  %v14888_v42 = vmul.f32 %v13915_v17, %v4634_v27  ;;  %v14891_v11 = vmul.f32 %v13922_v46, %v4634_v27  ;;  %v17644_v31 = vld [vmem:[#allocation143_spill] sm:$0xff] }
 0x468   : > { %v4891_v29 = vadd.f32 %v4790_v35, %v17636_v62  ;;  %v5446_v20 = vadd.f32 %v5343_v14, %v5202_v19  ;;  %v14894_v55 = vmul.f32 %v13945_v3, %v4634_v27  ;;  %v14897_v43 = vmul.f32 %v13948_v37, %v4634_v27  ;;  %v17646_v35 = vld [vmem:[#allocation144_spill] sm:$0xff] }
 0x469   : > { %17637 = vst [vmem:[#allocation212_spill] sm:$0xff] %v14888_v42  ;;  %17638 = vst [vmem:[#allocation90_spill] sm:$0xff] %v14891_v11  ;;  %v14900_v16 = vmul.f32 %v13988_v5, %v4634_v27  ;;  %v14903_v15 = vmul.f32 %v13991_v1, %v4634_v27  ;;  %v14906_v14 = vsel %vm1870_vm5, %v4547_v57, %v4548_v30  ;;  %v17645_v51 = vrot.slane %v17644_v31, 2 }
 0x46a   : > { %17639 = vst [vmem:[#allocation91_spill] sm:$0xff] %v14894_v55  ;;  %17640 = vst [vmem:[#allocation207_spill] sm:$0xff] %v14897_v43  ;;  %v5690_v19 = vadd.f32 %v5587_v9, %v5446_v20  ;;  %v17647_v62 = vrot.slane %v17646_v35, 2  ;;  %v14920_v30 = vsel %vm1870_vm5, 0.0, %v4547_v57  ;;  %v14946_v8 = vmul.f32 %v13927_v26, %v14906_v14  ;;  %v14951_v20 = vpop.f32.mrb[64].mxu0 }
 0x46b   : > { %17641 = vst [vmem:[#allocation102_spill] sm:$0xff] %v14900_v16  ;;  %17642 = vst [vmem:[#allocation105_spill] sm:$0xff] %v14903_v15  ;;  %v14930_v35 = vmul.f32 %v13927_v26, %v14920_v30  ;;  %v14938_v57 = vmul.f32 %v13922_v46, %v14920_v30  ;;  %v4636_v27 = vsel %vm1870_vm5, %v17655_v23, 0.0  ;;  %v5243_v42 = vmul.f32 %v13945_v3, %v14175_v21 }
 0x46c   : > { %17643 = vst [vmem:[#allocation209_spill] sm:$0xff] %v14906_v14  ;;  %v5034_v6 = vsel %vm2837_vm8, %v17647_v62, %v17645_v51  ;;  %17648 = vst [vmem:[#allocation111_spill] sm:$0xff] %v14920_v30  ;;  %v5758_v9 = vadd.f32 %v5726_v25, %v5690_v19  ;;  %v14926_v51 = vmul.f32 %v13915_v17, %v14920_v30  ;;  %v17666_v15 = vrot.slane %v14332_v24, 7 }
 0x46d   : > { %17650 = vst [vmem:[#allocation193_spill] sm:$0xff] %v14930_v35  ;;  %v14934_v62 = vmul.f32 %v13915_v17, %v14906_v14  ;;  %17652 = vst [vmem:[#allocation213_spill] sm:$0xff] %v14938_v57  ;;  %v14942_v25 = vmul.f32 %v13922_v46, %v14906_v14  ;;  %v5135_v34 = vadd.f32 %v5034_v6, %v4891_v29  ;;  %v5345_v57 = vrot.slane %v5243_v42, 1 }
 0x46e   : > { %17649 = vst [vmem:[#allocation114_spill] sm:$0xff] %v14926_v51  ;;  %v6002_v19 = vadd.f32 %v5899_v53, %v5758_v9  ;;  %17654 = vst [vmem:[#allocation192_spill] sm:$0xff] %v14946_v8  ;;  %v14957_v35 = vmul.f32 %v13945_v3, %v14920_v30  ;;  %v14960_v53 = vmul.f32 %v13945_v3, %v4636_v27  ;;  %v14962_v9 = vpop.f32.mrb[65].mxu0  ;;  %v17685_v30 = vrot.slane %v17644_v31, 2 }
 0x46f   : > { %17651 = vst [vmem:[#allocation194_spill] sm:$0xff] %v14934_v62  ;;  %17653 = vst [vmem:[#allocation204_spill] sm:$0xff] %v14942_v25  ;;  %v14966_v23 = vmul.f32 %v13948_v37, %v4636_v27  ;;  %v14969_v6 = vmul.f32 %v13988_v5, %v4636_v27  ;;  %v5203_v11 = vadd.f32 %v5171_v0, %v5135_v34 }
 0x470   : > { %17656 = vst [vmem:[#allocation200_spill] sm:$0xff] %v14951_v20  ;;  %17657 = vst [vmem:[#allocation19_spill] sm:$0xff] %v14957_v35  ;;  %v6246_v8 = vadd.f32 %v6143_v41, %v6002_v19  ;;  %v17662_v20 = vld [vmem:[#allocation150_spill] sm:$0xff]  ;;  %v14979_v43 = vmul.f32 %v13991_v1, %v4636_v27  ;;  %v5486_v0 = vmul.f32 %v13948_v37, %v14178_v2  ;;  %v17665_v41 = vld [vmem:[#allocation149_spill] sm:$0xff] }
 0x471   : > { %17658 = vst [vmem:[#allocation18_spill] sm:$0xff] %v14960_v53  ;;  %17659 = vst [vmem:[#allocation115_spill] sm:$0xff] %v14962_v9  ;;  %v5344_v51 = vrot.slane %v17662_v20, 1  ;;  %v5487_v34 = vmul.f32 %v13948_v37, %v14175_v21  ;;  %v17664_v20 = vld [vmem:[#allocation165_spill] sm:$0xff]  ;;  %v5799_v19 = vmul.f32 %v13988_v5, %v17665_v41  ;;  %v6043_v42 = vmul.f32 %v13991_v1, %v17665_v41 }
 0x472   : > { %17660 = vst [vmem:[#allocation125_spill] sm:$0xff] %v14966_v23  ;;  %17661 = vst [vmem:[#allocation127_spill] sm:$0xff] %v14969_v6  ;;  %v6284_v62 = vadd.f32 %v14368_v38, %v6246_v8  ;;  %v5798_v8 = vmul.f32 %v13988_v5, %v17664_v20  ;;  %v6042_v27 = vmul.f32 %v13991_v1, %v17664_v20  ;;  %v5588_v2 = vrot.slane %v5486_v0, 2 }
 0x473   : > { %17663 = vst [vmem:[#allocation131_spill] sm:$0xff] %v14979_v43  ;;  %v5346_v9 = vsel %vm2760_vm6, %v5344_v51, %v5345_v57  ;;  %v5589_v29 = vrot.slane %v5487_v34, 2  ;;  %v4553_v23 = vrot.slane %v14340_v4, 7  ;;  %v5901_v6 = vrot.slane %v5799_v19, 1 }
 0x474   : > { %10124 = vmatmul.mubr.msk.f32.gmra.mrb[70].mxu1 %vm8479_vm14, %v6284_v62  ;;  %v5447_v53 = vadd.f32 %v5346_v9, %v5203_v11  ;;  %v5900_v62 = vrot.slane %v5798_v8, 1  ;;  %v6144_v25 = vrot.slane %v6042_v27, 2  ;;  %v6145_v35 = vrot.slane %v6043_v42, 2 }
 0x475   : > { %v5590_v55 = vsel %vm2837_vm8, %v5588_v2, %v5589_v29  ;;  %v4555_v16 = vsel %vm1870_vm5, %v4553_v23, %v17666_v15  ;;  %v4620_v14 = vsel %vm1870_vm5, 0.0, %v4553_v23  ;;  %v5727_v0 = vmul.f32 %v13996_v45, %v17664_v20 }
 0x476   : > { %v5691_v51 = vadd.f32 %v5590_v55, %v5447_v53  ;;  %v5902_v4 = vsel %vm2760_vm6, %v5900_v62, %v5901_v6  ;;  %v6146_v11 = vsel %vm2837_vm8, %v6144_v25, %v6145_v35  ;;  %v5278_v9 = vmul.f32 %v13945_v3, %v4620_v14 }
 0x477   : > { %v15009_v19 = vmul.f32 %v13945_v3, %v4555_v16  ;;  %v15012_v24 = vmul.f32 %v13948_v37, %v4620_v14  ;;  %v15015_v23 = vmul.f32 %v13953_v12, %v4620_v14  ;;  %v15018_v55 = vmul.f32 %v13953_v12, %v4555_v16 }
 0x478   : > { %v5759_v15 = vadd.f32 %v5727_v0, %v5691_v51  ;;  %v15021_v53 = vmul.f32 %v13948_v37, %v4555_v16  ;;  %v5404_v34 = vrot.slane %v5278_v9, 1  ;;  %v15025_v8 = vmul.f32 %v13996_v45, %v4620_v14 }
 0x479   : > { %17667 = vst [vmem:[#allocation135_spill] sm:$0xff] %v15009_v19  ;;  %17668 = vst [vmem:[#allocation139_spill] sm:$0xff] %v15012_v24  ;;  %v16729_v25 = vrot.slane %v15009_v19, 1  ;;  %v15028_v27 = vmul.f32 %v13988_v5, %v4620_v14  ;;  %v15031_v2 = vmul.f32 %v13996_v45, %v4555_v16  ;;  %v15034_v62 = vmul.f32 %v13988_v5, %v4555_v16  ;;  %v17682_v19 = vld [vmem:[#allocation67_spill] sm:$0xff] }
 0x47a   : > { %17669 = vst [vmem:[#allocation121_spill] sm:$0xff] %v15015_v23  ;;  %17670 = vst [vmem:[#allocation120_spill] sm:$0xff] %v15018_v55  ;;  %v6003_v42 = vadd.f32 %v5902_v4, %v5759_v15  ;;  %v15037_v51 = vmul.f32 %v13991_v1, %v4620_v14  ;;  %v17678_v55 = vld [vmem:[#allocation43_spill] sm:$0xff]  ;;  %v17680_v15 = vrot.slane %v17632_v48, 1  ;;  %v15053_v14 = vmul.f32 %v13991_v1, %v4555_v16 }
 0x47b   : > { %17671 = vst [vmem:[#allocation24_spill] sm:$0xff] %v15021_v53  ;;  %17672 = vst [vmem:[#allocation52_spill] sm:$0xff] %v15025_v8  ;;  %v15042_v0 = vsel %vm2760_vm6, %v5404_v34, %v16729_v25  ;;  %v17679_v4 = vrot.slane %v17678_v55, 1  ;;  %v17683_v25 = vld [vmem:[#allocation41_spill] sm:$0xff]  ;;  %v5172_v48 = vmul.f32 %v13953_v12, %v14175_v21  ;;  %v17690_v34 = vld [vmem:[#allocation60_spill] sm:$0xff] }
 0x47c   : > { %17673 = vst [vmem:[#allocation54_spill] sm:$0xff] %v15028_v27  ;;  %17674 = vst [vmem:[#allocation22_spill] sm:$0xff] %v15031_v2  ;;  %v6247_v23 = vadd.f32 %v6146_v11, %v6003_v42  ;;  %v17684_v9 = vrot.slane %v17683_v25, 2  ;;  %v17691_v31 = vrot.slane %v17690_v34, 1  ;;  %v17699_v34 = vld [vmem:[#allocation136_spill] sm:$0xff] }
 0x47d   : > { %17675 = vst [vmem:[#allocation35_spill] sm:$0xff] %v15034_v62  ;;  %17676 = vst [vmem:[#allocation30_spill] sm:$0xff] %v15037_v51  ;;  %v4792_v2 = vsel %vm2760_vm6, %v17680_v15, %v17679_v4  ;;  %v17686_v4 = vld [vmem:[#allocation142_spill] sm:$0xff]  ;;  %v5802_v51 = vmul.f32 %v13988_v5, %v14348_v59 }
 0x47e   : > { %17677 = vst [vmem:[#allocation20_spill] sm:$0xff] %v15042_v0  ;;  %17681 = vst [vmem:[#allocation25_spill] sm:$0xff] %v15053_v14  ;;  %v4892_v43 = vadd.f32 %v4792_v2, %v17682_v19  ;;  %v5036_v55 = vsel %vm2837_vm8, %v17685_v30, %v17684_v9  ;;  %v17687_v11 = vrot.slane %v17686_v4, 1  ;;  %v6285_v16 = vadd.f32 %v14368_v38, %v6247_v23  ;;  %v17688_v2 = vld [vmem:[#allocation163_spill] sm:$0xff]  ;;  %v17697_v23 = vld [vmem:[#allocation50_spill] sm:$0xff] }
 0x47f   : > { %v17689_v8 = vrot.slane %v17688_v2, 2  ;;  %v5904_v30 = vsel %vm2760_vm6, %v5901_v6, %v17691_v31  ;;  %v17692_v9 = vld [vmem:[#allocation59_spill] sm:$0xff]  ;;  %v17698_v53 = vrot.slane %v17697_v23, 1  ;;  %v17700_v6 = vld [vmem:[#allocation68_spill] sm:$0xff]  ;;  %v17702_v31 = vld [vmem:[#allocation65_spill] sm:$0xff] }
 0x480   : > { %v5348_v42 = vsel %vm2760_vm6, %v5345_v57, %v17687_v11  ;;  %v5136_v19 = vadd.f32 %v5036_v55, %v4892_v43  ;;  %v17693_v0 = vrot.slane %v17692_v9, 2  ;;  %v17694_v4 = vld [vmem:[#allocation31_spill] sm:$0xff]  ;;  %10126 = vmatprep.mubr.msk.f32.mxu1 %vm8479_vm14, %v6285_v16  ;;  %v17701_v2 = vrot.slane %v17700_v6, 2 }
 0x481   : > { %v5592_v25 = vsel %vm2837_vm8, %v5589_v29, %v17689_v8  ;;  %v4539_v24 = vrot.slane %v17694_v4, 7  ;;  %v17695_v57 = vld [vmem:[#allocation51_spill] sm:$0xff]  ;;  %v17703_v9 = vrot.slane %v17702_v31, 2  ;;  %v17708_v31 = vld [vmem:[#allocation157_spill] sm:$0xff] }
 0x482   : > { %v6148_v21 = vsel %vm2837_vm8, %v6145_v35, %v17693_v0  ;;  %v17696_v11 = vrot.slane %v17695_v57, 1  ;;  %v5204_v8 = vadd.f32 %v5172_v48, %v5136_v19  ;;  %v5728_v0 = vmul.f32 %v13996_v45, %v17665_v41 }
 0x483   : > { %v5039_v35 = vsel %vm2837_vm8, %v17703_v9, %v17701_v2  ;;  %v4631_v4 = vsel %vm1870_vm5, %v4539_v24, 0.0  ;;  %v5489_v48 = vmul.f32 %v13948_v37, %v17664_v20  ;;  %v5173_v2 = vmul.f32 %v13953_v12, %v17664_v20 }
 0x484   : > { %v4795_v43 = vsel %vm2760_vm6, %v17698_v53, %v17696_v11  ;;  %v15097_v53 = vmul.f32 %v13945_v3, %v17665_v41  ;;  %v5448_v16 = vadd.f32 %v5348_v42, %v5204_v8  ;;  %v15102_v19 = vmul.f32 %v13915_v17, %v4631_v4 }
 0x485   : > { %v4893_v55 = vadd.f32 %v4795_v43, %v17699_v34  ;;  %v15105_v11 = vmul.f32 %v13922_v46, %v4631_v4  ;;  %v15108_v23 = vmul.f32 %v13945_v3, %v4631_v4  ;;  %v15111_v43 = vmul.f32 %v13948_v37, %v4631_v4 }
 0x486   : > { %17704 = vst [vmem:[#allocation117_spill] sm:$0xff] %v15102_v19  ;;  %v5349_v9 = vrot.slane %v17708_v31, 1  ;;  %v5692_v15 = vadd.f32 %v5592_v25, %v5448_v16  ;;  %v15118_v8 = vmul.f32 %v13988_v5, %v4631_v4  ;;  %v15121_v29 = vmul.f32 %v13991_v1, %v4631_v4 }
 0x487   : > { %17705 = vst [vmem:[#allocation116_spill] sm:$0xff] %v15105_v11  ;;  %17706 = vst [vmem:[#allocation123_spill] sm:$0xff] %v15108_v23  ;;  %v5137_v34 = vadd.f32 %v5039_v35, %v4893_v55  ;;  %v5350_v20 = vrot.slane %v15097_v53, 1  ;;  %v5490_v25 = vmul.f32 %v13948_v37, %v17665_v41  ;;  %v5593_v16 = vrot.slane %v5489_v48, 2 }
 0x488   : > { %17707 = vst [vmem:[#allocation119_spill] sm:$0xff] %v15111_v43  ;;  %v5760_v27 = vadd.f32 %v5728_v0, %v5692_v15  ;;  %v5729_v31 = vmul.f32 %v13996_v45, %v14351_v54  ;;  %v5801_v4 = vmul.f32 %v13988_v5, %v14351_v54  ;;  %v6045_v42 = vmul.f32 %v13991_v1, %v14351_v54  ;;  %v17709_v43 = vld [vmem:[#allocation32_spill] sm:$0xff] }
 0x489   : > { %v5205_v35 = vadd.f32 %v5173_v2, %v5137_v34  ;;  %v5351_v15 = vsel %vm2760_vm6, %v5349_v9, %v5350_v20  ;;  %v5594_v0 = vrot.slane %v5490_v25, 2  ;;  %v6046_v53 = vmul.f32 %v13991_v1, %v14348_v59 }
 0x48a   : > { %v6004_v34 = vadd.f32 %v5904_v30, %v5760_v27  ;;  %v5905_v2 = vrot.slane %v5801_v4, 1  ;;  %v5906_v55 = vrot.slane %v5802_v51, 1  ;;  %v6149_v14 = vrot.slane %v6045_v42, 2  ;;  %v17710_v27 = vld [vmem:[#allocation146_spill] sm:$0xff] }
 0x48b   : > { %v5449_v48 = vadd.f32 %v5351_v15, %v5205_v35  ;;  %v5595_v11 = vsel %vm2837_vm8, %v5593_v16, %v5594_v0  ;;  %v6150_v19 = vrot.slane %v6046_v53, 2  ;;  %v4538_v23 = vrot.slane %v17709_v43, 7  ;;  %v17721_v15 = vld [vmem:[#allocation137_spill] sm:$0xff] }
 0x48c   : > { %v6248_v62 = vadd.f32 %v6148_v21, %v6004_v34  ;;  %v5907_v58 = vsel %vm2760_vm6, %v5905_v2, %v5906_v55  ;;  %v17711_v30 = vrot.slane %v17710_v27, 1  ;;  %v17712_v9 = vrot.slane %v17695_v57, 1 }
 0x48d   : > { %v5693_v7 = vadd.f32 %v5595_v11, %v5449_v48  ;;  %v17714_v35 = vrot.slane %v17713_v40, 2  ;;  %v17715_v51 = vrot.slane %v17700_v6, 2  ;;  %v6151_v16 = vsel %vm2837_vm8, %v6149_v14, %v6150_v19 }
 0x48e   : > { %v4797_v25 = vsel %vm2760_vm6, %v17712_v9, %v17711_v30  ;;  %v6286_v42 = vadd.f32 %v14368_v38, %v6248_v62  ;;  %v15156_v11 = vsel %vm1870_vm5, %v4538_v23, %v4539_v24  ;;  %v15159_v43 = vsel %vm1870_vm5, 0.0, %v4538_v23  ;;  %v17722_v30 = vld [vmem:[#allocation57_spill] sm:$0xff] }
 0x48f   : > { %v5041_v21 = vsel %vm2837_vm8, %v17715_v51, %v17714_v35  ;;  %v5761_v34 = vadd.f32 %v5729_v31, %v5693_v7  ;;  %v15165_v40 = vmul.f32 %v13915_v17, %v15159_v43  ;;  %v15170_v62 = vmul.f32 %v13927_v26, %v15159_v43 }
 0x490   : > { %10127 = vmatmul.mubr.msk.f32.gmra.mrb[72].mxu1 %vm8479_vm14, %v6286_v42  ;;  %v15174_v24 = vmul.f32 %v13927_v26, %v15156_v11  ;;  %v15178_v14 = vmul.f32 %v13915_v17, %v15156_v11  ;;  %v15182_v7 = vmul.f32 %v13922_v46, %v15159_v43  ;;  %v15186_v23 = vmul.f32 %v13922_v46, %v15156_v11  ;;  %v17724_v42 = vld [vmem:[#allocation55_spill] sm:$0xff] }
 0x491   : > { %17716 = vst [vmem:[#allocation118_spill] sm:$0xff] %v15165_v40  ;;  %17717 = vst [vmem:[#allocation40_spill] sm:$0xff] %v15170_v62  ;;  %v6005_v6 = vadd.f32 %v5907_v58, %v5761_v34  ;;  %v15190_v31 = vmul.f32 %v13945_v3, %v15159_v43  ;;  %v4894_v53 = vadd.f32 %v4797_v25, %v17721_v15  ;;  %v17723_v9 = vrot.slane %v17722_v30, 1  ;;  %v17728_v30 = vld [vmem:[#allocation156_spill] sm:$0xff]  ;;  %v17738_v62 = vld [vmem:[#allocation167_spill] sm:$0xff] }
 0x492   : > { %17718 = vst [vmem:[#allocation134_spill] sm:$0xff] %v15174_v24  ;;  %17719 = vst [vmem:[#allocation28_spill] sm:$0xff] %v15178_v14  ;;  %v5174_v27 = vmul.f32 %v13953_v12, %v17665_v41  ;;  %v17725_v34 = vrot.slane %v17724_v42, 2  ;;  %v5730_v25 = vmul.f32 %v13996_v45, %v14348_v59  ;;  %v17726_v15 = vrot.slane %v14319_v32, 1  ;;  %v17742_v14 = vld [vmem:[#allocation58_spill] sm:$0xff] }
 0x493   : > { %17720 = vst [vmem:[#allocation21_spill] sm:$0xff] %v15190_v31  ;;  %v5353_v58 = vsel %vm2760_vm6, %v5350_v20, %v17723_v9  ;;  %v6249_v35 = vadd.f32 %v6151_v16, %v6005_v6  ;;  %v5138_v51 = vadd.f32 %v5041_v21, %v4894_v53  ;;  %v17727_v2 = vrot.slane %v14326_v13, 2  ;;  %v17730_v20 = vld [vmem:[#allocation56_spill] sm:$0xff] }
 0x494   : > { %v5597_v4 = vsel %vm2837_vm8, %v5594_v0, %v17725_v34  ;;  %v5909_v48 = vsel %vm2760_vm6, %v5906_v55, %v17726_v15  ;;  %v17729_v57 = vrot.slane %v17728_v30, 1  ;;  %v17731_v16 = vrot.slane %v17730_v20, 1  ;;  %v17733_v0 = vld [vmem:[#allocation159_spill] sm:$0xff] }
 0x495   : > { %v6153_v41 = vsel %vm2837_vm8, %v6150_v19, %v17727_v2  ;;  %v17732_v6 = vrot.slane %v14286_v44, 2  ;;  %v17734_v53 = vrot.slane %v17733_v0, 2  ;;  %v6287_v32 = vadd.f32 %v14368_v38, %v6249_v35  ;;  %v17735_v55 = vld [vmem:[#allocation79_spill] sm:$0xff]  ;;  %v17736_v2 = vld [vmem:[#allocation82_spill] sm:$0xff] }
 0x496   : > { %v4800_v21 = vsel %vm2760_vm6, %v17731_v16, %v17729_v57  ;;  %v5206_v42 = vadd.f32 %v5174_v27, %v5138_v51  ;;  %v5175_v13 = vmul.f32 %v13953_v12, %v14351_v54  ;;  %v5249_v19 = vmul.f32 %v13945_v3, %v14348_v59 }
 0x497   : > { %v5044_v9 = vsel %vm2837_vm8, %v17734_v53, %v17732_v6  ;;  %v4895_v34 = vadd.f32 %v4800_v21, %v17735_v55  ;;  %v5354_v15 = vrot.slane %v17736_v2, 1  ;;  %v5492_v57 = vmul.f32 %v13948_v37, %v14351_v54  ;;  %10129 = vmatprep.mubr.msk.f32.mxu1 %vm8479_vm14, %v6287_v32  ;;  %v17737_v53 = vld [vmem:[#allocation70_spill] sm:$0xff] }
 0x498   : > { %v5493_v20 = vmul.f32 %v13948_v37, %v14348_v59  ;;  %v5450_v35 = vadd.f32 %v5353_v58, %v5206_v42  ;;  %v5731_v51 = vmul.f32 %v13996_v45, %v14437_v47  ;;  %v5804_v16 = vmul.f32 %v13988_v5, %v14437_v47 }
 0x499   : > { %v5139_v27 = vadd.f32 %v5044_v9, %v4895_v34  ;;  %v5355_v21 = vrot.slane %v5249_v19, 1  ;;  %v5598_v6 = vrot.slane %v5492_v57, 2  ;;  %v5805_v55 = vmul.f32 %v13988_v5, %v17737_v53 }
 0x49a   : > { %v5599_v0 = vrot.slane %v5493_v20, 2  ;;  %v5694_v54 = vadd.f32 %v5597_v4, %v5450_v35  ;;  %v5910_v24 = vrot.slane %v5804_v16, 1  ;;  %v6048_v32 = vmul.f32 %v13991_v1, %v14437_v47  ;;  %v17741_v16 = vld [vmem:[#allocation80_spill] sm:$0xff] }
 0x49b   : > { %v5207_v2 = vadd.f32 %v5175_v13, %v5139_v27  ;;  %v5356_v58 = vsel %vm2760_vm6, %v5354_v15, %v5355_v21  ;;  %v5911_v42 = vrot.slane %v5805_v55, 1  ;;  %v6049_v34 = vmul.f32 %v13991_v1, %v17737_v53 }
 0x49c   : > { %v5600_v9 = vsel %vm2837_vm8, %v5598_v6, %v5599_v0  ;;  %v5762_v19 = vadd.f32 %v5730_v25, %v5694_v54  ;;  %v6154_v20 = vrot.slane %v6048_v32, 2  ;;  %v17739_v40 = vrot.slane %v17738_v62, 1 }
 0x49d   : > { %v5451_v57 = vadd.f32 %v5356_v58, %v5207_v2  ;;  %v17740_v4 = vrot.slane %v17728_v30, 1  ;;  %v5912_v35 = vsel %vm2760_vm6, %v5910_v24, %v5911_v42  ;;  %v6155_v27 = vrot.slane %v6049_v34, 2  ;;  %v17745_v2 = vld [vmem:[#allocation190_spill] sm:$0xff]  ;;  %v17747_v34 = vld [vmem:[#allocation181_spill] sm:$0xff] }
 0x49e   : > { %v17743_v6 = vrot.slane %v17742_v14, 2  ;;  %v17744_v55 = vrot.slane %v14286_v44, 2  ;;  %v6006_v25 = vadd.f32 %v5909_v48, %v5762_v19  ;;  %v5176_v62 = vmul.f32 %v13953_v12, %v14348_v59  ;;  %v17749_v48 = vld [vmem:[#allocation179_spill] sm:$0xff]  ;;  %v17751_v59 = vld [vmem:[#allocation180_spill] sm:$0xff]  ;;  %v17766_v24 = vld [vmem:[#allocation170_spill] sm:$0xff] }
 0x49f   : > { %v4802_v13 = vsel %vm2760_vm6, %v17740_v4, %v17739_v40  ;;  %v5695_v54 = vadd.f32 %v5600_v9, %v5451_v57  ;;  %v17746_v30 = vrot.slane %v17745_v2, 1  ;;  %v6156_v32 = vsel %vm2837_vm8, %v6154_v20, %v6155_v27  ;;  %v17754_v2 = vld [vmem:[#allocation48_spill] sm:$0xff] }
 0x4a0   : > { %v4896_v15 = vadd.f32 %v4802_v13, %v17741_v16  ;;  %v5046_v31 = vsel %vm2837_vm8, %v17744_v55, %v17743_v6  ;;  %v17748_v14 = vrot.slane %v17747_v34, 2  ;;  %v6250_v4 = vadd.f32 %v6153_v41, %v6006_v25  ;;  %v17753_v6 = vld [vmem:[#allocation162_spill] sm:$0xff] }
 0x4a1   : > { %v5358_v40 = vsel %vm2760_vm6, %v5355_v21, %v17746_v30  ;;  %v5763_v13 = vadd.f32 %v5731_v51, %v5695_v54  ;;  %v17750_v9 = vrot.slane %v17749_v48, 1  ;;  %v17752_v57 = vrot.slane %v17751_v59, 2  ;;  %v17760_v51 = vld [vmem:[#allocation39_spill] sm:$0xff] }
 0x4a2   : > { %v5140_v58 = vadd.f32 %v5046_v31, %v4896_v15  ;;  %v5602_v44 = vsel %vm2837_vm8, %v5599_v0, %v17748_v14  ;;  %v4545_v55 = vrot.slane %v17753_v6, 7  ;;  %v17755_v20 = vrot.slane %v17754_v2, 1  ;;  %v17756_v31 = vld [vmem:[#allocation154_spill] sm:$0xff]  ;;  %v17758_v0 = vld [vmem:[#allocation81_spill] sm:$0xff] }
 0x4a3   : > { %v5914_v19 = vsel %vm2760_vm6, %v5911_v42, %v17750_v9  ;;  %v6158_v16 = vsel %vm2837_vm8, %v6155_v27, %v17752_v57  ;;  %v17757_v15 = vrot.slane %v17756_v31, 1  ;;  %v17759_v41 = vrot.slane %v17758_v0, 2 }
 0x4a4   : > { %v5208_v21 = vadd.f32 %v5176_v62, %v5140_v58  ;;  %v17761_v25 = vrot.slane %v17760_v51, 2  ;;  %v6288_v34 = vadd.f32 %v14368_v38, %v6250_v4  ;;  %v6007_v27 = vadd.f32 %v5912_v35, %v5763_v13  ;;  %v17762_v62 = vld [vmem:[#allocation210_spill] sm:$0xff] }
 0x4a5   : > { %v4805_v30 = vsel %vm2760_vm6, %v17757_v15, %v17755_v20  ;;  %v5732_v48 = vmul.f32 %v13996_v45, %v17737_v53  ;;  %v4633_v9 = vsel %vm1870_vm5, %v4545_v55, 0.0  ;;  %v15292_v59 = vmul.f32 %v13945_v3, %v17737_v53 }
 0x4a6   : > { %v5049_v54 = vsel %vm2837_vm8, %v17761_v25, %v17759_v41  ;;  %v4897_v58 = vadd.f32 %v4805_v30, %v17762_v62  ;;  %v5452_v14 = vadd.f32 %v5358_v40, %v5208_v21  ;;  %10130 = vmatmul.mubr.msk.f32.gmra.mrb[74].mxu1 %vm8479_vm14, %v6288_v34  ;;  %v6251_v57 = vadd.f32 %v6156_v32, %v6007_v27  ;;  %v17765_v21 = vld [vmem:[#allocation169_spill] sm:$0xff]  ;;  %v15313_v32 = vld [vmem:[%s16334_s18] ss:$0 sm:$0xff] }
 0x4a7   : > { %v15296_v6 = vmul.f32 %v13915_v17, %v4633_v9  ;;  %v15299_v38 = vmul.f32 %v13922_v46, %v4633_v9  ;;  %v15302_v35 = vmul.f32 %v13945_v3, %v4633_v9  ;;  %v15305_v4 = vmul.f32 %v13948_v37, %v4633_v9 }
 0x4a8   : > { %v5696_v40 = vadd.f32 %v5602_v44, %v5452_v14  ;;  %v5177_v13 = vmul.f32 %v13953_v12, %v14437_v47  ;;  %v5359_v20 = vrot.slane %v17765_v21, 1  ;;  %v6289_v31 = vadd.f32 %v15313_v32, %v6251_v57 }
 0x4a9   : > { %17763 = vst [vmem:[#allocation26_spill] sm:$0xff] %v15296_v6  ;;  %17764 = vst [vmem:[#allocation37_spill] sm:$0xff] %v15299_v38  ;;  %v15318_v30 = vmul.f32 %v13988_v5, %v4633_v9  ;;  %v15321_v44 = vmul.f32 %v13991_v1, %v4633_v9  ;;  %v5141_v27 = vadd.f32 %v5049_v54, %v4897_v58  ;;  %v5360_v62 = vrot.slane %v15292_v59, 1  ;;  %v17778_v38 = vld [vmem:[#allocation148_spill] sm:$0xff] }
 0x4aa   : > { %v5764_v41 = vadd.f32 %v5732_v48, %v5696_v40  ;;  %10132 = vmatprep.mubr.msk.f32.mxu1 %vm8479_vm14, %v6289_v31  ;;  %v5495_v14 = vmul.f32 %v13948_v37, %v14437_v47  ;;  %v5496_v57 = vmul.f32 %v13948_v37, %v17737_v53  ;;  %v5733_v48 = vmul.f32 %v13996_v45, %v14529_v52 }
 0x4ab   : > { %v5807_v40 = vmul.f32 %v13988_v5, %v14529_v52  ;;  %v5808_v21 = vmul.f32 %v13988_v5, %v14526_v10  ;;  %v5209_v31 = vadd.f32 %v5177_v13, %v5141_v27  ;;  %v5361_v54 = vsel %vm2760_vm6, %v5359_v20, %v5360_v62 }
 0x4ac   : > { %v6008_v9 = vadd.f32 %v5914_v19, %v5764_v41  ;;  %v5603_v58 = vrot.slane %v5495_v14, 2  ;;  %v5604_v59 = vrot.slane %v5496_v57, 2  ;;  %v6051_v19 = vmul.f32 %v13991_v1, %v14529_v52  ;;  %v17767_v14 = vld [vmem:[#allocation177_spill] sm:$0xff] }
 0x4ad   : > { %v5915_v47 = vrot.slane %v5807_v40, 1  ;;  %v5916_v15 = vrot.slane %v5808_v21, 1  ;;  %v5453_v41 = vadd.f32 %v5361_v54, %v5209_v31  ;;  %v6052_v25 = vmul.f32 %v13991_v1, %v14526_v10 }
 0x4ae   : > { %v6252_v51 = vadd.f32 %v6158_v16, %v6008_v9  ;;  %v5605_v34 = vsel %vm2837_vm8, %v5603_v58, %v5604_v59  ;;  %v4544_v42 = vrot.slane %v17766_v24, 7  ;;  %v6159_v27 = vrot.slane %v6051_v19, 2 }
 0x4af   : > { %v5917_v20 = vsel %vm2760_vm6, %v5915_v47, %v5916_v15  ;;  %v17768_v16 = vrot.slane %v17767_v14, 1  ;;  %v17769_v57 = vrot.slane %v17754_v2, 1  ;;  %v5697_v40 = vadd.f32 %v5605_v34, %v5453_v41 }
 0x4b0   : > { %v6290_v13 = vadd.f32 %v15313_v32, %v6252_v51  ;;  %v6160_v21 = vrot.slane %v6052_v25, 2  ;;  %v15353_v31 = vsel %vm1870_vm5, %v4544_v42, %v4545_v55  ;;  %v15356_v54 = vsel %vm1870_vm5, 0.0, %v4544_v42 }
 0x4b1   : > { %v4807_v9 = vsel %vm2760_vm6, %v17769_v57, %v17768_v16  ;;  %v15363_v58 = vmul.f32 %v13915_v17, %v15356_v54  ;;  %v15367_v2 = vmul.f32 %v13915_v17, %v15353_v31  ;;  %v5765_v25 = vadd.f32 %v5733_v48, %v5697_v40  ;;  %v17774_v48 = vld [vmem:[#allocation63_spill] sm:$0xff] }
 0x4b2   : > { %10133 = vmatmul.mubr.msk.f32.gmra.mrb[76].mxu1 %vm8479_vm14, %v6290_v13  ;;  %v6161_v55 = vsel %vm2837_vm8, %v6159_v27, %v6160_v21  ;;  %v15372_v42 = vmul.f32 %v13927_v26, %v15356_v54  ;;  %v15376_v34 = vmul.f32 %v13927_v26, %v15353_v31  ;;  %v15381_v19 = vmul.f32 %v13922_v46, %v15356_v54  ;;  %v17775_v57 = vld [vmem:[#allocation191_spill] sm:$0xff] }
 0x4b3   : > { %17770 = vst [vmem:[#allocation38_spill] sm:$0xff] %v15363_v58  ;;  %17771 = vst [vmem:[#allocation36_spill] sm:$0xff] %v15367_v2  ;;  %v15385_v41 = vmul.f32 %v13922_v46, %v15353_v31  ;;  %v4898_v13 = vadd.f32 %v4807_v9, %v17774_v48  ;;  %v6009_v27 = vadd.f32 %v5917_v20, %v5765_v25  ;;  %v17776_v40 = vrot.slane %v17775_v57, 2  ;;  %v17780_v9 = vld [vmem:[#allocation164_spill] sm:$0xff] }
 0x4b4   : > { %17772 = vst [vmem:[#allocation29_spill] sm:$0xff] %v15372_v42  ;;  %17773 = vst [vmem:[#allocation109_spill] sm:$0xff] %v15376_v34  ;;  %v15391_v16 = vmul.f32 %v13945_v3, %v15356_v54  ;;  %v17777_v47 = vrot.slane %v17758_v0, 2  ;;  %v5178_v34 = vmul.f32 %v13953_v12, %v17737_v53  ;;  %v17779_v6 = vrot.slane %v17778_v38, 1  ;;  %v17784_v38 = vld [vmem:[#allocation78_spill] sm:$0xff] }
 0x4b5   : > { %v17781_v25 = vrot.slane %v17780_v9, 2  ;;  %v6253_v14 = vadd.f32 %v6161_v55, %v6009_v27  ;;  %v5734_v57 = vmul.f32 %v13996_v45, %v14526_v10  ;;  %v17782_v0 = vrot.slane %v14544_v56, 1 }
 0x4b6   : > { %v5051_v51 = vsel %vm2837_vm8, %v17777_v47, %v17776_v40  ;;  %v5363_v20 = vsel %vm2760_vm6, %v5360_v62, %v17779_v6  ;;  %v17785_v40 = vrot.slane %v17784_v38, 1  ;;  %v17786_v6 = vld [vmem:[#allocation69_spill] sm:$0xff]  ;;  %v17790_v27 = vrot.slane %v14467_v22, 2 }
 0x4b7   : > { %v5142_v24 = vadd.f32 %v5051_v51, %v4898_v13  ;;  %v5607_v48 = vsel %vm2837_vm8, %v5604_v59, %v17781_v25  ;;  %v5919_v47 = vsel %vm2760_vm6, %v5916_v15, %v17782_v0  ;;  %v17783_v51 = vrot.slane %v14547_v61, 2  ;;  %v17788_v59 = vld [vmem:[#allocation73_spill] sm:$0xff] }
 0x4b8   : > { %v17787_v62 = vrot.slane %v17786_v6, 1  ;;  %v17789_v55 = vrot.slane %v17788_v59, 2  ;;  %v5179_v56 = vmul.f32 %v13953_v12, %v14529_v52  ;;  %v6291_v61 = vadd.f32 %v15313_v32, %v6253_v14  ;;  %v17791_v15 = vld [vmem:[#allocation89_spill] sm:$0xff] }
 0x4b9   : > { %v6163_v53 = vsel %vm2837_vm8, %v6160_v21, %v17783_v51  ;;  %v5210_v13 = vadd.f32 %v5178_v34, %v5142_v24  ;;  %v5255_v24 = vmul.f32 %v13945_v3, %v14526_v10  ;;  %v5364_v34 = vrot.slane %v14596_v18, 1 }
 0x4ba   : > { %v4810_v9 = vsel %vm2760_vm6, %v17787_v62, %v17785_v40  ;;  %v5054_v25 = vsel %vm2837_vm8, %v17790_v27, %v17789_v55  ;;  %v5498_v51 = vmul.f32 %v13948_v37, %v14529_v52  ;;  %v5499_v22 = vmul.f32 %v13948_v37, %v14526_v10  ;;  %10135 = vmatprep.mubr.msk.f32.mxu1 %vm8479_vm14, %v6291_v61 }
 0x4bb   : > { %v4899_v21 = vadd.f32 %v4810_v9, %v17791_v15  ;;  %v5454_v0 = vadd.f32 %v5363_v20, %v5210_v13  ;;  %v5735_v40 = vmul.f32 %v13996_v45, %v14766_v28  ;;  %v5365_v6 = vrot.slane %v5255_v24, 1 }
 0x4bc   : > { %v5810_v62 = vmul.f32 %v13988_v5, %v14766_v28  ;;  %v5811_v18 = vmul.f32 %v13988_v5, %v14763_v63  ;;  %v5608_v13 = vrot.slane %v5498_v51, 2  ;;  %v5609_v9 = vrot.slane %v5499_v22, 2 }
 0x4bd   : > { %v5143_v14 = vadd.f32 %v5054_v25, %v4899_v21  ;;  %v5698_v20 = vadd.f32 %v5607_v48, %v5454_v0  ;;  %v6054_v52 = vmul.f32 %v13991_v1, %v14766_v28  ;;  %v5366_v27 = vsel %vm2760_vm6, %v5364_v34, %v5365_v6  ;;  %v17792_v0 = vld [vmem:[#allocation130_spill] sm:$0xff] }
 0x4be   : > { %v5920_v15 = vrot.slane %v5810_v62, 1  ;;  %v5921_v42 = vrot.slane %v5811_v18, 1  ;;  %v5610_v25 = vsel %vm2837_vm8, %v5608_v13, %v5609_v9  ;;  %v6055_v21 = vmul.f32 %v13991_v1, %v14763_v63  ;;  %v17798_v13 = vld [vmem:[#allocation95_spill] sm:$0xff] }
 0x4bf   : > { %v5211_v55 = vadd.f32 %v5179_v56, %v5143_v14  ;;  %v5766_v61 = vadd.f32 %v5734_v57, %v5698_v20  ;;  %v6164_v24 = vrot.slane %v6054_v52, 2  ;;  %v17793_v51 = vrot.slane %v17792_v0, 1  ;;  %v17795_v14 = vld [vmem:[#allocation147_spill] sm:$0xff] }
 0x4c0   : > { %v5922_v48 = vsel %vm2760_vm6, %v5920_v15, %v5921_v42  ;;  %v17794_v22 = vrot.slane %v17784_v38, 1  ;;  %v17796_v34 = vrot.slane %v17795_v14, 2  ;;  %v17797_v62 = vrot.slane %v17788_v59, 2  ;;  %v17807_v14 = vld [vmem:[#allocation62_spill] sm:$0xff] }
 0x4c1   : > { %v5455_v58 = vadd.f32 %v5366_v27, %v5211_v55  ;;  %v6010_v18 = vadd.f32 %v5919_v47, %v5766_v61  ;;  %v6165_v20 = vrot.slane %v6055_v21, 2  ;;  %v5180_v52 = vmul.f32 %v13953_v12, %v14526_v10 }
 0x4c2   : > { %v4812_v56 = vsel %vm2760_vm6, %v17794_v22, %v17793_v51  ;;  %v5056_v57 = vsel %vm2837_vm8, %v17797_v62, %v17796_v34  ;;  %v17799_v38 = vrot.slane %v14538_v50, 1  ;;  %v17800_v0 = vrot.slane %v14541_v39, 2  ;;  %v17804_v39 = vld [vmem:[#allocation168_spill] sm:$0xff] }
 0x4c3   : > { %v4900_v2 = vadd.f32 %v4812_v56, %v17798_v13  ;;  %v5699_v27 = vadd.f32 %v5610_v25, %v5455_v58  ;;  %v6254_v51 = vadd.f32 %v6163_v53, %v6010_v18  ;;  %v6166_v47 = vsel %vm2837_vm8, %v6164_v24, %v6165_v20  ;;  %v17806_v24 = vld [vmem:[#allocation104_spill] sm:$0xff] }
 0x4c4   : > { %v5368_v15 = vsel %vm2760_vm6, %v5365_v6, %v17799_v38  ;;  %v5612_v59 = vsel %vm2837_vm8, %v5609_v9, %v17800_v0  ;;  %v17801_v21 = vrot.slane %v14680_v36, 1  ;;  %v17802_v56 = vrot.slane %v14683_v60, 2 }
 0x4c5   : > { %v5144_v61 = vadd.f32 %v5056_v57, %v4900_v2  ;;  %v5767_v10 = vadd.f32 %v5735_v40, %v5699_v27  ;;  %v4551_v50 = vrot.slane %v14675_v33, 7  ;;  %v17803_v6 = vrot.slane %v14573_v49, 1  ;;  %v17809_v40 = vld [vmem:[#allocation61_spill] sm:$0xff] }
 0x4c6   : > { %v5924_v22 = vsel %vm2760_vm6, %v5921_v42, %v17801_v21  ;;  %v6168_v58 = vsel %vm2837_vm8, %v6165_v20, %v17802_v56  ;;  %v17805_v25 = vrot.slane %v17804_v39, 1  ;;  %v6292_v9 = vadd.f32 %v15313_v32, %v6254_v51 }
 0x4c7   : > { %v5212_v2 = vadd.f32 %v5180_v52, %v5144_v61  ;;  %v17808_v42 = vrot.slane %v17807_v14, 2  ;;  %v17810_v34 = vrot.slane %v17809_v40, 2  ;;  %v6011_v33 = vadd.f32 %v5922_v48, %v5767_v10  ;;  %v17814_v40 = vld [vmem:[#allocation178_spill] sm:$0xff] }
 0x4c8   : > { %v4815_v53 = vsel %vm2760_vm6, %v17805_v25, %v17803_v6  ;;  %v5736_v57 = vmul.f32 %v13996_v45, %v14763_v63  ;;  %v4635_v18 = vsel %vm1870_vm5, %v4551_v50, 0.0  ;;  %10136 = vmatmul.mubr.msk.f32.gmra.mrb[78].mxu1 %vm8479_vm14, %v6292_v9  ;;  %v15502_v27 = vmul.f32 %v13945_v3, %v14763_v63  ;;  %v17813_v9 = vld [vmem:[#allocation97_spill] sm:$0xff] }
 0x4c9   : > { %v4901_v36 = vadd.f32 %v4815_v53, %v17806_v24  ;;  %v5059_v60 = vsel %vm2837_vm8, %v17810_v34, %v17808_v42  ;;  %v5456_v20 = vadd.f32 %v5368_v15, %v5212_v2  ;;  %v15495_v13 = vmul.f32 %v13915_v17, %v4635_v18 }
 0x4ca   : > { %v15498_v52 = vmul.f32 %v13945_v3, %v4635_v18  ;;  %v6255_v38 = vadd.f32 %v6166_v47, %v6011_v33  ;;  %v15505_v48 = vmul.f32 %v13948_v37, %v4635_v18  ;;  %v15508_v0 = vmul.f32 %v13988_v5, %v4635_v18 }
 0x4cb   : > { %17811 = vst [vmem:[#allocation110_spill] sm:$0xff] %v15495_v13  ;;  %v5181_v15 = vmul.f32 %v13953_v12, %v14766_v28  ;;  %v5700_v51 = vadd.f32 %v5612_v59, %v5456_v20  ;;  %v15514_v21 = vmul.f32 %v13922_v46, %v4635_v18  ;;  %v15517_v10 = vmul.f32 %v13991_v1, %v4635_v18  ;;  %v17815_v18 = vld [vmem:[#allocation206_spill] sm:$0xff] }
 0x4cc   : > { %v6293_v47 = vadd.f32 %v15313_v32, %v6255_v38  ;;  %v5145_v53 = vadd.f32 %v5059_v60, %v4901_v36  ;;  %v5369_v59 = vrot.slane %v17813_v9, 1  ;;  %v5370_v2 = vrot.slane %v15502_v27, 1 }
 0x4cd   : > { %17812 = vst [vmem:[#allocation122_spill] sm:$0xff] %v15514_v21  ;;  %v5768_v25 = vadd.f32 %v5736_v57, %v5700_v51  ;;  %v5501_v24 = vmul.f32 %v13948_v37, %v14766_v28  ;;  %v5502_v42 = vmul.f32 %v13948_v37, %v14763_v63  ;;  %v5737_v34 = vmul.f32 %v13996_v45, %v17814_v40 }
 0x4ce   : > { %10138 = vmatprep.mubr.msk.f32.mxu1 %vm8479_vm14, %v6293_v47  ;;  %v5813_v33 = vmul.f32 %v13988_v5, %v17814_v40  ;;  %v5213_v36 = vadd.f32 %v5181_v15, %v5145_v53  ;;  %v5371_v60 = vsel %vm2760_vm6, %v5369_v59, %v5370_v2  ;;  %v5814_v20 = vmul.f32 %v13988_v5, %v17815_v18  ;;  %v17817_v59 = vld [vmem:[#allocation173_spill] sm:$0xff] }
 0x4cf   : > { %v6012_v57 = vadd.f32 %v5924_v22, %v5768_v25  ;;  %v5613_v27 = vrot.slane %v5501_v24, 2  ;;  %v5614_v38 = vrot.slane %v5502_v42, 2  ;;  %v6057_v28 = vmul.f32 %v13991_v1, %v17814_v40  ;;  %v17816_v25 = vld [vmem:[#allocation93_spill] sm:$0xff] }
 0x4d0   : > { %v5925_v51 = vrot.slane %v5813_v33, 1  ;;  %v5457_v9 = vadd.f32 %v5371_v60, %v5213_v36  ;;  %v5926_v61 = vrot.slane %v5814_v20, 1  ;;  %v6058_v6 = vmul.f32 %v13991_v1, %v17815_v18  ;;  %v17820_v20 = vld [vmem:[#allocation76_spill] sm:$0xff] }
 0x4d1   : > { %v6256_v47 = vadd.f32 %v6168_v58, %v6012_v57  ;;  %v5615_v22 = vsel %vm2837_vm8, %v5613_v27, %v5614_v38  ;;  %v6169_v15 = vrot.slane %v6057_v28, 2  ;;  %v4550_v53 = vrot.slane %v17816_v25, 7  ;;  %v17821_v28 = vld [vmem:[#allocation172_spill] sm:$0xff] }
 0x4d2   : > { %v17818_v56 = vrot.slane %v17817_v59, 1  ;;  %v17819_v24 = vrot.slane %v14573_v49, 1  ;;  %v5701_v39 = vadd.f32 %v5615_v22, %v5457_v9  ;;  %v5927_v58 = vsel %vm2760_vm6, %v5925_v51, %v5926_v61 }
 0x4d3   : > { %v6294_v33 = vadd.f32 %v15313_v32, %v6256_v47  ;;  %v6170_v57 = vrot.slane %v6058_v6, 2  ;;  %v15551_v36 = vsel %vm1870_vm5, %v4550_v53, %v4551_v50  ;;  %v15554_v60 = vsel %vm1870_vm5, 0.0, %v4550_v53 }
 0x4d4   : > { %v4817_v42 = vsel %vm2760_vm6, %v17819_v24, %v17818_v56  ;;  %v17822_v25 = vrot.slane %v17821_v28, 2  ;;  %v17823_v49 = vrot.slane %v17807_v14, 2  ;;  %v5769_v51 = vadd.f32 %v5737_v34, %v5701_v39  ;;  %v17824_v28 = vld [vmem:[#allocation186_spill] sm:$0xff] }
 0x4d5   : > { %v4902_v27 = vadd.f32 %v4817_v42, %v17820_v20  ;;  %10139 = vmatmul.mubr.msk.f32.gmra.mrb[48].mxu1 %vm8479_vm14, %v6294_v33  ;;  %v6171_v6 = vsel %vm2837_vm8, %v6169_v15, %v6170_v57  ;;  %v15567_v50 = vmul.f32 %v13927_v26, %v15554_v60  ;;  %v15571_v9 = vmul.f32 %v13915_v17, %v15554_v60  ;;  %v17830_v42 = vld [vmem:[#allocation176_spill] sm:$0xff]  ;;  %v17837_v33 = vld [vmem:[#allocation174_spill] sm:$0xff] }
 0x4d6   : > { %v5061_v56 = vsel %vm2837_vm8, %v17823_v49, %v17822_v25  ;;  %v15575_v14 = vmul.f32 %v13915_v17, %v15551_v36  ;;  %v15579_v22 = vmul.f32 %v13922_v46, %v15554_v60  ;;  %v15583_v39 = vmul.f32 %v13922_v46, %v15551_v36  ;;  %v17826_v49 = vld [vmem:[#allocation182_spill] sm:$0xff] }
 0x4d7   : > { %v6013_v34 = vadd.f32 %v5927_v58, %v5769_v51  ;;  %v15587_v15 = vmul.f32 %v13945_v3, %v15554_v60  ;;  %v5146_v53 = vadd.f32 %v5061_v56, %v4902_v27  ;;  %v5182_v59 = vmul.f32 %v13953_v12, %v14763_v63  ;;  %v17828_v56 = vld [vmem:[#allocation161_spill] sm:$0xff] }
 0x4d8   : > { %v17825_v58 = vrot.slane %v17824_v28, 1  ;;  %v17827_v51 = vrot.slane %v17826_v49, 2  ;;  %v5738_v63 = vmul.f32 %v13996_v45, %v17815_v18  ;;  %v17829_v17 = vrot.slane %v17828_v56, 1  ;;  %v17836_v49 = vld [vmem:[#allocation175_spill] sm:$0xff]  ;;  %v17839_v56 = vld [vmem:[#allocation108_spill] sm:$0xff] }
 0x4d9   : > { %v6257_v20 = vadd.f32 %v6171_v6, %v6013_v34  ;;  %v5214_v46 = vadd.f32 %v5182_v59, %v5146_v53  ;;  %v17831_v47 = vrot.slane %v17830_v42, 2  ;;  %v17832_v34 = vld [vmem:[#allocation106_spill] sm:$0xff]  ;;  %v17834_v59 = vld [vmem:[#allocation112_spill] sm:$0xff]  ;;  %v17838_v55 = vrot.slane %v17837_v33, 2 }
 0x4da   : > { %v5373_v25 = vsel %vm2760_vm6, %v5370_v2, %v17825_v58  ;;  %v5617_v27 = vsel %vm2837_vm8, %v5614_v38, %v17827_v51  ;;  %v5929_v24 = vsel %vm2760_vm6, %v5926_v61, %v17829_v17  ;;  %v17833_v53 = vrot.slane %v17832_v34, 1  ;;  %v17841_v17 = vld [vmem:[#allocation87_spill] sm:$0xff] }
 0x4db   : > { %v6173_v6 = vsel %vm2837_vm8, %v6170_v57, %v17831_v47  ;;  %v17835_v28 = vrot.slane %v17834_v59, 1  ;;  %v6295_v58 = vadd.f32 %v15313_v32, %v6257_v20  ;;  %v5458_v38 = vadd.f32 %v5373_v25, %v5214_v46 }
 0x4dc   : > { %v17840_v62 = vrot.slane %v17839_v56, 2  ;;  %v5183_v57 = vmul.f32 %v13953_v12, %v17814_v40  ;;  %v5261_v47 = vmul.f32 %v13945_v3, %v17815_v18  ;;  %v5374_v42 = vrot.slane %v17841_v17, 1 }
 0x4dd   : > { %v4820_v2 = vsel %vm2760_vm6, %v17835_v28, %v17833_v53  ;;  %v5504_v20 = vmul.f32 %v13948_v37, %v17814_v40  ;;  %10141 = vmatprep.mubr.msk.f32.mxu1 %vm8479_vm14, %v6295_v58  ;;  %v5702_v46 = vadd.f32 %v5617_v27, %v5458_v38  ;;  %v5505_v53 = vmul.f32 %v13948_v37, %v17815_v18 }
 0x4de   : > { %v4903_v51 = vadd.f32 %v4820_v2, %v17836_v49  ;;  %v5064_v61 = vsel %vm2837_vm8, %v17840_v62, %v17838_v55  ;;  %v5739_v55 = vmul.f32 %v13996_v45, %v15159_v43  ;;  %v5375_v62 = vrot.slane %v5261_v47, 1 }
 0x4df   : > { %v5618_v59 = vrot.slane %v5504_v20, 2  ;;  %v5816_v28 = vmul.f32 %v13988_v5, %v15159_v43  ;;  %v5817_v2 = vmul.f32 %v13988_v5, %v15156_v11  ;;  %v5770_v49 = vadd.f32 %v5738_v63, %v5702_v46 }
 0x4e0   : > { %v5147_v25 = vadd.f32 %v5064_v61, %v4903_v51  ;;  %v5619_v56 = vrot.slane %v5505_v53, 2  ;;  %v6060_v27 = vmul.f32 %v13991_v1, %v15159_v43  ;;  %v5376_v58 = vsel %vm2760_vm6, %v5374_v42, %v5375_v62  ;;  %v17845_v42 = vld [vmem:[#allocation86_spill] sm:$0xff] }
 0x4e1   : > { %v5930_v38 = vrot.slane %v5816_v28, 1  ;;  %v5931_v51 = vrot.slane %v5817_v2, 1  ;;  %v6061_v61 = vmul.f32 %v13991_v1, %v15156_v11  ;;  %v6014_v47 = vadd.f32 %v5929_v24, %v5770_v49 }
 0x4e2   : > { %v5215_v40 = vadd.f32 %v5183_v57, %v5147_v25  ;;  %v5620_v20 = vsel %vm2837_vm8, %v5618_v59, %v5619_v56  ;;  %v6174_v13 = vrot.slane %v6060_v27, 2  ;;  %v17842_v57 = vld [vmem:[#allocation107_spill] sm:$0xff]  ;;  %v17844_v25 = vrot.slane %v17832_v34, 1 }
 0x4e3   : > { %v5932_v21 = vsel %vm2760_vm6, %v5930_v38, %v5931_v51  ;;  %v6175_v63 = vrot.slane %v6061_v61, 2  ;;  %v17843_v46 = vrot.slane %v17842_v57, 1  ;;  %v17846_v28 = vrot.slane %v17845_v42, 2  ;;  %v17849_v38 = vld [vmem:[#allocation96_spill] sm:$0xff] }
 0x4e4   : > { %v5459_v17 = vadd.f32 %v5376_v58, %v5215_v40  ;;  %v17847_v2 = vrot.slane %v17837_v33, 2  ;;  %v6258_v24 = vadd.f32 %v6173_v6, %v6014_v47  ;;  %v17848_v40 = vld [vmem:[#allocation98_spill] sm:$0xff]  ;;  %v5184_v27 = vmul.f32 %v13953_v12, %v17815_v18  ;;  %v17851_v57 = vld [vmem:[#allocation160_spill] sm:$0xff] }
 0x4e5   : > { %v4822_v53 = vsel %vm2760_vm6, %v17844_v25, %v17843_v46  ;;  %v6176_v58 = vsel %vm2837_vm8, %v6174_v13, %v6175_v63  ;;  %v17850_v61 = vrot.slane %v17849_v38, 1  ;;  %v17852_v46 = vrot.slane %v17851_v57, 2 }
 0x4e6   : > { %v5066_v26 = vsel %vm2837_vm8, %v17847_v2, %v17846_v28  ;;  %v5703_v49 = vadd.f32 %v5620_v20, %v5459_v17  ;;  %v4904_v59 = vadd.f32 %v4822_v53, %v17848_v40  ;;  %v5740_v33 = vmul.f32 %v13996_v45, %v15156_v11  ;;  %v17857_v28 = vld [vmem:[#allocation199_spill] sm:$0xff]  ;;  %v17859_v40 = vld [vmem:[#allocation88_spill] sm:$0xff] }
 0x4e7   : > { %v5378_v34 = vsel %vm2760_vm6, %v5375_v62, %v17850_v61  ;;  %v5622_v25 = vsel %vm2837_vm8, %v5619_v56, %v17852_v46  ;;  %v6296_v6 = vadd.f32 %v15313_v32, %v6258_v24  ;;  %v17853_v20 = vrot.slane %v15118_v8, 1  ;;  %v17855_v62 = vld [vmem:[#allocation84_spill] sm:$0xff]  ;;  %v17861_v61 = vld [vmem:[#allocation83_spill] sm:$0xff] }
 0x4e8   : > { %v5771_v47 = vadd.f32 %v5739_v55, %v5703_v49  ;;  %v5148_v17 = vadd.f32 %v5066_v26, %v4904_v59  ;;  %v17854_v13 = vrot.slane %v15121_v29, 2  ;;  %v17856_v42 = vrot.slane %v17855_v62, 1  ;;  %v17864_v59 = vld [vmem:[#allocation21_spill] sm:$0xff] }
 0x4e9   : > { %v5934_v18 = vsel %vm2760_vm6, %v5931_v51, %v17853_v20  ;;  %v17858_v2 = vrot.slane %v17857_v28, 1  ;;  %v17860_v38 = vrot.slane %v17859_v40, 2  ;;  %v17862_v24 = vrot.slane %v17861_v61, 2  ;;  %10142 = vmatmul.mubr.msk.f32.gmra.mrb[50].mxu1 %vm8479_vm14, %v6296_v6  ;;  %v17863_v51 = vld [vmem:[#allocation85_spill] sm:$0xff] }
 0x4ea   : > { %v6178_v53 = vsel %vm2837_vm8, %v6175_v63, %v17854_v13  ;;  %v5185_v8 = vmul.f32 %v13953_v12, %v15159_v43  ;;  %v6015_v29 = vadd.f32 %v5932_v21, %v5771_v47  ;;  %v5216_v55 = vadd.f32 %v5184_v27, %v5148_v17  ;;  %v17865_v13 = vld [vmem:[#allocation196_spill] sm:$0xff] }
 0x4eb   : > { %v4825_v56 = vsel %vm2760_vm6, %v17858_v2, %v17856_v42  ;;  %v5069_v26 = vsel %vm2837_vm8, %v17862_v24, %v17860_v38  ;;  %v5264_v49 = vmul.f32 %v13945_v3, %v15156_v11  ;;  %v5379_v57 = vrot.slane %v17864_v59, 1 }
 0x4ec   : > { %v4905_v63 = vadd.f32 %v4825_v56, %v17863_v51  ;;  %v5507_v46 = vmul.f32 %v13948_v37, %v15159_v43  ;;  %v5508_v20 = vmul.f32 %v13948_v37, %v15156_v11  ;;  %v5741_v42 = vmul.f32 %v13996_v45, %v17865_v13  ;;  %v17866_v56 = vld [vmem:[#allocation195_spill] sm:$0xff] }
 0x4ed   : > { %v6259_v28 = vadd.f32 %v6176_v58, %v6015_v29  ;;  %v5460_v6 = vadd.f32 %v5378_v34, %v5216_v55  ;;  %v5380_v27 = vrot.slane %v5264_v49, 1  ;;  %v5819_v2 = vmul.f32 %v13988_v5, %v17865_v13  ;;  %v17867_v49 = vld [vmem:[#allocation77_spill] sm:$0xff] }
 0x4ee   : > { %v5149_v21 = vadd.f32 %v5069_v26, %v4905_v63  ;;  %v5623_v47 = vrot.slane %v5507_v46, 2  ;;  %v5624_v17 = vrot.slane %v5508_v20, 2  ;;  %v5820_v38 = vmul.f32 %v13988_v5, %v17866_v56 }
 0x4ef   : > { %v6297_v43 = vadd.f32 %v15313_v32, %v6259_v28  ;;  %v5704_v61 = vadd.f32 %v5622_v25, %v5460_v6  ;;  %v5381_v51 = vsel %vm2760_vm6, %v5379_v57, %v5380_v27  ;;  %v5935_v58 = vrot.slane %v5819_v2, 1  ;;  %v17870_v28 = vld [vmem:[#allocation197_spill] sm:$0xff] }
 0x4f0   : > { %v5217_v24 = vadd.f32 %v5185_v8, %v5149_v21  ;;  %v5625_v59 = vsel %vm2837_vm8, %v5623_v47, %v5624_v17  ;;  %v5936_v34 = vrot.slane %v5820_v38, 1  ;;  %v6063_v26 = vmul.f32 %v13991_v1, %v17865_v13  ;;  %v17871_v21 = vld [vmem:[#allocation94_spill] sm:$0xff] }
 0x4f1   : > { %10144 = vmatprep.mubr.msk.f32.mxu1 %vm8479_vm14, %v6297_v43  ;;  %v5772_v29 = vadd.f32 %v5740_v33, %v5704_v61  ;;  %v6064_v63 = vmul.f32 %v13991_v1, %v17866_v56  ;;  %v17868_v46 = vrot.slane %v17867_v49, 1  ;;  %v17869_v25 = vrot.slane %v17855_v62, 1 }
 0x4f2   : > { %v5461_v55 = vadd.f32 %v5381_v51, %v5217_v24  ;;  %v5937_v57 = vsel %vm2760_vm6, %v5935_v58, %v5936_v34  ;;  %v6179_v20 = vrot.slane %v6063_v26, 2  ;;  %v17872_v47 = vrot.slane %v17871_v21, 2  ;;  %v17874_v51 = vld [vmem:[#allocation123_spill] sm:$0xff]  ;;  %v17882_v21 = vld [vmem:[#allocation28_spill] sm:$0xff] }
 0x4f3   : > { %v4827_v8 = vsel %vm2760_vm6, %v17869_v25, %v17868_v46  ;;  %v17873_v2 = vrot.slane %v17859_v40, 2  ;;  %v6016_v38 = vadd.f32 %v5934_v18, %v5772_v29  ;;  %v6180_v61 = vrot.slane %v6064_v63, 2  ;;  %v17876_v26 = vld [vmem:[#allocation119_spill] sm:$0xff]  ;;  %v17880_v63 = vld [vmem:[#allocation92_spill] sm:$0xff] }
 0x4f4   : > { %v4906_v6 = vadd.f32 %v4827_v8, %v17870_v28  ;;  %v5705_v43 = vadd.f32 %v5625_v59, %v5461_v55  ;;  %v5186_v24 = vmul.f32 %v13953_v12, %v15156_v11  ;;  %v17875_v49 = vrot.slane %v17874_v51, 1  ;;  %v17878_v59 = vld [vmem:[#allocation75_spill] sm:$0xff] }
 0x4f5   : > { %v5071_v33 = vsel %vm2837_vm8, %v17873_v2, %v17872_v47  ;;  %v17877_v46 = vrot.slane %v17876_v26, 2  ;;  %v5742_v40 = vmul.f32 %v13996_v45, %v17866_v56  ;;  %v6260_v8 = vadd.f32 %v6178_v53, %v6016_v38  ;;  %v17884_v2 = vld [vmem:[#allocation118_spill] sm:$0xff] }
 0x4f6   : > { %v5150_v62 = vadd.f32 %v5071_v33, %v4906_v6  ;;  %v5383_v58 = vsel %vm2760_vm6, %v5380_v27, %v17875_v49  ;;  %v5773_v28 = vadd.f32 %v5741_v42, %v5705_v43  ;;  %v6181_v18 = vsel %vm2837_vm8, %v6179_v20, %v6180_v61  ;;  %v17888_v43 = vld [vmem:[#allocation40_spill] sm:$0xff]  ;;  %v17889_v49 = vld [vmem:[#allocation203_spill] sm:$0xff] }
 0x4f7   : > { %v5627_v25 = vsel %vm2837_vm8, %v5624_v17, %v17877_v46  ;;  %v17879_v29 = vrot.slane %v17878_v59, 1  ;;  %v17881_v6 = vrot.slane %v17880_v63, 2  ;;  %v17883_v47 = vrot.slane %v17882_v21, 1 }
 0x4f8   : > { %v5218_v55 = vadd.f32 %v5186_v24, %v5150_v62  ;;  %v17885_v17 = vrot.slane %v17884_v2, 1  ;;  %v17886_v53 = vrot.slane %v15186_v23, 2  ;;  %v17887_v42 = vrot.slane %v15182_v7, 2 }
 0x4f9   : > { %v5939_v11 = vsel %vm2760_vm6, %v5936_v34, %v17879_v29  ;;  %v6183_v27 = vsel %vm2837_vm8, %v6180_v61, %v17881_v6  ;;  %v6298_v38 = vadd.f32 %v15313_v32, %v6260_v8  ;;  %v6017_v34 = vadd.f32 %v5937_v57, %v5773_v28 }
 0x4fa   : > { %v4830_v33 = vsel %vm2760_vm6, %v17885_v17, %v17883_v47  ;;  %v5074_v20 = vsel %vm2837_vm8, %v17887_v42, %v17886_v53  ;;  %v5187_v61 = vmul.f32 %v13953_v12, %v17865_v13  ;;  %v5462_v62 = vadd.f32 %v5383_v58, %v5218_v55 }
 0x4fb   : > { %v4907_v24 = vadd.f32 %v4830_v33, %v17888_v43  ;;  %v5267_v51 = vmul.f32 %v13945_v3, %v17866_v56  ;;  %v5384_v26 = vrot.slane %v17889_v49, 1  ;;  %v5510_v46 = vmul.f32 %v13948_v37, %v17865_v13  ;;  %10145 = vmatmul.mubr.msk.f32.gmra.mrb[52].mxu1 %vm8479_vm14, %v6298_v38  ;;  %v17890_v43 = vld [vmem:[#allocation117_spill] sm:$0xff] }
 0x4fc   : > { %v6261_v7 = vadd.f32 %v6181_v18, %v6017_v34  ;;  %v5511_v57 = vmul.f32 %v13948_v37, %v17866_v56  ;;  %v5743_v8 = vmul.f32 %v13996_v45, %v15356_v54  ;;  %v5706_v28 = vadd.f32 %v5627_v25, %v5462_v62  ;;  %v17893_v62 = vld [vmem:[#allocation116_spill] sm:$0xff] }
 0x4fd   : > { %v5151_v59 = vadd.f32 %v5074_v20, %v4907_v24  ;;  %v5385_v58 = vrot.slane %v5267_v51, 1  ;;  %v5628_v29 = vrot.slane %v5510_v46, 2  ;;  %v5822_v55 = vmul.f32 %v13988_v5, %v15356_v54 }
 0x4fe   : > { %v6299_v63 = vadd.f32 %v15313_v32, %v6261_v7  ;;  %v5629_v13 = vrot.slane %v5511_v57, 2  ;;  %v5823_v18 = vmul.f32 %v13988_v5, %v15353_v31  ;;  %v5774_v47 = vadd.f32 %v5742_v40, %v5706_v28  ;;  %v17896_v57 = vld [vmem:[#allocation134_spill] sm:$0xff] }
 0x4ff   : > { %v5219_v6 = vadd.f32 %v5187_v61, %v5151_v59  ;;  %v5386_v2 = vsel %vm2760_vm6, %v5384_v26, %v5385_v58  ;;  %v5940_v17 = vrot.slane %v5822_v55, 1  ;;  %v6066_v33 = vmul.f32 %v13991_v1, %v15356_v54  ;;  %v17897_v55 = vld [vmem:[#allocation183_spill] sm:$0xff] }
 0x500   : > { %10147 = vmatprep.mubr.msk.f32.mxu1 %vm8479_vm14, %v6299_v63  ;;  %v5630_v53 = vsel %vm2837_vm8, %v5628_v29, %v5629_v13  ;;  %v5941_v42 = vrot.slane %v5823_v18, 1  ;;  %v6067_v20 = vmul.f32 %v13991_v1, %v15353_v31  ;;  %v6018_v38 = vadd.f32 %v5939_v11, %v5774_v47 }
 0x501   : > { %v5463_v25 = vadd.f32 %v5386_v2, %v5219_v6  ;;  %v6184_v34 = vrot.slane %v6066_v33, 2  ;;  %v17891_v24 = vrot.slane %v17890_v43, 1  ;;  %v17892_v40 = vrot.slane %v17882_v21, 1  ;;  %v17899_v6 = vld [vmem:[#allocation74_spill] sm:$0xff] }
 0x502   : > { %v17894_v51 = vrot.slane %v17893_v62, 2  ;;  %v17895_v49 = vrot.slane %v15186_v23, 2  ;;  %v5942_v7 = vsel %vm2760_vm6, %v5940_v17, %v5941_v42  ;;  %v6185_v59 = vrot.slane %v6067_v20, 2  ;;  %v17903_v20 = vld [vmem:[#allocation113_spill] sm:$0xff]  ;;  %v17908_v62 = vld [vmem:[#allocation202_spill] sm:$0xff] }
 0x503   : > { %v4832_v61 = vsel %vm2760_vm6, %v17892_v40, %v17891_v24  ;;  %v5707_v46 = vadd.f32 %v5630_v53, %v5463_v25  ;;  %v6262_v11 = vadd.f32 %v6183_v27, %v6018_v38  ;;  %v5188_v29 = vmul.f32 %v13953_v12, %v17866_v56  ;;  %v17907_v40 = vld [vmem:[#allocation103_spill] sm:$0xff] }
 0x504   : > { %v5076_v26 = vsel %vm2837_vm8, %v17895_v49, %v17894_v51  ;;  %v4908_v28 = vadd.f32 %v4832_v61, %v17896_v57  ;;  %v17898_v21 = vrot.slane %v17897_v55, 1  ;;  %v17900_v18 = vrot.slane %v17899_v6, 2  ;;  %v17910_v49 = vld [vmem:[#allocation100_spill] sm:$0xff] }
 0x505   : > { %v5775_v47 = vadd.f32 %v5743_v8, %v5707_v46  ;;  %v6186_v2 = vsel %vm2837_vm8, %v6184_v34, %v6185_v59  ;;  %v5744_v17 = vmul.f32 %v13996_v45, %v15353_v31  ;;  %v6300_v27 = vadd.f32 %v15313_v32, %v6262_v11 }
 0x506   : > { %v5388_v63 = vsel %vm2760_vm6, %v5385_v58, %v17898_v21  ;;  %v5632_v23 = vsel %vm2837_vm8, %v5629_v13, %v17900_v18  ;;  %v5152_v33 = vadd.f32 %v5076_v26, %v4908_v28  ;;  %v17901_v25 = vrot.slane %v15318_v30, 1  ;;  %v17905_v13 = vld [vmem:[#allocation101_spill] sm:$0xff]  ;;  %v17912_v21 = vld [vmem:[#allocation111_spill] sm:$0xff] }
 0x507   : > { %v17902_v53 = vrot.slane %v15321_v44, 2  ;;  %v17904_v38 = vrot.slane %v17903_v20, 1  ;;  %v17906_v8 = vrot.slane %v17905_v13, 1  ;;  %v6019_v43 = vadd.f32 %v5942_v7, %v5775_v47  ;;  %10148 = vmatmul.mubr.msk.f32.gmra.mrb[54].mxu1 %vm8479_vm14, %v6300_v27 }
 0x508   : > { %v5944_v56 = vsel %vm2760_vm6, %v5941_v42, %v17901_v25  ;;  %v5220_v24 = vadd.f32 %v5188_v29, %v5152_v33  ;;  %v17909_v51 = vrot.slane %v17908_v62, 2  ;;  %v17911_v30 = vrot.slane %v17910_v49, 2  ;;  %v17917_v49 = vld [vmem:[#allocation184_spill] sm:$0xff] }
 0x509   : > { %v6188_v58 = vsel %vm2837_vm8, %v6185_v59, %v17902_v53  ;;  %v4835_v34 = vsel %vm2760_vm6, %v17906_v8, %v17904_v38  ;;  %v5189_v44 = vmul.f32 %v13953_v12, %v15356_v54  ;;  %v5270_v26 = vmul.f32 %v13945_v3, %v15353_v31 }
 0x50a   : > { %v4909_v61 = vadd.f32 %v4835_v34, %v17907_v40  ;;  %v5079_v42 = vsel %vm2837_vm8, %v17911_v30, %v17909_v51  ;;  %v5389_v46 = vrot.slane %v15391_v16, 1  ;;  %v5513_v7 = vmul.f32 %v13948_v37, %v15356_v54 }
 0x50b   : > { %v6263_v59 = vadd.f32 %v6186_v2, %v6019_v43  ;;  %v5464_v57 = vadd.f32 %v5388_v63, %v5220_v24  ;;  %v5514_v11 = vmul.f32 %v13948_v37, %v15353_v31  ;;  %v5390_v29 = vrot.slane %v5270_v26, 1  ;;  %v17913_v63 = vld [vmem:[#allocation209_spill] sm:$0xff] }
 0x50c   : > { %v5153_v28 = vadd.f32 %v5079_v42, %v4909_v61  ;;  %v5633_v55 = vrot.slane %v5513_v7, 2  ;;  %v5745_v6 = vmul.f32 %v13996_v45, %v17912_v21  ;;  %v5825_v18 = vmul.f32 %v13988_v5, %v17912_v21  ;;  %v17914_v24 = vld [vmem:[#allocation185_spill] sm:$0xff] }
 0x50d   : > { %v6301_v47 = vadd.f32 %v15313_v32, %v6263_v59  ;;  %v5708_v16 = vadd.f32 %v5632_v23, %v5464_v57  ;;  %v5634_v27 = vrot.slane %v5514_v11, 2  ;;  %v5391_v54 = vsel %vm2760_vm6, %v5389_v46, %v5390_v29  ;;  %v17920_v7 = vld [vmem:[#allocation205_spill] sm:$0xff] }
 0x50e   : > { %v5221_v33 = vadd.f32 %v5189_v44, %v5153_v28  ;;  %v5826_v2 = vmul.f32 %v13988_v5, %v17913_v63  ;;  %v5945_v25 = vrot.slane %v5825_v18, 1  ;;  %v6069_v53 = vmul.f32 %v13991_v1, %v17912_v21 }
 0x50f   : > { %10150 = vmatprep.mubr.msk.f32.mxu1 %vm8479_vm14, %v6301_v47  ;;  %v5776_v38 = vadd.f32 %v5744_v17, %v5708_v16  ;;  %v5635_v8 = vsel %vm2837_vm8, %v5633_v55, %v5634_v27  ;;  %v6070_v23 = vmul.f32 %v13991_v1, %v17913_v63  ;;  %v17915_v40 = vrot.slane %v17914_v24, 1 }
 0x510   : > { %v5465_v13 = vadd.f32 %v5391_v54, %v5221_v33  ;;  %v5946_v34 = vrot.slane %v5826_v2, 1  ;;  %v6189_v43 = vrot.slane %v6069_v53, 2  ;;  %v17916_v61 = vrot.slane %v17903_v20, 1  ;;  %v17923_v54 = vld [vmem:[#allocation102_spill] sm:$0xff]  ;;  %v17927_v53 = vld [vmem:[#allocation36_spill] sm:$0xff] }
 0x511   : > { %v17918_v30 = vrot.slane %v17917_v49, 2  ;;  %v17919_v42 = vrot.slane %v17908_v62, 2  ;;  %v6020_v44 = vadd.f32 %v5944_v56, %v5776_v38  ;;  %v6190_v46 = vrot.slane %v6070_v23, 2  ;;  %v17929_v38 = vld [vmem:[#allocation38_spill] sm:$0xff]  ;;  %v17931_v23 = vld [vmem:[#allocation29_spill] sm:$0xff]  ;;  %v17934_v49 = vld [vmem:[#allocation19_spill] sm:$0xff] }
 0x512   : > { %v4837_v51 = vsel %vm2760_vm6, %v17916_v61, %v17915_v40  ;;  %v5709_v26 = vadd.f32 %v5635_v8, %v5465_v13  ;;  %v5947_v57 = vsel %vm2760_vm6, %v5945_v25, %v5946_v34  ;;  %v5190_v28 = vmul.f32 %v13953_v12, %v15353_v31  ;;  %v17925_v25 = vld [vmem:[#allocation105_spill] sm:$0xff] }
 0x513   : > { %v5081_v17 = vsel %vm2837_vm8, %v17919_v42, %v17918_v30  ;;  %v4910_v59 = vadd.f32 %v4837_v51, %v17920_v7  ;;  %v17921_v20 = vrot.slane %v15302_v35, 1  ;;  %v17922_v55 = vrot.slane %v15305_v4, 2 }
 0x514   : > { %v6264_v18 = vadd.f32 %v6188_v58, %v6020_v44  ;;  %v5777_v47 = vadd.f32 %v5745_v6, %v5709_v26  ;;  %v6191_v56 = vsel %vm2837_vm8, %v6189_v43, %v6190_v46  ;;  %v5746_v33 = vmul.f32 %v13996_v45, %v17913_v63 }
 0x515   : > { %v5393_v11 = vsel %vm2760_vm6, %v5390_v29, %v17921_v20  ;;  %v5637_v62 = vsel %vm2837_vm8, %v5634_v27, %v17922_v55  ;;  %v5154_v16 = vadd.f32 %v5081_v17, %v4910_v59  ;;  %v17924_v2 = vrot.slane %v17923_v54, 1 }
 0x516   : > { %v17926_v35 = vrot.slane %v17925_v25, 2  ;;  %v17928_v4 = vrot.slane %v17927_v53, 1  ;;  %v17930_v27 = vrot.slane %v17929_v38, 1  ;;  %v6302_v6 = vadd.f32 %v15313_v32, %v6264_v18  ;;  %v17935_v38 = vld [vmem:[#allocation26_spill] sm:$0xff] }
 0x517   : > { %v5949_v31 = vsel %vm2760_vm6, %v5946_v34, %v17924_v2  ;;  %v6021_v13 = vadd.f32 %v5947_v57, %v5777_v47  ;;  %v5222_v8 = vadd.f32 %v5190_v28, %v5154_v16  ;;  %v17932_v24 = vrot.slane %v15385_v41, 2 }
 0x518   : > { %v6193_v29 = vsel %vm2837_vm8, %v6190_v46, %v17926_v35  ;;  %v4840_v58 = vsel %vm2760_vm6, %v17930_v27, %v17928_v4  ;;  %v17933_v34 = vrot.slane %v15381_v19, 2  ;;  %v5191_v61 = vmul.f32 %v13953_v12, %v17912_v21  ;;  %10151 = vmatmul.mubr.msk.f32.gmra.mrb[56].mxu1 %vm8479_vm14, %v6302_v6  ;;  %v15887_v46 = vpop.f32.mrb[66].mxu1 }
 0x519   : > { %v4911_v43 = vadd.f32 %v4840_v58, %v17931_v23  ;;  %v5273_v51 = vmul.f32 %v13945_v3, %v17913_v63  ;;  %v5394_v30 = vrot.slane %v17934_v49, 1  ;;  %v6265_v42 = vadd.f32 %v6191_v56, %v6021_v13  ;;  %v15895_v28 = vpop.f32.mrb[67].mxu1  ;;  %v17938_v13 = vld [vmem:[#allocation37_spill] sm:$0xff] }
 0x51a   : > { %v5084_v40 = vsel %vm2837_vm8, %v17933_v34, %v17932_v24  ;;  %v5466_v17 = vadd.f32 %v5393_v11, %v5222_v8  ;;  %v5516_v26 = vmul.f32 %v13948_v37, %v17912_v21  ;;  %v5517_v7 = vmul.f32 %v13948_v37, %v17913_v63 }
 0x51b   : > { %v5155_v44 = vadd.f32 %v5084_v40, %v4911_v43  ;;  %v5395_v19 = vrot.slane %v5273_v51, 1  ;;  %v5747_v59 = vmul.f32 %v13996_v45, %v15554_v60  ;;  %v5828_v57 = vmul.f32 %v13988_v5, %v15554_v60  ;;  %v17941_v51 = vld [vmem:[#allocation109_spill] sm:$0xff] }
 0x51c   : > { %v6303_v20 = vadd.f32 %v15313_v32, %v6265_v42  ;;  %v5710_v11 = vadd.f32 %v5637_v62, %v5466_v17  ;;  %v5638_v18 = vrot.slane %v5516_v26, 2  ;;  %v5639_v47 = vrot.slane %v5517_v7, 2  ;;  %v17944_v7 = vld [vmem:[#allocation207_spill] sm:$0xff] }
 0x51d   : > { %v5223_v55 = vadd.f32 %v5191_v61, %v5155_v44  ;;  %v5396_v21 = vsel %vm2760_vm6, %v5394_v30, %v5395_v19  ;;  %v5829_v56 = vmul.f32 %v13988_v5, %v15551_v36  ;;  %v5950_v16 = vrot.slane %v5828_v57, 1 }
 0x51e   : > { %10153 = vmatprep.mubr.msk.f32.mxu1 %vm8479_vm14, %v6303_v20  ;;  %v5778_v54 = vadd.f32 %v5746_v33, %v5710_v11  ;;  %v6072_v25 = vmul.f32 %v13991_v1, %v15554_v60  ;;  %v6073_v35 = vmul.f32 %v13991_v1, %v15551_v36  ;;  %v5640_v62 = vsel %vm2837_vm8, %v5638_v18, %v5639_v47 }
 0x51f   : > { %v5467_v2 = vadd.f32 %v5396_v21, %v5223_v55  ;;  %v5951_v4 = vrot.slane %v5829_v56, 1  ;;  %v17936_v27 = vrot.slane %v17935_v38, 1  ;;  %v17937_v58 = vrot.slane %v17927_v53, 1  ;;  %v17942_v53 = vld [vmem:[#allocation91_spill] sm:$0xff]  ;;  %v17948_v21 = vld [vmem:[#allocation194_spill] sm:$0xff]  ;;  %v17956_v38 = vld [vmem:[#allocation193_spill] sm:$0xff] }
 0x520   : > { %v17939_v8 = vrot.slane %v17938_v13, 2  ;;  %v17940_v33 = vmov %v17932_v24  ;;  %v6022_v43 = vadd.f32 %v5949_v31, %v5778_v54  ;;  %v6194_v34 = vrot.slane %v6072_v25, 2 }
 0x521   : > { %v4842_v6 = vsel %vm2760_vm6, %v17937_v58, %v17936_v27  ;;  %v5711_v24 = vadd.f32 %v5640_v62, %v5467_v2  ;;  %v6195_v40 = vrot.slane %v6073_v35, 2  ;;  %v5952_v61 = vsel %vm2760_vm6, %v5950_v16, %v5951_v4  ;;  %v17950_v16 = vld [vmem:[#allocation114_spill] sm:$0xff]  ;;  %v17952_v2 = vld [vmem:[#allocation204_spill] sm:$0xff]  ;;  %v17954_v35 = vld [vmem:[#allocation213_spill] sm:$0xff] }
 0x522   : > { %v5086_v23 = vsel %vm2837_vm8, %v17940_v33, %v17939_v8  ;;  %v4912_v49 = vadd.f32 %v4842_v6, %v17941_v51  ;;  %v5192_v30 = vmul.f32 %v13953_v12, %v17913_v63  ;;  %v17943_v42 = vrot.slane %v17942_v53, 1 }
 0x523   : > { %v6266_v44 = vadd.f32 %v6193_v29, %v6022_v43  ;;  %v5779_v26 = vadd.f32 %v5747_v59, %v5711_v24  ;;  %v6196_v41 = vsel %vm2837_vm8, %v6194_v34, %v6195_v40  ;;  %v17945_v31 = vrot.slane %v17944_v7, 2  ;;  %v17957_v34 = vld [vmem:[#allocation35_spill] sm:$0xff]  ;;  %v17965_v7 = vld [vmem:[#allocation212_spill] sm:$0xff] }
 0x524   : > { %v5398_v17 = vsel %vm2760_vm6, %v5395_v19, %v17943_v42  ;;  %v5156_v20 = vadd.f32 %v5086_v23, %v4912_v49  ;;  %v5748_v11 = vmul.f32 %v13996_v45, %v15551_v36  ;;  %v17946_v55 = vrot.slane %v15508_v0, 1 }
 0x525   : > { %v5642_v57 = vsel %vm2837_vm8, %v5639_v47, %v17945_v31  ;;  %v17947_v18 = vrot.slane %v15517_v10, 2  ;;  %v6304_v29 = vadd.f32 %v15313_v32, %v6266_v44  ;;  %v6023_v59 = vadd.f32 %v5952_v61, %v5779_v26  ;;  %v17959_v61 = vld [vmem:[#allocation54_spill] sm:$0xff] }
 0x526   : > { %v5954_v63 = vsel %vm2760_vm6, %v5951_v4, %v17946_v55  ;;  %v17949_v56 = vrot.slane %v17948_v21, 1  ;;  %v17951_v54 = vrot.slane %v17950_v16, 1  ;;  %v17953_v25 = vrot.slane %v17952_v2, 2  ;;  %v17963_v44 = vld [vmem:[#allocation30_spill] sm:$0xff] }
 0x527   : > { %v6198_v19 = vsel %vm2837_vm8, %v6195_v40, %v17947_v18  ;;  %v17955_v62 = vrot.slane %v17954_v35, 2  ;;  %v5224_v4 = vadd.f32 %v5192_v30, %v5156_v20  ;;  %v5193_v27 = vmul.f32 %v13953_v12, %v15554_v60  ;;  %10154 = vmatmul.mubr.msk.f32.gmra.mrb[58].mxu1 %vm8479_vm14, %v6304_v29  ;;  %v17968_v29 = vld [vmem:[#allocation192_spill] sm:$0xff] }
 0x528   : > { %v4845_v47 = vsel %vm2760_vm6, %v17951_v54, %v17949_v56  ;;  %v5276_v58 = vmul.f32 %v13945_v3, %v15551_v36  ;;  %v6267_v6 = vadd.f32 %v6196_v41, %v6023_v59  ;;  %v5399_v13 = vrot.slane %v15587_v15, 1  ;;  %v17961_v15 = vld [vmem:[#allocation25_spill] sm:$0xff] }
 0x529   : > { %v5089_v0 = vsel %vm2837_vm8, %v17955_v62, %v17953_v25  ;;  %v4913_v10 = vadd.f32 %v4845_v47, %v17956_v38  ;;  %v5519_v8 = vmul.f32 %v13948_v37, %v15554_v60  ;;  %v5520_v33 = vmul.f32 %v13948_v37, %v15551_v36 }
 0x52a   : > { %v5468_v23 = vadd.f32 %v5398_v17, %v5224_v4  ;;  %v5400_v24 = vrot.slane %v5276_v58, 1  ;;  %v17958_v40 = vrot.slane %v17957_v34, 1  ;;  %v17960_v51 = vrot.slane %v17959_v61, 1  ;;  %v17984_v61 = vld [vmem:[#allocation140_spill] sm:$0xff] }
 0x52b   : > { %v5157_v43 = vadd.f32 %v5089_v0, %v4913_v10  ;;  %v6305_v49 = vadd.f32 %v15313_v32, %v6267_v6  ;;  %v5643_v30 = vrot.slane %v5519_v8, 2  ;;  %v5644_v53 = vrot.slane %v5520_v33, 2  ;;  %v17974_v10 = vld [vmem:[#allocation127_spill] sm:$0xff] }
 0x52c   : > { %v5957_v3 = vsel %vm2760_vm6, %v17960_v51, %v17958_v40  ;;  %v17962_v42 = vrot.slane %v17961_v15, 2  ;;  %v17964_v60 = vrot.slane %v17963_v44, 2  ;;  %v5712_v37 = vadd.f32 %v5642_v57, %v5468_v23  ;;  %v17977_v6 = vld [vmem:[#allocation131_spill] sm:$0xff] }
 0x52d   : > { %v5225_v17 = vadd.f32 %v5193_v27, %v5157_v43  ;;  %v5401_v41 = vsel %vm2760_vm6, %v5399_v13, %v5400_v24  ;;  %v17966_v31 = vrot.slane %v17965_v7, 1  ;;  %v17967_v20 = vmov %v17949_v56  ;;  %10156 = vmatprep.mubr.msk.f32.mxu1 %vm8479_vm14, %v6305_v49  ;;  %v17969_v56 = vld [vmem:[#allocation90_spill] sm:$0xff]  ;;  %v17987_v15 = vld [vmem:[#allocation139_spill] sm:$0xff]  ;;  %v16026_v7 = vpop.f32.mrb[68].mxu1 }
 0x52e   : > { %v6201_v26 = vsel %vm2837_vm8, %v17964_v60, %v17962_v42  ;;  %v5645_v18 = vsel %vm2837_vm8, %v5643_v30, %v5644_v53  ;;  %v17970_v16 = vrot.slane %v17969_v56, 2  ;;  %v17971_v54 = vmov %v17953_v25  ;;  %v17985_v30 = vld [vmem:[#allocation24_spill] sm:$0xff]  ;;  %v17993_v56 = vld [vmem:[#allocation121_spill] sm:$0xff] }
 0x52f   : > { %v4847_v55 = vsel %vm2760_vm6, %v17967_v20, %v17966_v31  ;;  %v5194_v47 = vmul.f32 %v13953_v12, %v15551_v36  ;;  %v5780_v25 = vadd.f32 %v5748_v11, %v5712_v37  ;;  %v5469_v35 = vadd.f32 %v5401_v41, %v5225_v17  ;;  %v17990_v60 = vld [vmem:[#allocation52_spill] sm:$0xff] }
 0x530   : > { %v4914_v59 = vadd.f32 %v4847_v55, %v17968_v29  ;;  %v5091_v57 = vsel %vm2837_vm8, %v17971_v54, %v17970_v16  ;;  %v17972_v21 = vrot.slane %v15498_v52, 1  ;;  %v17973_v0 = vrot.slane %v15505_v48, 2 }
 0x531   : > { %v17975_v27 = vrot.slane %v17974_v10, 1  ;;  %v17976_v2 = vmov %v17958_v40  ;;  %v17978_v13 = vrot.slane %v17977_v6, 2  ;;  %v17979_v12 = vmov %v17962_v42 }
 0x532   : > { %v5403_v62 = vsel %vm2760_vm6, %v5400_v24, %v17972_v21  ;;  %v5647_v4 = vsel %vm2837_vm8, %v5644_v53, %v17973_v0  ;;  %v5158_v38 = vadd.f32 %v5091_v57, %v4914_v59  ;;  %v17980_v52 = vrot.slane %v15575_v14, 1 }
 0x533   : > { %v5959_v58 = vsel %vm2760_vm6, %v17976_v2, %v17975_v27  ;;  %v6203_v11 = vsel %vm2837_vm8, %v17979_v12, %v17978_v13  ;;  %v17981_v8 = vrot.slane %v15571_v9, 1  ;;  %v6024_v33 = vadd.f32 %v5954_v63, %v5780_v25  ;;  %v17989_v63 = vld [vmem:[#allocation15_spill] sm:$0xff]  ;;  %v17998_v2 = vld [vmem:[#allocation22_spill] sm:$0xff] }
 0x534   : > { %v5713_v23 = vadd.f32 %v5645_v18, %v5469_v35  ;;  %v17982_v24 = vrot.slane %v15583_v39, 2  ;;  %v17983_v34 = vrot.slane %v15579_v22, 2  ;;  %v4672_v51 = vmul.f32 %v17984_v61, %v15551_v36  ;;  %v17991_v22 = vld [vmem:[#allocation13_spill] sm:$0xff]  ;;  %v17992_v36 = vld [vmem:[#allocation122_spill] sm:$0xff]  ;;  %v8875_v39 = vld [vmem:[%s16339_s23 + $0x18] sm:$0xff] }
 0x535   : > { %v4850_v48 = vsel %vm2760_vm6, %v17981_v8, %v17980_v52  ;;  %v5226_v49 = vadd.f32 %v5194_v47, %v5158_v38  ;;  %v17986_v53 = vrot.slane %v17985_v30, 2  ;;  %v17988_v9 = vrot.slane %v17987_v15, 2  ;;  %v17994_v35 = vld [vmem:[#allocation110_spill] sm:$0xff] }
 0x536   : > { %v4915_v43 = vadd.f32 %v4850_v48, %v15567_v50  ;;  %v5094_v40 = vsel %vm2837_vm8, %v17983_v34, %v17982_v24  ;;  %v5834_v44 = vmul.f32 %v13988_v5, %v17989_v63  ;;  %v6268_v50 = vadd.f32 %v6198_v19, %v6024_v33  ;;  %v8652_v19 = vpop.f32.mrb[69].mxu1  ;;  %v18002_v48 = vld [vmem:[#allocation135_spill] sm:$0xff] }
 0x537   : > { %v5650_v42 = vsel %vm2837_vm8, %v17988_v9, %v17986_v53  ;;  %v5781_v37 = vadd.f32 %v17990_v60, %v5713_v23  ;;  %v16024_v41 = vmul.f32 %v13988_v5, %v17991_v22  ;;  %v5095_v31 = vrot.slane %v17992_v36, 2  ;;  %v8873_v23 = vld [vmem:[%s16339_s23 + $0x8] sm:$0xff] }
 0x538   : > { %v5159_v17 = vadd.f32 %v5094_v40, %v4915_v43  ;;  %v5470_v20 = vadd.f32 %v5403_v62, %v5226_v49  ;;  %v6078_v55 = vmul.f32 %v13991_v1, %v17989_v63  ;;  %v16033_v18 = vmul.f32 %v13991_v1, %v17991_v22  ;;  %v8874_v43 = vld [vmem:[%s16339_s23 + $0x10] sm:$0xff] }
 0x539   : > { %v6306_v29 = vadd.f32 %v15313_v32, %v6268_v50  ;;  %v6025_v59 = vadd.f32 %v5957_v3, %v5781_v37  ;;  %v5751_v54 = vmul.f32 %v13996_v45, %v17989_v63  ;;  %v5960_v47 = vrot.slane %v5834_v44, 1  ;;  %v17997_v32 = vld [vmem:[#allocation20_spill] sm:$0xff] }
 0x53a   : > { %v5227_v16 = vadd.f32 %v17993_v56, %v5159_v17  ;;  %v5714_v57 = vadd.f32 %v5647_v4, %v5470_v20  ;;  %v5961_v25 = vrot.slane %v16024_v41, 1  ;;  %v17995_v21 = vrot.slane %v17994_v35, 1  ;;  %v8872_v4 = vld [vmem:[%s16339_s23] sm:$0xff] }
 0x53b   : > { %v17996_v62 = vmov %v17980_v52  ;;  %10157 = vmatmul.mubr.msk.f32.gmra.mrb[60].mxu1 %vm8479_vm14, %v6306_v29  ;;  %v6269_v38 = vadd.f32 %v6201_v26, %v6025_v59  ;;  %v6204_v10 = vrot.slane %v6078_v55, 2  ;;  %v6205_v13 = vrot.slane %v16033_v18, 2  ;;  %v18000_v52 = vld [vmem:[#allocation18_spill] sm:$0xff]  ;;  %v18006_v44 = vld [vmem:[#allocation16_spill] sm:$0xff]  ;;  %v8877_v18 = vld [vmem:[%s16339_s23 + $0x28] sm:$0xff] }
 0x53c   : > { %v4852_v0 = vsel %vm2760_vm6, %v17996_v62, %v17995_v21  ;;  %v5471_v3 = vadd.f32 %v17997_v32, %v5227_v16  ;;  %v5782_v6 = vadd.f32 %v17998_v2, %v5714_v57  ;;  %v17999_v12 = vmov %v17982_v24  ;;  %v10366_v24 = vld [vmem:[%s16334_s18] ss:$0 sm:$0xff] }
 0x53d   : > { %v4916_v27 = vadd.f32 %v4852_v0, %v4672_v51  ;;  %v5096_v14 = vsel %vm2837_vm8, %v17999_v12, %v5095_v31  ;;  %v18001_v8 = vrot.slane %v18000_v52, 1  ;;  %v18003_v26 = vrot.slane %v18002_v48, 1  ;;  %v18004_v51 = vld [vmem:[#allocation125_spill] sm:$0xff] }
 0x53e   : > { %v6307_v34 = vadd.f32 %v10366_v24, %v6269_v38  ;;  %v5715_v40 = vadd.f32 %v5650_v42, %v5471_v3  ;;  %v18005_v49 = vrot.slane %v18004_v51, 2  ;;  %v6026_v9 = vadd.f32 %v5959_v58, %v5782_v6  ;;  %v18007_v42 = vld [vmem:[#allocation120_spill] sm:$0xff]  ;;  %v18008_v58 = vld [vmem:[#allocation49_spill] sm:$0xff]  ;;  %v18011_v38 = vld [vmem:[#allocation71_spill] sm:$0xff] }
 0x53f   : > { %v5408_v33 = vsel %vm2760_vm6, %v18003_v26, %v18001_v8  ;;  %v5160_v61 = vadd.f32 %v5096_v14, %v4916_v27  ;;  %v5962_v63 = vsel %vm2760_vm6, %v5960_v47, %v5961_v25  ;;  %v5836_v50 = vmul.f32 %v13988_v5, %v18006_v44  ;;  %v16090_v5 = vld [vmem:[%s16338_s22] ss:$0 sm:$0xff] }
 0x540   : > { %v5652_v15 = vsel %vm2837_vm8, %v17986_v53, %v18005_v49  ;;  %v6080_v60 = vmul.f32 %v13991_v1, %v18006_v44  ;;  %10159 = vmatprep.mubr.msk.f32.mxu1 %vm8479_vm14, %v6307_v34  ;;  %v5783_v37 = vadd.f32 %v5751_v54, %v5715_v40  ;;  %v10270_v41 = vpack.c.bf16 %v8873_v23, %v8872_v4  ;;  %v8876_v1 = vld [vmem:[%s16339_s23 + $0x20] sm:$0xff]  ;;  %v18014_v49 = vld [vmem:[#allocation189_spill] sm:$0xff] }
 0x541   : > { %v5228_v17 = vadd.f32 %v18007_v42, %v5160_v61  ;;  %v10274_v36 = vpack.c.bf16 %v8875_v39, %v8874_v43  ;;  %v6270_v31 = vadd.f32 %v6203_v11, %v6026_v9  ;;  %v6206_v30 = vsel %vm2837_vm8, %v6204_v10, %v6205_v13  ;;  %v18012_v26 = vld [vmem:[#allocation72_spill] sm:$0xff]  ;;  %v18013_v43 = vld [vmem:[#allocation171_spill] sm:$0xff]  ;;  %v18015_v9 = vld [vmem:[#allocation198_spill] sm:$0xff] }
 0x542   : > { %v5963_v20 = vrot.slane %v5836_v50, 1  ;;  %v8648_v55 = vadd.f32 %v15887_v46, %v18008_v58  ;;  %v6027_v11 = vadd.f32 %v5962_v63, %v5783_v37  ;;  %v5752_v59 = vmul.f32 %v13996_v45, %v17991_v22  ;;  %10271 = vmatprep.subr.bf16.mxu0 %v10270_v41  ;;  %v18009_v46 = vld [vmem:[#allocation64_spill] sm:$0xff]  ;;  %v8878_v45 = vld [vmem:[%s16339_s23 + $0x30] sm:$0xff]  ;;  %v18010_v22 = vld [vmem:[#allocation211_spill] sm:$0xff] }
 0x543   : > { %v5472_v29 = vadd.f32 %v5408_v33, %v5228_v17  ;;  %v8643_v56 = vadd.f32 %v15895_v28, %v18009_v46  ;;  %v6308_v16 = vadd.f32 %v10366_v24, %v6270_v31  ;;  %v6207_v54 = vrot.slane %v6080_v60, 2  ;;  %10273 = vmatpush3.bf16.msra.mxu0 %v10270_v41  ;;  %v8879_v28 = vld [vmem:[%s16339_s23 + $0x38] sm:$0xff]  ;;  %v18016_v17 = vld [vmem:[#allocation188_spill] sm:$0xff]  ;;  %v18019_v46 = vld [vmem:[#allocation201_spill] sm:$0xff] }
 0x544   : > { %v6271_v57 = vadd.f32 %v6206_v30, %v6027_v11  ;;  %10275 = vmatprep.subr.bf16.mxu0 %v10274_v36  ;;  %v10278_v21 = vpack.c.bf16 %v8877_v18, %v8876_v1  ;;  %v5964_v62 = vsel %vm2760_vm6, %v5961_v25, %v5963_v20  ;;  %v8658_v0 = vadd.f32 %v16026_v7, %v18010_v22  ;;  %v18017_v31 = vld [vmem:[#allocation187_spill] sm:$0xff] }
 0x545   : > { %v5716_v47 = vadd.f32 %v5652_v15, %v5472_v29  ;;  %v8808_v35 = vadd.f32 %v16090_v5, %v8643_v56  ;;  %10160 = vmatmul.mubr.msk.f32.gmra.mrb[62].mxu1 %vm8479_vm14, %v6308_v16  ;;  %v8653_v32 = vadd.f32 %v8652_v19, %v18011_v38  ;;  %v6208_v4 = vsel %vm2837_vm8, %v6205_v13, %v6207_v54  ;;  %v18018_v11 = vld [vmem:[#allocation99_spill] sm:$0xff] }
 0x546   : > { %v6309_v3 = vadd.f32 %v10366_v24, %v6271_v57  ;;  %v10282_v2 = vpack.c.bf16 %v8879_v28, %v8878_v45  ;;  %v8809_v19 = vadd.f32 %v16090_v5, %v8648_v55  ;;  %v8811_v52 = vadd.f32 %v16090_v5, %v8658_v0  ;;  %v18021_v28 = vld [vmem:[#allocation115_spill] sm:$0xff] }
 0x547   : > { %v5784_v10 = vadd.f32 %v5752_v59, %v5716_v47  ;;  %v8840_v27 = vmax.f32 %v8808_v35, 0.0  ;;  %10277 = vmatpush3.bf16.msra.mxu0 %v10274_v36  ;;  %v8810_v12 = vadd.f32 %v16090_v5, %v8653_v32  ;;  %v10125_v48 = vpop.f32.mrb[70].mxu1 }
 0x548   : > { %10162 = vmatprep.mubr.msk.f32.mxu1 %vm8479_vm14, %v6309_v3  ;;  %10279 = vmatprep.subr.bf16.mxu0 %v10278_v21  ;;  %v8841_v14 = vmax.f32 %v8809_v19, 0.0  ;;  %v8843_v8 = vmax.f32 %v8811_v52, 0.0  ;;  %v8668_v33 = vadd.f32 %v10125_v48, %v18012_v26  ;;  %v8662_v23 = vpop.f32.mrb[71].mxu1 }
 0x549   : > { %v6028_v25 = vadd.f32 %v5964_v62, %v5784_v10  ;;  %10181 = vmatprep.mubr.msk.f32.mxu0 %vm8479_vm14, %v8840_v27  ;;  %v8842_v13 = vmax.f32 %v8810_v12, 0.0  ;;  %v8663_v39 = vadd.f32 %v8662_v23, %v18013_v43 }
 0x54b   : > { %v6272_v6 = vadd.f32 %v6208_v4, %v6028_v25  ;;  %10281 = vmatpush3.bf16.msra.mxu0 %v10278_v21  ;;  %v8812_v34 = vadd.f32 %v16090_v5, %v8663_v39  ;;  %v18020_v21 = vld [vmem:[#allocation200_spill] sm:$0xff] }
 0x54c   : > { %10283 = vmatprep.subr.bf16.mxu0 %v10282_v2 }
 0x54d   : > { %v6310_v7 = vadd.f32 %v10366_v24, %v6272_v6  ;;  %v8813_v24 = vadd.f32 %v16090_v5, %v8668_v33  ;;  %v8844_v40 = vmax.f32 %v8812_v34, 0.0 }
 0x54f   : > { %10163 = vmatmul.mubr.msk.f32.gmra.mrb[64].mxu1 %vm8479_vm14, %v6310_v7  ;;  %10285 = vmatpush3.bf16.msra.mxu0 %v10282_v2  ;;  %v8845_v61 = vmax.f32 %v8813_v24, 0.0 }
 0x552   : > { %10182 = vmatmul.mubr.msk.f32.vlgmr.msra.gmra.mrb[66].mxu0 %vm8479_vm14, %v8841_v14 }
 0x553   : > { %10184 = vmatprep.mubr.msk.f32.mxu0 %vm8479_vm14, %v8842_v13 }
 0x556   : > { %10185 = vmatmul.mubr.msk.f32.gmra.mrb[68].mxu0 %vm8479_vm14, %v8843_v8 }
 0x557   : > { %10187 = vmatprep.mubr.msk.f32.mxu0 %vm8479_vm14, %v8844_v40 }
 0x55a   : > { %10188 = vmatmul.mubr.msk.f32.gmra.mrb[70].mxu0 %vm8479_vm14, %v8845_v61 }
 0x563   : > { %v10128_v51 = vpop.f32.mrb[72].mxu1 }
 0x564   : > { %v8678_v53 = vadd.f32 %v10128_v51, %v18014_v49  ;;  %v8672_v15 = vpop.f32.mrb[73].mxu1 }
 0x565   : > { %v8673_v63 = vadd.f32 %v8672_v15, %v18015_v9 }
 0x566   : > { %v8815_v44 = vadd.f32 %v16090_v5, %v8678_v53 }
 0x567   : > { %v8814_v50 = vadd.f32 %v16090_v5, %v8673_v63 }
 0x568   : > { %v8847_v37 = vmax.f32 %v8815_v44, 0.0 }
 0x569   : > { %v8846_v60 = vmax.f32 %v8814_v50, 0.0 }
 0x56b   : > { %10190 = vmatprep.mubr.msk.f32.mxu0 %vm8479_vm14, %v8846_v60 }
 0x56c   : > { %10191 = vmatmul.mubr.msk.f32.gmra.mrb[72].mxu0 %vm8479_vm14, %v8847_v37 }
 0x579   : > { %v10131_v42 = vpop.f32.mrb[74].mxu1 }
 0x57a   : > { %v8688_v41 = vadd.f32 %v10131_v42, %v18016_v17  ;;  %v8682_v36 = vpop.f32.mrb[75].mxu1 }
 0x57b   : > { %v8683_v30 = vadd.f32 %v8682_v36, %v18017_v31 }
 0x57c   : > { %v8817_v20 = vadd.f32 %v16090_v5, %v8688_v41 }
 0x57d   : > { %v8816_v58 = vadd.f32 %v16090_v5, %v8683_v30 }
 0x57e   : > { %v8849_v1 = vmax.f32 %v8817_v20, 0.0 }
 0x57f   : > { %v8848_v55 = vmax.f32 %v8816_v58, 0.0 }
 0x581   : > { %10193 = vmatprep.mubr.msk.f32.mxu0 %vm8479_vm14, %v8848_v55 }
 0x582   : > { %10194 = vmatmul.mubr.msk.f32.gmra.mrb[74].mxu0 %vm8479_vm14, %v8849_v1 }
 0x585   : > { %v10134_v18 = vpop.f32.mrb[76].mxu1 }
 0x586   : > { %v8698_v29 = vadd.f32 %v10134_v18, %v18018_v11  ;;  %v8692_v59 = vpop.f32.mrb[77].mxu1 }
 0x587   : > { %v8693_v56 = vadd.f32 %v8692_v59, %v18019_v46 }
 0x588   : > { %v8819_v16 = vadd.f32 %v16090_v5, %v8698_v29 }
 0x589   : > { %v8818_v54 = vadd.f32 %v16090_v5, %v8693_v56 }
 0x58a   : > { %v8851_v47 = vmax.f32 %v8819_v16, 0.0 }
 0x58b   : > { %v8850_v57 = vmax.f32 %v8818_v54, 0.0 }
 0x58d   : > { %10196 = vmatprep.mubr.msk.f32.mxu0 %vm8479_vm14, %v8850_v57 }
 0x58e   : > { %10197 = vmatmul.mubr.msk.f32.gmra.mrb[76].mxu0 %vm8479_vm14, %v8851_v47  ;;  %v16194_v47 = vld [vmem:[%s16340_s24] ss:$0 sm:$0xff] }
 0x59b   : > { %v10137_v35 = vpop.f32.mrb[78].mxu1 }
 0x59c   : > { %v8708_v62 = vadd.f32 %v10137_v35, %v18020_v21  ;;  %v8702_v45 = vpop.f32.mrb[79].mxu1 }
 0x59d   : > { %v8703_v22 = vadd.f32 %v8702_v45, %v18021_v28 }
 0x59e   : > { %v8821_v0 = vadd.f32 %v16090_v5, %v8708_v62 }
 0x59f   : > { %v8820_v38 = vadd.f32 %v16090_v5, %v8703_v22 }
 0x5a0   : > { %v8853_v3 = vmax.f32 %v8821_v0, 0.0 }
 0x5a1   : > { %v8852_v32 = vmax.f32 %v8820_v38, 0.0 }
 0x5a3   : > { %10199 = vmatprep.mubr.msk.f32.mxu0 %vm8479_vm14, %v8852_v32 }
 0x5a4   : > { %10200 = vmatmul.mubr.msk.f32.gmra.mrb[78].mxu0 %vm8479_vm14, %v8853_v3 }
 0x5a8   : > { %v10140_v10 = vpop.f32.mrb[48].mxu1 }
 0x5a9   : > { %v8823_v27 = vadd.f32 %v10140_v10, %v16090_v5  ;;  %v8712_v4 = vpop.f32.mrb[49].mxu1 }
 0x5aa   : > { %v8822_v25 = vadd.f32 %v16090_v5, %v8712_v4 }
 0x5ab   : > { %v8855_v6 = vmax.f32 %v8823_v27, 0.0 }
 0x5ac   : > { %v8854_v2 = vmax.f32 %v8822_v25, 0.0 }
 0x5ae   : > { %10202 = vmatprep.mubr.msk.f32.mxu0 %vm8479_vm14, %v8854_v2 }
 0x5af   : > { %10203 = vmatmul.mubr.msk.f32.gmra.mrb[80].mxu0 %vm8479_vm14, %v8855_v6 }
 0x5bc   : > { %v10143_v12 = vpop.f32.mrb[50].mxu1 }
 0x5bd   : > { %v8825_v7 = vadd.f32 %v10143_v12, %v16090_v5  ;;  %v8722_v19 = vpop.f32.mrb[51].mxu1 }
 0x5be   : > { %v8824_v13 = vadd.f32 %v16090_v5, %v8722_v19 }
 0x5bf   : > { %v8857_v52 = vmax.f32 %v8825_v7, 0.0 }
 0x5c0   : > { %v8856_v14 = vmax.f32 %v8824_v13, 0.0 }
 0x5c2   : > { %10205 = vmatprep.mubr.msk.f32.mxu0 %vm8479_vm14, %v8856_v14 }
 0x5c3   : > { %10206 = vmatmul.mubr.msk.f32.gmra.mrb[82].mxu0 %vm8479_vm14, %v8857_v52 }
 0x5ce   : > { %v10146_v8 = vpop.f32.mrb[52].mxu1 }
 0x5cf   : > { %v8827_v48 = vadd.f32 %v10146_v8, %v16090_v5  ;;  %v8732_v26 = vpop.f32.mrb[53].mxu1 }
 0x5d0   : > { %v8826_v33 = vadd.f32 %v16090_v5, %v8732_v26 }
 0x5d1   : > { %v8859_v43 = vmax.f32 %v8827_v48, 0.0 }
 0x5d2   : > { %v8858_v23 = vmax.f32 %v8826_v33, 0.0 }
 0x5d4   : > { %10208 = vmatprep.mubr.msk.f32.mxu0 %vm8479_vm14, %v8858_v23 }
 0x5d5   : > { %10209 = vmatmul.mubr.msk.f32.gmra.mrb[84].mxu0 %vm8479_vm14, %v8859_v43 }
 0x5da   : > { %v10149_v39 = vpop.f32.mrb[54].mxu1 }
 0x5db   : > { %v8829_v24 = vadd.f32 %v10149_v39, %v16090_v5  ;;  %v8742_v34 = vpop.f32.mrb[55].mxu1 }
 0x5dc   : > { %v8828_v40 = vadd.f32 %v16090_v5, %v8742_v34 }
 0x5dd   : > { %v8861_v51 = vmax.f32 %v8829_v24, 0.0 }
 0x5de   : > { %v8860_v61 = vmax.f32 %v8828_v40, 0.0 }
 0x5e0   : > { %10211 = vmatprep.mubr.msk.f32.mxu0 %vm8479_vm14, %v8860_v61 }
 0x5e1   : > { %10212 = vmatmul.mubr.msk.f32.gmra.mrb[86].mxu0 %vm8479_vm14, %v8861_v51 }
 0x5eb   : > { %v10152_v49 = vpop.f32.mrb[56].mxu1 }
 0x5ec   : > { %v8831_v53 = vadd.f32 %v10152_v49, %v16090_v5  ;;  %v8752_v15 = vpop.f32.mrb[57].mxu1 }
 0x5ed   : > { %v8830_v9 = vadd.f32 %v16090_v5, %v8752_v15 }
 0x5ee   : > { %v8863_v44 = vmax.f32 %v8831_v53, 0.0 }
 0x5ef   : > { %v8862_v63 = vmax.f32 %v8830_v9, 0.0 }
 0x5f1   : > { %10214 = vmatprep.mubr.msk.f32.mxu0 %vm8479_vm14, %v8862_v63 }
 0x5f2   : > { %10215 = vmatmul.mubr.msk.f32.gmra.mrb[88].mxu0 %vm8479_vm14, %v8863_v44 }
 0x5fa   : > { %v10155_v50 = vpop.f32.mrb[58].mxu1 }
 0x5fb   : > { %v8833_v60 = vadd.f32 %v10155_v50, %v16090_v5  ;;  %v8762_v37 = vpop.f32.mrb[59].mxu1 }
 0x5fc   : > { %v8832_v42 = vadd.f32 %v16090_v5, %v8762_v37 }
 0x5fd   : > { %v8865_v41 = vmax.f32 %v8833_v60, 0.0 }
 0x5fe   : > { %v8864_v17 = vmax.f32 %v8832_v42, 0.0 }
 0x600   : > { %10217 = vmatprep.mubr.msk.f32.mxu0 %vm8479_vm14, %v8864_v17 }
 0x601   : > { %10218 = vmatmul.mubr.msk.f32.gmra.mrb[90].mxu0 %vm8479_vm14, %v8865_v41 }
 0x60e   : > { %v10158_v36 = vpop.f32.mrb[60].mxu1 }
 0x60f   : > { %v8835_v31 = vadd.f32 %v10158_v36, %v16090_v5  ;;  %v8772_v30 = vpop.f32.mrb[61].mxu1 }
 0x610   : > { %v8834_v20 = vadd.f32 %v16090_v5, %v8772_v30 }
 0x611   : > { %v8867_v55 = vmax.f32 %v8835_v31, 0.0 }
 0x612   : > { %v8866_v58 = vmax.f32 %v8834_v20, 0.0 }
 0x614   : > { %10220 = vmatprep.mubr.msk.f32.mxu0 %vm8479_vm14, %v8866_v58 }
 0x615   : > { %10221 = vmatmul.mubr.msk.f32.gmra.mrb[92].mxu0 %vm8479_vm14, %v8867_v55 }
 0x618   : > { %v10161_v1 = vpop.f32.mrb[62].mxu1 }
 0x619   : > { %v8837_v18 = vadd.f32 %v10161_v1, %v16090_v5  ;;  %v8782_v11 = vpop.f32.mrb[63].mxu1 }
 0x61a   : > { %v8836_v29 = vadd.f32 %v16090_v5, %v8782_v11 }
 0x61b   : > { %v8869_v46 = vmax.f32 %v8837_v18, 0.0 }
 0x61c   : > { %v8868_v59 = vmax.f32 %v8836_v29, 0.0 }
 0x61e   : > { %10223 = vmatprep.mubr.msk.f32.mxu0 %vm8479_vm14, %v8868_v59 }
 0x61f   : > { %10224 = vmatmul.mubr.msk.f32.gmra.mrb[94].mxu0 %vm8479_vm14, %v8869_v46 }
 0x622   : > { %v10164_v56 = vpop.f32.mrb[64].mxu1 }
 0x623   : > { %v8839_v16 = vadd.f32 %v10164_v56, %v16090_v5  ;;  %v8792_v54 = vpop.f32.mrb[65].mxu1 }
 0x624   : > { %v8838_v57 = vadd.f32 %v16090_v5, %v8792_v54 }
 0x625   : > { %v10183_v21 = vpop.f32.mrb[66].mxu0  ;;  %v8871_v62 = vmax.f32 %v8839_v16, 0.0 }
 0x626   : > { %v8870_v35 = vmax.f32 %v8838_v57, 0.0  ;;  %v9055_v45 = vadd.f32 %v10183_v21, %v16194_v47  ;;  %v9049_v28 = vpop.f32.mrb[67].mxu0 }
 0x627   : > { %v9050_v22 = vadd.f32 %v16194_v47, %v9049_v28 }
 0x628   : > { %10226 = vmatprep.mubr.msk.f32.mxu0 %vm8479_vm14, %v8870_v35  ;;  %9209 = vst [vmem:[%s16200_s3 + $0x8] sm:$0xff] %v9055_v45 }
 0x629   : > { %10227 = vmatmul.mubr.msk.f32.gmra.mrb[96].mxu0 %vm8479_vm14, %v8871_v62  ;;  %9208 = vst [vmem:[%s16200_s3] sm:$0xff] %v9050_v22  ;;  %v10186_v5 = vpop.f32.mrb[68].mxu0 }
 0x62a   : > { %v9065_v0 = vadd.f32 %v10186_v5, %v16194_v47  ;;  %v9059_v38 = vpop.f32.mrb[69].mxu0 }
 0x62b   : > { %v9060_v32 = vadd.f32 %v16194_v47, %v9059_v38 }
 0x62c   : > { %9211 = vst [vmem:[%s16200_s3 + $0x18] sm:$0xff] %v9065_v0 }
 0x62d   : > { %9210 = vst [vmem:[%s16200_s3 + $0x10] sm:$0xff] %v9060_v32  ;;  %v10189_v3 = vpop.f32.mrb[70].mxu0 }
 0x62e   : > { %v9075_v10 = vadd.f32 %v10189_v3, %v16194_v47  ;;  %v9069_v27 = vpop.f32.mrb[71].mxu0 }
 0x62f   : > { %v9070_v4 = vadd.f32 %v16194_v47, %v9069_v27 }
 0x630   : > { %9213 = vst [vmem:[%s16200_s3 + $0x28] sm:$0xff] %v9075_v10 }
 0x631   : > { %9212 = vst [vmem:[%s16200_s3 + $0x20] sm:$0xff] %v9070_v4 }
 0x63f   : > { %v10192_v25 = vpop.f32.mrb[72].mxu0 }
 0x640   : > { %v9085_v2 = vadd.f32 %v10192_v25, %v16194_v47  ;;  %v9079_v6 = vpop.f32.mrb[73].mxu0 }
 0x641   : > { %v9080_v12 = vadd.f32 %v16194_v47, %v9079_v6 }
 0x642   : > { %9215 = vst [vmem:[%s16200_s3 + $0x38] sm:$0xff] %v9085_v2 }
 0x643   : > { %9214 = vst [vmem:[%s16200_s3 + $0x30] sm:$0xff] %v9080_v12 }
 0x655   : > { %v10195_v7 = vpop.f32.mrb[74].mxu0 }
 0x656   : > { %v9095_v19 = vadd.f32 %v10195_v7, %v16194_v47  ;;  %v9089_v13 = vpop.f32.mrb[75].mxu0 }
 0x657   : > { %v9090_v14 = vadd.f32 %v16194_v47, %v9089_v13 }
 0x658   : > { %9217 = vst [vmem:[%s16200_s3 + $0x48] sm:$0xff] %v9095_v19 }
 0x659   : > { %9216 = vst [vmem:[%s16200_s3 + $0x40] sm:$0xff] %v9090_v14 }
 0x661   : > { %v10198_v52 = vpop.f32.mrb[76].mxu0 }
 0x662   : > { %v9105_v8 = vadd.f32 %v10198_v52, %v16194_v47  ;;  %v9099_v48 = vpop.f32.mrb[77].mxu0 }
 0x663   : > { %v9100_v26 = vadd.f32 %v16194_v47, %v9099_v48 }
 0x664   : > { %9219 = vst [vmem:[%s16200_s3 + $0x58] sm:$0xff] %v9105_v8 }
 0x665   : > { %9218 = vst [vmem:[%s16200_s3 + $0x50] sm:$0xff] %v9100_v26 }
 0x677   : > { %v10201_v33 = vpop.f32.mrb[78].mxu0 }
 0x678   : > { %v9115_v23 = vadd.f32 %v10201_v33, %v16194_v47  ;;  %v9109_v43 = vpop.f32.mrb[79].mxu0 }
 0x679   : > { %v9110_v39 = vadd.f32 %v16194_v47, %v9109_v43 }
 0x67a   : > { %9221 = vst [vmem:[%s16200_s3 + $0x68] sm:$0xff] %v9115_v23 }
 0x67b   : > { %9220 = vst [vmem:[%s16200_s3 + $0x60] sm:$0xff] %v9110_v39 }
 0x682   : > { %v10204_v24 = vpop.f32.mrb[80].mxu0 }
 0x683   : > { %v9125_v34 = vadd.f32 %v10204_v24, %v16194_v47  ;;  %v9119_v40 = vpop.f32.mrb[81].mxu0 }
 0x684   : > { %v9120_v61 = vadd.f32 %v16194_v47, %v9119_v40 }
 0x685   : > { %9223 = vst [vmem:[%s16200_s3 + $0x78] sm:$0xff] %v9125_v34 }
 0x686   : > { %9222 = vst [vmem:[%s16200_s3 + $0x70] sm:$0xff] %v9120_v61 }
 0x696   : > { %v10207_v51 = vpop.f32.mrb[82].mxu0 }
 0x697   : > { %v9135_v49 = vadd.f32 %v10207_v51, %v16194_v47  ;;  %v9129_v53 = vpop.f32.mrb[83].mxu0 }
 0x698   : > { %v9130_v15 = vadd.f32 %v16194_v47, %v9129_v53 }
 0x699   : > { %9225 = vst [vmem:[%s16200_s3 + $0x88] sm:$0xff] %v9135_v49 }
 0x69a   : > { %9224 = vst [vmem:[%s16200_s3 + $0x80] sm:$0xff] %v9130_v15 }
 0x6a8   : > { %v10210_v9 = vpop.f32.mrb[84].mxu0 }
 0x6a9   : > { %v9145_v63 = vadd.f32 %v10210_v9, %v16194_v47  ;;  %v9139_v44 = vpop.f32.mrb[85].mxu0 }
 0x6aa   : > { %v9140_v50 = vadd.f32 %v16194_v47, %v9139_v44 }
 0x6ab   : > { %9227 = vst [vmem:[%s16200_s3 + $0x98] sm:$0xff] %v9145_v63 }
 0x6ac   : > { %9226 = vst [vmem:[%s16200_s3 + $0x90] sm:$0xff] %v9140_v50 }
 0x6b4   : > { %v10213_v60 = vpop.f32.mrb[86].mxu0 }
 0x6b5   : > { %v9155_v37 = vadd.f32 %v10213_v60, %v16194_v47  ;;  %v9149_v42 = vpop.f32.mrb[87].mxu0 }
 0x6b6   : > { %v9150_v17 = vadd.f32 %v16194_v47, %v9149_v42 }
 0x6b7   : > { %9229 = vst [vmem:[%s16200_s3 + $0xa8] sm:$0xff] %v9155_v37 }
 0x6b8   : > { %9228 = vst [vmem:[%s16200_s3 + $0xa0] sm:$0xff] %v9150_v17 }
 0x6c5   : > { %v10216_v41 = vpop.f32.mrb[88].mxu0 }
 0x6c6   : > { %v9165_v36 = vadd.f32 %v10216_v41, %v16194_v47  ;;  %v9159_v31 = vpop.f32.mrb[89].mxu0 }
 0x6c7   : > { %v9160_v30 = vadd.f32 %v16194_v47, %v9159_v31 }
 0x6c8   : > { %9231 = vst [vmem:[%s16200_s3 + $0xb8] sm:$0xff] %v9165_v36 }
 0x6c9   : > { %9230 = vst [vmem:[%s16200_s3 + $0xb0] sm:$0xff] %v9160_v30 }
 0x6d4   : > { %v10219_v20 = vpop.f32.mrb[90].mxu0 }
 0x6d5   : > { %v9175_v58 = vadd.f32 %v10219_v20, %v16194_v47  ;;  %v9169_v55 = vpop.f32.mrb[91].mxu0 }
 0x6d6   : > { %v9170_v1 = vadd.f32 %v16194_v47, %v9169_v55 }
 0x6d7   : > { %9233 = vst [vmem:[%s16200_s3 + $0xc8] sm:$0xff] %v9175_v58 }
 0x6d8   : > { %9232 = vst [vmem:[%s16200_s3 + $0xc0] sm:$0xff] %v9170_v1 }
 0x6e8   : > { %v10222_v18 = vpop.f32.mrb[92].mxu0 }
 0x6e9   : > { %v9185_v11 = vadd.f32 %v10222_v18, %v16194_v47  ;;  %v9179_v29 = vpop.f32.mrb[93].mxu0 }
 0x6ea   : > { %v9180_v59 = vadd.f32 %v16194_v47, %v9179_v29 }
 0x6eb   : > { %9235 = vst [vmem:[%s16200_s3 + $0xd8] sm:$0xff] %v9185_v11 }
 0x6ec   : > { %9234 = vst [vmem:[%s16200_s3 + $0xd0] sm:$0xff] %v9180_v59 }
 0x6f2   : > { %v10225_v46 = vpop.f32.mrb[94].mxu0 }
 0x6f3   : > { %v9195_v56 = vadd.f32 %v10225_v46, %v16194_v47  ;;  %v9189_v16 = vpop.f32.mrb[95].mxu0 }
 0x6f4   : > { %v9190_v54 = vadd.f32 %v16194_v47, %v9189_v16 }
 0x6f5   : > { %9237 = vst [vmem:[%s16200_s3 + $0xe8] sm:$0xff] %v9195_v56 }
 0x6f6   : > { %9236 = vst [vmem:[%s16200_s3 + $0xe0] sm:$0xff] %v9190_v54 }
 0x6fc   : > { %v10228_v57 = vpop.f32.mrb[96].mxu0 }
 0x6fd   : > { %v9205_v35 = vadd.f32 %v10228_v57, %v16194_v47  ;;  %v9199_v21 = vpop.f32.mrb[97].mxu0 }
 0x6fe   : > { %v9200_v62 = vadd.f32 %v16194_v47, %v9199_v21 }
 0x6ff   : > { %9239 = vst [vmem:[%s16200_s3 + $0xf8] sm:$0xff] %v9205_v35 }
 0x700   : > { %9238 = vst [vmem:[%s16200_s3 + $0xf0] sm:$0xff] %v9200_v62 }
 0x701   : > { %10380 = shalt.err (!%p10377_p3)
}
 0x702   : > { %s10381_s2 = scalar_lea.hbm %s16266_s0, 4096  ;;  %s10385_s5 = scalar_lea.hbm %s18023_s30, 8192 }
 0x703   : > { %p10382_p4 = scmp.ne.s32.totalorder %s16266_s0, %s10381_s2  ;;  %p10386_p9 = scmp.lt.u32.totalorder %s16266_s0, %s18023_s30 }
 0x704   : > { %p10387_p10 = scmp.lt.u32.totalorder %s10385_s5, %s10381_s2  ;;  %p10389_p12 = scmp.lt.u32.totalorder %s10381_s2, %s16266_s0 }
 0x705   : > { %p10383_p7 = pnand %p10382_p4, %p10606_p5 }
 0x706   : > { %p10388_p11 = por %p10387_p10, %p10386_p9 }
 0x707   : > { %p10384_p8 = pneg %p10383_p7 }
 0x708   : > { %p10390_p13 = por %p10389_p12, %p10388_p11 }
 0x70a   : > { %p10391_p0 = pnand %p10390_p13, %p10384_p8 }
 0x70c   : > { %10394 = shalt.err (!%p10391_p0)
}
 0x70d   : > { %s10436_s28 = smov 128   ;;  %s10437_s26 = smov 8  }
 0x70e   : > { %10320 = dma.vmem_to_hbm [thread:$0]  (%p10606_p5), %s16268_s12, 4096, %s16266_s0, %s16275_s6, %s10436_s28, %s10436_s28, %s10437_s26  }
 0x70f PF: > { %s18024_s27 = sld [smem:[#allocation7_spill]]  ;;  %s18025_s3 = sld [smem:[#allocation5_spill]] }
 0x715   : > { %p10326_p1 = scmp.ge.s32.totalorder %s18024_s27, 2  ;;  %s9269_s4 = sand.u32 1, %s18025_s3  }
 0x716   : > { %s9270_s2 = scalar_lea.sflag [#allocation3], %s9269_s4 }
 0x717   : > { %p10323_p2 = pnand %p10326_p1, %p10610_p6 }
 0x719   : > { %10412 = dma.done.wait (!%p10323_p2), %s9270_s2, 4096  }
 0x71a   : > { %10414 = vsyncadd (!%p10323_p2), %s9270_s2, 4294963200  ;;  %s18027_s29 = sld [smem:[#allocation8_spill]]  ;;  %s18028_s7 = sld [smem:[#allocation6_spill]] }
 0x71b   : > { %s18029_s0 = sld [smem:[#allocation9_spill]]  ;;  %s18030_s5 = smov %s10421_s10 }
 0x720   : > { %p35_p3 = scmp.ge.s32.totalorder %s18027_s29, 4   ;;  %s18031_s10 = smov %s18028_s7 }
 0x722   :  { %37 = sbr.rel (!%p35_p3) target bundleno = 14 (0xe), region = 164 }
 0x729   :  { %9275 = vsyncpa [#allocation3], 1 }
 0x72a   :  { %9277 = vsyncpa [#allocation3 + $0x1], 1 }

</bundles_post_ra>
